<compile_context>
chip_gen: v7x
topology: tpu7x:2x2x1
jax: 0.10.0
libtpu: 0.0.40
codegen_flags: <defaults>
</compile_context>

<pallas_src>
import functools

import numpy as np
import jax
import jax.numpy as jnp
from jax import lax
from jax.experimental import pallas as pl
from jax.experimental.pallas import tpu as pltpu

EPS = 1e-5  # nn.LayerNorm default


# ----------------------------- in-kernel helpers -----------------------------
def _layernorm(x, gamma, beta):
    m = jnp.mean(x, axis=-1, keepdims=True)
    v = jnp.mean((x - m) ** 2, axis=-1, keepdims=True)
    return (x - m) * lax.rsqrt(v + EPS) * gamma + beta


def _gelu(x):
    # tanh-approx GELU: tanh lowers to the EUP slot, relieving the VALU.
    # TODO(synk): torch.nn.GELU() default is exact erf; restore the erf polynomial
    # if bit-level parity with PyTorch is required (tail diff ~1e-3).
    c = 0.7978845608028654  # sqrt(2/pi)
    return 0.5 * x * (1.0 + jnp.tanh(c * (x + 0.044715 * x * x * x)))


# ----------------------- host-side constant: shift matrices ------------------
def _shift_matrices(H, W):
    """(9, N, N) 0/1 matrices: (S[t] @ tok)[n] == zero-padded 3x3 tap t at token n."""
    N = H * W
    n = np.arange(N)
    y, xc = n // W, n % W
    mats = []
    for dy in (-1, 0, 1):
        for dx in (-1, 0, 1):
            yy, xx = y + dy, xc + dx
            valid = (yy >= 0) & (yy < H) & (xx >= 0) & (xx < W)
            src = yy * W + xx
            S = np.zeros((N, N), np.float32)
            S[n[valid], src[valid]] = 1.0
            mats.append(S)
    return jnp.asarray(np.stack(mats), dtype=jnp.bfloat16)


# -------------------------- fused kernel (one pallas_call) -------------------
def make_fused(H, W, Cin, C, Chid):
    N = H * W
    scale = float(C) ** -0.5  # num_heads = 1 -> head_dim = C
    bf16 = jnp.bfloat16

    def conv_ln(x_tok, s_ref, wc_ref, bc_ref, g_ref, b_ref):
        # 3x3 same-padded conv + LayerNorm.
        # Stage 1: one wide channel matmul (K=Cin, Nout=9*C) -> im2col-equivalent slab.
        xw = jnp.dot(x_tok, wc_ref[...],
                     preferred_element_type=jnp.float32).astype(bf16)     # (N, 9*C)
        # Stage 2: 9 MXU shift-matmuls gather the halo taps (zero fill at edges).
        acc = jnp.zeros((N, C), jnp.float32)
        for t in range(9):
            acc = acc + jnp.dot(s_ref[t], xw[:, t * C:(t + 1) * C],
                                preferred_element_type=jnp.float32)
        return _layernorm(acc + bc_ref[...], g_ref[...], b_ref[...])

    def kernel(xkv_ref, xq_ref, s_ref,
               wckv_ref, bckv_ref, gkv_ref, bkv_ref,
               wcq_ref, bcq_ref, gq_ref, bq_ref,
               ln1g_ref, ln1b_ref, ln2g_ref, ln2b_ref,
               wq_ref, wkv_ref, wp_ref, bp_ref,
               w1_ref, b1_ref, dww_ref, dwb_ref, w2_ref, b2_ref,
               lnfg_ref, lnfb_ref,
               out_ref):
        # ---- OverlapPatchEmbed for both streams (kept in VMEM, never hit HBM) ----
        x = conv_ln(xkv_ref[...], s_ref, wckv_ref, bckv_ref, gkv_ref, bkv_ref)  # (N, C)
        g = conv_ln(xq_ref[...], s_ref, wcq_ref, bcq_ref, gq_ref, bq_ref)       # (N, C)

        # ---- Block: single-head cross attention (q from g, k/v from x) ----
        xn = _layernorm(x, ln1g_ref[...], ln1b_ref[...]).astype(bf16)   # norm1(x)
        gn = _layernorm(g, ln2g_ref[...], ln2b_ref[...]).astype(bf16)   # norm2(g)

        q = jnp.dot(gn, wq_ref[...], preferred_element_type=jnp.float32)
        kv = jnp.dot(xn, wkv_ref[...], preferred_element_type=jnp.float32)  # (N, 2C)
        k = kv[:, :C].astype(bf16)
        v = kv[:, C:].astype(bf16)

        attn = lax.dot_general(q.astype(bf16), k, (((1,), (1,)), ((), ())),
                               preferred_element_type=jnp.float32) * scale
        attn = jnp.exp(attn - jnp.max(attn, axis=-1, keepdims=True))
        attn = attn * pl.reciprocal(jnp.sum(attn, axis=-1, keepdims=True),
                                    approx=True)

        msa = jnp.dot(attn.astype(bf16), v, preferred_element_type=jnp.float32)
        msa = jnp.dot(msa.astype(bf16), wp_ref[...],
                      preferred_element_type=jnp.float32) + bp_ref[...]

        x1 = x + g + msa

        # ---- MLP: fc1 -> depthwise 3x3 conv -> GELU -> fc2 ----
        x1n = _layernorm(x1, ln2g_ref[...], ln2b_ref[...]).astype(bf16)  # norm2 shared
        h = jnp.dot(x1n, w1_ref[...],
                    preferred_element_type=jnp.float32) + b1_ref[...]    # (N, Chid)
        h_bf = h.astype(bf16)

        dww = dww_ref[...]                                   # (9, 1, Chid) f32, loaded once
        dw = jnp.zeros((N, Chid), jnp.float32)
        for t in range(9):
            dw = dw + jnp.dot(s_ref[t], h_bf,
                              preferred_element_type=jnp.float32) * dww[t]
        dw = dw + dwb_ref[...]

        h2 = _gelu(dw).astype(bf16)
        mlp = jnp.dot(h2, w2_ref[...],
                      preferred_element_type=jnp.float32) + b2_ref[...]

        x2 = x1 + mlp
        out_ref[...] = _layernorm(x2, lnfg_ref[...], lnfb_ref[...])      # final norm

    def apply(xkv_tok, xq_tok, consts):
        B = xkv_tok.shape[0]

        def tok_spec(Cc):
            return pl.BlockSpec((None, N, Cc), lambda b: (b, 0, 0))

        def bcast(a):
            return pl.BlockSpec(a.shape, lambda b: (0,) * a.ndim)

        return pl.pallas_call(
            kernel,
            out_shape=jax.ShapeDtypeStruct((B, N, C), jnp.float32),
            grid_spec=pltpu.PrefetchScalarGridSpec(
                num_scalar_prefetch=0,
                grid=(B,),
                in_specs=[tok_spec(Cin), tok_spec(C)] + [bcast(a) for a in consts],
                out_specs=pl.BlockSpec((None, N, C), lambda b: (b, 0, 0)),
            ),
            compiler_params=pltpu.CompilerParams(
                dimension_semantics=("parallel",),
                vmem_limit_bytes=32 * 1024 * 1024),
        )(xkv_tok, xq_tok, *consts)

    return apply


# ----------------------------- parameters ------------------------------------
def init_params(key, in_planes, out_planes, mlp_ratio=4):
    C = out_planes
    Chid = int(C * mlp_ratio)
    ks = jax.random.split(key, 10)

    def w(k, shape, s=0.02):
        return (s * jax.random.normal(k, shape)).astype(jnp.float32)

    ones = lambda shape: jnp.ones(shape, jnp.float32)
    zeros = lambda shape: jnp.zeros(shape, jnp.float32)

    return {
        # OverlapPatchEmbed for Fkv: Conv2d(in_planes, C, 3, 1, 1) + LayerNorm
        "pe_kv": {"wc": w(ks[0], (3, 3, in_planes, C)), "bc": w(ks[1], (1, C)),
                  "g": ones((1, C)), "b": zeros((1, C))},
        # OverlapPatchEmbed for Fq: Conv2d(C, C, 3, 1, 1) + LayerNorm
        "pe_q": {"wc": w(ks[2], (3, 3, C, C)), "bc": w(ks[3], (1, C)),
                 "g": ones((1, C)), "b": zeros((1, C))},
        # Block (single head, qkv_bias=False) + final CrossAttentionModule.norm
        "block": {
            "ln1_g": ones((1, C)), "ln1_b": zeros((1, C)),
            "ln2_g": ones((1, C)), "ln2_b": zeros((1, C)),
            "wq": w(ks[4], (C, C)),               # q: Linear(C, C), no bias
            "wkv": w(ks[5], (C, 2 * C)),          # kv: Linear(C, 2C); cols [k | v]
            "wp": w(ks[6], (C, C)), "bp": zeros((1, C)),          # proj
            "w1": w(ks[7], (C, Chid)), "b1": zeros((1, Chid)),    # Mlp.fc1
            "dww": w(ks[8], (9, 1, Chid)), "dwb": zeros((1, Chid)),  # DWConv 3x3 taps
            "w2": w(ks[9], (Chid, C)), "b2": zeros((1, C)),       # Mlp.fc2
            "lnf_g": ones((1, C)), "lnf_b": zeros((1, C)),        # final norm
        },
    }


# ----------------------------- forward wrapper -------------------------------
def cross_attention_module(Fkv, Fq, params, *, in_planes, out_planes,
                           mlp_ratio=4):
    # layout: Fkv (B, in_planes, H, W) and Fq (B, out_planes, H, W) in NCHW,
    #         output (B, out_planes, H, W) in NCHW.
    B, _, H, W = Fkv.shape
    C = out_planes
    Chid = int(C * mlp_ratio)
    N = H * W
    bf16 = jnp.bfloat16

    # NCHW -> token-major (B, N, Cc); bf16 since these feed only MXU matmuls.
    xkv_tok = jnp.transpose(Fkv, (0, 2, 3, 1)).reshape(B, N, in_planes).astype(bf16)
    xq_tok = jnp.transpose(Fq, (0, 2, 3, 1)).reshape(B, N, C).astype(bf16)

    S = _shift_matrices(H, W)  # (9, N, N) bf16, shared by both convs + dwconv

    def wide(wc):  # (3,3,Ci,Co) -> (Ci, 9*Co) bf16, tap-major column blocks
        Ci, Co = wc.shape[2], wc.shape[3]
        return jnp.transpose(wc, (2, 0, 1, 3)).reshape(Ci, 9 * Co).astype(bf16)

    pkv, pq, blk = params["pe_kv"], params["pe_q"], params["block"]
    f32 = lambda a: a.astype(jnp.float32)

    consts = [
        S,
        wide(pkv["wc"]), f32(pkv["bc"]), f32(pkv["g"]), f32(pkv["b"]),
        wide(pq["wc"]), f32(pq["bc"]), f32(pq["g"]), f32(pq["b"]),
        f32(blk["ln1_g"]), f32(blk["ln1_b"]), f32(blk["ln2_g"]), f32(blk["ln2_b"]),
        blk["wq"].astype(bf16), blk["wkv"].astype(bf16),
        blk["wp"].astype(bf16), f32(blk["bp"]),
        blk["w1"].astype(bf16), f32(blk["b1"]),
        f32(blk["dww"]), f32(blk["dwb"]),
        blk["w2"].astype(bf16), f32(blk["b2"]),
        f32(blk["lnf_g"]), f32(blk["lnf_b"]),
    ]

    fused = make_fused(H, W, in_planes, C, Chid)
    y_tok = fused(xkv_tok, xq_tok, consts)                        # (B, N, C) f32
    return jnp.transpose(y_tok.reshape(B, H, W, C), (0, 3, 1, 2))  # NCHW


if __name__ == "__main__":
    # C = 128 keeps every (., C) intermediate and the output store lane-dense.
    B, in_planes, out_planes, H, W = 2, 4, 128, 8, 8
    key = jax.random.PRNGKey(0)
    k1, k2, k3 = jax.random.split(key, 3)
    Fkv = jax.random.normal(k1, (B, in_planes, H, W), dtype=jnp.float32)
    Fq = jax.random.normal(k2, (B, out_planes, H, W), dtype=jnp.float32)
    params = init_params(k3, in_planes, out_planes)

    fwd = jax.jit(functools.partial(cross_attention_module,
                                    in_planes=in_planes,
                                    out_planes=out_planes))
    y = fwd(Fkv, Fq, params)
    jax.block_until_ready(y)
    assert y.shape == (B, out_planes, H, W)
    assert bool(jnp.all(jnp.isfinite(y)))
    print("KERNEL_OK")
</pallas_src>

<mosaic_0001>
module attributes {stable_mosaic.version = 11 : i64} {
  func.func @kernel(%arg0: i32, %arg1: memref<1x64x4xbf16, #tpu.memory_space<vmem>>, %arg2: memref<1x64x128xbf16, #tpu.memory_space<vmem>>, %arg3: memref<9x64x64xbf16, #tpu.memory_space<vmem>>, %arg4: memref<4x1152xbf16, #tpu.memory_space<vmem>>, %arg5: memref<1x128xf32, #tpu.memory_space<vmem>>, %arg6: memref<1x128xf32, #tpu.memory_space<vmem>>, %arg7: memref<1x128xf32, #tpu.memory_space<vmem>>, %arg8: memref<128x1152xbf16, #tpu.memory_space<vmem>>, %arg9: memref<1x128xf32, #tpu.memory_space<vmem>>, %arg10: memref<1x128xf32, #tpu.memory_space<vmem>>, %arg11: memref<1x128xf32, #tpu.memory_space<vmem>>, %arg12: memref<1x128xf32, #tpu.memory_space<vmem>>, %arg13: memref<1x128xf32, #tpu.memory_space<vmem>>, %arg14: memref<1x128xf32, #tpu.memory_space<vmem>>, %arg15: memref<1x128xf32, #tpu.memory_space<vmem>>, %arg16: memref<128x128xbf16, #tpu.memory_space<vmem>>, %arg17: memref<128x256xbf16, #tpu.memory_space<vmem>>, %arg18: memref<128x128xbf16, #tpu.memory_space<vmem>>, %arg19: memref<1x128xf32, #tpu.memory_space<vmem>>, %arg20: memref<128x512xbf16, #tpu.memory_space<vmem>>, %arg21: memref<1x512xf32, #tpu.memory_space<vmem>>, %arg22: memref<9x1x512xf32, #tpu.memory_space<vmem>>, %arg23: memref<1x512xf32, #tpu.memory_space<vmem>>, %arg24: memref<512x128xbf16, #tpu.memory_space<vmem>>, %arg25: memref<1x128xf32, #tpu.memory_space<vmem>>, %arg26: memref<1x128xf32, #tpu.memory_space<vmem>>, %arg27: memref<1x128xf32, #tpu.memory_space<vmem>>, %arg28: memref<1x64x128xf32, #tpu.memory_space<vmem>>) attributes {dimension_semantics = [#tpu.dimension_semantics<parallel>], iteration_bounds = array<i64: 2>, scalar_prefetch = 0 : i64, scratch_operands = 0 : i64, tpu.core_type = #tpu.core_type<tc>, window_params = [{transform_indices = @transform_0, window_bounds = array<i64: 1, 64, 4>}, {transform_indices = @transform_1, window_bounds = array<i64: 1, 64, 128>}, {pipeline_mode = #tpu.pipeline_mode<synchronous>, transform_indices = @transform_2, window_bounds = array<i64: 9, 64, 64>}, {pipeline_mode = #tpu.pipeline_mode<synchronous>, transform_indices = @transform_3, window_bounds = array<i64: 4, 1152>}, {pipeline_mode = #tpu.pipeline_mode<synchronous>, transform_indices = @transform_4, window_bounds = array<i64: 1, 128>}, {pipeline_mode = #tpu.pipeline_mode<synchronous>, transform_indices = @transform_5, window_bounds = array<i64: 1, 128>}, {pipeline_mode = #tpu.pipeline_mode<synchronous>, transform_indices = @transform_6, window_bounds = array<i64: 1, 128>}, {pipeline_mode = #tpu.pipeline_mode<synchronous>, transform_indices = @transform_7, window_bounds = array<i64: 128, 1152>}, {pipeline_mode = #tpu.pipeline_mode<synchronous>, transform_indices = @transform_8, window_bounds = array<i64: 1, 128>}, {pipeline_mode = #tpu.pipeline_mode<synchronous>, transform_indices = @transform_9, window_bounds = array<i64: 1, 128>}, {pipeline_mode = #tpu.pipeline_mode<synchronous>, transform_indices = @transform_10, window_bounds = array<i64: 1, 128>}, {pipeline_mode = #tpu.pipeline_mode<synchronous>, transform_indices = @transform_11, window_bounds = array<i64: 1, 128>}, {pipeline_mode = #tpu.pipeline_mode<synchronous>, transform_indices = @transform_12, window_bounds = array<i64: 1, 128>}, {pipeline_mode = #tpu.pipeline_mode<synchronous>, transform_indices = @transform_13, window_bounds = array<i64: 1, 128>}, {pipeline_mode = #tpu.pipeline_mode<synchronous>, transform_indices = @transform_14, window_bounds = array<i64: 1, 128>}, {pipeline_mode = #tpu.pipeline_mode<synchronous>, transform_indices = @transform_15, window_bounds = array<i64: 128, 128>}, {pipeline_mode = #tpu.pipeline_mode<synchronous>, transform_indices = @transform_16, window_bounds = array<i64: 128, 256>}, {pipeline_mode = #tpu.pipeline_mode<synchronous>, transform_indices = @transform_17, window_bounds = array<i64: 128, 128>}, {pipeline_mode = #tpu.pipeline_mode<synchronous>, transform_indices = @transform_18, window_bounds = array<i64: 1, 128>}, {pipeline_mode = #tpu.pipeline_mode<synchronous>, transform_indices = @transform_19, window_bounds = array<i64: 128, 512>}, {pipeline_mode = #tpu.pipeline_mode<synchronous>, transform_indices = @transform_20, window_bounds = array<i64: 1, 512>}, {pipeline_mode = #tpu.pipeline_mode<synchronous>, transform_indices = @transform_21, window_bounds = array<i64: 9, 1, 512>}, {pipeline_mode = #tpu.pipeline_mode<synchronous>, transform_indices = @transform_22, window_bounds = array<i64: 1, 512>}, {pipeline_mode = #tpu.pipeline_mode<synchronous>, transform_indices = @transform_23, window_bounds = array<i64: 512, 128>}, {pipeline_mode = #tpu.pipeline_mode<synchronous>, transform_indices = @transform_24, window_bounds = array<i64: 1, 128>}, {pipeline_mode = #tpu.pipeline_mode<synchronous>, transform_indices = @transform_25, window_bounds = array<i64: 1, 128>}, {pipeline_mode = #tpu.pipeline_mode<synchronous>, transform_indices = @transform_26, window_bounds = array<i64: 1, 128>}, {transform_indices = @transform_27, window_bounds = array<i64: 1, 64, 128>}]} {
    %c0 = arith.constant 0 : index
    %c0_0 = arith.constant 0 : index
    %c0_1 = arith.constant 0 : index
    %0 = vector.load %arg1[%c0, %c0_0, %c0_1] : memref<1x64x4xbf16, #tpu.memory_space<vmem>>, vector<1x64x4xbf16>
    %1 = vector.shape_cast %0 : vector<1x64x4xbf16> to vector<64x4xbf16>
    %c0_2 = arith.constant 0 : index
    %c0_3 = arith.constant 0 : index
    %2 = vector.load %arg4[%c0_2, %c0_3] : memref<4x1152xbf16, #tpu.memory_space<vmem>>, vector<4x1152xbf16>
    %cst = arith.constant dense<0.000000e+00> : vector<64x1152xf32>
    %3 = tpu.matmul %1, %2, %cst {dimension_numbers = #tpu.dot_dimension_numbers<[1], [0], [0], [1], [0, 0, 1, 1], [], []>} : vector<64x4xbf16>, vector<4x1152xbf16>, vector<64x1152xf32> -> vector<64x1152xf32>
    %4 = arith.truncf %3 : vector<64x1152xf32> to vector<64x1152xbf16>
    %cst_4 = arith.constant 0.000000e+00 : f32
    %5 = vector.broadcast %cst_4 : f32 to vector<64x128xf32>
    %c0_5 = arith.constant 0 : index
    %c0_6 = arith.constant 0 : index
    %c0_7 = arith.constant 0 : index
    %6 = vector.load %arg3[%c0_5, %c0_6, %c0_7] : memref<9x64x64xbf16, #tpu.memory_space<vmem>>, vector<1x64x64xbf16>
    %7 = vector.shape_cast %6 : vector<1x64x64xbf16> to vector<64x64xbf16>
    %8 = vector.extract_strided_slice %4 {offsets = [0, 0], sizes = [64, 128], strides = [1, 1]} : vector<64x1152xbf16> to vector<64x128xbf16>
    %cst_8 = arith.constant dense<0.000000e+00> : vector<64x128xf32>
    %9 = tpu.matmul %7, %8, %cst_8 {dimension_numbers = #tpu.dot_dimension_numbers<[1], [0], [0], [1], [0, 0, 1, 1], [], []>} : vector<64x64xbf16>, vector<64x128xbf16>, vector<64x128xf32> -> vector<64x128xf32>
    %10 = arith.addf %5, %9 : vector<64x128xf32>
    %c1 = arith.constant 1 : index
    %c0_9 = arith.constant 0 : index
    %c0_10 = arith.constant 0 : index
    %11 = vector.load %arg3[%c1, %c0_9, %c0_10] : memref<9x64x64xbf16, #tpu.memory_space<vmem>>, vector<1x64x64xbf16>
    %12 = vector.shape_cast %11 : vector<1x64x64xbf16> to vector<64x64xbf16>
    %13 = vector.extract_strided_slice %4 {offsets = [0, 128], sizes = [64, 128], strides = [1, 1]} : vector<64x1152xbf16> to vector<64x128xbf16>
    %cst_11 = arith.constant dense<0.000000e+00> : vector<64x128xf32>
    %14 = tpu.matmul %12, %13, %cst_11 {dimension_numbers = #tpu.dot_dimension_numbers<[1], [0], [0], [1], [0, 0, 1, 1], [], []>} : vector<64x64xbf16>, vector<64x128xbf16>, vector<64x128xf32> -> vector<64x128xf32>
    %15 = arith.addf %10, %14 : vector<64x128xf32>
    %c2 = arith.constant 2 : index
    %c0_12 = arith.constant 0 : index
    %c0_13 = arith.constant 0 : index
    %16 = vector.load %arg3[%c2, %c0_12, %c0_13] : memref<9x64x64xbf16, #tpu.memory_space<vmem>>, vector<1x64x64xbf16>
    %17 = vector.shape_cast %16 : vector<1x64x64xbf16> to vector<64x64xbf16>
    %18 = vector.extract_strided_slice %4 {offsets = [0, 256], sizes = [64, 128], strides = [1, 1]} : vector<64x1152xbf16> to vector<64x128xbf16>
    %cst_14 = arith.constant dense<0.000000e+00> : vector<64x128xf32>
    %19 = tpu.matmul %17, %18, %cst_14 {dimension_numbers = #tpu.dot_dimension_numbers<[1], [0], [0], [1], [0, 0, 1, 1], [], []>} : vector<64x64xbf16>, vector<64x128xbf16>, vector<64x128xf32> -> vector<64x128xf32>
    %20 = arith.addf %15, %19 : vector<64x128xf32>
    %c3 = arith.constant 3 : index
    %c0_15 = arith.constant 0 : index
    %c0_16 = arith.constant 0 : index
    %21 = vector.load %arg3[%c3, %c0_15, %c0_16] : memref<9x64x64xbf16, #tpu.memory_space<vmem>>, vector<1x64x64xbf16>
    %22 = vector.shape_cast %21 : vector<1x64x64xbf16> to vector<64x64xbf16>
    %23 = vector.extract_strided_slice %4 {offsets = [0, 384], sizes = [64, 128], strides = [1, 1]} : vector<64x1152xbf16> to vector<64x128xbf16>
    %cst_17 = arith.constant dense<0.000000e+00> : vector<64x128xf32>
    %24 = tpu.matmul %22, %23, %cst_17 {dimension_numbers = #tpu.dot_dimension_numbers<[1], [0], [0], [1], [0, 0, 1, 1], [], []>} : vector<64x64xbf16>, vector<64x128xbf16>, vector<64x128xf32> -> vector<64x128xf32>
    %25 = arith.addf %20, %24 : vector<64x128xf32>
    %c4 = arith.constant 4 : index
    %c0_18 = arith.constant 0 : index
    %c0_19 = arith.constant 0 : index
    %26 = vector.load %arg3[%c4, %c0_18, %c0_19] : memref<9x64x64xbf16, #tpu.memory_space<vmem>>, vector<1x64x64xbf16>
    %27 = vector.shape_cast %26 : vector<1x64x64xbf16> to vector<64x64xbf16>
    %28 = vector.extract_strided_slice %4 {offsets = [0, 512], sizes = [64, 128], strides = [1, 1]} : vector<64x1152xbf16> to vector<64x128xbf16>
    %cst_20 = arith.constant dense<0.000000e+00> : vector<64x128xf32>
    %29 = tpu.matmul %27, %28, %cst_20 {dimension_numbers = #tpu.dot_dimension_numbers<[1], [0], [0], [1], [0, 0, 1, 1], [], []>} : vector<64x64xbf16>, vector<64x128xbf16>, vector<64x128xf32> -> vector<64x128xf32>
    %30 = arith.addf %25, %29 : vector<64x128xf32>
    %c5 = arith.constant 5 : index
    %c0_21 = arith.constant 0 : index
    %c0_22 = arith.constant 0 : index
    %31 = vector.load %arg3[%c5, %c0_21, %c0_22] : memref<9x64x64xbf16, #tpu.memory_space<vmem>>, vector<1x64x64xbf16>
    %32 = vector.shape_cast %31 : vector<1x64x64xbf16> to vector<64x64xbf16>
    %33 = vector.extract_strided_slice %4 {offsets = [0, 640], sizes = [64, 128], strides = [1, 1]} : vector<64x1152xbf16> to vector<64x128xbf16>
    %cst_23 = arith.constant dense<0.000000e+00> : vector<64x128xf32>
    %34 = tpu.matmul %32, %33, %cst_23 {dimension_numbers = #tpu.dot_dimension_numbers<[1], [0], [0], [1], [0, 0, 1, 1], [], []>} : vector<64x64xbf16>, vector<64x128xbf16>, vector<64x128xf32> -> vector<64x128xf32>
    %35 = arith.addf %30, %34 : vector<64x128xf32>
    %c6 = arith.constant 6 : index
    %c0_24 = arith.constant 0 : index
    %c0_25 = arith.constant 0 : index
    %36 = vector.load %arg3[%c6, %c0_24, %c0_25] : memref<9x64x64xbf16, #tpu.memory_space<vmem>>, vector<1x64x64xbf16>
    %37 = vector.shape_cast %36 : vector<1x64x64xbf16> to vector<64x64xbf16>
    %38 = vector.extract_strided_slice %4 {offsets = [0, 768], sizes = [64, 128], strides = [1, 1]} : vector<64x1152xbf16> to vector<64x128xbf16>
    %cst_26 = arith.constant dense<0.000000e+00> : vector<64x128xf32>
    %39 = tpu.matmul %37, %38, %cst_26 {dimension_numbers = #tpu.dot_dimension_numbers<[1], [0], [0], [1], [0, 0, 1, 1], [], []>} : vector<64x64xbf16>, vector<64x128xbf16>, vector<64x128xf32> -> vector<64x128xf32>
    %40 = arith.addf %35, %39 : vector<64x128xf32>
    %c7 = arith.constant 7 : index
    %c0_27 = arith.constant 0 : index
    %c0_28 = arith.constant 0 : index
    %41 = vector.load %arg3[%c7, %c0_27, %c0_28] : memref<9x64x64xbf16, #tpu.memory_space<vmem>>, vector<1x64x64xbf16>
    %42 = vector.shape_cast %41 : vector<1x64x64xbf16> to vector<64x64xbf16>
    %43 = vector.extract_strided_slice %4 {offsets = [0, 896], sizes = [64, 128], strides = [1, 1]} : vector<64x1152xbf16> to vector<64x128xbf16>
    %cst_29 = arith.constant dense<0.000000e+00> : vector<64x128xf32>
    %44 = tpu.matmul %42, %43, %cst_29 {dimension_numbers = #tpu.dot_dimension_numbers<[1], [0], [0], [1], [0, 0, 1, 1], [], []>} : vector<64x64xbf16>, vector<64x128xbf16>, vector<64x128xf32> -> vector<64x128xf32>
    %45 = arith.addf %40, %44 : vector<64x128xf32>
    %c8 = arith.constant 8 : index
    %c0_30 = arith.constant 0 : index
    %c0_31 = arith.constant 0 : index
    %46 = vector.load %arg3[%c8, %c0_30, %c0_31] : memref<9x64x64xbf16, #tpu.memory_space<vmem>>, vector<1x64x64xbf16>
    %47 = vector.shape_cast %46 : vector<1x64x64xbf16> to vector<64x64xbf16>
    %48 = vector.extract_strided_slice %4 {offsets = [0, 1024], sizes = [64, 128], strides = [1, 1]} : vector<64x1152xbf16> to vector<64x128xbf16>
    %cst_32 = arith.constant dense<0.000000e+00> : vector<64x128xf32>
    %49 = tpu.matmul %47, %48, %cst_32 {dimension_numbers = #tpu.dot_dimension_numbers<[1], [0], [0], [1], [0, 0, 1, 1], [], []>} : vector<64x64xbf16>, vector<64x128xbf16>, vector<64x128xf32> -> vector<64x128xf32>
    %50 = arith.addf %45, %49 : vector<64x128xf32>
    %c0_33 = arith.constant 0 : index
    %c0_34 = arith.constant 0 : index
    %51 = vector.load %arg5[%c0_33, %c0_34] : memref<1x128xf32, #tpu.memory_space<vmem>>, vector<1x128xf32>
    %52 = vector.broadcast %51 : vector<1x128xf32> to vector<64x128xf32>
    %53 = arith.addf %50, %52 : vector<64x128xf32>
    %c0_35 = arith.constant 0 : index
    %c0_36 = arith.constant 0 : index
    %54 = vector.load %arg6[%c0_35, %c0_36] : memref<1x128xf32, #tpu.memory_space<vmem>>, vector<1x128xf32>
    %c0_37 = arith.constant 0 : index
    %c0_38 = arith.constant 0 : index
    %55 = vector.load %arg7[%c0_37, %c0_38] : memref<1x128xf32, #tpu.memory_space<vmem>>, vector<1x128xf32>
    %cst_39 = arith.constant dense<0.000000e+00> : vector<64xf32>
    %56 = vector.multi_reduction <add>, %53, %cst_39 [1] : vector<64x128xf32> to vector<64xf32>
    %57 = vector.shape_cast %56 : vector<64xf32> to vector<64x1xf32>
    %cst_40 = arith.constant 1.280000e+02 : f32
    %58 = vector.broadcast %cst_40 : f32 to vector<64x1xf32>
    %59 = arith.divf %57, %58 : vector<64x1xf32>
    %60 = vector.broadcast %59 : vector<64x1xf32> to vector<64x128xf32>
    %61 = arith.subf %53, %60 : vector<64x128xf32>
    %62 = arith.mulf %61, %61 : vector<64x128xf32>
    %cst_41 = arith.constant dense<0.000000e+00> : vector<64xf32>
    %63 = vector.multi_reduction <add>, %62, %cst_41 [1] : vector<64x128xf32> to vector<64xf32>
    %64 = vector.shape_cast %63 : vector<64xf32> to vector<64x1xf32>
    %cst_42 = arith.constant 1.280000e+02 : f32
    %65 = vector.broadcast %cst_42 : f32 to vector<64x1xf32>
    %66 = arith.divf %64, %65 : vector<64x1xf32>
    %67 = vector.broadcast %59 : vector<64x1xf32> to vector<64x128xf32>
    %68 = arith.subf %53, %67 : vector<64x128xf32>
    %cst_43 = arith.constant 9.99999974E-6 : f32
    %69 = vector.broadcast %cst_43 : f32 to vector<64x1xf32>
    %70 = arith.addf %66, %69 : vector<64x1xf32>
    %71 = math.rsqrt %70 : vector<64x1xf32>
    %72 = vector.broadcast %71 : vector<64x1xf32> to vector<64x128xf32>
    %73 = arith.mulf %68, %72 : vector<64x128xf32>
    %74 = vector.broadcast %54 : vector<1x128xf32> to vector<64x128xf32>
    %75 = arith.mulf %73, %74 : vector<64x128xf32>
    %76 = vector.broadcast %55 : vector<1x128xf32> to vector<64x128xf32>
    %77 = arith.addf %75, %76 : vector<64x128xf32>
    %c0_44 = arith.constant 0 : index
    %c0_45 = arith.constant 0 : index
    %c0_46 = arith.constant 0 : index
    %78 = vector.load %arg2[%c0_44, %c0_45, %c0_46] : memref<1x64x128xbf16, #tpu.memory_space<vmem>>, vector<1x64x128xbf16>
    %79 = vector.shape_cast %78 : vector<1x64x128xbf16> to vector<64x128xbf16>
    %c0_47 = arith.constant 0 : index
    %c0_48 = arith.constant 0 : index
    %80 = vector.load %arg8[%c0_47, %c0_48] : memref<128x1152xbf16, #tpu.memory_space<vmem>>, vector<128x1152xbf16>
    %cst_49 = arith.constant dense<0.000000e+00> : vector<64x1152xf32>
    %81 = tpu.matmul %79, %80, %cst_49 {dimension_numbers = #tpu.dot_dimension_numbers<[1], [0], [0], [1], [0, 0, 1, 1], [], []>} : vector<64x128xbf16>, vector<128x1152xbf16>, vector<64x1152xf32> -> vector<64x1152xf32>
    %82 = arith.truncf %81 : vector<64x1152xf32> to vector<64x1152xbf16>
    %cst_50 = arith.constant 0.000000e+00 : f32
    %83 = vector.broadcast %cst_50 : f32 to vector<64x128xf32>
    %c0_51 = arith.constant 0 : index
    %c0_52 = arith.constant 0 : index
    %c0_53 = arith.constant 0 : index
    %84 = vector.load %arg3[%c0_51, %c0_52, %c0_53] : memref<9x64x64xbf16, #tpu.memory_space<vmem>>, vector<1x64x64xbf16>
    %85 = vector.shape_cast %84 : vector<1x64x64xbf16> to vector<64x64xbf16>
    %86 = vector.extract_strided_slice %82 {offsets = [0, 0], sizes = [64, 128], strides = [1, 1]} : vector<64x1152xbf16> to vector<64x128xbf16>
    %cst_54 = arith.constant dense<0.000000e+00> : vector<64x128xf32>
    %87 = tpu.matmul %85, %86, %cst_54 {dimension_numbers = #tpu.dot_dimension_numbers<[1], [0], [0], [1], [0, 0, 1, 1], [], []>} : vector<64x64xbf16>, vector<64x128xbf16>, vector<64x128xf32> -> vector<64x128xf32>
    %88 = arith.addf %83, %87 : vector<64x128xf32>
    %c1_55 = arith.constant 1 : index
    %c0_56 = arith.constant 0 : index
    %c0_57 = arith.constant 0 : index
    %89 = vector.load %arg3[%c1_55, %c0_56, %c0_57] : memref<9x64x64xbf16, #tpu.memory_space<vmem>>, vector<1x64x64xbf16>
    %90 = vector.shape_cast %89 : vector<1x64x64xbf16> to vector<64x64xbf16>
    %91 = vector.extract_strided_slice %82 {offsets = [0, 128], sizes = [64, 128], strides = [1, 1]} : vector<64x1152xbf16> to vector<64x128xbf16>
    %cst_58 = arith.constant dense<0.000000e+00> : vector<64x128xf32>
    %92 = tpu.matmul %90, %91, %cst_58 {dimension_numbers = #tpu.dot_dimension_numbers<[1], [0], [0], [1], [0, 0, 1, 1], [], []>} : vector<64x64xbf16>, vector<64x128xbf16>, vector<64x128xf32> -> vector<64x128xf32>
    %93 = arith.addf %88, %92 : vector<64x128xf32>
    %c2_59 = arith.constant 2 : index
    %c0_60 = arith.constant 0 : index
    %c0_61 = arith.constant 0 : index
    %94 = vector.load %arg3[%c2_59, %c0_60, %c0_61] : memref<9x64x64xbf16, #tpu.memory_space<vmem>>, vector<1x64x64xbf16>
    %95 = vector.shape_cast %94 : vector<1x64x64xbf16> to vector<64x64xbf16>
    %96 = vector.extract_strided_slice %82 {offsets = [0, 256], sizes = [64, 128], strides = [1, 1]} : vector<64x1152xbf16> to vector<64x128xbf16>
    %cst_62 = arith.constant dense<0.000000e+00> : vector<64x128xf32>
    %97 = tpu.matmul %95, %96, %cst_62 {dimension_numbers = #tpu.dot_dimension_numbers<[1], [0], [0], [1], [0, 0, 1, 1], [], []>} : vector<64x64xbf16>, vector<64x128xbf16>, vector<64x128xf32> -> vector<64x128xf32>
    %98 = arith.addf %93, %97 : vector<64x128xf32>
    %c3_63 = arith.constant 3 : index
    %c0_64 = arith.constant 0 : index
    %c0_65 = arith.constant 0 : index
    %99 = vector.load %arg3[%c3_63, %c0_64, %c0_65] : memref<9x64x64xbf16, #tpu.memory_space<vmem>>, vector<1x64x64xbf16>
    %100 = vector.shape_cast %99 : vector<1x64x64xbf16> to vector<64x64xbf16>
    %101 = vector.extract_strided_slice %82 {offsets = [0, 384], sizes = [64, 128], strides = [1, 1]} : vector<64x1152xbf16> to vector<64x128xbf16>
    %cst_66 = arith.constant dense<0.000000e+00> : vector<64x128xf32>
    %102 = tpu.matmul %100, %101, %cst_66 {dimension_numbers = #tpu.dot_dimension_numbers<[1], [0], [0], [1], [0, 0, 1, 1], [], []>} : vector<64x64xbf16>, vector<64x128xbf16>, vector<64x128xf32> -> vector<64x128xf32>
    %103 = arith.addf %98, %102 : vector<64x128xf32>
    %c4_67 = arith.constant 4 : index
    %c0_68 = arith.constant 0 : index
    %c0_69 = arith.constant 0 : index
    %104 = vector.load %arg3[%c4_67, %c0_68, %c0_69] : memref<9x64x64xbf16, #tpu.memory_space<vmem>>, vector<1x64x64xbf16>
    %105 = vector.shape_cast %104 : vector<1x64x64xbf16> to vector<64x64xbf16>
    %106 = vector.extract_strided_slice %82 {offsets = [0, 512], sizes = [64, 128], strides = [1, 1]} : vector<64x1152xbf16> to vector<64x128xbf16>
    %cst_70 = arith.constant dense<0.000000e+00> : vector<64x128xf32>
    %107 = tpu.matmul %105, %106, %cst_70 {dimension_numbers = #tpu.dot_dimension_numbers<[1], [0], [0], [1], [0, 0, 1, 1], [], []>} : vector<64x64xbf16>, vector<64x128xbf16>, vector<64x128xf32> -> vector<64x128xf32>
    %108 = arith.addf %103, %107 : vector<64x128xf32>
    %c5_71 = arith.constant 5 : index
    %c0_72 = arith.constant 0 : index
    %c0_73 = arith.constant 0 : index
    %109 = vector.load %arg3[%c5_71, %c0_72, %c0_73] : memref<9x64x64xbf16, #tpu.memory_space<vmem>>, vector<1x64x64xbf16>
    %110 = vector.shape_cast %109 : vector<1x64x64xbf16> to vector<64x64xbf16>
    %111 = vector.extract_strided_slice %82 {offsets = [0, 640], sizes = [64, 128], strides = [1, 1]} : vector<64x1152xbf16> to vector<64x128xbf16>
    %cst_74 = arith.constant dense<0.000000e+00> : vector<64x128xf32>
    %112 = tpu.matmul %110, %111, %cst_74 {dimension_numbers = #tpu.dot_dimension_numbers<[1], [0], [0], [1], [0, 0, 1, 1], [], []>} : vector<64x64xbf16>, vector<64x128xbf16>, vector<64x128xf32> -> vector<64x128xf32>
    %113 = arith.addf %108, %112 : vector<64x128xf32>
    %c6_75 = arith.constant 6 : index
    %c0_76 = arith.constant 0 : index
    %c0_77 = arith.constant 0 : index
    %114 = vector.load %arg3[%c6_75, %c0_76, %c0_77] : memref<9x64x64xbf16, #tpu.memory_space<vmem>>, vector<1x64x64xbf16>
    %115 = vector.shape_cast %114 : vector<1x64x64xbf16> to vector<64x64xbf16>
    %116 = vector.extract_strided_slice %82 {offsets = [0, 768], sizes = [64, 128], strides = [1, 1]} : vector<64x1152xbf16> to vector<64x128xbf16>
    %cst_78 = arith.constant dense<0.000000e+00> : vector<64x128xf32>
    %117 = tpu.matmul %115, %116, %cst_78 {dimension_numbers = #tpu.dot_dimension_numbers<[1], [0], [0], [1], [0, 0, 1, 1], [], []>} : vector<64x64xbf16>, vector<64x128xbf16>, vector<64x128xf32> -> vector<64x128xf32>
    %118 = arith.addf %113, %117 : vector<64x128xf32>
    %c7_79 = arith.constant 7 : index
    %c0_80 = arith.constant 0 : index
    %c0_81 = arith.constant 0 : index
    %119 = vector.load %arg3[%c7_79, %c0_80, %c0_81] : memref<9x64x64xbf16, #tpu.memory_space<vmem>>, vector<1x64x64xbf16>
    %120 = vector.shape_cast %119 : vector<1x64x64xbf16> to vector<64x64xbf16>
    %121 = vector.extract_strided_slice %82 {offsets = [0, 896], sizes = [64, 128], strides = [1, 1]} : vector<64x1152xbf16> to vector<64x128xbf16>
    %cst_82 = arith.constant dense<0.000000e+00> : vector<64x128xf32>
    %122 = tpu.matmul %120, %121, %cst_82 {dimension_numbers = #tpu.dot_dimension_numbers<[1], [0], [0], [1], [0, 0, 1, 1], [], []>} : vector<64x64xbf16>, vector<64x128xbf16>, vector<64x128xf32> -> vector<64x128xf32>
    %123 = arith.addf %118, %122 : vector<64x128xf32>
    %c8_83 = arith.constant 8 : index
    %c0_84 = arith.constant 0 : index
    %c0_85 = arith.constant 0 : index
    %124 = vector.load %arg3[%c8_83, %c0_84, %c0_85] : memref<9x64x64xbf16, #tpu.memory_space<vmem>>, vector<1x64x64xbf16>
    %125 = vector.shape_cast %124 : vector<1x64x64xbf16> to vector<64x64xbf16>
    %126 = vector.extract_strided_slice %82 {offsets = [0, 1024], sizes = [64, 128], strides = [1, 1]} : vector<64x1152xbf16> to vector<64x128xbf16>
    %cst_86 = arith.constant dense<0.000000e+00> : vector<64x128xf32>
    %127 = tpu.matmul %125, %126, %cst_86 {dimension_numbers = #tpu.dot_dimension_numbers<[1], [0], [0], [1], [0, 0, 1, 1], [], []>} : vector<64x64xbf16>, vector<64x128xbf16>, vector<64x128xf32> -> vector<64x128xf32>
    %128 = arith.addf %123, %127 : vector<64x128xf32>
    %c0_87 = arith.constant 0 : index
    %c0_88 = arith.constant 0 : index
    %129 = vector.load %arg9[%c0_87, %c0_88] : memref<1x128xf32, #tpu.memory_space<vmem>>, vector<1x128xf32>
    %130 = vector.broadcast %129 : vector<1x128xf32> to vector<64x128xf32>
    %131 = arith.addf %128, %130 : vector<64x128xf32>
    %c0_89 = arith.constant 0 : index
    %c0_90 = arith.constant 0 : index
    %132 = vector.load %arg10[%c0_89, %c0_90] : memref<1x128xf32, #tpu.memory_space<vmem>>, vector<1x128xf32>
    %c0_91 = arith.constant 0 : index
    %c0_92 = arith.constant 0 : index
    %133 = vector.load %arg11[%c0_91, %c0_92] : memref<1x128xf32, #tpu.memory_space<vmem>>, vector<1x128xf32>
    %cst_93 = arith.constant dense<0.000000e+00> : vector<64xf32>
    %134 = vector.multi_reduction <add>, %131, %cst_93 [1] : vector<64x128xf32> to vector<64xf32>
    %135 = vector.shape_cast %134 : vector<64xf32> to vector<64x1xf32>
    %cst_94 = arith.constant 1.280000e+02 : f32
    %136 = vector.broadcast %cst_94 : f32 to vector<64x1xf32>
    %137 = arith.divf %135, %136 : vector<64x1xf32>
    %138 = vector.broadcast %137 : vector<64x1xf32> to vector<64x128xf32>
    %139 = arith.subf %131, %138 : vector<64x128xf32>
    %140 = arith.mulf %139, %139 : vector<64x128xf32>
    %cst_95 = arith.constant dense<0.000000e+00> : vector<64xf32>
    %141 = vector.multi_reduction <add>, %140, %cst_95 [1] : vector<64x128xf32> to vector<64xf32>
    %142 = vector.shape_cast %141 : vector<64xf32> to vector<64x1xf32>
    %cst_96 = arith.constant 1.280000e+02 : f32
    %143 = vector.broadcast %cst_96 : f32 to vector<64x1xf32>
    %144 = arith.divf %142, %143 : vector<64x1xf32>
    %145 = vector.broadcast %137 : vector<64x1xf32> to vector<64x128xf32>
    %146 = arith.subf %131, %145 : vector<64x128xf32>
    %cst_97 = arith.constant 9.99999974E-6 : f32
    %147 = vector.broadcast %cst_97 : f32 to vector<64x1xf32>
    %148 = arith.addf %144, %147 : vector<64x1xf32>
    %149 = math.rsqrt %148 : vector<64x1xf32>
    %150 = vector.broadcast %149 : vector<64x1xf32> to vector<64x128xf32>
    %151 = arith.mulf %146, %150 : vector<64x128xf32>
    %152 = vector.broadcast %132 : vector<1x128xf32> to vector<64x128xf32>
    %153 = arith.mulf %151, %152 : vector<64x128xf32>
    %154 = vector.broadcast %133 : vector<1x128xf32> to vector<64x128xf32>
    %155 = arith.addf %153, %154 : vector<64x128xf32>
    %c0_98 = arith.constant 0 : index
    %c0_99 = arith.constant 0 : index
    %156 = vector.load %arg12[%c0_98, %c0_99] : memref<1x128xf32, #tpu.memory_space<vmem>>, vector<1x128xf32>
    %c0_100 = arith.constant 0 : index
    %c0_101 = arith.constant 0 : index
    %157 = vector.load %arg13[%c0_100, %c0_101] : memref<1x128xf32, #tpu.memory_space<vmem>>, vector<1x128xf32>
    %cst_102 = arith.constant dense<0.000000e+00> : vector<64xf32>
    %158 = vector.multi_reduction <add>, %77, %cst_102 [1] : vector<64x128xf32> to vector<64xf32>
    %159 = vector.shape_cast %158 : vector<64xf32> to vector<64x1xf32>
    %cst_103 = arith.constant 1.280000e+02 : f32
    %160 = vector.broadcast %cst_103 : f32 to vector<64x1xf32>
    %161 = arith.divf %159, %160 : vector<64x1xf32>
    %162 = vector.broadcast %161 : vector<64x1xf32> to vector<64x128xf32>
    %163 = arith.subf %77, %162 : vector<64x128xf32>
    %164 = arith.mulf %163, %163 : vector<64x128xf32>
    %cst_104 = arith.constant dense<0.000000e+00> : vector<64xf32>
    %165 = vector.multi_reduction <add>, %164, %cst_104 [1] : vector<64x128xf32> to vector<64xf32>
    %166 = vector.shape_cast %165 : vector<64xf32> to vector<64x1xf32>
    %cst_105 = arith.constant 1.280000e+02 : f32
    %167 = vector.broadcast %cst_105 : f32 to vector<64x1xf32>
    %168 = arith.divf %166, %167 : vector<64x1xf32>
    %169 = vector.broadcast %161 : vector<64x1xf32> to vector<64x128xf32>
    %170 = arith.subf %77, %169 : vector<64x128xf32>
    %cst_106 = arith.constant 9.99999974E-6 : f32
    %171 = vector.broadcast %cst_106 : f32 to vector<64x1xf32>
    %172 = arith.addf %168, %171 : vector<64x1xf32>
    %173 = math.rsqrt %172 : vector<64x1xf32>
    %174 = vector.broadcast %173 : vector<64x1xf32> to vector<64x128xf32>
    %175 = arith.mulf %170, %174 : vector<64x128xf32>
    %176 = vector.broadcast %156 : vector<1x128xf32> to vector<64x128xf32>
    %177 = arith.mulf %175, %176 : vector<64x128xf32>
    %178 = vector.broadcast %157 : vector<1x128xf32> to vector<64x128xf32>
    %179 = arith.addf %177, %178 : vector<64x128xf32>
    %180 = arith.truncf %179 : vector<64x128xf32> to vector<64x128xbf16>
    %c0_107 = arith.constant 0 : index
    %c0_108 = arith.constant 0 : index
    %181 = vector.load %arg14[%c0_107, %c0_108] : memref<1x128xf32, #tpu.memory_space<vmem>>, vector<1x128xf32>
    %c0_109 = arith.constant 0 : index
    %c0_110 = arith.constant 0 : index
    %182 = vector.load %arg15[%c0_109, %c0_110] : memref<1x128xf32, #tpu.memory_space<vmem>>, vector<1x128xf32>
    %cst_111 = arith.constant dense<0.000000e+00> : vector<64xf32>
    %183 = vector.multi_reduction <add>, %155, %cst_111 [1] : vector<64x128xf32> to vector<64xf32>
    %184 = vector.shape_cast %183 : vector<64xf32> to vector<64x1xf32>
    %cst_112 = arith.constant 1.280000e+02 : f32
    %185 = vector.broadcast %cst_112 : f32 to vector<64x1xf32>
    %186 = arith.divf %184, %185 : vector<64x1xf32>
    %187 = vector.broadcast %186 : vector<64x1xf32> to vector<64x128xf32>
    %188 = arith.subf %155, %187 : vector<64x128xf32>
    %189 = arith.mulf %188, %188 : vector<64x128xf32>
    %cst_113 = arith.constant dense<0.000000e+00> : vector<64xf32>
    %190 = vector.multi_reduction <add>, %189, %cst_113 [1] : vector<64x128xf32> to vector<64xf32>
    %191 = vector.shape_cast %190 : vector<64xf32> to vector<64x1xf32>
    %cst_114 = arith.constant 1.280000e+02 : f32
    %192 = vector.broadcast %cst_114 : f32 to vector<64x1xf32>
    %193 = arith.divf %191, %192 : vector<64x1xf32>
    %194 = vector.broadcast %186 : vector<64x1xf32> to vector<64x128xf32>
    %195 = arith.subf %155, %194 : vector<64x128xf32>
    %cst_115 = arith.constant 9.99999974E-6 : f32
    %196 = vector.broadcast %cst_115 : f32 to vector<64x1xf32>
    %197 = arith.addf %193, %196 : vector<64x1xf32>
    %198 = math.rsqrt %197 : vector<64x1xf32>
    %199 = vector.broadcast %198 : vector<64x1xf32> to vector<64x128xf32>
    %200 = arith.mulf %195, %199 : vector<64x128xf32>
    %201 = vector.broadcast %181 : vector<1x128xf32> to vector<64x128xf32>
    %202 = arith.mulf %200, %201 : vector<64x128xf32>
    %203 = vector.broadcast %182 : vector<1x128xf32> to vector<64x128xf32>
    %204 = arith.addf %202, %203 : vector<64x128xf32>
    %205 = arith.truncf %204 : vector<64x128xf32> to vector<64x128xbf16>
    %c0_116 = arith.constant 0 : index
    %c0_117 = arith.constant 0 : index
    %206 = vector.load %arg16[%c0_116, %c0_117] : memref<128x128xbf16, #tpu.memory_space<vmem>>, vector<128x128xbf16>
    %cst_118 = arith.constant dense<0.000000e+00> : vector<64x128xf32>
    %207 = tpu.matmul %205, %206, %cst_118 {dimension_numbers = #tpu.dot_dimension_numbers<[1], [0], [0], [1], [0, 0, 1, 1], [], []>} : vector<64x128xbf16>, vector<128x128xbf16>, vector<64x128xf32> -> vector<64x128xf32>
    %c0_119 = arith.constant 0 : index
    %c0_120 = arith.constant 0 : index
    %208 = vector.load %arg17[%c0_119, %c0_120] : memref<128x256xbf16, #tpu.memory_space<vmem>>, vector<128x256xbf16>
    %cst_121 = arith.constant dense<0.000000e+00> : vector<64x256xf32>
    %209 = tpu.matmul %180, %208, %cst_121 {dimension_numbers = #tpu.dot_dimension_numbers<[1], [0], [0], [1], [0, 0, 1, 1], [], []>} : vector<64x128xbf16>, vector<128x256xbf16>, vector<64x256xf32> -> vector<64x256xf32>
    %210 = vector.extract_strided_slice %209 {offsets = [0, 0], sizes = [64, 128], strides = [1, 1]} : vector<64x256xf32> to vector<64x128xf32>
    %211 = arith.truncf %210 : vector<64x128xf32> to vector<64x128xbf16>
    %212 = vector.extract_strided_slice %209 {offsets = [0, 128], sizes = [64, 128], strides = [1, 1]} : vector<64x256xf32> to vector<64x128xf32>
    %213 = arith.truncf %212 : vector<64x128xf32> to vector<64x128xbf16>
    %214 = arith.truncf %207 : vector<64x128xf32> to vector<64x128xbf16>
    %cst_122 = arith.constant dense<0.000000e+00> : vector<64x64xf32>
    %215 = tpu.matmul %214, %211, %cst_122 {dimension_numbers = #tpu.dot_dimension_numbers<[1], [1], [0], [0], [0, 0, 1, 0], [], []>} : vector<64x128xbf16>, vector<64x128xbf16>, vector<64x64xf32> -> vector<64x64xf32>
    %cst_123 = arith.constant 0.0883883461 : f32
    %216 = vector.broadcast %cst_123 : f32 to vector<64x64xf32>
    %217 = arith.mulf %215, %216 : vector<64x64xf32>
    %cst_124 = arith.constant dense<0xFF800000> : vector<64xf32>
    %218 = vector.multi_reduction <maximumf>, %217, %cst_124 [1] : vector<64x64xf32> to vector<64xf32>
    %219 = vector.shape_cast %218 : vector<64xf32> to vector<64x1xf32>
    %220 = vector.broadcast %219 : vector<64x1xf32> to vector<64x64xf32>
    %221 = arith.subf %217, %220 : vector<64x64xf32>
    %222 = math.exp %221 : vector<64x64xf32>
    %cst_125 = arith.constant dense<0.000000e+00> : vector<64xf32>
    %223 = vector.multi_reduction <add>, %222, %cst_125 [1] : vector<64x64xf32> to vector<64xf32>
    %224 = vector.shape_cast %223 : vector<64xf32> to vector<64x1xf32>
    %225 = tpu.reciprocal %224 {approx = true} : vector<64x1xf32> -> vector<64x1xf32>
    %226 = vector.broadcast %225 : vector<64x1xf32> to vector<64x64xf32>
    %227 = arith.mulf %222, %226 : vector<64x64xf32>
    %228 = arith.truncf %227 : vector<64x64xf32> to vector<64x64xbf16>
    %cst_126 = arith.constant dense<0.000000e+00> : vector<64x128xf32>
    %229 = tpu.matmul %228, %213, %cst_126 {dimension_numbers = #tpu.dot_dimension_numbers<[1], [0], [0], [1], [0, 0, 1, 1], [], []>} : vector<64x64xbf16>, vector<64x128xbf16>, vector<64x128xf32> -> vector<64x128xf32>
    %230 = arith.truncf %229 : vector<64x128xf32> to vector<64x128xbf16>
    %c0_127 = arith.constant 0 : index
    %c0_128 = arith.constant 0 : index
    %231 = vector.load %arg18[%c0_127, %c0_128] : memref<128x128xbf16, #tpu.memory_space<vmem>>, vector<128x128xbf16>
    %cst_129 = arith.constant dense<0.000000e+00> : vector<64x128xf32>
    %232 = tpu.matmul %230, %231, %cst_129 {dimension_numbers = #tpu.dot_dimension_numbers<[1], [0], [0], [1], [0, 0, 1, 1], [], []>} : vector<64x128xbf16>, vector<128x128xbf16>, vector<64x128xf32> -> vector<64x128xf32>
    %c0_130 = arith.constant 0 : index
    %c0_131 = arith.constant 0 : index
    %233 = vector.load %arg19[%c0_130, %c0_131] : memref<1x128xf32, #tpu.memory_space<vmem>>, vector<1x128xf32>
    %234 = vector.broadcast %233 : vector<1x128xf32> to vector<64x128xf32>
    %235 = arith.addf %232, %234 : vector<64x128xf32>
    %236 = arith.addf %77, %155 : vector<64x128xf32>
    %237 = arith.addf %236, %235 : vector<64x128xf32>
    %c0_132 = arith.constant 0 : index
    %c0_133 = arith.constant 0 : index
    %238 = vector.load %arg14[%c0_132, %c0_133] : memref<1x128xf32, #tpu.memory_space<vmem>>, vector<1x128xf32>
    %c0_134 = arith.constant 0 : index
    %c0_135 = arith.constant 0 : index
    %239 = vector.load %arg15[%c0_134, %c0_135] : memref<1x128xf32, #tpu.memory_space<vmem>>, vector<1x128xf32>
    %cst_136 = arith.constant dense<0.000000e+00> : vector<64xf32>
    %240 = vector.multi_reduction <add>, %237, %cst_136 [1] : vector<64x128xf32> to vector<64xf32>
    %241 = vector.shape_cast %240 : vector<64xf32> to vector<64x1xf32>
    %cst_137 = arith.constant 1.280000e+02 : f32
    %242 = vector.broadcast %cst_137 : f32 to vector<64x1xf32>
    %243 = arith.divf %241, %242 : vector<64x1xf32>
    %244 = vector.broadcast %243 : vector<64x1xf32> to vector<64x128xf32>
    %245 = arith.subf %237, %244 : vector<64x128xf32>
    %246 = arith.mulf %245, %245 : vector<64x128xf32>
    %cst_138 = arith.constant dense<0.000000e+00> : vector<64xf32>
    %247 = vector.multi_reduction <add>, %246, %cst_138 [1] : vector<64x128xf32> to vector<64xf32>
    %248 = vector.shape_cast %247 : vector<64xf32> to vector<64x1xf32>
    %cst_139 = arith.constant 1.280000e+02 : f32
    %249 = vector.broadcast %cst_139 : f32 to vector<64x1xf32>
    %250 = arith.divf %248, %249 : vector<64x1xf32>
    %251 = vector.broadcast %243 : vector<64x1xf32> to vector<64x128xf32>
    %252 = arith.subf %237, %251 : vector<64x128xf32>
    %cst_140 = arith.constant 9.99999974E-6 : f32
    %253 = vector.broadcast %cst_140 : f32 to vector<64x1xf32>
    %254 = arith.addf %250, %253 : vector<64x1xf32>
    %255 = math.rsqrt %254 : vector<64x1xf32>
    %256 = vector.broadcast %255 : vector<64x1xf32> to vector<64x128xf32>
    %257 = arith.mulf %252, %256 : vector<64x128xf32>
    %258 = vector.broadcast %238 : vector<1x128xf32> to vector<64x128xf32>
    %259 = arith.mulf %257, %258 : vector<64x128xf32>
    %260 = vector.broadcast %239 : vector<1x128xf32> to vector<64x128xf32>
    %261 = arith.addf %259, %260 : vector<64x128xf32>
    %262 = arith.truncf %261 : vector<64x128xf32> to vector<64x128xbf16>
    %c0_141 = arith.constant 0 : index
    %c0_142 = arith.constant 0 : index
    %263 = vector.load %arg20[%c0_141, %c0_142] : memref<128x512xbf16, #tpu.memory_space<vmem>>, vector<128x512xbf16>
    %cst_143 = arith.constant dense<0.000000e+00> : vector<64x512xf32>
    %264 = tpu.matmul %262, %263, %cst_143 {dimension_numbers = #tpu.dot_dimension_numbers<[1], [0], [0], [1], [0, 0, 1, 1], [], []>} : vector<64x128xbf16>, vector<128x512xbf16>, vector<64x512xf32> -> vector<64x512xf32>
    %c0_144 = arith.constant 0 : index
    %c0_145 = arith.constant 0 : index
    %265 = vector.load %arg21[%c0_144, %c0_145] : memref<1x512xf32, #tpu.memory_space<vmem>>, vector<1x512xf32>
    %266 = vector.broadcast %265 : vector<1x512xf32> to vector<64x512xf32>
    %267 = arith.addf %264, %266 : vector<64x512xf32>
    %268 = arith.truncf %267 : vector<64x512xf32> to vector<64x512xbf16>
    %c0_146 = arith.constant 0 : index
    %c0_147 = arith.constant 0 : index
    %c0_148 = arith.constant 0 : index
    %269 = vector.load %arg22[%c0_146, %c0_147, %c0_148] : memref<9x1x512xf32, #tpu.memory_space<vmem>>, vector<9x1x512xf32>
    %cst_149 = arith.constant 0.000000e+00 : f32
    %270 = vector.broadcast %cst_149 : f32 to vector<64x512xf32>
    %c0_150 = arith.constant 0 : index
    %c0_151 = arith.constant 0 : index
    %c0_152 = arith.constant 0 : index
    %271 = vector.load %arg3[%c0_150, %c0_151, %c0_152] : memref<9x64x64xbf16, #tpu.memory_space<vmem>>, vector<1x64x64xbf16>
    %272 = vector.shape_cast %271 : vector<1x64x64xbf16> to vector<64x64xbf16>
    %cst_153 = arith.constant dense<0.000000e+00> : vector<64x512xf32>
    %273 = tpu.matmul %272, %268, %cst_153 {dimension_numbers = #tpu.dot_dimension_numbers<[1], [0], [0], [1], [0, 0, 1, 1], [], []>} : vector<64x64xbf16>, vector<64x512xbf16>, vector<64x512xf32> -> vector<64x512xf32>
    %274 = vector.extract_strided_slice %269 {offsets = [0, 0, 0], sizes = [1, 1, 512], strides = [1, 1, 1]} : vector<9x1x512xf32> to vector<1x1x512xf32>
    %275 = vector.shape_cast %274 : vector<1x1x512xf32> to vector<1x512xf32>
    %276 = vector.broadcast %275 : vector<1x512xf32> to vector<64x512xf32>
    %277 = arith.mulf %273, %276 : vector<64x512xf32>
    %278 = arith.addf %270, %277 : vector<64x512xf32>
    %c1_154 = arith.constant 1 : index
    %c0_155 = arith.constant 0 : index
    %c0_156 = arith.constant 0 : index
    %279 = vector.load %arg3[%c1_154, %c0_155, %c0_156] : memref<9x64x64xbf16, #tpu.memory_space<vmem>>, vector<1x64x64xbf16>
    %280 = vector.shape_cast %279 : vector<1x64x64xbf16> to vector<64x64xbf16>
    %cst_157 = arith.constant dense<0.000000e+00> : vector<64x512xf32>
    %281 = tpu.matmul %280, %268, %cst_157 {dimension_numbers = #tpu.dot_dimension_numbers<[1], [0], [0], [1], [0, 0, 1, 1], [], []>} : vector<64x64xbf16>, vector<64x512xbf16>, vector<64x512xf32> -> vector<64x512xf32>
    %282 = vector.extract_strided_slice %269 {offsets = [1, 0, 0], sizes = [1, 1, 512], strides = [1, 1, 1]} : vector<9x1x512xf32> to vector<1x1x512xf32>
    %283 = vector.shape_cast %282 : vector<1x1x512xf32> to vector<1x512xf32>
    %284 = vector.broadcast %283 : vector<1x512xf32> to vector<64x512xf32>
    %285 = arith.mulf %281, %284 : vector<64x512xf32>
    %286 = arith.addf %278, %285 : vector<64x512xf32>
    %c2_158 = arith.constant 2 : index
    %c0_159 = arith.constant 0 : index
    %c0_160 = arith.constant 0 : index
    %287 = vector.load %arg3[%c2_158, %c0_159, %c0_160] : memref<9x64x64xbf16, #tpu.memory_space<vmem>>, vector<1x64x64xbf16>
    %288 = vector.shape_cast %287 : vector<1x64x64xbf16> to vector<64x64xbf16>
    %cst_161 = arith.constant dense<0.000000e+00> : vector<64x512xf32>
    %289 = tpu.matmul %288, %268, %cst_161 {dimension_numbers = #tpu.dot_dimension_numbers<[1], [0], [0], [1], [0, 0, 1, 1], [], []>} : vector<64x64xbf16>, vector<64x512xbf16>, vector<64x512xf32> -> vector<64x512xf32>
    %290 = vector.extract_strided_slice %269 {offsets = [2, 0, 0], sizes = [1, 1, 512], strides = [1, 1, 1]} : vector<9x1x512xf32> to vector<1x1x512xf32>
    %291 = vector.shape_cast %290 : vector<1x1x512xf32> to vector<1x512xf32>
    %292 = vector.broadcast %291 : vector<1x512xf32> to vector<64x512xf32>
    %293 = arith.mulf %289, %292 : vector<64x512xf32>
    %294 = arith.addf %286, %293 : vector<64x512xf32>
    %c3_162 = arith.constant 3 : index
    %c0_163 = arith.constant 0 : index
    %c0_164 = arith.constant 0 : index
    %295 = vector.load %arg3[%c3_162, %c0_163, %c0_164] : memref<9x64x64xbf16, #tpu.memory_space<vmem>>, vector<1x64x64xbf16>
    %296 = vector.shape_cast %295 : vector<1x64x64xbf16> to vector<64x64xbf16>
    %cst_165 = arith.constant dense<0.000000e+00> : vector<64x512xf32>
    %297 = tpu.matmul %296, %268, %cst_165 {dimension_numbers = #tpu.dot_dimension_numbers<[1], [0], [0], [1], [0, 0, 1, 1], [], []>} : vector<64x64xbf16>, vector<64x512xbf16>, vector<64x512xf32> -> vector<64x512xf32>
    %298 = vector.extract_strided_slice %269 {offsets = [3, 0, 0], sizes = [1, 1, 512], strides = [1, 1, 1]} : vector<9x1x512xf32> to vector<1x1x512xf32>
    %299 = vector.shape_cast %298 : vector<1x1x512xf32> to vector<1x512xf32>
    %300 = vector.broadcast %299 : vector<1x512xf32> to vector<64x512xf32>
    %301 = arith.mulf %297, %300 : vector<64x512xf32>
    %302 = arith.addf %294, %301 : vector<64x512xf32>
    %c4_166 = arith.constant 4 : index
    %c0_167 = arith.constant 0 : index
    %c0_168 = arith.constant 0 : index
    %303 = vector.load %arg3[%c4_166, %c0_167, %c0_168] : memref<9x64x64xbf16, #tpu.memory_space<vmem>>, vector<1x64x64xbf16>
    %304 = vector.shape_cast %303 : vector<1x64x64xbf16> to vector<64x64xbf16>
    %cst_169 = arith.constant dense<0.000000e+00> : vector<64x512xf32>
    %305 = tpu.matmul %304, %268, %cst_169 {dimension_numbers = #tpu.dot_dimension_numbers<[1], [0], [0], [1], [0, 0, 1, 1], [], []>} : vector<64x64xbf16>, vector<64x512xbf16>, vector<64x512xf32> -> vector<64x512xf32>
    %306 = vector.extract_strided_slice %269 {offsets = [4, 0, 0], sizes = [1, 1, 512], strides = [1, 1, 1]} : vector<9x1x512xf32> to vector<1x1x512xf32>
    %307 = vector.shape_cast %306 : vector<1x1x512xf32> to vector<1x512xf32>
    %308 = vector.broadcast %307 : vector<1x512xf32> to vector<64x512xf32>
    %309 = arith.mulf %305, %308 : vector<64x512xf32>
    %310 = arith.addf %302, %309 : vector<64x512xf32>
    %c5_170 = arith.constant 5 : index
    %c0_171 = arith.constant 0 : index
    %c0_172 = arith.constant 0 : index
    %311 = vector.load %arg3[%c5_170, %c0_171, %c0_172] : memref<9x64x64xbf16, #tpu.memory_space<vmem>>, vector<1x64x64xbf16>
    %312 = vector.shape_cast %311 : vector<1x64x64xbf16> to vector<64x64xbf16>
    %cst_173 = arith.constant dense<0.000000e+00> : vector<64x512xf32>
    %313 = tpu.matmul %312, %268, %cst_173 {dimension_numbers = #tpu.dot_dimension_numbers<[1], [0], [0], [1], [0, 0, 1, 1], [], []>} : vector<64x64xbf16>, vector<64x512xbf16>, vector<64x512xf32> -> vector<64x512xf32>
    %314 = vector.extract_strided_slice %269 {offsets = [5, 0, 0], sizes = [1, 1, 512], strides = [1, 1, 1]} : vector<9x1x512xf32> to vector<1x1x512xf32>
    %315 = vector.shape_cast %314 : vector<1x1x512xf32> to vector<1x512xf32>
    %316 = vector.broadcast %315 : vector<1x512xf32> to vector<64x512xf32>
    %317 = arith.mulf %313, %316 : vector<64x512xf32>
    %318 = arith.addf %310, %317 : vector<64x512xf32>
    %c6_174 = arith.constant 6 : index
    %c0_175 = arith.constant 0 : index
    %c0_176 = arith.constant 0 : index
    %319 = vector.load %arg3[%c6_174, %c0_175, %c0_176] : memref<9x64x64xbf16, #tpu.memory_space<vmem>>, vector<1x64x64xbf16>
    %320 = vector.shape_cast %319 : vector<1x64x64xbf16> to vector<64x64xbf16>
    %cst_177 = arith.constant dense<0.000000e+00> : vector<64x512xf32>
    %321 = tpu.matmul %320, %268, %cst_177 {dimension_numbers = #tpu.dot_dimension_numbers<[1], [0], [0], [1], [0, 0, 1, 1], [], []>} : vector<64x64xbf16>, vector<64x512xbf16>, vector<64x512xf32> -> vector<64x512xf32>
    %322 = vector.extract_strided_slice %269 {offsets = [6, 0, 0], sizes = [1, 1, 512], strides = [1, 1, 1]} : vector<9x1x512xf32> to vector<1x1x512xf32>
    %323 = vector.shape_cast %322 : vector<1x1x512xf32> to vector<1x512xf32>
    %324 = vector.broadcast %323 : vector<1x512xf32> to vector<64x512xf32>
    %325 = arith.mulf %321, %324 : vector<64x512xf32>
    %326 = arith.addf %318, %325 : vector<64x512xf32>
    %c7_178 = arith.constant 7 : index
    %c0_179 = arith.constant 0 : index
    %c0_180 = arith.constant 0 : index
    %327 = vector.load %arg3[%c7_178, %c0_179, %c0_180] : memref<9x64x64xbf16, #tpu.memory_space<vmem>>, vector<1x64x64xbf16>
    %328 = vector.shape_cast %327 : vector<1x64x64xbf16> to vector<64x64xbf16>
    %cst_181 = arith.constant dense<0.000000e+00> : vector<64x512xf32>
    %329 = tpu.matmul %328, %268, %cst_181 {dimension_numbers = #tpu.dot_dimension_numbers<[1], [0], [0], [1], [0, 0, 1, 1], [], []>} : vector<64x64xbf16>, vector<64x512xbf16>, vector<64x512xf32> -> vector<64x512xf32>
    %330 = vector.extract_strided_slice %269 {offsets = [7, 0, 0], sizes = [1, 1, 512], strides = [1, 1, 1]} : vector<9x1x512xf32> to vector<1x1x512xf32>
    %331 = vector.shape_cast %330 : vector<1x1x512xf32> to vector<1x512xf32>
    %332 = vector.broadcast %331 : vector<1x512xf32> to vector<64x512xf32>
    %333 = arith.mulf %329, %332 : vector<64x512xf32>
    %334 = arith.addf %326, %333 : vector<64x512xf32>
    %c8_182 = arith.constant 8 : index
    %c0_183 = arith.constant 0 : index
    %c0_184 = arith.constant 0 : index
    %335 = vector.load %arg3[%c8_182, %c0_183, %c0_184] : memref<9x64x64xbf16, #tpu.memory_space<vmem>>, vector<1x64x64xbf16>
    %336 = vector.shape_cast %335 : vector<1x64x64xbf16> to vector<64x64xbf16>
    %cst_185 = arith.constant dense<0.000000e+00> : vector<64x512xf32>
    %337 = tpu.matmul %336, %268, %cst_185 {dimension_numbers = #tpu.dot_dimension_numbers<[1], [0], [0], [1], [0, 0, 1, 1], [], []>} : vector<64x64xbf16>, vector<64x512xbf16>, vector<64x512xf32> -> vector<64x512xf32>
    %338 = vector.extract_strided_slice %269 {offsets = [8, 0, 0], sizes = [1, 1, 512], strides = [1, 1, 1]} : vector<9x1x512xf32> to vector<1x1x512xf32>
    %339 = vector.shape_cast %338 : vector<1x1x512xf32> to vector<1x512xf32>
    %340 = vector.broadcast %339 : vector<1x512xf32> to vector<64x512xf32>
    %341 = arith.mulf %337, %340 : vector<64x512xf32>
    %342 = arith.addf %334, %341 : vector<64x512xf32>
    %c0_186 = arith.constant 0 : index
    %c0_187 = arith.constant 0 : index
    %343 = vector.load %arg23[%c0_186, %c0_187] : memref<1x512xf32, #tpu.memory_space<vmem>>, vector<1x512xf32>
    %344 = vector.broadcast %343 : vector<1x512xf32> to vector<64x512xf32>
    %345 = arith.addf %342, %344 : vector<64x512xf32>
    %cst_188 = arith.constant 5.000000e-01 : f32
    %346 = vector.broadcast %cst_188 : f32 to vector<64x512xf32>
    %347 = arith.mulf %346, %345 : vector<64x512xf32>
    %cst_189 = arith.constant 4.471500e-02 : f32
    %348 = vector.broadcast %cst_189 : f32 to vector<64x512xf32>
    %349 = arith.mulf %348, %345 : vector<64x512xf32>
    %350 = arith.mulf %349, %345 : vector<64x512xf32>
    %351 = arith.mulf %350, %345 : vector<64x512xf32>
    %352 = arith.addf %345, %351 : vector<64x512xf32>
    %cst_190 = arith.constant 0.797884583 : f32
    %353 = vector.broadcast %cst_190 : f32 to vector<64x512xf32>
    %354 = arith.mulf %353, %352 : vector<64x512xf32>
    %355 = math.tanh %354 : vector<64x512xf32>
    %cst_191 = arith.constant 1.000000e+00 : f32
    %356 = vector.broadcast %cst_191 : f32 to vector<64x512xf32>
    %357 = arith.addf %356, %355 : vector<64x512xf32>
    %358 = arith.mulf %347, %357 : vector<64x512xf32>
    %359 = arith.truncf %358 : vector<64x512xf32> to vector<64x512xbf16>
    %c0_192 = arith.constant 0 : index
    %c0_193 = arith.constant 0 : index
    %360 = vector.load %arg24[%c0_192, %c0_193] : memref<512x128xbf16, #tpu.memory_space<vmem>>, vector<512x128xbf16>
    %cst_194 = arith.constant dense<0.000000e+00> : vector<64x128xf32>
    %361 = tpu.matmul %359, %360, %cst_194 {dimension_numbers = #tpu.dot_dimension_numbers<[1], [0], [0], [1], [0, 0, 1, 1], [], []>} : vector<64x512xbf16>, vector<512x128xbf16>, vector<64x128xf32> -> vector<64x128xf32>
    %c0_195 = arith.constant 0 : index
    %c0_196 = arith.constant 0 : index
    %362 = vector.load %arg25[%c0_195, %c0_196] : memref<1x128xf32, #tpu.memory_space<vmem>>, vector<1x128xf32>
    %363 = vector.broadcast %362 : vector<1x128xf32> to vector<64x128xf32>
    %364 = arith.addf %361, %363 : vector<64x128xf32>
    %365 = arith.addf %237, %364 : vector<64x128xf32>
    %c0_197 = arith.constant 0 : index
    %c0_198 = arith.constant 0 : index
    %366 = vector.load %arg26[%c0_197, %c0_198] : memref<1x128xf32, #tpu.memory_space<vmem>>, vector<1x128xf32>
    %c0_199 = arith.constant 0 : index
    %c0_200 = arith.constant 0 : index
    %367 = vector.load %arg27[%c0_199, %c0_200] : memref<1x128xf32, #tpu.memory_space<vmem>>, vector<1x128xf32>
    %cst_201 = arith.constant dense<0.000000e+00> : vector<64xf32>
    %368 = vector.multi_reduction <add>, %365, %cst_201 [1] : vector<64x128xf32> to vector<64xf32>
    %369 = vector.shape_cast %368 : vector<64xf32> to vector<64x1xf32>
    %cst_202 = arith.constant 1.280000e+02 : f32
    %370 = vector.broadcast %cst_202 : f32 to vector<64x1xf32>
    %371 = arith.divf %369, %370 : vector<64x1xf32>
    %372 = vector.broadcast %371 : vector<64x1xf32> to vector<64x128xf32>
    %373 = arith.subf %365, %372 : vector<64x128xf32>
    %374 = arith.mulf %373, %373 : vector<64x128xf32>
    %cst_203 = arith.constant dense<0.000000e+00> : vector<64xf32>
    %375 = vector.multi_reduction <add>, %374, %cst_203 [1] : vector<64x128xf32> to vector<64xf32>
    %376 = vector.shape_cast %375 : vector<64xf32> to vector<64x1xf32>
    %cst_204 = arith.constant 1.280000e+02 : f32
    %377 = vector.broadcast %cst_204 : f32 to vector<64x1xf32>
    %378 = arith.divf %376, %377 : vector<64x1xf32>
    %379 = vector.broadcast %371 : vector<64x1xf32> to vector<64x128xf32>
    %380 = arith.subf %365, %379 : vector<64x128xf32>
    %cst_205 = arith.constant 9.99999974E-6 : f32
    %381 = vector.broadcast %cst_205 : f32 to vector<64x1xf32>
    %382 = arith.addf %378, %381 : vector<64x1xf32>
    %383 = math.rsqrt %382 : vector<64x1xf32>
    %384 = vector.broadcast %383 : vector<64x1xf32> to vector<64x128xf32>
    %385 = arith.mulf %380, %384 : vector<64x128xf32>
    %386 = vector.broadcast %366 : vector<1x128xf32> to vector<64x128xf32>
    %387 = arith.mulf %385, %386 : vector<64x128xf32>
    %388 = vector.broadcast %367 : vector<1x128xf32> to vector<64x128xf32>
    %389 = arith.addf %387, %388 : vector<64x128xf32>
    %c0_206 = arith.constant 0 : index
    %c0_207 = arith.constant 0 : index
    %c0_208 = arith.constant 0 : index
    %390 = vector.load %arg28[%c0_206, %c0_207, %c0_208] : memref<1x64x128xf32, #tpu.memory_space<vmem>>, vector<1x64x128xf32>
    %391 = vector.shape_cast %390 : vector<1x64x128xf32> to vector<64x128xf32>
    %392 = vector.shape_cast %389 : vector<64x128xf32> to vector<1x64x128xf32>
    tpu.vector_store %arg28[%c0_206, %c0_207, %c0_208], %392 {strides = array<i32>} : memref<1x64x128xf32, #tpu.memory_space<vmem>>, vector<1x64x128xf32>,
    return
  }
  func.func @transform_0(%arg0: i32) -> (i32, i32, i32) {
    %c0_i32 = arith.constant 0 : i32
    %c0_i32_0 = arith.constant 0 : i32
    %c0_i32_1 = arith.constant 0 : i32
    return %arg0, %c0_i32, %c0_i32_0 : i32, i32, i32
  }
  func.func @transform_1(%arg0: i32) -> (i32, i32, i32) {
    %c0_i32 = arith.constant 0 : i32
    %c0_i32_0 = arith.constant 0 : i32
    %c0_i32_1 = arith.constant 0 : i32
    return %arg0, %c0_i32, %c0_i32_0 : i32, i32, i32
  }
  func.func @transform_2(%arg0: i32) -> (i32, i32, i32) {
    %c0_i32 = arith.constant 0 : i32
    %c0_i32_0 = arith.constant 0 : i32
    %c0_i32_1 = arith.constant 0 : i32
    %c0_i32_2 = arith.constant 0 : i32
    return %c0_i32, %c0_i32_0, %c0_i32_1 : i32, i32, i32
  }
  func.func @transform_3(%arg0: i32) -> (i32, i32) {
    %c0_i32 = arith.constant 0 : i32
    %c0_i32_0 = arith.constant 0 : i32
    %c0_i32_1 = arith.constant 0 : i32
    return %c0_i32, %c0_i32_0 : i32, i32
  }
  func.func @transform_4(%arg0: i32) -> (i32, i32) {
    %c0_i32 = arith.constant 0 : i32
    %c0_i32_0 = arith.constant 0 : i32
    %c0_i32_1 = arith.constant 0 : i32
    return %c0_i32, %c0_i32_0 : i32, i32
  }
  func.func @transform_5(%arg0: i32) -> (i32, i32) {
    %c0_i32 = arith.constant 0 : i32
    %c0_i32_0 = arith.constant 0 : i32
    %c0_i32_1 = arith.constant 0 : i32
    return %c0_i32, %c0_i32_0 : i32, i32
  }
  func.func @transform_6(%arg0: i32) -> (i32, i32) {
    %c0_i32 = arith.constant 0 : i32
    %c0_i32_0 = arith.constant 0 : i32
    %c0_i32_1 = arith.constant 0 : i32
    return %c0_i32, %c0_i32_0 : i32, i32
  }
  func.func @transform_7(%arg0: i32) -> (i32, i32) {
    %c0_i32 = arith.constant 0 : i32
    %c0_i32_0 = arith.constant 0 : i32
    %c0_i32_1 = arith.constant 0 : i32
    return %c0_i32, %c0_i32_0 : i32, i32
  }
  func.func @transform_8(%arg0: i32) -> (i32, i32) {
    %c0_i32 = arith.constant 0 : i32
    %c0_i32_0 = arith.constant 0 : i32
    %c0_i32_1 = arith.constant 0 : i32
    return %c0_i32, %c0_i32_0 : i32, i32
  }
  func.func @transform_9(%arg0: i32) -> (i32, i32) {
    %c0_i32 = arith.constant 0 : i32
    %c0_i32_0 = arith.constant 0 : i32
    %c0_i32_1 = arith.constant 0 : i32
    return %c0_i32, %c0_i32_0 : i32, i32
  }
  func.func @transform_10(%arg0: i32) -> (i32, i32) {
    %c0_i32 = arith.constant 0 : i32
    %c0_i32_0 = arith.constant 0 : i32
    %c0_i32_1 = arith.constant 0 : i32
    return %c0_i32, %c0_i32_0 : i32, i32
  }
  func.func @transform_11(%arg0: i32) -> (i32, i32) {
    %c0_i32 = arith.constant 0 : i32
    %c0_i32_0 = arith.constant 0 : i32
    %c0_i32_1 = arith.constant 0 : i32
    return %c0_i32, %c0_i32_0 : i32, i32
  }
  func.func @transform_12(%arg0: i32) -> (i32, i32) {
    %c0_i32 = arith.constant 0 : i32
    %c0_i32_0 = arith.constant 0 : i32
    %c0_i32_1 = arith.constant 0 : i32
    return %c0_i32, %c0_i32_0 : i32, i32
  }
  func.func @transform_13(%arg0: i32) -> (i32, i32) {
    %c0_i32 = arith.constant 0 : i32
    %c0_i32_0 = arith.constant 0 : i32
    %c0_i32_1 = arith.constant 0 : i32
    return %c0_i32, %c0_i32_0 : i32, i32
  }
  func.func @transform_14(%arg0: i32) -> (i32, i32) {
    %c0_i32 = arith.constant 0 : i32
    %c0_i32_0 = arith.constant 0 : i32
    %c0_i32_1 = arith.constant 0 : i32
    return %c0_i32, %c0_i32_0 : i32, i32
  }
  func.func @transform_15(%arg0: i32) -> (i32, i32) {
    %c0_i32 = arith.constant 0 : i32
    %c0_i32_0 = arith.constant 0 : i32
    %c0_i32_1 = arith.constant 0 : i32
    return %c0_i32, %c0_i32_0 : i32, i32
  }
  func.func @transform_16(%arg0: i32) -> (i32, i32) {
    %c0_i32 = arith.constant 0 : i32
    %c0_i32_0 = arith.constant 0 : i32
    %c0_i32_1 = arith.constant 0 : i32
    return %c0_i32, %c0_i32_0 : i32, i32
  }
  func.func @transform_17(%arg0: i32) -> (i32, i32) {
    %c0_i32 = arith.constant 0 : i32
    %c0_i32_0 = arith.constant 0 : i32
    %c0_i32_1 = arith.constant 0 : i32
    return %c0_i32, %c0_i32_0 : i32, i32
  }
  func.func @transform_18(%arg0: i32) -> (i32, i32) {
    %c0_i32 = arith.constant 0 : i32
    %c0_i32_0 = arith.constant 0 : i32
    %c0_i32_1 = arith.constant 0 : i32
    return %c0_i32, %c0_i32_0 : i32, i32
  }
  func.func @transform_19(%arg0: i32) -> (i32, i32) {
    %c0_i32 = arith.constant 0 : i32
    %c0_i32_0 = arith.constant 0 : i32
    %c0_i32_1 = arith.constant 0 : i32
    return %c0_i32, %c0_i32_0 : i32, i32
  }
  func.func @transform_20(%arg0: i32) -> (i32, i32) {
    %c0_i32 = arith.constant 0 : i32
    %c0_i32_0 = arith.constant 0 : i32
    %c0_i32_1 = arith.constant 0 : i32
    return %c0_i32, %c0_i32_0 : i32, i32
  }
  func.func @transform_21(%arg0: i32) -> (i32, i32, i32) {
    %c0_i32 = arith.constant 0 : i32
    %c0_i32_0 = arith.constant 0 : i32
    %c0_i32_1 = arith.constant 0 : i32
    %c0_i32_2 = arith.constant 0 : i32
    return %c0_i32, %c0_i32_0, %c0_i32_1 : i32, i32, i32
  }
  func.func @transform_22(%arg0: i32) -> (i32, i32) {
    %c0_i32 = arith.constant 0 : i32
    %c0_i32_0 = arith.constant 0 : i32
    %c0_i32_1 = arith.constant 0 : i32
    return %c0_i32, %c0_i32_0 : i32, i32
  }
  func.func @transform_23(%arg0: i32) -> (i32, i32) {
    %c0_i32 = arith.constant 0 : i32
    %c0_i32_0 = arith.constant 0 : i32
    %c0_i32_1 = arith.constant 0 : i32
    return %c0_i32, %c0_i32_0 : i32, i32
  }
  func.func @transform_24(%arg0: i32) -> (i32, i32) {
    %c0_i32 = arith.constant 0 : i32
    %c0_i32_0 = arith.constant 0 : i32
    %c0_i32_1 = arith.constant 0 : i32
    return %c0_i32, %c0_i32_0 : i32, i32
  }
  func.func @transform_25(%arg0: i32) -> (i32, i32) {
    %c0_i32 = arith.constant 0 : i32
    %c0_i32_0 = arith.constant 0 : i32
    %c0_i32_1 = arith.constant 0 : i32
    return %c0_i32, %c0_i32_0 : i32, i32
  }
  func.func @transform_26(%arg0: i32) -> (i32, i32) {
    %c0_i32 = arith.constant 0 : i32
    %c0_i32_0 = arith.constant 0 : i32
    %c0_i32_1 = arith.constant 0 : i32
    return %c0_i32, %c0_i32_0 : i32, i32
  }
  func.func @transform_27(%arg0: i32) -> (i32, i32, i32) {
    %c0_i32 = arith.constant 0 : i32
    %c0_i32_0 = arith.constant 0 : i32
    %c0_i32_1 = arith.constant 0 : i32
    return %arg0, %c0_i32, %c0_i32_0 : i32, i32, i32
  }
}

</mosaic_0001>

<bundles_post_ra>
// kernel: cross_attention_module.1
= control target key start
LH: loop header
LB: loop body
LE: loop exit
PB: predicated region body
PF: predicated region fallthrough
CT: control target
= control target key end

     0   :  { %s14517_s0 = inlined_call_operand.vmem [shape: bf16[2,64,4], index: 0, kind: input, shape index: {}]   ;;  %s14518_s1 = inlined_call_operand.vmem [shape: bf16[2,64,128], index: 1, kind: input, shape index: {}]   ;;  %s14519_s2 = inlined_call_operand.vmem [shape: bf16[9,64,64], index: 2, kind: input, shape index: {}]   ;;  %s14520_s3 = inlined_call_operand.vmem [shape: bf16[4,1152], index: 3, kind: input, shape index: {}]   ;;  %s14521_s4 = inlined_call_operand.vmem [shape: f32[1,128], index: 4, kind: input, shape index: {}]   ;;  %s14522_s5 = inlined_call_operand.vmem [shape: f32[1,128], index: 5, kind: input, shape index: {}]   ;;  %s14523_s6 = inlined_call_operand.vmem [shape: f32[1,128], index: 6, kind: input, shape index: {}]   ;;  %s14524_s7 = inlined_call_operand.vmem [shape: bf16[128,1152], index: 7, kind: input, shape index: {}]   ;;  %s14525_s8 = inlined_call_operand.vmem [shape: f32[1,128], index: 8, kind: input, shape index: {}]   ;;  %s14526_s9 = inlined_call_operand.vmem [shape: f32[1,128], index: 9, kind: input, shape index: {}]   ;;  %s14527_s10 = inlined_call_operand.vmem [shape: f32[1,128], index: 10, kind: input, shape index: {}]   ;;  %s14528_s11 = inlined_call_operand.vmem [shape: f32[1,128], index: 11, kind: input, shape index: {}]   ;;  %s14529_s12 = inlined_call_operand.vmem [shape: f32[1,128], index: 12, kind: input, shape index: {}]   ;;  %s14530_s13 = inlined_call_operand.vmem [shape: f32[1,128], index: 13, kind: input, shape index: {}]   ;;  %s14531_s14 = inlined_call_operand.vmem [shape: f32[1,128], index: 14, kind: input, shape index: {}]   ;;  %s14532_s15 = inlined_call_operand.vmem [shape: bf16[128,128], index: 15, kind: input, shape index: {}]   ;;  %s14533_s16 = inlined_call_operand.vmem [shape: bf16[128,256], index: 16, kind: input, shape index: {}]   ;;  %s14534_s17 = inlined_call_operand.vmem [shape: bf16[128,128], index: 17, kind: input, shape index: {}]   ;;  %s14535_s18 = inlined_call_operand.vmem [shape: f32[1,128], index: 18, kind: input, shape index: {}]   ;;  %s14536_s19 = inlined_call_operand.vmem [shape: bf16[128,512], index: 19, kind: input, shape index: {}]   ;;  %s14537_s20 = inlined_call_operand.vmem [shape: f32[1,512], index: 20, kind: input, shape index: {}]   ;;  %s14538_s21 = inlined_call_operand.vmem [shape: f32[9,1,512], index: 21, kind: input, shape index: {}]   ;;  %s14539_s22 = inlined_call_operand.vmem [shape: f32[1,512], index: 22, kind: input, shape index: {}]   ;;  %s14540_s23 = inlined_call_operand.vmem [shape: bf16[512,128], index: 23, kind: input, shape index: {}]   ;;  %s14541_s24 = inlined_call_operand.vmem [shape: f32[1,128], index: 24, kind: input, shape index: {}]   ;;  %s14542_s25 = inlined_call_operand.vmem [shape: f32[1,128], index: 25, kind: input, shape index: {}]   ;;  %s14543_s26 = inlined_call_operand.vmem [shape: f32[1,128], index: 26, kind: input, shape index: {}]   ;;  %s14544_s27 = inlined_call_operand.hbm [shape: f32[2,64,128], index: 27, kind: output, shape index: {}]  }
   0x1   :  { %14575 = sst [smem:[#allocation29_spill]] %s14517_s0 }
   0x2   :  { %14576 = sst [smem:[#allocation30_spill]] %s14518_s1 }
   0x3   :  { %14577 = sst [smem:[#allocation31_spill]] %s14519_s2 }
   0x4   :  { %14578 = sst [smem:[#allocation32_spill]] %s14520_s3 }
   0x5   :  { %14579 = sst [smem:[#allocation33_spill]] %s14521_s4 }
   0x6   :  { %14580 = sst [smem:[#allocation34_spill]] %s14522_s5 }
   0x7   :  { %14581 = sst [smem:[#allocation35_spill]] %s14523_s6 }
   0x8   :  { %14582 = sst [smem:[#allocation36_spill]] %s14524_s7 }
   0x9   :  { %14583 = sst [smem:[#allocation37_spill]] %s14525_s8 }
   0xa   :  { %14584 = sst [smem:[#allocation38_spill]] %s14526_s9 }
   0xb   :  { %14585 = sst [smem:[#allocation39_spill]] %s14527_s10 }
   0xc   :  { %14586 = sst [smem:[#allocation40_spill]] %s14528_s11 }
   0xd   :  { %14587 = sst [smem:[#allocation41_spill]] %s14529_s12 }
   0xe   :  { %14588 = sst [smem:[#allocation42_spill]] %s14532_s15 }
   0xf   :  { %14589 = sst [smem:[#allocation43_spill]] %s14533_s16 }
  0x10   :  { %32 = vsyncpa [#allocation3], 0 }
  0x11   :  { %34 = vsyncpa [#allocation3 + $0x1], 0  ;;  %s10681_s7 = smov 0   ;;  %s10683_s4 = smov 0  }
  0x12   :  { %s10685_s8 = smov 0   ;;  %s10687_s30 = smov 0  }
  0x13 LB: > { %14590 = sst [smem:[#allocation5_spill]] %s10530_s8  ;;  %s10702_s9 = sadd.s32 4294967295, %s10534_s30   ;;  %s10534_s30 = sphi %s10687_s30, %s14657_s30   ;;  %s10530_s8 = sphi %s10685_s8, %s14662_s8   ;;  %s10526_s4 = sphi %s10683_s4, %s14661_s4   ;;  %s10522_s7 = sphi %s10681_s7, %s14660_s7  }
  0x14   : > { %s8635_s5 = sadd.s32 4294967294, %s10534_s30   ;;  %s10706_s28 = sadd.s32 1, %s10534_s30  }
  0x15   : > { %14591 = sst [smem:[#allocation6_spill]] %s10706_s28  ;;  %s624_s0 = sadd.s32 1, %s10530_s8 }
  0x16   : > { %s621_s10 = ssub.s32 %s10534_s30, %s10706_s28  ;;  %p634_p0 = scmp.ne.s32.totalorder %s10530_s8, %s10526_s4 }
  0x17   : > { %p622_p1 = scmp.eq.s32.totalorder %s621_s10, 0  ;;  %p635_p2 = scmp.eq.s32.totalorder %s10702_s9, 1 }
  0x18   : > { %p640_p3 = scmp.ne.s32.totalorder %s10526_s4, %s10522_s7  ;;  %p641_p4 = scmp.eq.s32.totalorder %s8635_s5, 1 }
  0x19   : > { %s10717_s29 = scalar_select %p622_p1, %s10530_s8, %s624_s0  }
  0x1a   : > { %p10719_p5 = por %p635_p2, %p634_p0  ;;  %p10723_p6 = por %p641_p4, %p640_p3 }
  0x1b   : > { %14592 = sst [smem:[#allocation7_spill]] %s10717_s29  ;;  %p8638_p7 = scmp.ge.s32.totalorder %s10534_s30, 1 }
  0x1c   : > { %s14594_s6 = scalar_select %p10723_p6, 1, 0 }
  0x1d   : > { %p750_p8 = scmp.lt.s32.totalorder %s10534_s30, 3 }
  0x1e   : > { %14595 = sst [smem:[#allocation8_spill]] %s14594_s6 }
  0x1f   : > { %p751_p9 = pnand %p8638_p7, %p750_p8 }
  0x21   : > { %754 = sbr.rel (%p751_p9) target bundleno = 4356 (0x1104), region = 128 }
  0x28   : > { %v876_v0 = vlaneseq  ;;  %p827_p10 = scmp.lt.s32.totalorder %s10702_s9, 1  ;;  %s14596_s3 = sld [smem:[#allocation32_spill]]  ;;  %v10536_v2 = vmov 1983009808   ;;  %v14553_v4 = vmov 0   ;;  %vm926_vm0 = vcmask 1041408  }
  0x29   : > { %v874_v3 = vunpack.c.l.s4 %v10536_v2  ;;  %986 = vmatprep.mubr.bf16.mxu0 %v14553_v4  ;;  %1006 = vmatprep.mubr.bf16.mxu1 %v14553_v4  ;;  %s14597_s8 = sld [smem:[#allocation29_spill]]  ;;  %vm913_vm1 = vcmask 31744   ;;  %s14598_s2 = sld [smem:[#allocation30_spill]]  ;;  %vm1384_vm2 = vcmask 523264  }
  0x2a   : > { %v10735_v5 = vshrl.u32 %v876_v0, 7  ;;  %s10738_s5 = scalar_select %p827_p10, %s10702_s9, 1 }
  0x2b   : > { %v875_v7 = vunpack.c.0.s8 %v874_v3  ;;  %s14601_s10 = sld [smem:[#allocation31_spill]]  ;;  %s14608_s15 = sld [smem:[#allocation42_spill]] }
  0x2c   : > { %s9112_s0 = sshll.u32 %s10738_s5, 5  ;;  %s14606_s5 = sld [smem:[#allocation34_spill]] }
  0x2d   : > { %v878_v9 = vsub.s32 %v875_v7, %v10735_v5  ;;  %s14609_s16 = sld [smem:[#allocation43_spill]]  ;;  %s14611_s12 = sld [smem:[#allocation41_spill]] }
  0x2e   : > { %v846_v1 = vld [vmem:[%s14596_s3] sm:$0xff]  ;;  %v847_v8 = vld [vmem:[%s14596_s3 + $0x8] sm:$0xff]  ;;  %v8648_v24 = vld.sshfl [vmem:[%s14596_s3 + $0x10] sm:$0x3 pattern:$0x76325410] }
  0x2f   : > { %v872_v6 = vcombine.high %v846_v1, %v846_v1  ;;  %s10750_s28 = scalar_lea.vmem %s14597_s8, %s9112_s0  ;;  %v889_v10 = vcombine.high %v847_v8, %v847_v8  ;;  %v879_v11 = vrot.slane %v846_v1, %v878_v9  ;;  %v896_v13 = vrot.slane %v847_v8, %v878_v9  ;;  %s10776_s6 = scalar_lea.vmem %s14598_s2, %s9112_s0 }
  0x30   : > { %v9973_v19 = vld [vmem:[%s10750_s28] sm:$0xff]   ;;  %v10757_v20 = vld [vmem:[%s10750_s28 + $0x10] sm:$0xff]   ;;  %v9974_v25 = vld [vmem:[%s10750_s28 + $0x8] sm:$0xff]   ;;  %v952_v28 = vsel %vm926_vm0, %v8648_v24, 0  ;;  %s14599_s8 = sld [smem:[#allocation36_spill]]  ;;  %s14603_s2 = sld [smem:[#allocation33_spill]] }
  0x31   : > { %v886_v12 = vrot.slane %v872_v6, %v878_v9  ;;  %v887_v14 = vcombine.high %v879_v11, %v879_v11  ;;  %v928_v15 = vsel %vm926_vm0, %v879_v11, 0  ;;  %v904_v17 = vcombine.high %v896_v13, %v896_v13  ;;  %v10782_v26 = vld [vmem:[%s10750_s28 + $0x18] sm:$0xff]   ;;  %v10878_v46 = vld [vmem:[%s10776_s6] sm:$0xff]   ;;  %v10895_v51 = vld [vmem:[%s10776_s6 + $0x8] sm:$0xff]   ;;  %s14604_s0 = sld [smem:[#allocation38_spill]]  ;;  %s14605_s28 = sld [smem:[#allocation39_spill]] }
  0x32   : > { %v903_v18 = vrot.slane %v889_v10, %v878_v9  ;;  %v940_v22 = vsel %vm926_vm0, %v896_v13, 0  ;;  %v10912_v56 = vld [vmem:[%s10776_s6 + $0x10] sm:$0xff]   ;;  %v10929_v61 = vld [vmem:[%s10776_s6 + $0x18] sm:$0xff]   ;;  %v10948_v2 = vld [vmem:[%s14601_s10 + $0x20] sm:$0xff]   ;;  %s14602_s6 = sld [smem:[#allocation37_spill]] }
  0x33   : > { %v888_v16 = vcombine.high %v886_v12, %v886_v12  ;;  %8649 = vmatprep.subr.msk.bf16.mxu0 %vm926_vm0, %v887_v14  ;;  %9798 = vmatprep.subr.msk.bf16.mxu1 %vm926_vm0, %v887_v14  ;;  %v934_v21 = vsel %vm926_vm0, %v886_v12, 0 }
  0x34   : > { %955 = vmatpush1.bf16.msra.mxu0 %v928_v15  ;;  %9799 = vmatpush1.bf16.msra.mxu1 %v928_v15  ;;  %v905_v23 = vcombine.high %v903_v18, %v903_v18  ;;  %v946_v27 = vsel %vm926_vm0, %v903_v18, 0 }
  0x35   : > { %8654 = vmatprep.subr.msk.bf16.mxu1 %vm926_vm0, %v888_v16  ;;  %8659 = vmatprep.subr.msk.bf16.mxu0 %vm926_vm0, %v904_v17 }
  0x36   : > { %s14600_s29 = smov %s14599_s8  ;;  %v9980_v29 = vld [vmem:[%s14599_s8 + $0x4] ss:$36 sps:$4 sm:$0xff]   ;;  %s14607_s8 = sld [smem:[#allocation35_spill]] }
  0x37   : > { %8650 = vmatmul.mubr.msk.bf16.vlgmr.msra.gmra.mrb[0].mxu0 %vm913_vm1, %v9973_v19  ;;  %8652 = vmatmul.mubr.msk.bf16.vlgmr.msra.gmra.mrb[0].mxu1 %vm913_vm1, %v10757_v20  ;;  %v9978_v30 = vld [vmem:[%s14600_s29] ss:$36 sps:$4 sm:$0xff]   ;;  %v9983_v31 = vld [vmem:[%s14600_s29 + $0x4c] ss:$36 sps:$4 sm:$0xff]   ;;  %v9986_v33 = vld [vmem:[%s14600_s29 + $0x94] ss:$36 sps:$4 sm:$0xff]  }
  0x38   : > { %996 = vmatprep.mubr.bf16.mxu0 %v14553_v4  ;;  %1016 = vmatprep.mubr.bf16.mxu1 %v14553_v4  ;;  %v9981_v32 = vld [vmem:[%s14600_s29 + $0x48] ss:$36 sps:$4 sm:$0xff]   ;;  %v9984_v34 = vld [vmem:[%s14600_s29 + $0x90] ss:$36 sps:$4 sm:$0xff]   ;;  %v9989_v35 = vld [vmem:[%s14600_s29 + $0xdc] ss:$36 sps:$4 sm:$0xff]  }
  0x39   : > { %1028 = vmatpush1.bf16.msra.mxu1 %v934_v21  ;;  %1101 = vmatpush1.bf16.msra.mxu0 %v940_v22  ;;  %v9987_v36 = vld [vmem:[%s14600_s29 + $0xd8] ss:$36 sps:$4 sm:$0xff]   ;;  %v9992_v37 = vld [vmem:[%s14600_s29 + $0x124] ss:$36 sps:$4 sm:$0xff]   ;;  %v9995_v39 = vld [vmem:[%s14600_s29 + $0x16c] ss:$36 sps:$4 sm:$0xff]  }
  0x3a   : > { %8664 = vmatprep.subr.msk.bf16.mxu1 %vm926_vm0, %v905_v23  ;;  %9928 = vmatprep.subr.msk.bf16.mxu0 %vm926_vm0, %v8648_v24  ;;  %v9990_v38 = vld [vmem:[%s14600_s29 + $0x120] ss:$36 sps:$4 sm:$0xff]   ;;  %v9993_v40 = vld [vmem:[%s14600_s29 + $0x168] ss:$36 sps:$4 sm:$0xff]   ;;  %v9998_v41 = vld [vmem:[%s14600_s29 + $0x1b4] ss:$36 sps:$4 sm:$0xff]  }
  0x3b   : > { %v9996_v42 = vld [vmem:[%s14600_s29 + $0x1b0] ss:$36 sps:$4 sm:$0xff]   ;;  %v10001_v43 = vld [vmem:[%s14600_s29 + $0x1fc] ss:$36 sps:$4 sm:$0xff]   ;;  %v10003_v47 = vld [vmem:[%s14600_s29 + $0x8] ss:$36 sps:$4 sm:$0xff]  }
  0x3c   : > { %v9999_v44 = vld [vmem:[%s14600_s29 + $0x1f8] ss:$36 sps:$4 sm:$0xff]   ;;  %v10005_v45 = vld [vmem:[%s14600_s29 + $0xc] ss:$36 sps:$4 sm:$0xff]   ;;  %v10015_v53 = vld [vmem:[%s14600_s29 + $0xe4] ss:$36 sps:$4 sm:$0xff]  }
  0x3d   : > { %v10008_v48 = vld [vmem:[%s14600_s29 + $0x54] ss:$36 sps:$4 sm:$0xff]   ;;  %v10012_v50 = vld [vmem:[%s14600_s29 + $0x9c] ss:$36 sps:$4 sm:$0xff]   ;;  %v10019_v55 = vld [vmem:[%s14600_s29 + $0x12c] ss:$36 sps:$4 sm:$0xff]  }
  0x3e   : > { %v10006_v49 = vld [vmem:[%s14600_s29 + $0x50] ss:$36 sps:$4 sm:$0xff]   ;;  %v10010_v52 = vld [vmem:[%s14600_s29 + $0x98] ss:$36 sps:$4 sm:$0xff]   ;;  %v10013_v54 = vld [vmem:[%s14600_s29 + $0xe0] ss:$36 sps:$4 sm:$0xff]  }
  0x3f   : > { %8651 = vmatmul.mubr.msk.bf16.gmra.mrb[4].mxu0 %vm913_vm1, %v9974_v25  ;;  %8653 = vmatmul.mubr.msk.bf16.gmra.mrb[4].mxu1 %vm913_vm1, %v10782_v26  ;;  %v10017_v57 = vld [vmem:[%s14600_s29 + $0x128] ss:$36 sps:$4 sm:$0xff]   ;;  %v10022_v58 = vld [vmem:[%s14600_s29 + $0x174] ss:$36 sps:$4 sm:$0xff]   ;;  %v10026_v60 = vld [vmem:[%s14600_s29 + $0x1bc] ss:$36 sps:$4 sm:$0xff]  }
  0x40   : > { %1059 = vmatprep.mubr.bf16.mxu1 %v14553_v4  ;;  %1132 = vmatprep.mubr.bf16.mxu0 %v14553_v4  ;;  %v10020_v59 = vld [vmem:[%s14600_s29 + $0x170] ss:$36 sps:$4 sm:$0xff]   ;;  %v10024_v62 = vld [vmem:[%s14600_s29 + $0x1b8] ss:$36 sps:$4 sm:$0xff]   ;;  %v10029_v63 = vld [vmem:[%s14600_s29 + $0x204] ss:$36 sps:$4 sm:$0xff]  }
  0x41   : > { %v10027_v0 = vld [vmem:[%s14600_s29 + $0x200] ss:$36 sps:$4 sm:$0xff]   ;;  %v10032_v1 = vld [vmem:[%s14600_s29 + $0x14] ss:$36 sps:$4 sm:$0xff]   ;;  %v10041_v10 = vld [vmem:[%s14600_s29 + $0xec] ss:$36 sps:$4 sm:$0xff]  }
  0x42   : > { %v10030_v3 = vld [vmem:[%s14600_s29 + $0x10] ss:$36 sps:$4 sm:$0xff]   ;;  %v10035_v6 = vld [vmem:[%s14600_s29 + $0x5c] ss:$36 sps:$4 sm:$0xff]   ;;  %v10038_v8 = vld [vmem:[%s14600_s29 + $0xa4] ss:$36 sps:$4 sm:$0xff]  }
  0x43   : > { %v10033_v7 = vld [vmem:[%s14600_s29 + $0x58] ss:$36 sps:$4 sm:$0xff]   ;;  %v10036_v9 = vld [vmem:[%s14600_s29 + $0xa0] ss:$36 sps:$4 sm:$0xff]   ;;  %v10039_v11 = vld [vmem:[%s14600_s29 + $0xe8] ss:$36 sps:$4 sm:$0xff]  }
  0x44   : > { %v10044_v12 = vld [vmem:[%s14600_s29 + $0x134] ss:$36 sps:$4 sm:$0xff]   ;;  %v10047_v14 = vld [vmem:[%s14600_s29 + $0x17c] ss:$36 sps:$4 sm:$0xff]   ;;  %v10050_v16 = vld [vmem:[%s14600_s29 + $0x1c4] ss:$36 sps:$4 sm:$0xff]  }
  0x45   : > { %v10042_v13 = vld [vmem:[%s14600_s29 + $0x130] ss:$36 sps:$4 sm:$0xff]   ;;  %v10045_v15 = vld [vmem:[%s14600_s29 + $0x178] ss:$36 sps:$4 sm:$0xff]   ;;  %v10048_v17 = vld [vmem:[%s14600_s29 + $0x1c0] ss:$36 sps:$4 sm:$0xff]  }
  0x46   : > { %v10053_v18 = vld [vmem:[%s14600_s29 + $0x20c] ss:$36 sps:$4 sm:$0xff]   ;;  %v10054_v21 = vld [vmem:[%s14600_s29 + $0x18] ss:$36 sps:$4 sm:$0xff]   ;;  %v10059_v22 = vld [vmem:[%s14600_s29 + $0x64] ss:$36 sps:$4 sm:$0xff]  }
  0x47   : > { %8655 = vmatmul.mubr.msk.bf16.vlgmr.msra.gmra.mrb[8].mxu1 %vm913_vm1, %v9973_v19  ;;  %8660 = vmatmul.mubr.msk.bf16.vlgmr.msra.gmra.mrb[8].mxu0 %vm913_vm1, %v9973_v19  ;;  %v10057_v23 = vld [vmem:[%s14600_s29 + $0x60] ss:$36 sps:$4 sm:$0xff]   ;;  %v10062_v24 = vld [vmem:[%s14600_s29 + $0xac] ss:$36 sps:$4 sm:$0xff]  }
  0x48   : > { %1069 = vmatprep.mubr.bf16.mxu1 %v14553_v4  ;;  %1142 = vmatprep.mubr.bf16.mxu0 %v14553_v4 }
  0x49   : > { %1174 = vmatpush1.bf16.msra.mxu1 %v946_v27  ;;  %9397 = vmatpush3.bf16.msra.mxu0 %v952_v28  ;;  %v10063_v27 = vld [vmem:[%s14600_s29 + $0xf0] ss:$36 sps:$4 sm:$0xff]   ;;  %v10068_v28 = vld [vmem:[%s14600_s29 + $0x13c] ss:$36 sps:$4 sm:$0xff]  }
  0x4a   : > { %2971 = vmatprep.subr.bf16.mxu0 %v9980_v29  ;;  %v10066_v29 = vld [vmem:[%s14600_s29 + $0x138] ss:$36 sps:$4 sm:$0xff]  }
  0x4f   : > { %8656 = vmatmul.mubr.msk.bf16.gmra.mrb[12].mxu1 %vm913_vm1, %v9974_v25  ;;  %8661 = vmatmul.mubr.msk.bf16.gmra.mrb[12].mxu0 %vm913_vm1, %v9974_v25 }
  0x50   : > { %1079 = vmatprep.mubr.bf16.mxu1 %v14553_v4  ;;  %1152 = vmatprep.mubr.bf16.mxu0 %v14553_v4 }
  0x57   : > { %8657 = vmatmul.mubr.msk.bf16.gmra.mrb[16].mxu1 %vm913_vm1, %v10757_v20  ;;  %8662 = vmatmul.mubr.msk.bf16.gmra.mrb[16].mxu0 %vm913_vm1, %v10757_v20 }
  0x58   : > { %1089 = vmatprep.mubr.bf16.mxu1 %v14553_v4  ;;  %1162 = vmatprep.mubr.bf16.mxu0 %v14553_v4 }
  0x5f   : > { %8658 = vmatmul.mubr.msk.bf16.gmra.mrb[20].mxu1 %vm913_vm1, %v10782_v26  ;;  %8663 = vmatmul.mubr.msk.bf16.gmra.mrb[20].mxu0 %vm913_vm1, %v10782_v26 }
  0x60   : > { %1205 = vmatprep.mubr.bf16.mxu1 %v14553_v4  ;;  %9398 = vmatprep.mubr.msk.bf16.mxu0 %vm913_vm1, %v9973_v19 }
  0x67   : > { %8665 = vmatmul.mubr.msk.bf16.vlgmr.msra.gmra.mrb[24].mxu1 %vm913_vm1, %v9973_v19  ;;  %9399 = vmatmul.mubr.msk.bf16.vlgmr.msra.gmra.mrb[24].mxu0 %vm913_vm1, %v9974_v25  ;;  %v10051_v19 = vld [vmem:[%s14600_s29 + $0x208] ss:$36 sps:$4 sm:$0xff]  }
  0x68   : > { %1215 = vmatprep.mubr.bf16.mxu1 %v14553_v4  ;;  %2972 = vmatpush1.bf16.msra.mxu0 %v9978_v30  ;;  %v10071_v30 = vld [vmem:[%s14600_s29 + $0x184] ss:$36 sps:$4 sm:$0xff]  }
  0x69   : > { %2973 = vmatprep.subr.bf16.mxu0 %v9983_v31  ;;  %9402 = vmatprep.mubr.msk.bf16.mxu0 %vm913_vm1, %v10757_v20  ;;  %v10069_v31 = vld [vmem:[%s14600_s29 + $0x180] ss:$36 sps:$4 sm:$0xff]  }
  0x6c   : > { %2974 = vmatpush1.bf16.msra.mxu0 %v9981_v32  ;;  %v10074_v32 = vld [vmem:[%s14600_s29 + $0x1cc] ss:$36 sps:$4 sm:$0xff]  }
  0x6d   : > { %2975 = vmatprep.subr.bf16.mxu0 %v9986_v33  ;;  %v10072_v33 = vld [vmem:[%s14600_s29 + $0x1c8] ss:$36 sps:$4 sm:$0xff]  }
  0x6f   : > { %8666 = vmatmul.mubr.msk.bf16.gmra.mrb[28].mxu1 %vm913_vm1, %v9974_v25  ;;  %9403 = vmatmul.mubr.msk.bf16.gmra.mrb[28].mxu0 %vm913_vm1, %v10782_v26  ;;  %v10060_v25 = vld [vmem:[%s14600_s29 + $0xa8] ss:$36 sps:$4 sm:$0xff]  }
  0x70   : > { %1225 = vmatprep.mubr.bf16.mxu1 %v14553_v4  ;;  %2976 = vmatpush1.bf16.msra.mxu0 %v9984_v34  ;;  %v10077_v34 = vld [vmem:[%s14600_s29 + $0x214] ss:$36 sps:$4 sm:$0xff]  }
  0x71   : > { %2977 = vmatprep.subr.bf16.mxu0 %v9989_v35  ;;  %3003 = vmatprep.mubr.bf16.mxu0 %v14553_v4  ;;  %v10075_v35 = vld [vmem:[%s14600_s29 + $0x210] ss:$36 sps:$4 sm:$0xff]  }
  0x74   : > { %2978 = vmatpush1.bf16.msra.mxu0 %v9987_v36  ;;  %v10081_v36 = vld [vmem:[%s14600_s29 + $0x20] ss:$36 sps:$4 sm:$0xff]  }
  0x75   : > { %2979 = vmatprep.subr.bf16.mxu0 %v9992_v37  ;;  %v10083_v37 = vld [vmem:[%s14600_s29 + $0x68] ss:$36 sps:$4 sm:$0xff]  }
  0x77   : > { %8667 = vmatmul.mubr.msk.bf16.gmra.mrb[32].mxu1 %vm913_vm1, %v10757_v20  ;;  %v10056_v20 = vld [vmem:[%s14600_s29 + $0x1c] ss:$36 sps:$4 sm:$0xff]  }
  0x78   : > { %1235 = vmatprep.mubr.bf16.mxu1 %v14553_v4  ;;  %2980 = vmatpush1.bf16.msra.mxu0 %v9990_v38  ;;  %v10085_v38 = vld [vmem:[%s14600_s29 + $0xb0] ss:$36 sps:$4 sm:$0xff]  }
  0x79   : > { %2981 = vmatprep.subr.bf16.mxu0 %v9995_v39  ;;  %v10087_v39 = vld [vmem:[%s14600_s29 + $0xf8] ss:$36 sps:$4 sm:$0xff]  }
  0x7c   : > { %2982 = vmatpush1.bf16.msra.mxu0 %v9993_v40  ;;  %v10089_v40 = vld [vmem:[%s14600_s29 + $0x140] ss:$36 sps:$4 sm:$0xff]  }
  0x7d   : > { %2983 = vmatprep.subr.bf16.mxu0 %v9998_v41  ;;  %v10091_v41 = vld [vmem:[%s14600_s29 + $0x188] ss:$36 sps:$4 sm:$0xff]  }
  0x7f   : > { %8668 = vmatmul.mubr.msk.bf16.gmra.mrb[36].mxu1 %vm913_vm1, %v10782_v26  ;;  %v10065_v26 = vld [vmem:[%s14600_s29 + $0xf4] ss:$36 sps:$4 sm:$0xff]  }
  0x80   : > { %2984 = vmatpush1.bf16.msra.mxu0 %v9996_v42  ;;  %9414 = vmatprep.mubr.msk.bf16.mxu1 %vm1384_vm2, %v10948_v2  ;;  %v10093_v42 = vld [vmem:[%s14600_s29 + $0x1d0] ss:$36 sps:$4 sm:$0xff]  }
  0x81   : > { %2985 = vmatprep.subr.bf16.mxu0 %v10001_v43  ;;  %v10095_v43 = vld [vmem:[%s14600_s29 + $0x218] ss:$36 sps:$4 sm:$0xff]  }
  0x84   : > { %2986 = vmatpush1.bf16.msra.mxu0 %v9999_v44 }
  0x85   : > { %3044 = vmatprep.subr.bf16.mxu0 %v10005_v45 }
  0x87   : > { %3004 = vmatmul.mubr.bf16.vlgmr.msra.gmra.mrb[32].mxu0 %v10878_v46 }
  0x88   : > { %3045 = vmatpush1.bf16.msra.mxu0 %v10003_v47  ;;  %3013 = vmatprep.mubr.bf16.mxu0 %v14553_v4 }
  0x89   : > { %3046 = vmatprep.subr.bf16.mxu0 %v10008_v48 }
  0x8c   : > { %3047 = vmatpush1.bf16.msra.mxu0 %v10006_v49 }
  0x8d   : > { %3048 = vmatprep.subr.bf16.mxu0 %v10012_v50 }
  0x8f   : > { %3014 = vmatmul.mubr.bf16.gmra.mrb[36].mxu0 %v10895_v51 }
  0x90   : > { %3049 = vmatpush1.bf16.msra.mxu0 %v10010_v52  ;;  %3023 = vmatprep.mubr.bf16.mxu0 %v14553_v4 }
  0x91   : > { %3050 = vmatprep.subr.bf16.mxu0 %v10015_v53 }
  0x94   : > { %3051 = vmatpush1.bf16.msra.mxu0 %v10013_v54 }
  0x95   : > { %3052 = vmatprep.subr.bf16.mxu0 %v10019_v55 }
  0x97   : > { %3024 = vmatmul.mubr.bf16.gmra.mrb[40].mxu0 %v10912_v56 }
  0x98   : > { %3053 = vmatpush1.bf16.msra.mxu0 %v10017_v57  ;;  %3033 = vmatprep.mubr.bf16.mxu0 %v14553_v4 }
  0x99   : > { %3054 = vmatprep.subr.bf16.mxu0 %v10022_v58 }
  0x9c   : > { %3055 = vmatpush1.bf16.msra.mxu0 %v10020_v59 }
  0x9d   : > { %3056 = vmatprep.subr.bf16.mxu0 %v10026_v60 }
  0x9f   : > { %3034 = vmatmul.mubr.bf16.gmra.mrb[44].mxu0 %v10929_v61 }
  0xa0   : > { %3057 = vmatpush1.bf16.msra.mxu0 %v10024_v62  ;;  %3076 = vmatprep.mubr.bf16.mxu0 %v14553_v4 }
  0xa1   : > { %3058 = vmatprep.subr.bf16.mxu0 %v10029_v63 }
  0xa4   : > { %3059 = vmatpush1.bf16.msra.mxu0 %v10027_v0 }
  0xa5   : > { %3117 = vmatprep.subr.bf16.mxu0 %v10032_v1 }
  0xa7   : > { %3077 = vmatmul.mubr.bf16.vlgmr.msra.gmra.mrb[48].mxu0 %v10878_v46 }
  0xa8   : > { %3118 = vmatpush1.bf16.msra.mxu0 %v10030_v3  ;;  %3086 = vmatprep.mubr.bf16.mxu0 %v14553_v4 }
  0xa9   : > { %3119 = vmatprep.subr.bf16.mxu0 %v10035_v6 }
  0xac   : > { %3120 = vmatpush1.bf16.msra.mxu0 %v10033_v7 }
  0xad   : > { %3121 = vmatprep.subr.bf16.mxu0 %v10038_v8 }
  0xaf   : > { %3087 = vmatmul.mubr.bf16.gmra.mrb[52].mxu0 %v10895_v51 }
  0xb0   : > { %3122 = vmatpush1.bf16.msra.mxu0 %v10036_v9  ;;  %3096 = vmatprep.mubr.bf16.mxu0 %v14553_v4 }
  0xb1   : > { %3123 = vmatprep.subr.bf16.mxu0 %v10041_v10 }
  0xb4   : > { %3124 = vmatpush1.bf16.msra.mxu0 %v10039_v11 }
  0xb5   : > { %3125 = vmatprep.subr.bf16.mxu0 %v10044_v12 }
  0xb7   : > { %3097 = vmatmul.mubr.bf16.gmra.mrb[56].mxu0 %v10912_v56 }
  0xb8   : > { %3126 = vmatpush1.bf16.msra.mxu0 %v10042_v13  ;;  %3106 = vmatprep.mubr.bf16.mxu0 %v14553_v4 }
  0xb9   : > { %3127 = vmatprep.subr.bf16.mxu0 %v10047_v14 }
  0xbc   : > { %3128 = vmatpush1.bf16.msra.mxu0 %v10045_v15 }
  0xbd   : > { %3129 = vmatprep.subr.bf16.mxu0 %v10050_v16 }
  0xbf   : > { %3107 = vmatmul.mubr.bf16.gmra.mrb[60].mxu0 %v10929_v61 }
  0xc0   : > { %3130 = vmatpush1.bf16.msra.mxu0 %v10048_v17  ;;  %3149 = vmatprep.mubr.bf16.mxu0 %v14553_v4 }
  0xc1   : > { %3131 = vmatprep.subr.bf16.mxu0 %v10053_v18 }
  0xc4   : > { %3132 = vmatpush1.bf16.msra.mxu0 %v10051_v19  ;;  %v11107_v19 = vld [vmem:[%s14601_s10 + $0x28] sm:$0xff]  }
  0xc5   : > { %3190 = vmatprep.subr.bf16.mxu0 %v10056_v20  ;;  %v11112_v20 = vld [vmem:[%s14601_s10 + $0x30] sm:$0xff]  }
  0xc7   : > { %3150 = vmatmul.mubr.bf16.vlgmr.msra.gmra.mrb[64].mxu0 %v10878_v46 }
  0xc8   : > { %3191 = vmatpush1.bf16.msra.mxu0 %v10054_v21  ;;  %3159 = vmatprep.mubr.bf16.mxu0 %v14553_v4 }
  0xc9   : > { %3192 = vmatprep.subr.bf16.mxu0 %v10059_v22 }
  0xcc   : > { %3193 = vmatpush1.bf16.msra.mxu0 %v10057_v23 }
  0xcd   : > { %3194 = vmatprep.subr.bf16.mxu0 %v10062_v24 }
  0xcf   : > { %3160 = vmatmul.mubr.bf16.gmra.mrb[68].mxu0 %v10895_v51 }
  0xd0   : > { %3195 = vmatpush1.bf16.msra.mxu0 %v10060_v25  ;;  %3169 = vmatprep.mubr.bf16.mxu0 %v14553_v4 }
  0xd1   : > { %3196 = vmatprep.subr.bf16.mxu0 %v10065_v26 }
  0xd4   : > { %3197 = vmatpush1.bf16.msra.mxu0 %v10063_v27 }
  0xd5   : > { %3198 = vmatprep.subr.bf16.mxu0 %v10068_v28 }
  0xd7   : > { %3170 = vmatmul.mubr.bf16.gmra.mrb[72].mxu0 %v10912_v56 }
  0xd8   : > { %3199 = vmatpush1.bf16.msra.mxu0 %v10066_v29  ;;  %3179 = vmatprep.mubr.bf16.mxu0 %v14553_v4 }
  0xd9   : > { %3200 = vmatprep.subr.bf16.mxu0 %v10071_v30 }
  0xdc   : > { %3201 = vmatpush1.bf16.msra.mxu0 %v10069_v31 }
  0xdd   : > { %3202 = vmatprep.subr.bf16.mxu0 %v10074_v32 }
  0xdf   : > { %3180 = vmatmul.mubr.bf16.gmra.mrb[76].mxu0 %v10929_v61 }
  0xe0   : > { %3203 = vmatpush1.bf16.msra.mxu0 %v10072_v33  ;;  %3222 = vmatprep.mubr.bf16.mxu0 %v14553_v4  ;;  %v11127_v33 = vld [vmem:[%s14601_s10 + $0x38] sm:$0xff]  }
  0xe1   : > { %3204 = vmatprep.subr.bf16.mxu0 %v10077_v34  ;;  %v11132_v34 = vld [vmem:[%s14601_s10] sm:$0xff]  }
  0xe4   : > { %3205 = vmatpush1.bf16.msra.mxu0 %v10075_v35 }
  0xe5   : > { %9550 = vmatprep.subr.bf16.mxu0 %v10081_v36 }
  0xe7   : > { %3223 = vmatmul.mubr.bf16.vlgmr.msra.gmra.mrb[80].mxu0 %v10878_v46 }
  0xe8   : > { %3232 = vmatprep.mubr.bf16.mxu0 %v14553_v4  ;;  %9551 = vmatpush3.bf16.msra.mxu0 %v10081_v36 }
  0xe9   : > { %9552 = vmatprep.subr.bf16.mxu0 %v10083_v37 }
  0xec   : > { %9553 = vmatpush3.bf16.msra.mxu0 %v10083_v37 }
  0xed   : > { %9554 = vmatprep.subr.bf16.mxu0 %v10085_v38 }
  0xef   : > { %3233 = vmatmul.mubr.bf16.gmra.mrb[84].mxu0 %v10895_v51 }
  0xf0   : > { %3242 = vmatprep.mubr.bf16.mxu0 %v14553_v4  ;;  %9555 = vmatpush3.bf16.msra.mxu0 %v10085_v38 }
  0xf1   : > { %9556 = vmatprep.subr.bf16.mxu0 %v10087_v39 }
  0xf4   : > { %9557 = vmatpush3.bf16.msra.mxu0 %v10087_v39 }
  0xf5   : > { %9558 = vmatprep.subr.bf16.mxu0 %v10089_v40 }
  0xf7   : > { %3243 = vmatmul.mubr.bf16.gmra.mrb[88].mxu0 %v10912_v56 }
  0xf8   : > { %3252 = vmatprep.mubr.bf16.mxu0 %v14553_v4  ;;  %9559 = vmatpush3.bf16.msra.mxu0 %v10089_v40 }
  0xf9   : > { %9560 = vmatprep.subr.bf16.mxu0 %v10091_v41 }
  0xfc   : > { %9561 = vmatpush3.bf16.msra.mxu0 %v10091_v41 }
  0xfd   : > { %9562 = vmatprep.subr.bf16.mxu0 %v10093_v42 }
  0xff   : > { %3253 = vmatmul.mubr.bf16.gmra.mrb[92].mxu0 %v10929_v61 }
 0x100   : > { %9563 = vmatpush3.bf16.msra.mxu0 %v10093_v42  ;;  %9566 = vmatprep.mubr.bf16.mxu0 %v10878_v46 }
 0x101   : > { %9564 = vmatprep.subr.bf16.mxu0 %v10095_v43 }
 0x104   : > { %9565 = vmatpush3.bf16.msra.mxu0 %v10095_v43 }
 0x107   : > { %9567 = vmatmul.mubr.bf16.vlgmr.msra.gmra.mrb[96].mxu0 %v10895_v51 }
 0x108   : > { %9570 = vmatprep.mubr.bf16.mxu0 %v10912_v56 }
 0x10a   : > { %v988_v44 = vpop.f32.mrb[0].mxu0  ;;  %v1008_v45 = vpop.f32.mrb[0].mxu1 }
 0x10b   : > { %v990_v47 = vpop.f32.mrb[1].mxu0  ;;  %v1010_v48 = vpop.f32.mrb[1].mxu1 }
 0x10c   : > { %v992_v49 = vpop.f32.mrb[2].mxu0  ;;  %v1012_v50 = vpop.f32.mrb[2].mxu1 }
 0x10d   : > { %v1311_v52 = vpack.c.bf16 %v992_v49, %v988_v44  ;;  %v994_v53 = vpop.f32.mrb[3].mxu0  ;;  %v11095_v54 = vpack.c.bf16 %v1012_v50, %v1008_v45  ;;  %v1014_v55 = vpop.f32.mrb[3].mxu1  ;;  %v11154_v49 = vld [vmem:[%s14601_s10 + $0x10] sm:$0xff]  }
 0x10e   : > { %v1312_v57 = vpack.c.bf16 %v994_v53, %v990_v47  ;;  %v1330_v58 = vpack.c.bf16 %v1014_v55, %v1010_v48  ;;  %v11149_v48 = vld [vmem:[%s14601_s10 + $0x8] sm:$0xff]  }
 0x10f   : > { %9571 = vmatmul.mubr.bf16.gmra.mrb[100].mxu0 %v10929_v61 }
 0x110   : > { %9406 = vmatprep.subr.bf16.mxu1 %v1312_v57 }
 0x111   : > { %9407 = vmatpush3.bf16.msra.mxu1 %v1312_v57 }
 0x112   : > { %v998_v46 = vpop.f32.mrb[4].mxu0  ;;  %v1018_v51 = vpop.f32.mrb[4].mxu1 }
 0x113   : > { %v1000_v56 = vpop.f32.mrb[5].mxu0  ;;  %v1020_v59 = vpop.f32.mrb[5].mxu1 }
 0x114   : > { %v1002_v60 = vpop.f32.mrb[6].mxu0  ;;  %v1022_v62 = vpop.f32.mrb[6].mxu1 }
 0x115   : > { %v1320_v63 = vpack.c.bf16 %v1002_v60, %v998_v46  ;;  %v1004_v0 = vpop.f32.mrb[7].mxu0  ;;  %v1338_v1 = vpack.c.bf16 %v1022_v62, %v1018_v51  ;;  %v1024_v3 = vpop.f32.mrb[7].mxu1  ;;  %v11167_v62 = vld [vmem:[%s14601_s10 + $0x18] sm:$0xff]  }
 0x116   : > { %v1321_v6 = vpack.c.bf16 %v1004_v0, %v1000_v56  ;;  %v1339_v7 = vpack.c.bf16 %v1024_v3, %v1020_v59 }
 0x118   : > { %9408 = vmatprep.subr.bf16.mxu1 %v1321_v6 }
 0x119   : > { %9409 = vmatpush3.bf16.msra.mxu1 %v1321_v6 }
 0x11a   : > { %9410 = vmatprep.subr.bf16.mxu1 %v1330_v58  ;;  %v1061_v8 = vpop.f32.mrb[8].mxu1  ;;  %v1134_v9 = vpop.f32.mrb[8].mxu0 }
 0x11b   : > { %v1063_v61 = vpop.f32.mrb[9].mxu1  ;;  %v1136_v10 = vpop.f32.mrb[9].mxu0 }
 0x11c   : > { %v1065_v11 = vpop.f32.mrb[10].mxu1  ;;  %v1138_v12 = vpop.f32.mrb[10].mxu0 }
 0x11d   : > { %9411 = vmatpush3.bf16.msra.mxu1 %v1330_v58  ;;  %v1313_v13 = vpack.c.bf16 %v1065_v11, %v1061_v8  ;;  %v1067_v14 = vpop.f32.mrb[11].mxu1  ;;  %v11098_v15 = vpack.c.bf16 %v1138_v12, %v1134_v9  ;;  %v1140_v16 = vpop.f32.mrb[11].mxu0 }
 0x11e   : > { %9412 = vmatprep.subr.bf16.mxu1 %v1339_v7  ;;  %v11100_v17 = vpack.c.bf16 %v1067_v14, %v1063_v61  ;;  %v11102_v18 = vpack.c.bf16 %v1140_v16, %v1136_v10  ;;  %v11189_v14 = vld [vmem:[%s14601_s10 + $0x48] sm:$0xff]   ;;  %v11194_v16 = vld [vmem:[%s14601_s10 + $0x50] sm:$0xff]  }
 0x121   : > { %9413 = vmatpush3.bf16.msra.mxu1 %v1339_v7 }
 0x122   : > { %9422 = vmatprep.subr.bf16.mxu1 %v1311_v52  ;;  %v1071_v21 = vpop.f32.mrb[12].mxu1  ;;  %v1144_v22 = vpop.f32.mrb[12].mxu0 }
 0x123   : > { %v1073_v23 = vpop.f32.mrb[13].mxu1  ;;  %v1146_v24 = vpop.f32.mrb[13].mxu0 }
 0x124   : > { %9415 = vmatmul.mubr.msk.bf16.vlgmr.msra.gmra.mrb[40].mxu1 %vm1384_vm2, %v11107_v19  ;;  %v1075_v25 = vpop.f32.mrb[14].mxu1  ;;  %v1148_v26 = vpop.f32.mrb[14].mxu0 }
 0x125   : > { %9423 = vmatpush3.bf16.msra.mxu1 %v1311_v52  ;;  %9418 = vmatprep.mubr.msk.bf16.mxu1 %vm1384_vm2, %v11112_v20  ;;  %v1322_v27 = vpack.c.bf16 %v1075_v25, %v1071_v21  ;;  %v1077_v28 = vpop.f32.mrb[15].mxu1  ;;  %v11118_v29 = vpack.c.bf16 %v1148_v26, %v1144_v22  ;;  %v1150_v30 = vpop.f32.mrb[15].mxu0 }
 0x126   : > { %9424 = vmatprep.subr.bf16.mxu1 %v1320_v63  ;;  %v11120_v31 = vpack.c.bf16 %v1077_v28, %v1073_v23  ;;  %v11122_v32 = vpack.c.bf16 %v1150_v30, %v1146_v24 }
 0x129   : > { %9425 = vmatpush3.bf16.msra.mxu1 %v1320_v63  ;;  %v11172_v63 = vld [vmem:[%s14601_s10 + $0x40] sm:$0xff]  }
 0x12a   : > { %9426 = vmatprep.subr.bf16.mxu1 %v11095_v54  ;;  %v1081_v35 = vpop.f32.mrb[16].mxu1  ;;  %v1154_v36 = vpop.f32.mrb[16].mxu0 }
 0x12b   : > { %v1083_v37 = vpop.f32.mrb[17].mxu1  ;;  %v1156_v38 = vpop.f32.mrb[17].mxu0 }
 0x12c   : > { %9419 = vmatmul.mubr.msk.bf16.gmra.mrb[44].mxu1 %vm1384_vm2, %v11127_v33  ;;  %v1085_v39 = vpop.f32.mrb[18].mxu1  ;;  %v1158_v40 = vpop.f32.mrb[18].mxu0 }
 0x12d   : > { %9427 = vmatpush3.bf16.msra.mxu1 %v11095_v54  ;;  %9430 = vmatprep.mubr.msk.bf16.mxu1 %vm1384_vm2, %v11132_v34  ;;  %v1331_v41 = vpack.c.bf16 %v1085_v39, %v1081_v35  ;;  %v1087_v42 = vpop.f32.mrb[19].mxu1  ;;  %v11140_v43 = vpack.c.bf16 %v1158_v40, %v1154_v36  ;;  %v1160_v44 = vpop.f32.mrb[19].mxu0 }
 0x12e   : > { %9428 = vmatprep.subr.bf16.mxu1 %v1338_v1  ;;  %v11142_v45 = vpack.c.bf16 %v1087_v42, %v1083_v37  ;;  %v11144_v47 = vpack.c.bf16 %v1160_v44, %v1156_v38  ;;  %v11214_v38 = vld [vmem:[%s14601_s10 + $0x58] sm:$0xff]  }
 0x131   : > { %9429 = vmatpush3.bf16.msra.mxu1 %v1338_v1 }
 0x132   : > { %9438 = vmatprep.subr.bf16.mxu1 %v1313_v13  ;;  %v1091_v50 = vpop.f32.mrb[20].mxu1  ;;  %v1164_v52 = vpop.f32.mrb[20].mxu0 }
 0x133   : > { %v1093_v53 = vpop.f32.mrb[21].mxu1  ;;  %v1166_v54 = vpop.f32.mrb[21].mxu0 }
 0x134   : > { %9431 = vmatmul.mubr.msk.bf16.vlgmr.msra.gmra.mrb[40].mxu1 %vm1384_vm2, %v11149_v48  ;;  %v1095_v55 = vpop.f32.mrb[22].mxu1  ;;  %v1168_v57 = vpop.f32.mrb[22].mxu0 }
 0x135   : > { %9439 = vmatpush3.bf16.msra.mxu1 %v1313_v13  ;;  %9434 = vmatprep.mubr.msk.bf16.mxu1 %vm1384_vm2, %v11154_v49  ;;  %v1340_v58 = vpack.c.bf16 %v1095_v55, %v1091_v50  ;;  %v1097_v46 = vpop.f32.mrb[23].mxu1  ;;  %v11160_v51 = vpack.c.bf16 %v1168_v57, %v1164_v52  ;;  %v1170_v56 = vpop.f32.mrb[23].mxu0  ;;  %v11235_v50 = vld [vmem:[%s14601_s10 + $0x68] sm:$0xff]   ;;  %v11240_v52 = vld [vmem:[%s14601_s10 + $0x70] sm:$0xff]  }
 0x136   : > { %9440 = vmatprep.subr.bf16.mxu1 %v1322_v27  ;;  %v1341_v59 = vpack.c.bf16 %v1097_v46, %v1093_v53  ;;  %v11162_v60 = vpack.c.bf16 %v1170_v56, %v1166_v54  ;;  %v11256_v46 = vld [vmem:[%s14601_s10 + $0x78] sm:$0xff]  }
 0x139   : > { %9441 = vmatpush3.bf16.msra.mxu1 %v1322_v27 }
 0x13a   : > { %9442 = vmatprep.subr.bf16.mxu1 %v1331_v41  ;;  %v1207_v0 = vpop.f32.mrb[24].mxu1  ;;  %v9400_v1 = vpop.f32.mrb[24].mxu0 }
 0x13b   : > { %v1209_v3 = vpop.f32.mrb[25].mxu1  ;;  %v1280_v6 = vpop.f32.mrb[25].mxu0 }
 0x13c   : > { %9435 = vmatmul.mubr.msk.bf16.gmra.mrb[44].mxu1 %vm1384_vm2, %v11167_v62  ;;  %v1211_v7 = vpop.f32.mrb[26].mxu1  ;;  %v9401_v8 = vpop.f32.mrb[26].mxu0 }
 0x13d   : > { %9443 = vmatpush3.bf16.msra.mxu1 %v1331_v41  ;;  %9446 = vmatprep.mubr.msk.bf16.mxu1 %vm1384_vm2, %v11172_v63  ;;  %v11178_v9 = vpack.c.bf16 %v1211_v7, %v1207_v0  ;;  %v1213_v61 = vpop.f32.mrb[27].mxu1  ;;  %v11180_v10 = vpack.c.bf16 %v9401_v8, %v9400_v1  ;;  %v1283_v11 = vpop.f32.mrb[27].mxu0 }
 0x13e   : > { %9444 = vmatprep.subr.bf16.mxu1 %v1340_v58  ;;  %v11182_v12 = vpack.c.bf16 %v1213_v61, %v1209_v3  ;;  %v11184_v13 = vpack.c.bf16 %v1283_v11, %v1280_v6  ;;  %v11278_v6 = vld [vmem:[%s14601_s10 + $0x88] sm:$0xff]  }
 0x141   : > { %9445 = vmatpush3.bf16.msra.mxu1 %v1340_v58 }
 0x142   : > { %9454 = vmatprep.subr.bf16.mxu1 %v11100_v17  ;;  %v1217_v21 = vpop.f32.mrb[28].mxu1  ;;  %v9404_v22 = vpop.f32.mrb[28].mxu0 }
 0x143   : > { %v1219_v23 = vpop.f32.mrb[29].mxu1  ;;  %v1296_v24 = vpop.f32.mrb[29].mxu0 }
 0x144   : > { %9447 = vmatmul.mubr.msk.bf16.vlgmr.msra.gmra.mrb[40].mxu1 %vm1384_vm2, %v11189_v14  ;;  %v1221_v25 = vpop.f32.mrb[30].mxu1  ;;  %v9405_v26 = vpop.f32.mrb[30].mxu0 }
 0x145   : > { %9455 = vmatpush3.bf16.msra.mxu1 %v11100_v17  ;;  %9450 = vmatprep.mubr.msk.bf16.mxu1 %vm1384_vm2, %v11194_v16  ;;  %v11202_v27 = vpack.c.bf16 %v1221_v25, %v1217_v21  ;;  %v1223_v28 = vpop.f32.mrb[31].mxu1  ;;  %v11204_v30 = vpack.c.bf16 %v9405_v26, %v9404_v22  ;;  %v1299_v35 = vpop.f32.mrb[31].mxu0  ;;  %v11220_v17 = vld [vmem:[%s14601_s10 + $0x60] sm:$0xff]   ;;  %v11300_v22 = vld [vmem:[%s14601_s10 + $0x98] sm:$0xff]  }
 0x146   : > { %9456 = vmatprep.subr.bf16.mxu1 %v11120_v31  ;;  %v11207_v36 = vpack.c.bf16 %v1223_v28, %v1219_v23  ;;  %v11209_v37 = vpack.c.bf16 %v1299_v35, %v1296_v24  ;;  %v11322_v35 = vld [vmem:[%s14601_s10 + $0xa8] sm:$0xff]  }
 0x149   : > { %9457 = vmatpush3.bf16.msra.mxu1 %v11120_v31 }
 0x14a   : > { %9458 = vmatprep.subr.bf16.mxu1 %v11142_v45  ;;  %v1227_v39 = vpop.f32.mrb[32].mxu1 }
 0x14b   : > { %v1229_v40 = vpop.f32.mrb[33].mxu1 }
 0x14c   : > { %9451 = vmatmul.mubr.msk.bf16.gmra.mrb[44].mxu1 %vm1384_vm2, %v11214_v38  ;;  %v1231_v41 = vpop.f32.mrb[34].mxu1 }
 0x14d   : > { %9459 = vmatpush3.bf16.msra.mxu1 %v11142_v45  ;;  %9462 = vmatprep.mubr.msk.bf16.mxu1 %vm1384_vm2, %v11220_v17  ;;  %v11228_v42 = vpack.c.bf16 %v1231_v41, %v1227_v39  ;;  %v1233_v31 = vpop.f32.mrb[35].mxu1 }
 0x14e   : > { %9460 = vmatprep.subr.bf16.mxu1 %v1341_v59  ;;  %v11230_v44 = vpack.c.bf16 %v1233_v31, %v1229_v40 }
 0x151   : > { %9461 = vmatpush3.bf16.msra.mxu1 %v1341_v59 }
 0x152   : > { %9470 = vmatprep.subr.bf16.mxu1 %v11098_v15  ;;  %v1237_v45 = vpop.f32.mrb[36].mxu1 }
 0x153   : > { %v1239_v53 = vpop.f32.mrb[37].mxu1 }
 0x154   : > { %9463 = vmatmul.mubr.msk.bf16.vlgmr.msra.gmra.mrb[40].mxu1 %vm1384_vm2, %v11235_v50  ;;  %v1241_v54 = vpop.f32.mrb[38].mxu1 }
 0x155   : > { %9471 = vmatpush3.bf16.msra.mxu1 %v11098_v15  ;;  %9466 = vmatprep.mubr.msk.bf16.mxu1 %vm1384_vm2, %v11240_v52  ;;  %v11248_v55 = vpack.c.bf16 %v1241_v54, %v1237_v45  ;;  %v1243_v57 = vpop.f32.mrb[39].mxu1  ;;  %v11262_v15 = vld [vmem:[%s14601_s10 + $0x80] sm:$0xff]  }
 0x156   : > { %9472 = vmatprep.subr.bf16.mxu1 %v11118_v29  ;;  %v11251_v58 = vpack.c.bf16 %v1243_v57, %v1239_v53  ;;  %v11344_v53 = vld [vmem:[%s14601_s10 + $0xb8] sm:$0xff]  }
 0x159   : > { %9473 = vmatpush3.bf16.msra.mxu1 %v11118_v29 }
 0x15a   : > { %9474 = vmatprep.subr.bf16.mxu1 %v11140_v43  ;;  %v3005_v56 = vpop.f32.mrb[32].mxu0 }
 0x15b   : > { %v3007_v59 = vpop.f32.mrb[33].mxu0 }
 0x15c   : > { %9467 = vmatmul.mubr.msk.bf16.gmra.mrb[44].mxu1 %vm1384_vm2, %v11256_v46  ;;  %v3009_v0 = vpop.f32.mrb[34].mxu0 }
 0x15d   : > { %9475 = vmatpush3.bf16.msra.mxu1 %v11140_v43  ;;  %9478 = vmatprep.mubr.msk.bf16.mxu1 %vm1384_vm2, %v11262_v15  ;;  %v11270_v1 = vpack.c.bf16 %v3009_v0, %v3005_v56  ;;  %v3011_v29 = vpop.f32.mrb[35].mxu0  ;;  %v11284_v43 = vld [vmem:[%s14601_s10 + $0x90] sm:$0xff]  }
 0x15e   : > { %9476 = vmatprep.subr.bf16.mxu1 %v11160_v51  ;;  %v11273_v3 = vpack.c.bf16 %v3011_v29, %v3007_v59  ;;  %v11366_v29 = vld [vmem:[%s14601_s10 + $0xc8] sm:$0xff]  }
 0x161   : > { %9477 = vmatpush3.bf16.msra.mxu1 %v11160_v51 }
 0x162   : > { %9486 = vmatprep.subr.bf16.mxu1 %v11102_v18  ;;  %v3015_v7 = vpop.f32.mrb[36].mxu0 }
 0x163   : > { %v3017_v8 = vpop.f32.mrb[37].mxu0 }
 0x164   : > { %9479 = vmatmul.mubr.msk.bf16.vlgmr.msra.gmra.mrb[40].mxu1 %vm1384_vm2, %v11278_v6  ;;  %v3019_v61 = vpop.f32.mrb[38].mxu0 }
 0x165   : > { %9487 = vmatpush3.bf16.msra.mxu1 %v11102_v18  ;;  %9482 = vmatprep.mubr.msk.bf16.mxu1 %vm1384_vm2, %v11284_v43  ;;  %v11292_v11 = vpack.c.bf16 %v3019_v61, %v3015_v7  ;;  %v3021_v51 = vpop.f32.mrb[39].mxu0  ;;  %v11306_v18 = vld [vmem:[%s14601_s10 + $0xa0] sm:$0xff]  }
 0x166   : > { %9488 = vmatprep.subr.bf16.mxu1 %v11122_v32  ;;  %v11295_v21 = vpack.c.bf16 %v3021_v51, %v3017_v8 }
 0x169   : > { %9489 = vmatpush3.bf16.msra.mxu1 %v11122_v32 }
 0x16a   : > { %9490 = vmatprep.subr.bf16.mxu1 %v11144_v47  ;;  %v3025_v23 = vpop.f32.mrb[40].mxu0 }
 0x16b   : > { %v3027_v24 = vpop.f32.mrb[41].mxu0 }
 0x16c   : > { %9483 = vmatmul.mubr.msk.bf16.gmra.mrb[44].mxu1 %vm1384_vm2, %v11300_v22  ;;  %v3029_v25 = vpop.f32.mrb[42].mxu0 }
 0x16d   : > { %9491 = vmatpush3.bf16.msra.mxu1 %v11144_v47  ;;  %9494 = vmatprep.mubr.msk.bf16.mxu1 %vm1384_vm2, %v11306_v18  ;;  %v11314_v26 = vpack.c.bf16 %v3029_v25, %v3025_v23  ;;  %v3031_v32 = vpop.f32.mrb[43].mxu0  ;;  %v11328_v47 = vld [vmem:[%s14601_s10 + $0xb0] sm:$0xff]  }
 0x16e   : > { %9492 = vmatprep.subr.bf16.mxu1 %v11162_v60  ;;  %v11317_v28 = vpack.c.bf16 %v3031_v32, %v3027_v24  ;;  %v11388_v24 = vld [vmem:[%s14601_s10 + $0xd8] sm:$0xff]  }
 0x171   : > { %9493 = vmatpush3.bf16.msra.mxu1 %v11162_v60 }
 0x172   : > { %9502 = vmatprep.subr.bf16.mxu1 %v11178_v9  ;;  %v3035_v39 = vpop.f32.mrb[44].mxu0 }
 0x173   : > { %v3037_v40 = vpop.f32.mrb[45].mxu0 }
 0x174   : > { %9495 = vmatmul.mubr.msk.bf16.vlgmr.msra.gmra.mrb[40].mxu1 %vm1384_vm2, %v11322_v35  ;;  %v3039_v41 = vpop.f32.mrb[46].mxu0 }
 0x175   : > { %9503 = vmatpush3.bf16.msra.mxu1 %v11178_v9  ;;  %9498 = vmatprep.mubr.msk.bf16.mxu1 %vm1384_vm2, %v11328_v47  ;;  %v11336_v31 = vpack.c.bf16 %v3039_v41, %v3035_v39  ;;  %v3041_v60 = vpop.f32.mrb[47].mxu0  ;;  %v11350_v9 = vld [vmem:[%s14601_s10 + $0xc0] sm:$0xff]  }
 0x176   : > { %9504 = vmatprep.subr.bf16.mxu1 %v11202_v27  ;;  %v11339_v45 = vpack.c.bf16 %v3041_v60, %v3037_v40  ;;  %v11410_v60 = vld [vmem:[%s14601_s10 + $0xe8] sm:$0xff]  }
 0x179   : > { %9505 = vmatpush3.bf16.msra.mxu1 %v11202_v27 }
 0x17a   : > { %9506 = vmatprep.subr.bf16.mxu1 %v11228_v42  ;;  %v3078_v54 = vpop.f32.mrb[48].mxu0 }
 0x17b   : > { %v3080_v57 = vpop.f32.mrb[49].mxu0 }
 0x17c   : > { %9499 = vmatmul.mubr.msk.bf16.gmra.mrb[44].mxu1 %vm1384_vm2, %v11344_v53  ;;  %v3082_v56 = vpop.f32.mrb[50].mxu0 }
 0x17d   : > { %9507 = vmatpush3.bf16.msra.mxu1 %v11228_v42  ;;  %9510 = vmatprep.mubr.msk.bf16.mxu1 %vm1384_vm2, %v11350_v9  ;;  %v11358_v59 = vpack.c.bf16 %v3082_v56, %v3078_v54  ;;  %v3084_v27 = vpop.f32.mrb[51].mxu0  ;;  %v11372_v42 = vld [vmem:[%s14601_s10 + $0xd0] sm:$0xff]  }
 0x17e   : > { %9508 = vmatprep.subr.bf16.mxu1 %v11248_v55  ;;  %v11361_v0 = vpack.c.bf16 %v3084_v27, %v3080_v57 }
 0x181   : > { %9509 = vmatpush3.bf16.msra.mxu1 %v11248_v55 }
 0x182   : > { %9518 = vmatprep.subr.bf16.mxu1 %v11182_v12  ;;  %v3088_v7 = vpop.f32.mrb[52].mxu0 }
 0x183   : > { %v3090_v8 = vpop.f32.mrb[53].mxu0 }
 0x184   : > { %9511 = vmatmul.mubr.msk.bf16.vlgmr.msra.gmra.mrb[40].mxu1 %vm1384_vm2, %v11366_v29  ;;  %v3092_v61 = vpop.f32.mrb[54].mxu0 }
 0x185   : > { %9519 = vmatpush3.bf16.msra.mxu1 %v11182_v12  ;;  %9514 = vmatprep.mubr.msk.bf16.mxu1 %vm1384_vm2, %v11372_v42  ;;  %v11380_v51 = vpack.c.bf16 %v3092_v61, %v3088_v7  ;;  %v3094_v55 = vpop.f32.mrb[55].mxu0  ;;  %v11394_v12 = vld [vmem:[%s14601_s10 + $0xe0] sm:$0xff]  }
 0x186   : > { %9520 = vmatprep.subr.bf16.mxu1 %v11207_v36  ;;  %v11383_v23 = vpack.c.bf16 %v3094_v55, %v3090_v8  ;;  %v11432_v8 = vld [vmem:[%s14601_s10 + $0xf8] sm:$0xff]  }
 0x189   : > { %9521 = vmatpush3.bf16.msra.mxu1 %v11207_v36 }
 0x18a   : > { %9522 = vmatprep.subr.bf16.mxu1 %v11230_v44  ;;  %v3098_v25 = vpop.f32.mrb[56].mxu0 }
 0x18b   : > { %v3100_v32 = vpop.f32.mrb[57].mxu0 }
 0x18c   : > { %9515 = vmatmul.mubr.msk.bf16.gmra.mrb[44].mxu1 %vm1384_vm2, %v11388_v24  ;;  %v3102_v39 = vpop.f32.mrb[58].mxu0 }
 0x18d   : > { %9523 = vmatpush3.bf16.msra.mxu1 %v11230_v44  ;;  %9526 = vmatprep.mubr.msk.bf16.mxu1 %vm1384_vm2, %v11394_v12  ;;  %v11402_v40 = vpack.c.bf16 %v3102_v39, %v3098_v25  ;;  %v3104_v36 = vpop.f32.mrb[59].mxu0  ;;  %v11416_v44 = vld [vmem:[%s14601_s10 + $0xf0] sm:$0xff]  }
 0x18e   : > { %9524 = vmatprep.subr.bf16.mxu1 %v11251_v58  ;;  %v11405_v41 = vpack.c.bf16 %v3104_v36, %v3100_v32  ;;  %v11454_v36 = vld [vmem:[%s14601_s10 + $0x108] sm:$0xff]  }
 0x191   : > { %9525 = vmatpush3.bf16.msra.mxu1 %v11251_v58 }
 0x192   : > { %9534 = vmatprep.subr.bf16.mxu1 %v11184_v13  ;;  %v3108_v54 = vpop.f32.mrb[60].mxu0 }
 0x193   : > { %v3110_v57 = vpop.f32.mrb[61].mxu0 }
 0x194   : > { %9527 = vmatmul.mubr.msk.bf16.vlgmr.msra.gmra.mrb[40].mxu1 %vm1384_vm2, %v11410_v60  ;;  %v3112_v56 = vpop.f32.mrb[62].mxu0 }
 0x195   : > { %9535 = vmatpush3.bf16.msra.mxu1 %v11184_v13  ;;  %9530 = vmatprep.mubr.msk.bf16.mxu1 %vm1384_vm2, %v11416_v44  ;;  %v11424_v27 = vpack.c.bf16 %v3112_v56, %v3108_v54  ;;  %v3114_v58 = vpop.f32.mrb[63].mxu0  ;;  %v11438_v13 = vld [vmem:[%s14601_s10 + $0x100] sm:$0xff]  }
 0x196   : > { %9536 = vmatprep.subr.bf16.mxu1 %v11180_v10  ;;  %v11427_v7 = vpack.c.bf16 %v3114_v58, %v3110_v57 }
 0x199   : > { %9537 = vmatpush3.bf16.msra.mxu1 %v11180_v10 }
 0x19a   : > { %9538 = vmatprep.subr.bf16.mxu1 %v11209_v37  ;;  %v3151_v61 = vpop.f32.mrb[64].mxu0 }
 0x19b   : > { %v3153_v55 = vpop.f32.mrb[65].mxu0 }
 0x19c   : > { %9531 = vmatmul.mubr.msk.bf16.gmra.mrb[44].mxu1 %vm1384_vm2, %v11432_v8  ;;  %v3155_v25 = vpop.f32.mrb[66].mxu0 }
 0x19d   : > { %9539 = vmatpush3.bf16.msra.mxu1 %v11209_v37  ;;  %9542 = vmatprep.mubr.msk.bf16.mxu1 %vm1384_vm2, %v11438_v13  ;;  %v11446_v32 = vpack.c.bf16 %v3155_v25, %v3151_v61  ;;  %v3157_v10 = vpop.f32.mrb[67].mxu0  ;;  %v11460_v37 = vld [vmem:[%s14601_s10 + $0x110] sm:$0xff]  }
 0x19e   : > { %9540 = vmatprep.subr.bf16.mxu1 %v11204_v30  ;;  %v11449_v39 = vpack.c.bf16 %v3157_v10, %v3153_v55  ;;  %v11476_v55 = vld [vmem:[%s14601_s10 + $0x118] sm:$0xff]  }
 0x1a1   : > { %9541 = vmatpush3.bf16.msra.mxu1 %v11204_v30 }
 0x1a2   : > { %9574 = vmatprep.subr.bf16.mxu1 %v11273_v3  ;;  %v3161_v54 = vpop.f32.mrb[68].mxu0 }
 0x1a3   : > { %v3163_v57 = vpop.f32.mrb[69].mxu0 }
 0x1a4   : > { %9543 = vmatmul.mubr.msk.bf16.vlgmr.msra.gmra.mrb[40].mxu1 %vm1384_vm2, %v11454_v36  ;;  %v3165_v56 = vpop.f32.mrb[70].mxu0 }
 0x1a5   : > { %9575 = vmatpush3.bf16.msra.mxu1 %v11273_v3  ;;  %9546 = vmatprep.mubr.msk.bf16.mxu1 %vm1384_vm2, %v11460_v37  ;;  %v11468_v58 = vpack.c.bf16 %v3165_v56, %v3161_v54  ;;  %v3167_v30 = vpop.f32.mrb[71].mxu0 }
 0x1a6   : > { %9576 = vmatprep.subr.bf16.mxu1 %v11295_v21  ;;  %v11471_v61 = vpack.c.bf16 %v3167_v30, %v3163_v57 }
 0x1a9   : > { %9577 = vmatpush3.bf16.msra.mxu1 %v11295_v21 }
 0x1aa   : > { %9578 = vmatprep.subr.bf16.mxu1 %v11317_v28  ;;  %v3171_v3 = vpop.f32.mrb[72].mxu0 }
 0x1ab   : > { %v3173_v25 = vpop.f32.mrb[73].mxu0 }
 0x1ac   : > { %9547 = vmatmul.mubr.msk.bf16.gmra.mrb[44].mxu1 %vm1384_vm2, %v11476_v55  ;;  %v3175_v10 = vpop.f32.mrb[74].mxu0 }
 0x1ad   : > { %9579 = vmatpush3.bf16.msra.mxu1 %v11317_v28  ;;  %9582 = vmatprep.mubr.msk.bf16.mxu1 %vm1384_vm2, %v10948_v2  ;;  %v11485_v54 = vpack.c.bf16 %v3175_v10, %v3171_v3  ;;  %v3177_v57 = vpop.f32.mrb[75].mxu0 }
 0x1ae   : > { %9580 = vmatprep.subr.bf16.mxu1 %v11339_v45  ;;  %v11488_v56 = vpack.c.bf16 %v3177_v57, %v3173_v25 }
 0x1b1   : > { %9581 = vmatpush3.bf16.msra.mxu1 %v11339_v45 }
 0x1b2   : > { %9590 = vmatprep.subr.bf16.mxu1 %v11270_v1  ;;  %v3181_v21 = vpop.f32.mrb[76].mxu0 }
 0x1b3   : > { %v3183_v30 = vpop.f32.mrb[77].mxu0 }
 0x1b4   : > { %9583 = vmatmul.mubr.msk.bf16.vlgmr.msra.gmra.mrb[48].mxu1 %vm1384_vm2, %v11107_v19  ;;  %v3185_v28 = vpop.f32.mrb[78].mxu0 }
 0x1b5   : > { %9591 = vmatpush3.bf16.msra.mxu1 %v11270_v1  ;;  %9586 = vmatprep.mubr.msk.bf16.mxu1 %vm1384_vm2, %v11112_v20  ;;  %v11497_v2 = vpack.c.bf16 %v3185_v28, %v3181_v21  ;;  %v3187_v3 = vpop.f32.mrb[79].mxu0 }
 0x1b6   : > { %9592 = vmatprep.subr.bf16.mxu1 %v11292_v11  ;;  %v11500_v25 = vpack.c.bf16 %v3187_v3, %v3183_v30 }
 0x1b9   : > { %9593 = vmatpush3.bf16.msra.mxu1 %v11292_v11 }
 0x1ba   : > { %9594 = vmatprep.subr.bf16.mxu1 %v11314_v26  ;;  %v3224_v45 = vpop.f32.mrb[80].mxu0 }
 0x1bb   : > { %v3226_v10 = vpop.f32.mrb[81].mxu0 }
 0x1bc   : > { %9587 = vmatmul.mubr.msk.bf16.gmra.mrb[52].mxu1 %vm1384_vm2, %v11127_v33  ;;  %v3228_v19 = vpop.f32.mrb[82].mxu0 }
 0x1bd   : > { %9595 = vmatpush3.bf16.msra.mxu1 %v11314_v26  ;;  %9598 = vmatprep.mubr.msk.bf16.mxu1 %vm1384_vm2, %v11132_v34  ;;  %v11509_v20 = vpack.c.bf16 %v3228_v19, %v3224_v45  ;;  %v3230_v1 = vpop.f32.mrb[83].mxu0 }
 0x1be   : > { %9596 = vmatprep.subr.bf16.mxu1 %v11336_v31  ;;  %v11512_v57 = vpack.c.bf16 %v3230_v1, %v3226_v10 }
 0x1c1   : > { %9597 = vmatpush3.bf16.msra.mxu1 %v11336_v31 }
 0x1c2   : > { %9606 = vmatprep.subr.bf16.mxu1 %v11358_v59  ;;  %v3234_v11 = vpop.f32.mrb[84].mxu0 }
 0x1c3   : > { %v3236_v21 = vpop.f32.mrb[85].mxu0 }
 0x1c4   : > { %9599 = vmatmul.mubr.msk.bf16.vlgmr.msra.gmra.mrb[48].mxu1 %vm1384_vm2, %v11149_v48  ;;  %v3238_v33 = vpop.f32.mrb[86].mxu0 }
 0x1c5   : > { %9607 = vmatpush3.bf16.msra.mxu1 %v11358_v59  ;;  %9602 = vmatprep.mubr.msk.bf16.mxu1 %vm1384_vm2, %v11154_v49  ;;  %v11521_v34 = vpack.c.bf16 %v3238_v33, %v3234_v11  ;;  %v3240_v26 = vpop.f32.mrb[87].mxu0 }
 0x1c6   : > { %9608 = vmatprep.subr.bf16.mxu1 %v11380_v51  ;;  %v11524_v30 = vpack.c.bf16 %v3240_v26, %v3236_v21 }
 0x1c9   : > { %9609 = vmatpush3.bf16.msra.mxu1 %v11380_v51 }
 0x1ca   : > { %9610 = vmatprep.subr.bf16.mxu1 %v11402_v40  ;;  %v3244_v31 = vpop.f32.mrb[88].mxu0 }
 0x1cb   : > { %v3246_v28 = vpop.f32.mrb[89].mxu0 }
 0x1cc   : > { %9603 = vmatmul.mubr.msk.bf16.gmra.mrb[52].mxu1 %vm1384_vm2, %v11167_v62  ;;  %v3248_v48 = vpop.f32.mrb[90].mxu0 }
 0x1cd   : > { %9611 = vmatpush3.bf16.msra.mxu1 %v11402_v40  ;;  %9614 = vmatprep.mubr.msk.bf16.mxu1 %vm1384_vm2, %v11172_v63  ;;  %v11533_v49 = vpack.c.bf16 %v3248_v48, %v3244_v31  ;;  %v3250_v59 = vpop.f32.mrb[91].mxu0 }
 0x1ce   : > { %9612 = vmatprep.subr.bf16.mxu1 %v11424_v27  ;;  %v11536_v3 = vpack.c.bf16 %v3250_v59, %v3246_v28 }
 0x1d1   : > { %9613 = vmatpush3.bf16.msra.mxu1 %v11424_v27 }
 0x1d2   : > { %9622 = vmatprep.subr.bf16.mxu1 %v11361_v0  ;;  %v3254_v51 = vpop.f32.mrb[92].mxu0 }
 0x1d3   : > { %v3256_v45 = vpop.f32.mrb[93].mxu0 }
 0x1d4   : > { %9615 = vmatmul.mubr.msk.bf16.vlgmr.msra.gmra.mrb[48].mxu1 %vm1384_vm2, %v11189_v14  ;;  %v3258_v62 = vpop.f32.mrb[94].mxu0 }
 0x1d5   : > { %9623 = vmatpush3.bf16.msra.mxu1 %v11361_v0  ;;  %9618 = vmatprep.mubr.msk.bf16.mxu1 %vm1384_vm2, %v11194_v16  ;;  %v3361_v63 = vpack.c.bf16 %v3258_v62, %v3254_v51  ;;  %v3260_v40 = vpop.f32.mrb[95].mxu0 }
 0x1d6   : > { %9624 = vmatprep.subr.bf16.mxu1 %v11383_v23  ;;  %v11546_v10 = vpack.c.bf16 %v3260_v40, %v3256_v45 }
 0x1d9   : > { %9625 = vmatpush3.bf16.msra.mxu1 %v11383_v23 }
 0x1da   : > { %9626 = vmatprep.subr.bf16.mxu1 %v11405_v41  ;;  %v9568_v27 = vpop.f32.mrb[96].mxu0 }
 0x1db   : > { %v3297_v19 = vpop.f32.mrb[97].mxu0 }
 0x1dc   : > { %9619 = vmatmul.mubr.msk.bf16.gmra.mrb[52].mxu1 %vm1384_vm2, %v11214_v38  ;;  %v9569_v14 = vpop.f32.mrb[98].mxu0 }
 0x1dd   : > { %9627 = vmatpush3.bf16.msra.mxu1 %v11405_v41  ;;  %9630 = vmatprep.mubr.msk.bf16.mxu1 %vm1384_vm2, %v11220_v17  ;;  %v11555_v16 = vpack.c.bf16 %v9569_v14, %v9568_v27  ;;  %v3300_v0 = vpop.f32.mrb[99].mxu0 }
 0x1de   : > { %9628 = vmatprep.subr.bf16.mxu1 %v11427_v7  ;;  %v3336_v1 = vpack.c.bf16 %v3300_v0, %v3297_v19 }
 0x1e1   : > { %9629 = vmatpush3.bf16.msra.mxu1 %v11427_v7 }
 0x1e2   : > { %9638 = vmatprep.subr.bf16.mxu1 %v11446_v32  ;;  %v9572_v23 = vpop.f32.mrb[100].mxu0 }
 0x1e3   : > { %v3313_v11 = vpop.f32.mrb[101].mxu0 }
 0x1e4   : > { %9631 = vmatmul.mubr.msk.bf16.vlgmr.msra.gmra.mrb[48].mxu1 %vm1384_vm2, %v11235_v50  ;;  %v9573_v38 = vpop.f32.mrb[102].mxu0 }
 0x1e5   : > { %9639 = vmatpush3.bf16.msra.mxu1 %v11446_v32  ;;  %9634 = vmatprep.mubr.msk.bf16.mxu1 %vm1384_vm2, %v11240_v52  ;;  %v3363_v17 = vpack.c.bf16 %v9573_v38, %v9572_v23  ;;  %v3316_v41 = vpop.f32.mrb[103].mxu0 }
 0x1e6   : > { %9640 = vmatprep.subr.bf16.mxu1 %v11468_v58  ;;  %v3354_v21 = vpack.c.bf16 %v3316_v41, %v3313_v11 }
 0x1e9   : > { %9641 = vmatpush3.bf16.msra.mxu1 %v11468_v58 }
 0x1ea   : > { %9642 = vmatprep.subr.bf16.mxu1 %v11485_v54 }
 0x1ec   : > { %9635 = vmatmul.mubr.msk.bf16.gmra.mrb[52].mxu1 %vm1384_vm2, %v11256_v46 }
 0x1ed   : > { %9643 = vmatpush3.bf16.msra.mxu1 %v11485_v54  ;;  %9646 = vmatprep.mubr.msk.bf16.mxu1 %vm1384_vm2, %v11262_v15 }
 0x1ee   : > { %9644 = vmatprep.subr.bf16.mxu1 %v11497_v2 }
 0x1f1   : > { %9645 = vmatpush3.bf16.msra.mxu1 %v11497_v2 }
 0x1f2   : > { %9654 = vmatprep.subr.bf16.mxu1 %v11449_v39 }
 0x1f4   : > { %9647 = vmatmul.mubr.msk.bf16.vlgmr.msra.gmra.mrb[48].mxu1 %vm1384_vm2, %v11278_v6 }
 0x1f5   : > { %9655 = vmatpush3.bf16.msra.mxu1 %v11449_v39  ;;  %9650 = vmatprep.mubr.msk.bf16.mxu1 %vm1384_vm2, %v11284_v43 }
 0x1f6   : > { %9656 = vmatprep.subr.bf16.mxu1 %v11471_v61 }
 0x1f9   : > { %9657 = vmatpush3.bf16.msra.mxu1 %v11471_v61 }
 0x1fa   : > { %9658 = vmatprep.subr.bf16.mxu1 %v11488_v56 }
 0x1fc   : > { %9651 = vmatmul.mubr.msk.bf16.gmra.mrb[52].mxu1 %vm1384_vm2, %v11300_v22 }
 0x1fd   : > { %9659 = vmatpush3.bf16.msra.mxu1 %v11488_v56  ;;  %9662 = vmatprep.mubr.msk.bf16.mxu1 %vm1384_vm2, %v11306_v18 }
 0x1fe   : > { %9660 = vmatprep.subr.bf16.mxu1 %v11500_v25 }
 0x201   : > { %9661 = vmatpush3.bf16.msra.mxu1 %v11500_v25 }
 0x202   : > { %9670 = vmatprep.subr.bf16.mxu1 %v11509_v20 }
 0x204   : > { %9663 = vmatmul.mubr.msk.bf16.vlgmr.msra.gmra.mrb[48].mxu1 %vm1384_vm2, %v11322_v35  ;;  %v8924_v35 = vld [vmem:[%s14602_s6] ss:$0 sm:$0xff]  ;;  %s14610_s6 = sld [smem:[#allocation40_spill]] }
 0x205   : > { %9671 = vmatpush3.bf16.msra.mxu1 %v11509_v20  ;;  %9666 = vmatprep.mubr.msk.bf16.mxu1 %vm1384_vm2, %v11328_v47 }
 0x206   : > { %9672 = vmatprep.subr.bf16.mxu1 %v11521_v34 }
 0x209   : > { %9673 = vmatpush3.bf16.msra.mxu1 %v11521_v34 }
 0x20a   : > { %9674 = vmatprep.subr.bf16.mxu1 %v11533_v49 }
 0x20c   : > { %9667 = vmatmul.mubr.msk.bf16.gmra.mrb[52].mxu1 %vm1384_vm2, %v11344_v53 }
 0x20d   : > { %9675 = vmatpush3.bf16.msra.mxu1 %v11533_v49  ;;  %9678 = vmatprep.mubr.msk.bf16.mxu1 %vm1384_vm2, %v11350_v9 }
 0x20e   : > { %9676 = vmatprep.subr.bf16.mxu1 %v3361_v63 }
 0x211   : > { %9677 = vmatpush3.bf16.msra.mxu1 %v3361_v63 }
 0x212   : > { %9686 = vmatprep.subr.bf16.mxu1 %v11512_v57 }
 0x214   : > { %9679 = vmatmul.mubr.msk.bf16.vlgmr.msra.gmra.mrb[48].mxu1 %vm1384_vm2, %v11366_v29 }
 0x215   : > { %9687 = vmatpush3.bf16.msra.mxu1 %v11512_v57  ;;  %9682 = vmatprep.mubr.msk.bf16.mxu1 %vm1384_vm2, %v11372_v42 }
 0x216   : > { %9688 = vmatprep.subr.bf16.mxu1 %v11524_v30 }
 0x219   : > { %9689 = vmatpush3.bf16.msra.mxu1 %v11524_v30 }
 0x21a   : > { %9690 = vmatprep.subr.bf16.mxu1 %v11536_v3 }
 0x21c   : > { %9683 = vmatmul.mubr.msk.bf16.gmra.mrb[52].mxu1 %vm1384_vm2, %v11388_v24 }
 0x21d   : > { %9691 = vmatpush3.bf16.msra.mxu1 %v11536_v3  ;;  %9694 = vmatprep.mubr.msk.bf16.mxu1 %vm1384_vm2, %v11394_v12 }
 0x21e   : > { %9692 = vmatprep.subr.bf16.mxu1 %v11546_v10 }
 0x221   : > { %9693 = vmatpush3.bf16.msra.mxu1 %v11546_v10 }
 0x222   : > { %9702 = vmatprep.subr.bf16.mxu1 %v3336_v1 }
 0x224   : > { %9695 = vmatmul.mubr.msk.bf16.vlgmr.msra.gmra.mrb[48].mxu1 %vm1384_vm2, %v11410_v60 }
 0x225   : > { %9703 = vmatpush3.bf16.msra.mxu1 %v3336_v1  ;;  %9698 = vmatprep.mubr.msk.bf16.mxu1 %vm1384_vm2, %v11416_v44 }
 0x226   : > { %9704 = vmatprep.subr.bf16.mxu1 %v11555_v16 }
 0x229   : > { %9705 = vmatpush3.bf16.msra.mxu1 %v11555_v16 }
 0x22a   : > { %9706 = vmatprep.subr.bf16.mxu1 %v3354_v21 }
 0x22c   : > { %9699 = vmatmul.mubr.msk.bf16.gmra.mrb[52].mxu1 %vm1384_vm2, %v11432_v8 }
 0x22d   : > { %9707 = vmatpush3.bf16.msra.mxu1 %v3354_v21  ;;  %9710 = vmatprep.mubr.msk.bf16.mxu1 %vm1384_vm2, %v11438_v13 }
 0x22e   : > { %9708 = vmatprep.subr.bf16.mxu1 %v3363_v17 }
 0x231   : > { %9709 = vmatpush3.bf16.msra.mxu1 %v3363_v17 }
 0x234   : > { %9711 = vmatmul.mubr.msk.bf16.vlgmr.msra.gmra.mrb[48].mxu1 %vm1384_vm2, %v11454_v36 }
 0x235   : > { %9714 = vmatprep.mubr.msk.bf16.mxu1 %vm1384_vm2, %v11460_v37  ;;  %v8809_v37 = vld [vmem:[%s14603_s2] ss:$0 sm:$0xff] }
 0x23c   : > { %9715 = vmatmul.mubr.msk.bf16.gmra.mrb[52].mxu1 %vm1384_vm2, %v11476_v55 }
 0x23d   : > { %5444 = vmatprep.mubr.bf16.mxu1 %v14553_v4 }
 0x277   : > { %v9544_v50 = vpop.f32.mrb[40].mxu1 }
 0x278   : > { %v2318_v52 = vpop.f32.mrb[41].mxu1  ;;  %v11644_v54 = vadd.f32 %v9544_v50, %v8809_v37 }
 0x279   : > { %v9545_v46 = vpop.f32.mrb[42].mxu1  ;;  %v2364_v61 = vadd.f32 %v8809_v37, %v2318_v52 }
 0x27a   : > { %v2321_v15 = vpop.f32.mrb[43].mxu1  ;;  %v11646_v56 = vadd.f32 %v9545_v46, %v8809_v37 }
 0x27b   : > { %v2365_v55 = vadd.f32 %v8809_v37, %v2321_v15 }
 0x27f   : > { %v9548_v6 = vpop.f32.mrb[44].mxu1 }
 0x280   : > { %v2334_v43 = vpop.f32.mrb[45].mxu1  ;;  %v11655_v20 = vadd.f32 %v9548_v6, %v8809_v37 }
 0x281   : > { %v9549_v22 = vpop.f32.mrb[46].mxu1  ;;  %v11649_v2 = vadd.f32 %v8809_v37, %v2334_v43 }
 0x282   : > { %v2337_v18 = vpop.f32.mrb[47].mxu1  ;;  %v11658_v57 = vadd.f32 %v9549_v22, %v8809_v37 }
 0x283   : > { %v11652_v25 = vadd.f32 %v8809_v37, %v2337_v18 }
 0x307   : > { %v9712_v47 = vpop.f32.mrb[48].mxu1 }
 0x308   : > { %v4014_v53 = vadd.f32 %v9712_v47, %v8924_v35  ;;  %v3966_v9 = vpop.f32.mrb[49].mxu1 }
 0x309   : > { %v4012_v29 = vadd.f32 %v8924_v35, %v3966_v9  ;;  %v9713_v42 = vpop.f32.mrb[50].mxu1 }
 0x30a   : > { %4026 = vadd.xlane.f32.xlu1 %v4014_v53  ;;  %v3969_v24 = vpop.f32.mrb[51].mxu1  ;;  %v4015_v12 = vadd.f32 %v9713_v42, %v8924_v35 }
 0x30b   : > { %4022 = vadd.xlane.f32.xlu0 %v4012_v29  ;;  %v4013_v60 = vadd.f32 %v8924_v35, %v3969_v24 }
 0x30e   : > { %4028 = vadd.xlane.f32.xlu1 %v4015_v12 }
 0x30f   : > { %4024 = vadd.xlane.f32.xlu0 %v4013_v60  ;;  %v9716_v44 = vpop.f32.mrb[52].mxu1 }
 0x310   : > { %v3982_v7 = vpop.f32.mrb[53].mxu1  ;;  %v4018_v36 = vadd.f32 %v9716_v44, %v8924_v35 }
 0x311   : > { %v4016_v8 = vadd.f32 %v8924_v35, %v3982_v7  ;;  %v9717_v13 = vpop.f32.mrb[54].mxu1 }
 0x312   : > { %v3985_v32 = vpop.f32.mrb[55].mxu1  ;;  %v4019_v58 = vadd.f32 %v9717_v13, %v8924_v35 }
 0x313   : > { %v4017_v39 = vadd.f32 %v8924_v35, %v3985_v32  ;;  %4030 = vadd.xlane.f32.xlu0 %v4016_v8 }
 0x315   : > { %4032 = vadd.xlane.f32.xlu1 %v4017_v39 }
 0x317   : > { %4034 = vadd.xlane.f32.xlu0 %v4018_v36 }
 0x319   : > { %4036 = vadd.xlane.f32.xlu1 %v4019_v58 }
 0x31b   : > { %2374 = vadd.xlane.f32.xlu0 %v2364_v61 }
 0x31d   : > { %2376 = vadd.xlane.f32.xlu1 %v2365_v55 }
 0x31f   : > { %2378 = vadd.xlane.f32.xlu0 %v11644_v54 }
 0x321   : > { %2380 = vadd.xlane.f32.xlu1 %v11646_v56 }
 0x323   : > { %2382 = vadd.xlane.f32.xlu0 %v11649_v2 }
 0x325   : > { %2384 = vadd.xlane.f32.xlu1 %v11652_v25 }
 0x327   : > { %2386 = vadd.xlane.f32.xlu0 %v11655_v20 }
 0x329   : > { %2388 = vadd.xlane.f32.xlu1 %v11658_v57 }
 0x397   : > { %v4027_v33 = vpop.xlane.xlu1 %4026 }
 0x398   : > { %v4023_v34 = vpop.xlane.xlu0 %4022  ;;  %v4040_v26 = vmul.f32 0.0078125, %v4027_v33 }
 0x399   : > { %v4038_v30 = vmul.f32 0.0078125, %v4023_v34 }
 0x39a   : > { %v11666_v51 = vsub.f32 %v4014_v53, %v4040_v26 }
 0x39b   : > { %v4029_v31 = vpop.xlane.xlu1 %4028  ;;  %v11662_v28 = vsub.f32 %v4012_v29, %v4038_v30 }
 0x39c   : > { %v4025_v48 = vpop.xlane.xlu0 %4024  ;;  %v4041_v49 = vmul.f32 0.0078125, %v4029_v31  ;;  %v4056_v40 = vmul.f32 %v11666_v51, %v11666_v51 }
 0x39d   : > { %v4039_v59 = vmul.f32 0.0078125, %v4025_v48  ;;  %v4054_v3 = vmul.f32 %v11662_v28, %v11662_v28 }
 0x39e   : > { %v11674_v27 = vsub.f32 %v4015_v12, %v4041_v49 }
 0x39f   : > { %4062 = vadd.xlane.f32.xlu0 %v4054_v3  ;;  %v11668_v45 = vsub.f32 %v4013_v60, %v4039_v59 }
 0x3a0   : > { %v4031_v62 = vpop.xlane.xlu0 %4030  ;;  %v4057_v11 = vmul.f32 %v11674_v27, %v11674_v27 }
 0x3a1   : > { %v4042_v63 = vmul.f32 0.0078125, %v4031_v62  ;;  %v4055_v10 = vmul.f32 %v11668_v45, %v11668_v45 }
 0x3a2   : > { %v4033_v19 = vpop.xlane.xlu1 %4032 }
 0x3a3   : > { %v4043_v14 = vmul.f32 0.0078125, %v4033_v19  ;;  %4066 = vadd.xlane.f32.xlu0 %v4056_v40  ;;  %4064 = vadd.xlane.f32.xlu1 %v4055_v10  ;;  %v11676_v16 = vsub.f32 %v4016_v8, %v4042_v63 }
 0x3a4   : > { %v4035_v0 = vpop.xlane.xlu0 %4034 }
 0x3a5   : > { %v4044_v1 = vmul.f32 0.0078125, %v4035_v0  ;;  %v4058_v23 = vmul.f32 %v11676_v16, %v11676_v16  ;;  %v11682_v38 = vsub.f32 %v4017_v39, %v4043_v14 }
 0x3a6   : > { %v4037_v17 = vpop.xlane.xlu1 %4036 }
 0x3a7   : > { %v4045_v41 = vmul.f32 0.0078125, %v4037_v17  ;;  %4070 = vadd.xlane.f32.xlu0 %v4058_v23  ;;  %4068 = vadd.xlane.f32.xlu1 %v4057_v11  ;;  %v11684_v21 = vsub.f32 %v4018_v36, %v4044_v1  ;;  %v4059_v15 = vmul.f32 %v11682_v38, %v11682_v38 }
 0x3a8   : > { %v2375_v50 = vpop.xlane.xlu0 %2374 }
 0x3a9   : > { %v2391_v52 = vmul.f32 0.0078125, %v2375_v50  ;;  %v4060_v46 = vmul.f32 %v11684_v21, %v11684_v21  ;;  %v11690_v6 = vsub.f32 %v4019_v58, %v4045_v41 }
 0x3aa   : > { %v2377_v43 = vpop.xlane.xlu1 %2376 }
 0x3ab   : > { %v2392_v22 = vmul.f32 0.0078125, %v2377_v43  ;;  %4074 = vadd.xlane.f32.xlu0 %v4060_v46  ;;  %4072 = vadd.xlane.f32.xlu1 %v4059_v15  ;;  %v11692_v18 = vsub.f32 %v2364_v61, %v2391_v52  ;;  %v4061_v9 = vmul.f32 %v11690_v6, %v11690_v6  ;;  %v11735_v15 = vld [vmem:[%s14604_s0] ss:$0 sm:$0xff] }
 0x3ac   : > { %v2379_v35 = vpop.xlane.xlu0 %2378 }
 0x3ad   : > { %v2393_v47 = vmul.f32 0.0078125, %v2379_v35  ;;  %v2407_v53 = vmul.f32 %v11692_v18, %v11692_v18  ;;  %v11698_v29 = vsub.f32 %v2365_v55, %v2392_v22 }
 0x3ae   : > { %v2381_v42 = vpop.xlane.xlu1 %2380 }
 0x3af   : > { %v2394_v24 = vmul.f32 0.0078125, %v2381_v42  ;;  %2415 = vadd.xlane.f32.xlu0 %v2407_v53  ;;  %4076 = vadd.xlane.f32.xlu1 %v4061_v9  ;;  %v11701_v12 = vsub.f32 %v11644_v54, %v2393_v47  ;;  %v2408_v8 = vmul.f32 %v11698_v29, %v11698_v29  ;;  %v11741_v9 = vld [vmem:[%s14605_s28] ss:$0 sm:$0xff] }
 0x3b0   : > { %v2383_v60 = vpop.xlane.xlu0 %2382 }
 0x3b1   : > { %v2395_v44 = vmul.f32 0.0078125, %v2383_v60  ;;  %v2409_v7 = vmul.f32 %v11701_v12, %v11701_v12  ;;  %v11708_v13 = vsub.f32 %v11646_v56, %v2394_v24 }
 0x3b2   : > { %v2385_v32 = vpop.xlane.xlu1 %2384 }
 0x3b3   : > { %v2396_v39 = vmul.f32 0.0078125, %v2385_v32  ;;  %2419 = vadd.xlane.f32.xlu0 %v2409_v7  ;;  %2417 = vadd.xlane.f32.xlu1 %v2408_v8  ;;  %v11711_v36 = vsub.f32 %v11649_v2, %v2395_v44  ;;  %v2410_v55 = vmul.f32 %v11708_v13, %v11708_v13 }
 0x3b4   : > { %v2387_v37 = vpop.xlane.xlu0 %2386 }
 0x3b5   : > { %v2397_v58 = vmul.f32 0.0078125, %v2387_v37  ;;  %v2411_v61 = vmul.f32 %v11711_v36, %v11711_v36  ;;  %v11718_v54 = vsub.f32 %v11652_v25, %v2396_v39 }
 0x3b6   : > { %v2389_v56 = vpop.xlane.xlu1 %2388 }
 0x3b7   : > { %v11721_v33 = vsub.f32 %v11655_v20, %v2397_v58  ;;  %v2398_v34 = vmul.f32 0.0078125, %v2389_v56  ;;  %2423 = vadd.xlane.f32.xlu0 %v2411_v61  ;;  %2421 = vadd.xlane.f32.xlu1 %v2410_v55  ;;  %v2412_v30 = vmul.f32 %v11718_v54, %v11718_v54 }
 0x3b9   : > { %v11724_v2 = vsub.f32 %v11658_v57, %v2398_v34  ;;  %v2413_v26 = vmul.f32 %v11721_v33, %v11721_v33 }
 0x3bb   : > { %2427 = vadd.xlane.f32.xlu0 %v2413_v26  ;;  %2425 = vadd.xlane.f32.xlu1 %v2412_v30  ;;  %v2414_v25 = vmul.f32 %v11724_v2, %v11724_v2 }
 0x3bf   : > { %2429 = vadd.xlane.f32.xlu1 %v2414_v25 }
 0x42c   : > { %v4063_v20 = vpop.xlane.xlu0 %4062 }
 0x42d   : > { %v4078_v31 = vmul.f32 0.0078125, %v4063_v20 }
 0x42f   : > { %v4086_v48 = vadd.f32 1e-05, %v4078_v31 }
 0x430   : > { %v4067_v49 = vpop.xlane.xlu0 %4066  ;;  %v4065_v59 = vpop.xlane.xlu1 %4064 }
 0x431   : > { %10242 = vrsqrt.f32 %v4086_v48  ;;  %v4080_v57 = vmul.f32 0.0078125, %v4067_v49  ;;  %v4079_v3 = vmul.f32 0.0078125, %v4065_v59 }
 0x433   : > { %v4088_v62 = vadd.f32 1e-05, %v4080_v57  ;;  %v4087_v63 = vadd.f32 1e-05, %v4079_v3 }
 0x434   : > { %v4071_v40 = vpop.xlane.xlu0 %4070  ;;  %v4069_v10 = vpop.xlane.xlu1 %4068 }
 0x435   : > { %10244 = vrsqrt.f32 %v4088_v62  ;;  %v4082_v19 = vmul.f32 0.0078125, %v4071_v40  ;;  %v4081_v14 = vmul.f32 0.0078125, %v4069_v10 }
 0x436   : > { %10246 = vrsqrt.f32 %v4087_v63 }
 0x437   : > { %v4090_v0 = vadd.f32 1e-05, %v4082_v19  ;;  %v4089_v1 = vadd.f32 1e-05, %v4081_v14 }
 0x438   : > { %v4075_v23 = vpop.xlane.xlu0 %4074  ;;  %v4073_v11 = vpop.xlane.xlu1 %4072 }
 0x439   : > { %10248 = vrsqrt.f32 %v4090_v0  ;;  %v4084_v17 = vmul.f32 0.0078125, %v4075_v23  ;;  %v4083_v41 = vmul.f32 0.0078125, %v4073_v11 }
 0x43a   : > { %10250 = vrsqrt.f32 %v4089_v1 }
 0x43b   : > { %v10243_v50 = vpop.eup %10242  ;;  %v4092_v52 = vadd.f32 1e-05, %v4084_v17  ;;  %v4091_v46 = vadd.f32 1e-05, %v4083_v41 }
 0x43c   : > { %v2416_v43 = vpop.xlane.xlu0 %2415  ;;  %v4077_v22 = vpop.xlane.xlu1 %4076  ;;  %v4102_v35 = vmul.f32 %v10243_v50, %v11662_v28 }
 0x43d   : > { %10252 = vrsqrt.f32 %v4092_v52  ;;  %v2431_v47 = vmul.f32 0.0078125, %v2416_v43  ;;  %v4085_v53 = vmul.f32 0.0078125, %v4077_v22 }
 0x43e   : > { %10254 = vrsqrt.f32 %v4091_v46  ;;  %v4116_v42 = vmul.f32 %v11735_v15, %v4102_v35 }
 0x43f   : > { %v10245_v24 = vpop.eup %10244  ;;  %v2439_v60 = vadd.f32 1e-05, %v2431_v47  ;;  %v4093_v44 = vadd.f32 1e-05, %v4085_v53 }
 0x440   : > { %v10247_v7 = vpop.eup %10246  ;;  %v2420_v8 = vpop.xlane.xlu0 %2419  ;;  %v11745_v39 = vadd.f32 %v11741_v9, %v4116_v42  ;;  %v4104_v28 = vmul.f32 %v10245_v24, %v11666_v51  ;;  %v8811_v24 = vld [vmem:[%s14607_s8] ss:$0 sm:$0xff]  ;;  %s9114_s8 = sshll.u32 %s10702_s9, 10 }
 0x441   : > { %v2418_v32 = vpop.xlane.xlu1 %2417  ;;  %10256 = vrsqrt.f32 %v2439_v60  ;;  %v2433_v37 = vmul.f32 0.0078125, %v2420_v8  ;;  %v4103_v61 = vmul.f32 %v10247_v7, %v11668_v45  ;;  %s14468_s28 = scalar_lea.hbm %s14544_s27, %s9114_s8 }
 0x442   : > { %v2432_v58 = vmul.f32 0.0078125, %v2418_v32  ;;  %10258 = vrsqrt.f32 %v4093_v44  ;;  %4262 = vadd.xlane.f32.xlu0 %v11745_v39  ;;  %v4118_v55 = vmul.f32 %v11735_v15, %v4104_v28 }
 0x443   : > { %v10249_v56 = vpop.eup %10248  ;;  %v2441_v34 = vadd.f32 1e-05, %v2433_v37  ;;  %v4117_v30 = vmul.f32 %v11735_v15, %v4103_v61 }
 0x444   : > { %v2440_v26 = vadd.f32 1e-05, %v2432_v58  ;;  %v10251_v25 = vpop.eup %10250  ;;  %v2424_v20 = vpop.xlane.xlu0 %2423  ;;  %v11753_v51 = vadd.f32 %v11741_v9, %v4118_v55  ;;  %v4106_v48 = vmul.f32 %v10249_v56, %v11676_v16 }
 0x445   : > { %v2422_v31 = vpop.xlane.xlu1 %2421  ;;  %10260 = vrsqrt.f32 %v2441_v34  ;;  %v2435_v45 = vmul.f32 0.0078125, %v2424_v20  ;;  %v11757_v59 = vadd.f32 %v11741_v9, %v4117_v30  ;;  %v4105_v3 = vmul.f32 %v10251_v25, %v11674_v27 }
 0x446   : > { %v2434_v49 = vmul.f32 0.0078125, %v2422_v31  ;;  %10262 = vrsqrt.f32 %v2440_v26  ;;  %4266 = vadd.xlane.f32.xlu0 %v11753_v51  ;;  %v4120_v57 = vmul.f32 %v11735_v15, %v4106_v48 }
 0x447   : > { %v10253_v62 = vpop.eup %10252  ;;  %v2443_v63 = vadd.f32 1e-05, %v2435_v45  ;;  %4264 = vadd.xlane.f32.xlu1 %v11757_v59  ;;  %v4119_v0 = vmul.f32 %v11735_v15, %v4105_v3 }
 0x448   : > { %v2442_v40 = vadd.f32 1e-05, %v2434_v49  ;;  %v10255_v10 = vpop.eup %10254  ;;  %v2428_v16 = vpop.xlane.xlu0 %2427  ;;  %v11764_v14 = vadd.f32 %v11741_v9, %v4120_v57  ;;  %v4108_v1 = vmul.f32 %v10253_v62, %v11684_v21  ;;  %v8810_v21 = vld [vmem:[%s14606_s5] ss:$0 sm:$0xff] }
 0x449   : > { %v2426_v19 = vpop.xlane.xlu1 %2425  ;;  %10264 = vrsqrt.f32 %v2443_v63  ;;  %v2437_v23 = vmul.f32 0.0078125, %v2428_v16  ;;  %v4107_v27 = vmul.f32 %v10255_v10, %v11682_v38  ;;  %v11771_v17 = vadd.f32 %v11741_v9, %v4119_v0 }
 0x44a   : > { %v2436_v11 = vmul.f32 0.0078125, %v2426_v19  ;;  %10266 = vrsqrt.f32 %v2442_v40  ;;  %4270 = vadd.xlane.f32.xlu0 %v11764_v14  ;;  %v4122_v41 = vmul.f32 %v11735_v15, %v4108_v1 }
 0x44b   : > { %v10257_v50 = vpop.eup %10256  ;;  %v2445_v52 = vadd.f32 1e-05, %v2437_v23  ;;  %v4121_v43 = vmul.f32 %v11735_v15, %v4107_v27  ;;  %4268 = vadd.xlane.f32.xlu1 %v11771_v17 }
 0x44c   : > { %v2444_v46 = vadd.f32 1e-05, %v2436_v11  ;;  %v10259_v22 = vpop.eup %10258  ;;  %v11780_v35 = vadd.f32 %v11741_v9, %v4122_v41  ;;  %v2455_v47 = vmul.f32 %v10257_v50, %v11692_v18 }
 0x44d   : > { %v2430_v38 = vpop.xlane.xlu1 %2429  ;;  %10268 = vrsqrt.f32 %v2445_v52  ;;  %v11784_v42 = vadd.f32 %v11741_v9, %v4121_v43  ;;  %v4109_v60 = vmul.f32 %v10259_v22, %v11690_v6 }
 0x44e   : > { %v2438_v53 = vmul.f32 0.0078125, %v2430_v38  ;;  %10270 = vrsqrt.f32 %v2444_v46  ;;  %4274 = vadd.xlane.f32.xlu0 %v11780_v35  ;;  %v2469_v44 = vmul.f32 %v8810_v21, %v2455_v47 }
 0x44f   : > { %v10261_v7 = vpop.eup %10260  ;;  %v4123_v32 = vmul.f32 %v11735_v15, %v4109_v60  ;;  %4272 = vadd.xlane.f32.xlu1 %v11784_v42 }
 0x450   : > { %v2446_v8 = vadd.f32 1e-05, %v2438_v53  ;;  %v10263_v18 = vpop.eup %10262  ;;  %v11793_v28 = vadd.f32 %v8811_v24, %v2469_v44  ;;  %v2457_v37 = vmul.f32 %v10261_v7, %v11701_v12 }
 0x451   : > { %v11797_v58 = vadd.f32 %v11741_v9, %v4123_v32  ;;  %v2456_v6 = vmul.f32 %v10263_v18, %v11698_v29 }
 0x452   : > { %10272 = vrsqrt.f32 %v2446_v8  ;;  %4140 = vadd.xlane.f32.xlu0 %v11793_v28  ;;  %v2471_v61 = vmul.f32 %v8810_v21, %v2457_v37 }
 0x453   : > { %v10265_v55 = vpop.eup %10264  ;;  %v2470_v56 = vmul.f32 %v8810_v21, %v2456_v6  ;;  %4276 = vadd.xlane.f32.xlu1 %v11797_v58 }
 0x454   : > { %v10267_v34 = vpop.eup %10266  ;;  %v11802_v15 = vadd.f32 %v8811_v24, %v2471_v61  ;;  %v2459_v26 = vmul.f32 %v10265_v55, %v11711_v36 }
 0x455   : > { %v11805_v30 = vadd.f32 %v8811_v24, %v2470_v56  ;;  %v2458_v12 = vmul.f32 %v10267_v34, %v11708_v13 }
 0x456   : > { %4144 = vadd.xlane.f32.xlu0 %v11802_v15  ;;  %v2473_v9 = vmul.f32 %v8810_v21, %v2459_v26 }
 0x457   : > { %v10269_v29 = vpop.eup %10268  ;;  %v2472_v25 = vmul.f32 %v8810_v21, %v2458_v12  ;;  %4142 = vadd.xlane.f32.xlu1 %v11805_v30 }
 0x458   : > { %v10271_v20 = vpop.eup %10270  ;;  %v11810_v31 = vadd.f32 %v8811_v24, %v2473_v9  ;;  %v2461_v48 = vmul.f32 %v10269_v29, %v11721_v33 }
 0x459   : > { %v11813_v45 = vadd.f32 %v8811_v24, %v2472_v25  ;;  %v2460_v36 = vmul.f32 %v10271_v20, %v11718_v54  ;;  %v10122_v54 = vld [vmem:[%s14608_s15] sm:$0xff]  }
 0x45a   : > { %4148 = vadd.xlane.f32.xlu0 %v11810_v31  ;;  %v2475_v49 = vmul.f32 %v8810_v21, %v2461_v48  ;;  %9718 = vmatprep.subr.bf16.mxu0 %v10122_v54 }
 0x45b   : > { %v2474_v57 = vmul.f32 %v8810_v21, %v2460_v36  ;;  %4146 = vadd.xlane.f32.xlu1 %v11813_v45  ;;  %9719 = vmatpush3.bf16.msra.mxu0 %v10122_v54 }
 0x45c   : > { %v10273_v13 = vpop.eup %10272  ;;  %v11818_v3 = vadd.f32 %v8811_v24, %v2475_v49 }
 0x45d   : > { %v2462_v62 = vmul.f32 %v10273_v13, %v11724_v2  ;;  %v11821_v63 = vadd.f32 %v8811_v24, %v2474_v57  ;;  %v10123_v13 = vld [vmem:[%s14608_s15 + $0x8] sm:$0xff]  }
 0x45e   : > { %4152 = vadd.xlane.f32.xlu0 %v11818_v3  ;;  %9720 = vmatprep.subr.bf16.mxu0 %v10123_v13 }
 0x45f   : > { %v2476_v33 = vmul.f32 %v8810_v21, %v2462_v62  ;;  %4150 = vadd.xlane.f32.xlu1 %v11821_v63  ;;  %9721 = vmatpush3.bf16.msra.mxu0 %v10123_v13 }
 0x461   : > { %v11825_v40 = vadd.f32 %v8811_v24, %v2476_v33 }
 0x463   : > { %4154 = vadd.xlane.f32.xlu1 %v11825_v40 }
 0x4cf   : > { %v4263_v10 = vpop.xlane.xlu0 %4262 }
 0x4d0   : > { %v4278_v16 = vmul.f32 0.0078125, %v4263_v10 }
 0x4d2   : > { %v11832_v2 = vsub.f32 %v11745_v39, %v4278_v16 }
 0x4d3   : > { %v4267_v19 = vpop.xlane.xlu0 %4266 }
 0x4d4   : > { %v4280_v0 = vmul.f32 0.0078125, %v4267_v19  ;;  %v4265_v1 = vpop.xlane.xlu1 %4264  ;;  %v4294_v23 = vmul.f32 %v11832_v2, %v11832_v2 }
 0x4d5   : > { %v4279_v11 = vmul.f32 0.0078125, %v4265_v1  ;;  %v10124_v1 = vld [vmem:[%s14608_s15 + $0x10] sm:$0xff]  }
 0x4d6   : > { %v11837_v27 = vsub.f32 %v11753_v51, %v4280_v0  ;;  %4302 = vadd.xlane.f32.xlu0 %v4294_v23  ;;  %9722 = vmatprep.subr.bf16.mxu0 %v10124_v1 }
 0x4d7   : > { %v11840_v41 = vsub.f32 %v11757_v59, %v4279_v11  ;;  %v4271_v50 = vpop.xlane.xlu0 %4270  ;;  %9723 = vmatpush3.bf16.msra.mxu0 %v10124_v1 }
 0x4d8   : > { %v4282_v52 = vmul.f32 0.0078125, %v4271_v50  ;;  %v4296_v46 = vmul.f32 %v11837_v27, %v11837_v27  ;;  %v4269_v43 = vpop.xlane.xlu1 %4268 }
 0x4d9   : > { %v4295_v21 = vmul.f32 %v11840_v41, %v11840_v41  ;;  %v4281_v38 = vmul.f32 0.0078125, %v4269_v43 }
 0x4da   : > { %v11847_v22 = vsub.f32 %v11764_v14, %v4282_v52  ;;  %4306 = vadd.xlane.f32.xlu0 %v4296_v46 }
 0x4db   : > { %4304 = vadd.xlane.f32.xlu1 %v4295_v21  ;;  %v4275_v47 = vpop.xlane.xlu0 %4274  ;;  %v11850_v53 = vsub.f32 %v11771_v17, %v4281_v38 }
 0x4dc   : > { %v4284_v24 = vmul.f32 0.0078125, %v4275_v47  ;;  %v4298_v60 = vmul.f32 %v11847_v22, %v11847_v22  ;;  %v4273_v44 = vpop.xlane.xlu1 %4272  ;;  %v10125_v47 = vld [vmem:[%s14608_s15 + $0x18] sm:$0xff]  }
 0x4dd   : > { %v4283_v8 = vmul.f32 0.0078125, %v4273_v44  ;;  %v4297_v32 = vmul.f32 %v11850_v53, %v11850_v53  ;;  %9724 = vmatprep.subr.bf16.mxu0 %v10125_v47 }
 0x4de   : > { %v11855_v7 = vsub.f32 %v11780_v35, %v4284_v24  ;;  %4310 = vadd.xlane.f32.xlu0 %v4298_v60  ;;  %9725 = vmatpush3.bf16.msra.mxu0 %v10125_v47 }
 0x4df   : > { %v4141_v18 = vpop.xlane.xlu0 %4140  ;;  %v11860_v37 = vsub.f32 %v11784_v42, %v4283_v8  ;;  %4308 = vadd.xlane.f32.xlu1 %v4297_v32 }
 0x4e0   : > { %v4156_v6 = vmul.f32 0.0078125, %v4141_v18  ;;  %v4300_v61 = vmul.f32 %v11855_v7, %v11855_v7  ;;  %v4277_v55 = vpop.xlane.xlu1 %4276  ;;  %v10126_v18 = vld [vmem:[%s14608_s15 + $0x20] sm:$0xff]  }
 0x4e1   : > { %v4285_v34 = vmul.f32 0.0078125, %v4277_v55  ;;  %v4299_v26 = vmul.f32 %v11860_v37, %v11860_v37  ;;  %9726 = vmatprep.subr.bf16.mxu0 %v10126_v18  ;;  %v10127_v55 = vld [vmem:[%s14608_s15 + $0x28] sm:$0xff]  }
 0x4e2   : > { %v11865_v56 = vsub.f32 %v11793_v28, %v4156_v6  ;;  %4314 = vadd.xlane.f32.xlu0 %v4300_v61  ;;  %9727 = vmatpush3.bf16.msra.mxu0 %v10126_v18 }
 0x4e3   : > { %v4145_v12 = vpop.xlane.xlu0 %4144  ;;  %v11870_v9 = vsub.f32 %v11797_v58, %v4285_v34  ;;  %4312 = vadd.xlane.f32.xlu1 %v4299_v26  ;;  %9728 = vmatprep.subr.bf16.mxu0 %v10127_v55  ;;  %v10128_v34 = vld [vmem:[%s14608_s15 + $0x30] sm:$0xff]   ;;  %v10129_v26 = vld [vmem:[%s14608_s15 + $0x38] sm:$0xff]  }
 0x4e4   : > { %v4158_v29 = vmul.f32 0.0078125, %v4145_v12  ;;  %v4172_v25 = vmul.f32 %v11865_v56, %v11865_v56  ;;  %v4143_v20 = vpop.xlane.xlu1 %4142  ;;  %v10132_v12 = vld [vmem:[%s14609_s16 + $0x4] ss:$8 sps:$4 sm:$0xff]  }
 0x4e5   : > { %v4157_v36 = vmul.f32 0.0078125, %v4143_v20  ;;  %v4301_v49 = vmul.f32 %v11870_v9, %v11870_v9 }
 0x4e6   : > { %v11875_v48 = vsub.f32 %v11802_v15, %v4158_v29  ;;  %4180 = vadd.xlane.f32.xlu0 %v4172_v25  ;;  %9729 = vmatpush3.bf16.msra.mxu0 %v10127_v55 }
 0x4e7   : > { %v4149_v57 = vpop.xlane.xlu0 %4148  ;;  %v11883_v62 = vsub.f32 %v11805_v30, %v4157_v36  ;;  %4316 = vadd.xlane.f32.xlu1 %v4301_v49  ;;  %9730 = vmatprep.subr.bf16.mxu0 %v10128_v34 }
 0x4e8   : > { %v4160_v33 = vmul.f32 0.0078125, %v4149_v57  ;;  %v4174_v54 = vmul.f32 %v11875_v48, %v11875_v48  ;;  %v4147_v10 = vpop.xlane.xlu1 %4146 }
 0x4e9   : > { %v4159_v19 = vmul.f32 0.0078125, %v4147_v10  ;;  %v4173_v0 = vmul.f32 %v11883_v62, %v11883_v62 }
 0x4ea   : > { %v11888_v16 = vsub.f32 %v11810_v31, %v4160_v33  ;;  %4184 = vadd.xlane.f32.xlu0 %v4174_v54  ;;  %9731 = vmatpush3.bf16.msra.mxu0 %v10128_v34 }
 0x4eb   : > { %v4153_v23 = vpop.xlane.xlu0 %4152  ;;  %v11896_v11 = vsub.f32 %v11813_v45, %v4159_v19  ;;  %4182 = vadd.xlane.f32.xlu1 %v4173_v0  ;;  %9732 = vmatprep.subr.bf16.mxu0 %v10129_v26 }
 0x4ec   : > { %v4162_v50 = vmul.f32 0.0078125, %v4153_v23  ;;  %v4176_v52 = vmul.f32 %v11888_v16, %v11888_v16  ;;  %v4151_v46 = vpop.xlane.xlu1 %4150 }
 0x4ed   : > { %v4161_v21 = vmul.f32 0.0078125, %v4151_v46  ;;  %v4175_v38 = vmul.f32 %v11896_v11, %v11896_v11 }
 0x4ee   : > { %v11901_v43 = vsub.f32 %v11818_v3, %v4162_v50  ;;  %4188 = vadd.xlane.f32.xlu0 %v4176_v52  ;;  %9733 = vmatpush3.bf16.msra.mxu0 %v10129_v26 }
 0x4ef   : > { %v11909_v24 = vsub.f32 %v11821_v63, %v4161_v21  ;;  %4186 = vadd.xlane.f32.xlu1 %v4175_v38  ;;  %4607 = vmatprep.subr.bf16.mxu0 %v10132_v12 }
 0x4f0   : > { %v4178_v60 = vmul.f32 %v11901_v43, %v11901_v43  ;;  %v4155_v44 = vpop.xlane.xlu1 %4154 }
 0x4f1   : > { %v4163_v8 = vmul.f32 0.0078125, %v4155_v44  ;;  %v4177_v32 = vmul.f32 %v11909_v24, %v11909_v24 }
 0x4f2   : > { %4192 = vadd.xlane.f32.xlu0 %v4178_v60 }
 0x4f3   : > { %v11919_v6 = vsub.f32 %v11825_v40, %v4163_v8  ;;  %4190 = vadd.xlane.f32.xlu1 %v4177_v32  ;;  %v8929_v32 = vld [vmem:[%s14530_s13] ss:$0 sm:$0xff] }
 0x4f5   : > { %v4179_v61 = vmul.f32 %v11919_v6, %v11919_v6 }
 0x4f7   : > { %4194 = vadd.xlane.f32.xlu1 %v4179_v61 }
 0x563   : > { %v4303_v29 = vpop.xlane.xlu0 %4302 }
 0x564   : > { %v4318_v25 = vmul.f32 0.0078125, %v4303_v29 }
 0x566   : > { %v4326_v20 = vadd.f32 1e-05, %v4318_v25 }
 0x567   : > { %v4307_v36 = vpop.xlane.xlu0 %4306 }
 0x568   : > { %10274 = vrsqrt.f32 %v4326_v20  ;;  %v4320_v49 = vmul.f32 0.0078125, %v4307_v36  ;;  %v4305_v13 = vpop.xlane.xlu1 %4304  ;;  %v8930_v20 = vld [vmem:[%s14531_s14] ss:$0 sm:$0xff] }
 0x569   : > { %v4319_v57 = vmul.f32 0.0078125, %v4305_v13 }
 0x56a   : > { %v4328_v33 = vadd.f32 1e-05, %v4320_v49 }
 0x56b   : > { %v4327_v54 = vadd.f32 1e-05, %v4319_v57  ;;  %v4311_v10 = vpop.xlane.xlu0 %4310 }
 0x56c   : > { %10276 = vrsqrt.f32 %v4328_v33  ;;  %v4322_v19 = vmul.f32 0.0078125, %v4311_v10  ;;  %v4309_v0 = vpop.xlane.xlu1 %4308 }
 0x56d   : > { %10278 = vrsqrt.f32 %v4327_v54  ;;  %v4321_v23 = vmul.f32 0.0078125, %v4309_v0 }
 0x56e   : > { %v4330_v1 = vadd.f32 1e-05, %v4322_v19 }
 0x56f   : > { %v4315_v50 = vpop.xlane.xlu0 %4314  ;;  %v4329_v52 = vadd.f32 1e-05, %v4321_v23 }
 0x570   : > { %10280 = vrsqrt.f32 %v4330_v1  ;;  %v4324_v46 = vmul.f32 0.0078125, %v4315_v50  ;;  %v4313_v21 = vpop.xlane.xlu1 %4312 }
 0x571   : > { %10282 = vrsqrt.f32 %v4329_v52  ;;  %v4323_v60 = vmul.f32 0.0078125, %v4313_v21 }
 0x572   : > { %v10275_v38 = vpop.eup %10274  ;;  %v4332_v47 = vadd.f32 1e-05, %v4324_v46 }
 0x573   : > { %v4331_v44 = vadd.f32 1e-05, %v4323_v60  ;;  %v4342_v8 = vmul.f32 %v10275_v38, %v11832_v2  ;;  %v4181_v50 = vpop.xlane.xlu0 %4180  ;;  %v10135_v60 = vld [vmem:[%s14609_s16 + $0x14] ss:$8 sps:$4 sm:$0xff]  }
 0x574   : > { %10284 = vrsqrt.f32 %v4332_v47  ;;  %v4317_v18 = vpop.xlane.xlu1 %4316 }
 0x575   : > { %10286 = vrsqrt.f32 %v4331_v44  ;;  %v4325_v55 = vmul.f32 0.0078125, %v4317_v18  ;;  %v4356_v25 = vmul.f32 %v8929_v32, %v4342_v8  ;;  %v4196_v18 = vmul.f32 0.0078125, %v4181_v50  ;;  %v10142_v50 = vld [vmem:[%s14609_s16 + $0x40] ss:$8 sps:$4 sm:$0xff]  }
 0x576   : > { %v10277_v61 = vpop.eup %10276 }
 0x577   : > { %v10279_v34 = vpop.eup %10278  ;;  %v4344_v26 = vmul.f32 %v10277_v61, %v11837_v27  ;;  %v4333_v12 = vadd.f32 1e-05, %v4325_v55  ;;  %v4370_v57 = vadd.f32 %v8930_v20, %v4356_v25  ;;  %v10138_v25 = vld [vmem:[%s14609_s16 + $0x24] ss:$8 sps:$4 sm:$0xff]  }
 0x578   : > { %v4343_v29 = vmul.f32 %v10279_v34, %v11840_v41  ;;  %v4183_v41 = vpop.xlane.xlu1 %4182 }
 0x579   : > { %10288 = vrsqrt.f32 %v4333_v12  ;;  %v4358_v13 = vmul.f32 %v8929_v32, %v4344_v26  ;;  %v4197_v47 = vmul.f32 0.0078125, %v4183_v41  ;;  %v10133_v26 = vld [vmem:[%s14609_s16 + $0x10] ss:$8 sps:$4 sm:$0xff]  }
 0x57a   : > { %v10281_v2 = vpop.eup %10280  ;;  %v4357_v36 = vmul.f32 %v8929_v32, %v4343_v29 }
 0x57b   : > { %v10283_v49 = vpop.eup %10282  ;;  %v4346_v10 = vmul.f32 %v10281_v2, %v11847_v22  ;;  %v4372_v23 = vadd.f32 %v8930_v20, %v4358_v13 }
 0x57c   : > { %v4371_v33 = vadd.f32 %v8930_v20, %v4357_v36  ;;  %v4345_v54 = vmul.f32 %v10283_v49, %v11850_v53  ;;  %v10130_v53 = vld [vmem:[%s14609_s16] ss:$8 sps:$4 sm:$0xff]   ;;  %v4187_v12 = vpop.xlane.xlu1 %4186  ;;  %v4204_v36 = vadd.f32 1e-05, %v4196_v18  ;;  %v4185_v49 = vpop.xlane.xlu0 %4184 }
 0x57d   : > { %v4360_v21 = vmul.f32 %v8929_v32, %v4346_v10  ;;  %v10141_v10 = vld [vmem:[%s14609_s16 + $0x34] ss:$8 sps:$4 sm:$0xff]  }
 0x57e   : > { %v10285_v27 = vpop.eup %10284  ;;  %v4378_v19 = vpack.c.bf16 %v4371_v33, %v4370_v57  ;;  %v4359_v0 = vmul.f32 %v8929_v32, %v4345_v54  ;;  %v4199_v57 = vmul.f32 0.0078125, %v4187_v12  ;;  %v10136_v33 = vld [vmem:[%s14609_s16 + $0x20] ss:$8 sps:$4 sm:$0xff]  }
 0x57f   : > { %v10287_v1 = vpop.eup %10286  ;;  %v4348_v38 = vmul.f32 %v10285_v27, %v11855_v7  ;;  %v4374_v61 = vadd.f32 %v8930_v20, %v4360_v21  ;;  %v4205_v7 = vadd.f32 1e-05, %v4197_v47 }
 0x580   : > { %9734 = vmatprep.mubr.bf16.mxu0 %v4378_v19  ;;  %v4373_v52 = vadd.f32 %v8930_v20, %v4359_v0  ;;  %v4347_v46 = vmul.f32 %v10287_v1, %v11860_v37  ;;  %v4207_v27 = vadd.f32 1e-05, %v4199_v57  ;;  %v4191_v19 = vpop.xlane.xlu1 %4190  ;;  %v10144_v0 = vld [vmem:[%s14609_s16 + $0x44] ss:$8 sps:$4 sm:$0xff]   ;;  %v4189_v1 = vpop.xlane.xlu0 %4188 }
 0x581   : > { %v4362_v34 = vmul.f32 %v8929_v32, %v4348_v38  ;;  %10290 = vrsqrt.f32 %v4205_v7  ;;  %v4200_v21 = vmul.f32 0.0078125, %v4189_v1  ;;  %v10153_v7 = vld [vmem:[%s14609_s16 + $0x74] ss:$8 sps:$4 sm:$0xff]  }
 0x582   : > { %v4379_v22 = vpack.c.bf16 %v4373_v52, %v4372_v23  ;;  %v4361_v44 = vmul.f32 %v8929_v32, %v4347_v46  ;;  %10292 = vrsqrt.f32 %v4204_v36  ;;  %v4201_v23 = vmul.f32 0.0078125, %v4191_v19  ;;  %v10147_v52 = vld [vmem:[%s14609_s16 + $0x54] ss:$8 sps:$4 sm:$0xff]   ;;  %v8928_v36 = vld [vmem:[%s14611_s12] ss:$0 sm:$0xff] }
 0x583   : > { %v10289_v8 = vpop.eup %10288  ;;  %v4376_v13 = vadd.f32 %v8930_v20, %v4362_v34  ;;  %10294 = vrsqrt.f32 %v4207_v27 }
 0x584   : > { %9735 = vmatmul.mubr.bf16.vlgmr.msra.gmra.mrb[104].mxu0 %v4379_v22  ;;  %v4375_v55 = vadd.f32 %v8930_v20, %v4361_v44  ;;  %v4349_v37 = vmul.f32 %v10289_v8, %v11870_v9  ;;  %v4209_v47 = vadd.f32 1e-05, %v4201_v23  ;;  %v10150_v44 = vld [vmem:[%s14609_s16 + $0x64] ss:$8 sps:$4 sm:$0xff]   ;;  %v4208_v8 = vadd.f32 1e-05, %v4200_v21 }
 0x585   : > { %4608 = vmatpush1.bf16.msra.mxu0 %v10130_v53  ;;  %v10145_v53 = vld [vmem:[%s14609_s16 + $0x50] ss:$8 sps:$4 sm:$0xff]  }
 0x586   : > { %4609 = vmatprep.subr.bf16.mxu0 %v10135_v60  ;;  %v4380_v29 = vpack.c.bf16 %v4375_v55, %v4374_v61  ;;  %v4363_v2 = vmul.f32 %v8929_v32, %v4349_v37  ;;  %v4198_v32 = vmul.f32 0.0078125, %v4185_v49  ;;  %v4195_v60 = vpop.xlane.xlu1 %4194  ;;  %v4193_v61 = vpop.xlane.xlu0 %4192  ;;  %v8927_v55 = vld [vmem:[%s14610_s6] ss:$0 sm:$0xff]  ;;  %s824_s6 = sand.u32 1, %s10526_s4  }
 0x587   : > { %v4203_v37 = vmul.f32 0.0078125, %v4195_v60  ;;  %s8639_s2 = sshll.u32 %s824_s6, 6  ;;  %s14476_s11 = scalar_lea.sflag [#allocation3], %s824_s6 }
 0x588   : > { %9738 = vmatprep.mubr.bf16.mxu0 %v4380_v29  ;;  %v4377_v9 = vadd.f32 %v8930_v20, %v4363_v2  ;;  %v10139_v20 = vld [vmem:[%s14609_s16 + $0x30] ss:$8 sps:$4 sm:$0xff]   ;;  %v4206_v41 = vadd.f32 1e-05, %v4198_v32  ;;  %s14450_s0 = scalar_lea.vmem [#allocation2], %s8639_s2  ;;  %s10538_s2 = smov [#allocation2]  }
 0x589   : > { %4610 = vmatpush1.bf16.msra.mxu0 %v10133_v26  ;;  %v10151_v2 = vld [vmem:[%s14609_s16 + $0x70] ss:$8 sps:$4 sm:$0xff]   ;;  %s8561_s12 = sshll.u32 %s14450_s0, 4  ;;  %s10476_s5 = sshll.u32 %s10538_s2, 4  ;;  %s14470_s12 = int_to_ptr.vmem [resolvable:$true] %s8561_s12  ;;  %s10477_s5 = int_to_ptr.vmem [resolvable:$false] %s10476_s5 }
 0x58a   : > { %4611 = vmatprep.subr.bf16.mxu0 %v10138_v25  ;;  %v4381_v54 = vpack.c.bf16 %v4377_v9, %v4376_v13  ;;  %10296 = vrsqrt.f32 %v4206_v41  ;;  %v4211_v25 = vadd.f32 1e-05, %v4203_v37  ;;  %s10472_s9 = scalar_lea.vmem %s14470_s12, 1024  ;;  %s10478_s3 = scalar_lea.vmem %s10477_s5, 2048 }
 0x58b   : > { %v10291_v46 = vpop.eup %10290  ;;  %10298 = vrsqrt.f32 %v4209_v47  ;;  %p10473_p11 = scmp.ne.s32.totalorder %s14470_s12, %s10472_s9  ;;  %p10479_p0 = scmp.lt.s32.totalorder %s14470_s12, %s10477_s5 }
 0x58c   : > { %9739 = vmatmul.mubr.bf16.gmra.mrb[108].mxu0 %v4381_v54  ;;  %v10293_v38 = vpop.eup %10292  ;;  %v4221_v22 = vmul.f32 %v10291_v46, %v11883_v62  ;;  %v10148_v62 = vld [vmem:[%s14609_s16 + $0x60] ss:$8 sps:$4 sm:$0xff]   ;;  %10300 = vrsqrt.f32 %v4208_v8  ;;  %p10480_p1 = scmp.lt.s32.totalorder %s10478_s3, %s10472_s9 }
 0x58d   : > { %4612 = vmatpush1.bf16.msra.mxu0 %v10136_v33  ;;  %4639 = vmatprep.mubr.bf16.mxu0 %v14553_v4  ;;  %v4220_v18 = vmul.f32 %v10293_v38, %v11865_v56  ;;  %v10295_v26 = vpop.eup %10294  ;;  %v4202_v56 = vmul.f32 0.0078125, %v4193_v61  ;;  %10302 = vrsqrt.f32 %v4211_v25  ;;  %p10474_p12 = pnand %p10473_p11, %p10719_p5 }
 0x58e   : > { %4613 = vmatprep.subr.bf16.mxu0 %v10141_v10  ;;  %v4235_v34 = vmul.f32 %v8927_v55, %v4221_v22  ;;  %v4223_v13 = vmul.f32 %v10295_v26, %v11896_v11  ;;  %p10481_p2 = por %p10480_p1, %p10479_p0 }
 0x58f   : > { %v4234_v12 = vmul.f32 %v8927_v55, %v4220_v18  ;;  %v4210_v9 = vadd.f32 1e-05, %v4202_v56  ;;  %p10475_p13 = pneg %p10474_p12 }
 0x590   : > { %v4249_v49 = vadd.f32 %v8928_v36, %v4235_v34  ;;  %v4237_v10 = vmul.f32 %v8927_v55, %v4223_v13 }
 0x591   : > { %4614 = vmatpush1.bf16.msra.mxu0 %v10139_v20  ;;  %v4248_v57 = vadd.f32 %v8928_v36, %v4234_v12  ;;  %10304 = vrsqrt.f32 %v4210_v9  ;;  %p10482_p3 = pnand %p10481_p2, %p10475_p13 }
 0x592   : > { %4615 = vmatprep.subr.bf16.mxu0 %v10144_v0  ;;  %v4251_v19 = vadd.f32 %v8928_v36, %v4237_v10 }
 0x593   : > { %v4256_v54 = vpack.c.bf16 %v4249_v49, %v4248_v57 }
 0x594   : > { %v10297_v29 = vpop.eup %10296 }
 0x595   : > { %4616 = vmatpush1.bf16.msra.mxu0 %v10142_v50  ;;  %v4222_v33 = vmul.f32 %v10297_v29, %v11875_v48  ;;  %v10299_v32 = vpop.eup %10298 }
 0x596   : > { %4617 = vmatprep.subr.bf16.mxu0 %v10147_v52  ;;  %v10301_v20 = vpop.eup %10300  ;;  %v4225_v0 = vmul.f32 %v10299_v32, %v11909_v24 }
 0x597   : > { %v4236_v27 = vmul.f32 %v8927_v55, %v4222_v33  ;;  %v4224_v11 = vmul.f32 %v10301_v20, %v11888_v16  ;;  %v10303_v48 = vpop.eup %10302 }
 0x598   : > { %v4239_v23 = vmul.f32 %v8927_v55, %v4225_v0  ;;  %v4227_v21 = vmul.f32 %v10303_v48, %v11919_v6 }
 0x599   : > { %4618 = vmatpush1.bf16.msra.mxu0 %v10145_v53  ;;  %v4250_v41 = vadd.f32 %v8928_v36, %v4236_v27  ;;  %v4238_v50 = vmul.f32 %v8927_v55, %v4224_v11 }
 0x59a   : > { %4619 = vmatprep.subr.bf16.mxu0 %v10150_v44  ;;  %v4253_v46 = vadd.f32 %v8928_v36, %v4239_v23  ;;  %v4241_v22 = vmul.f32 %v8927_v55, %v4227_v21 }
 0x59b   : > { %v4257_v1 = vpack.c.bf16 %v4251_v19, %v4250_v41  ;;  %v10305_v52 = vpop.eup %10304  ;;  %v4252_v38 = vadd.f32 %v8928_v36, %v4238_v50 }
 0x59c   : > { %v4226_v47 = vmul.f32 %v10305_v52, %v11901_v43  ;;  %v4255_v16 = vadd.f32 %v8928_v36, %v4241_v22 }
 0x59d   : > { %4620 = vmatpush1.bf16.msra.mxu0 %v10148_v62  ;;  %v4258_v53 = vpack.c.bf16 %v4253_v46, %v4252_v38 }
 0x59e   : > { %4621 = vmatprep.subr.bf16.mxu0 %v10153_v7  ;;  %v4240_v24 = vmul.f32 %v8927_v55, %v4226_v47 }
 0x5a0   : > { %v4254_v60 = vadd.f32 %v8928_v36, %v4240_v24 }
 0x5a1   : > { %4622 = vmatpush1.bf16.msra.mxu0 %v10151_v2 }
 0x5a2   : > { %v4259_v44 = vpack.c.bf16 %v4255_v16, %v4254_v60 }
 0x5a4   : > { %4640 = vmatmul.mubr.bf16.vlgmr.msra.gmra.mrb[112].mxu0 %v4256_v54 }
 0x5a5   : > { %4649 = vmatprep.mubr.bf16.mxu0 %v14553_v4 }
 0x5ac   : > { %4650 = vmatmul.mubr.bf16.gmra.mrb[116].mxu0 %v4257_v1 }
 0x5ad   : > { %4659 = vmatprep.mubr.bf16.mxu0 %v14553_v4 }
 0x5b4   : > { %4660 = vmatmul.mubr.bf16.gmra.mrb[120].mxu0 %v4258_v53 }
 0x5b5   : > { %4669 = vmatprep.mubr.bf16.mxu0 %v14553_v4 }
 0x5bc   : > { %4670 = vmatmul.mubr.bf16.gmra.mrb[124].mxu0 %v4259_v44 }
 0x657   : > { %v9736_v8 = vpop.f32.mrb[104].mxu0 }
 0x658   : > { %v4480_v18 = vpop.f32.mrb[105].mxu0 }
 0x659   : > { %v9737_v61 = vpop.f32.mrb[106].mxu0 }
 0x65a   : > { %v4689_v37 = vpack.c.bf16 %v9737_v61, %v9736_v8  ;;  %v4483_v62 = vpop.f32.mrb[107].mxu0 }
 0x65b   : > { %v4688_v34 = vpack.c.bf16 %v4483_v62, %v4480_v18 }
 0x65d   : > { %9750 = vmatprep.mubr.bf16.mxu0 %v4688_v34 }
 0x65f   : > { %v9740_v6 = vpop.f32.mrb[108].mxu0 }
 0x660   : > { %v4496_v7 = vpop.f32.mrb[109].mxu0 }
 0x661   : > { %v9741_v43 = vpop.f32.mrb[110].mxu0 }
 0x662   : > { %v4691_v26 = vpack.c.bf16 %v9741_v43, %v9740_v6  ;;  %v4499_v56 = vpop.f32.mrb[111].mxu0 }
 0x663   : > { %v4690_v12 = vpack.c.bf16 %v4499_v56, %v4496_v7 }
 0x677   : > { %v4641_v55 = vpop.f32.mrb[112].mxu0 }
 0x678   : > { %v4643_v29 = vpop.f32.mrb[113].mxu0 }
 0x679   : > { %v4645_v25 = vpop.f32.mrb[114].mxu0 }
 0x67a   : > { %v4680_v2 = vpack.c.bf16 %v4645_v25, %v4641_v55  ;;  %v4647_v36 = vpop.f32.mrb[115].mxu0 }
 0x67b   : > { %v4684_v49 = vpack.c.bf16 %v4647_v36, %v4643_v29 }
 0x67c   : > { %9742 = vmatprep.subr.bf16.mxu0 %v4680_v2 }
 0x67d   : > { %9743 = vmatpush3.bf16.xpose.msra.mxu0 %v4680_v2 }
 0x67f   : > { %v4651_v13 = vpop.f32.mrb[116].mxu0 }
 0x680   : > { %v4653_v9 = vpop.f32.mrb[117].mxu0 }
 0x681   : > { %v4655_v57 = vpop.f32.mrb[118].mxu0 }
 0x682   : > { %v4681_v33 = vpack.c.bf16 %v4655_v57, %v4651_v13  ;;  %v4657_v54 = vpop.f32.mrb[119].mxu0 }
 0x683   : > { %v4685_v10 = vpack.c.bf16 %v4657_v54, %v4653_v9 }
 0x684   : > { %9744 = vmatprep.subr.bf16.mxu0 %v4681_v33 }
 0x685   : > { %9745 = vmatpush3.bf16.xpose.msra.mxu0 %v4681_v33 }
 0x687   : > { %v4661_v32 = vpop.f32.mrb[120].mxu0 }
 0x688   : > { %v4663_v27 = vpop.f32.mrb[121].mxu0 }
 0x689   : > { %v4665_v20 = vpop.f32.mrb[122].mxu0 }
 0x68a   : > { %v4682_v19 = vpack.c.bf16 %v4665_v20, %v4661_v32  ;;  %v4667_v0 = vpop.f32.mrb[123].mxu0 }
 0x68b   : > { %v4686_v41 = vpack.c.bf16 %v4667_v0, %v4663_v27 }
 0x68c   : > { %9746 = vmatprep.subr.bf16.mxu0 %v4682_v19 }
 0x68d   : > { %9747 = vmatpush3.bf16.xpose.msra.mxu0 %v4682_v19 }
 0x68f   : > { %v4671_v11 = vpop.f32.mrb[124].mxu0 }
 0x690   : > { %v4673_v1 = vpop.f32.mrb[125].mxu0 }
 0x691   : > { %v4675_v23 = vpop.f32.mrb[126].mxu0 }
 0x692   : > { %v4683_v48 = vpack.c.bf16 %v4675_v23, %v4671_v11  ;;  %v4677_v50 = vpop.f32.mrb[127].mxu0 }
 0x693   : > { %v4687_v52 = vpack.c.bf16 %v4677_v50, %v4673_v1 }
 0x694   : > { %9748 = vmatprep.subr.bf16.mxu0 %v4683_v48 }
 0x695   : > { %9749 = vmatpush3.bf16.xpose.msra.mxu0 %v4683_v48 }
 0x696   : > { %9758 = vmatprep.subr.bf16.mxu0 %v4684_v49 }
 0x69c   : > { %9751 = vmatmul.mubr.bf16.vlgmr.msra.gmra.mrb[128].mxu0 %v4689_v37 }
 0x69d   : > { %9754 = vmatprep.mubr.bf16.mxu0 %v4690_v12  ;;  %9759 = vmatpush3.bf16.msra.mxu0 %v4684_v49 }
 0x69e   : > { %9760 = vmatprep.subr.bf16.mxu0 %v4685_v10 }
 0x6a1   : > { %9761 = vmatpush3.bf16.msra.mxu0 %v4685_v10 }
 0x6a2   : > { %9762 = vmatprep.subr.bf16.mxu0 %v4686_v41 }
 0x6a4   : > { %9755 = vmatmul.mubr.bf16.gmra.mrb[132].mxu0 %v4691_v26 }
 0x6a5   : > { %9763 = vmatpush3.bf16.msra.mxu0 %v4686_v41 }
 0x6a6   : > { %9764 = vmatprep.subr.bf16.mxu0 %v4687_v52 }
 0x6a9   : > { %9765 = vmatpush3.bf16.msra.mxu0 %v4687_v52 }
 0x76f   : > { %v9752_v46 = vpop.f32.mrb[128].mxu0 }
 0x770   : > { %v4726_v21 = vpop.f32.mrb[129].mxu0  ;;  %v4759_v22 = vmul.f32 0.088388346, %v9752_v46 }
 0x771   : > { %v4757_v38 = vmul.f32 0.088388346, %v4726_v21  ;;  %v9753_v47 = vpop.f32.mrb[130].mxu0 }
 0x772   : > { %v4729_v53 = vpop.f32.mrb[131].mxu0  ;;  %v4760_v60 = vmul.f32 0.088388346, %v9753_v47  ;;  %v4771_v18 = vsel %vm1384_vm2, %v4759_v22, -inf }
 0x773   : > { %v4758_v24 = vmul.f32 0.088388346, %v4729_v53  ;;  %v4765_v16 = vsel %vm1384_vm2, %v4757_v38, -inf }
 0x774   : > { %4766 = vmax.xlane.f32.xlu0 %v4765_v16  ;;  %v4774_v34 = vsel %vm1384_vm2, %v4760_v60, -inf }
 0x775   : > { %v4768_v44 = vsel %vm1384_vm2, %v4758_v24, -inf }
 0x776   : > { %4769 = vmax.xlane.f32.xlu1 %v4768_v44 }
 0x777   : > { %v9756_v8 = vpop.f32.mrb[132].mxu0 }
 0x778   : > { %4772 = vmax.xlane.f32.xlu0 %v4771_v18  ;;  %v4742_v61 = vpop.f32.mrb[133].mxu0  ;;  %v4763_v7 = vmul.f32 0.088388346, %v9756_v8 }
 0x779   : > { %v4761_v37 = vmul.f32 0.088388346, %v4742_v61  ;;  %v9757_v62 = vpop.f32.mrb[134].mxu0 }
 0x77a   : > { %4775 = vmax.xlane.f32.xlu1 %v4774_v34  ;;  %v4745_v6 = vpop.f32.mrb[135].mxu0  ;;  %v4764_v56 = vmul.f32 0.088388346, %v9757_v62  ;;  %v4783_v55 = vsel %vm1384_vm2, %v4763_v7, -inf }
 0x77b   : > { %v4762_v43 = vmul.f32 0.088388346, %v4745_v6  ;;  %v4777_v26 = vsel %vm1384_vm2, %v4761_v37, -inf }
 0x77c   : > { %4778 = vmax.xlane.f32.xlu0 %v4777_v26  ;;  %v4786_v29 = vsel %vm1384_vm2, %v4764_v56, -inf }
 0x77d   : > { %v4780_v12 = vsel %vm1384_vm2, %v4762_v43, -inf }
 0x77e   : > { %4781 = vmax.xlane.f32.xlu1 %v4780_v12 }
 0x780   : > { %4784 = vmax.xlane.f32.xlu0 %v4783_v55 }
 0x782   : > { %4787 = vmax.xlane.f32.xlu1 %v4786_v29 }
 0x801   : > { %v4767_v25 = vpop.xlane.xlu0 %4766 }
 0x802   : > { %v4789_v2 = vsub.f32 %v4757_v38, %v4767_v25 }
 0x803   : > { %v4770_v36 = vpop.xlane.xlu1 %4769 }
 0x804   : > { %v4797_v49 = vmul.f32 1.442695, %v4789_v2  ;;  %v4790_v13 = vsub.f32 %v4758_v24, %v4770_v36 }
 0x805   : > { %v4773_v9 = vpop.xlane.xlu0 %4772 }
 0x806   : > { %10306 = vpow2.f32 %v4797_v49  ;;  %v4799_v57 = vmul.f32 1.442695, %v4790_v13  ;;  %v4791_v33 = vsub.f32 %v4759_v22, %v4773_v9 }
 0x807   : > { %v4776_v54 = vpop.xlane.xlu1 %4775 }
 0x808   : > { %10308 = vpow2.f32 %v4799_v57  ;;  %v4801_v10 = vmul.f32 1.442695, %v4791_v33  ;;  %v4792_v32 = vsub.f32 %v4760_v60, %v4776_v54 }
 0x809   : > { %v4779_v27 = vpop.xlane.xlu0 %4778 }
 0x80a   : > { %10310 = vpow2.f32 %v4801_v10  ;;  %v4803_v20 = vmul.f32 1.442695, %v4792_v32  ;;  %v4793_v19 = vsub.f32 %v4761_v37, %v4779_v27 }
 0x80b   : > { %v4782_v0 = vpop.xlane.xlu1 %4781 }
 0x80c   : > { %10312 = vpow2.f32 %v4803_v20  ;;  %v4805_v41 = vmul.f32 1.442695, %v4793_v19  ;;  %v4794_v11 = vsub.f32 %v4762_v43, %v4782_v0  ;;  %v10154_v43 = vld [vmem:[%s14534_s17] sm:$0xff]   ;;  %v10155_v0 = vld [vmem:[%s14534_s17 + $0x8] sm:$0xff]  }
 0x80d   : > { %v4785_v1 = vpop.xlane.xlu0 %4784  ;;  %9774 = vmatprep.subr.bf16.mxu0 %v10154_v43 }
 0x80e   : > { %10314 = vpow2.f32 %v4805_v41  ;;  %v4807_v23 = vmul.f32 1.442695, %v4794_v11  ;;  %v4795_v48 = vsub.f32 %v4763_v7, %v4785_v1 }
 0x80f   : > { %v4788_v50 = vpop.xlane.xlu1 %4787 }
 0x810   : > { %v10307_v52 = vpop.eup %10306  ;;  %10316 = vpow2.f32 %v4807_v23  ;;  %v4809_v46 = vmul.f32 1.442695, %v4795_v48  ;;  %v4796_v21 = vsub.f32 %v4764_v56, %v4788_v50  ;;  %v10156_v50 = vld [vmem:[%s14534_s17 + $0x10] sm:$0xff]  }
 0x811   : > { %v4813_v38 = vsel %vm1384_vm2, %v10307_v52, 0.0 }
 0x812   : > { %v10309_v47 = vpop.eup %10308  ;;  %10318 = vpow2.f32 %v4809_v46  ;;  %v4811_v53 = vmul.f32 1.442695, %v4796_v21  ;;  %4814 = vadd.xlane.f32.xlu0 %v4813_v38 }
 0x813   : > { %v4816_v22 = vsel %vm1384_vm2, %v10309_v47, 0.0 }
 0x814   : > { %v10311_v24 = vpop.eup %10310  ;;  %10320 = vpow2.f32 %v4811_v53  ;;  %4817 = vadd.xlane.f32.xlu1 %v4816_v22  ;;  %v10158_v53 = vld [vmem:[%s14534_s17 + $0x20] sm:$0xff]   ;;  %v10159_v22 = vld [vmem:[%s14534_s17 + $0x28] sm:$0xff]  }
 0x815   : > { %v4819_v16 = vsel %vm1384_vm2, %v10311_v24, 0.0 }
 0x816   : > { %v10313_v60 = vpop.eup %10312  ;;  %4820 = vadd.xlane.f32.xlu0 %v4819_v16  ;;  %v10161_v16 = vld [vmem:[%s14534_s17 + $0x38] sm:$0xff]  }
 0x817   : > { %v4822_v44 = vsel %vm1384_vm2, %v10313_v60, 0.0 }
 0x818   : > { %v10315_v8 = vpop.eup %10314  ;;  %4823 = vadd.xlane.f32.xlu1 %v4822_v44 }
 0x819   : > { %v4825_v18 = vsel %vm1384_vm2, %v10315_v8, 0.0 }
 0x81a   : > { %v10317_v61 = vpop.eup %10316  ;;  %4826 = vadd.xlane.f32.xlu0 %v4825_v18 }
 0x81b   : > { %v4828_v37 = vsel %vm1384_vm2, %v10317_v61, 0.0 }
 0x81c   : > { %v10319_v62 = vpop.eup %10318  ;;  %4829 = vadd.xlane.f32.xlu1 %v4828_v37 }
 0x81d   : > { %v4831_v34 = vsel %vm1384_vm2, %v10319_v62, 0.0 }
 0x81e   : > { %v10321_v6 = vpop.eup %10320  ;;  %4832 = vadd.xlane.f32.xlu0 %v4831_v34 }
 0x81f   : > { %v4834_v7 = vsel %vm1384_vm2, %v10321_v6, 0.0 }
 0x820   : > { %4835 = vadd.xlane.f32.xlu1 %v4834_v7 }
 0x89f   : > { %v4815_v26 = vpop.xlane.xlu0 %4814 }
 0x8a0   : > { %10322 = vrcp.f32 %v4815_v26 }
 0x8a1   : > { %v4818_v56 = vpop.xlane.xlu1 %4817 }
 0x8a2   : > { %10324 = vrcp.f32 %v4818_v56  ;;  %v8959_v56 = vld [vmem:[%s14535_s18] ss:$0 sm:$0xff] }
 0x8a3   : > { %v4821_v12 = vpop.xlane.xlu0 %4820 }
 0x8a4   : > { %10326 = vrcp.f32 %v4821_v12 }
 0x8a5   : > { %v4824_v55 = vpop.xlane.xlu1 %4823 }
 0x8a6   : > { %10328 = vrcp.f32 %v4824_v55 }
 0x8a7   : > { %v4827_v29 = vpop.xlane.xlu0 %4826 }
 0x8a8   : > { %10330 = vrcp.f32 %v4827_v29 }
 0x8a9   : > { %v4830_v25 = vpop.xlane.xlu1 %4829 }
 0x8aa   : > { %v10323_v2 = vpop.eup %10322  ;;  %10332 = vrcp.f32 %v4830_v25  ;;  %v5074_v25 = vadd.f32 %v11745_v39, %v11793_v28  ;;  %v5077_v39 = vadd.f32 %v11771_v17, %v11813_v45  ;;  %v5079_v17 = vadd.f32 %v11784_v42, %v11821_v63  ;;  %v10164_v42 = vld [vmem:[%s14536_s19 + $0x4] ss:$16 sps:$4 sm:$0xff]  }
 0x8ab   : > { %v4833_v36 = vpop.xlane.xlu0 %4832  ;;  %v4845_v9 = vmul.f32 %v10323_v2, %v10307_v52  ;;  %v5080_v45 = vadd.f32 %v11780_v35, %v11818_v3  ;;  %v10162_v35 = vld [vmem:[%s14536_s19] ss:$16 sps:$4 sm:$0xff]   ;;  %v10167_v3 = vld [vmem:[%s14536_s19 + $0xc] ss:$16 sps:$4 sm:$0xff]   ;;  %v10170_v63 = vld [vmem:[%s14536_s19 + $0x24] ss:$16 sps:$4 sm:$0xff]   ;;  %5412 = vmatprep.subr.bf16.mxu1 %v10164_v42 }
 0x8ac   : > { %v10325_v49 = vpop.eup %10324  ;;  %10334 = vrcp.f32 %v4833_v36  ;;  %5413 = vmatpush1.bf16.msra.mxu1 %v10162_v35  ;;  %v10192_v35 = vld [vmem:[%s14536_s19 + $0xa0] ss:$16 sps:$4 sm:$0xff]   ;;  %v10195_v42 = vld [vmem:[%s14536_s19 + $0xa8] ss:$16 sps:$4 sm:$0xff]  }
 0x8ad   : > { %v4836_v13 = vpop.xlane.xlu1 %4835  ;;  %v4846_v57 = vmul.f32 %v10325_v49, %v10309_v47  ;;  %v10157_v47 = vld [vmem:[%s14534_s17 + $0x18] sm:$0xff]   ;;  %5414 = vmatprep.subr.bf16.mxu1 %v10170_v63  ;;  %v10198_v63 = vld [vmem:[%s14536_s19 + $0xc0] ss:$16 sps:$4 sm:$0xff]  }
 0x8ae   : > { %v10327_v33 = vpop.eup %10326  ;;  %10336 = vrcp.f32 %v4836_v13 }
 0x8af   : > { %v4853_v54 = vpack.c.bf16 %v4846_v57, %v4845_v9  ;;  %v4847_v32 = vmul.f32 %v10327_v33, %v10311_v24  ;;  %v10160_v24 = vld [vmem:[%s14534_s17 + $0x30] sm:$0xff]   ;;  %v5075_v57 = vadd.f32 %v11757_v59, %v11805_v30  ;;  %v5076_v33 = vadd.f32 %v11753_v51, %v11802_v15 }
 0x8b0   : > { %v10329_v10 = vpop.eup %10328  ;;  %v5078_v51 = vadd.f32 %v11764_v14, %v11810_v31  ;;  %v5081_v31 = vadd.f32 %v11797_v58, %v11825_v40  ;;  %v10165_v58 = vld [vmem:[%s14536_s19 + $0x8] ss:$16 sps:$4 sm:$0xff]   ;;  %v10173_v40 = vld [vmem:[%s14536_s19 + $0x2c] ss:$16 sps:$4 sm:$0xff]  }
 0x8b1   : > { %v4848_v27 = vmul.f32 %v10329_v10, %v10313_v60  ;;  %9766 = vmatprep.mubr.msk.bf16.mxu0 %vm1384_vm2, %v4853_v54 }
 0x8b2   : > { %v10331_v20 = vpop.eup %10330 }
 0x8b3   : > { %v4854_v19 = vpack.c.bf16 %v4848_v27, %v4847_v32  ;;  %v4849_v11 = vmul.f32 %v10331_v20, %v10315_v8 }
 0x8b4   : > { %v10333_v41 = vpop.eup %10332 }
 0x8b5   : > { %9767 = vmatmul.mubr.msk.bf16.vlgmr.msra.gmra.mrb[136].mxu0 %vm1384_vm2, %v4854_v19  ;;  %v4850_v1 = vmul.f32 %v10333_v41, %v10317_v61 }
 0x8b6   : > { %v10335_v23 = vpop.eup %10334  ;;  %9775 = vmatpush3.bf16.msra.mxu0 %v10154_v43 }
 0x8b7   : > { %v4855_v48 = vpack.c.bf16 %v4850_v1, %v4849_v11  ;;  %9776 = vmatprep.subr.bf16.mxu0 %v10155_v0  ;;  %v4851_v46 = vmul.f32 %v10335_v23, %v10319_v62 }
 0x8b8   : > { %v10337_v52 = vpop.eup %10336 }
 0x8b9   : > { %9770 = vmatprep.mubr.msk.bf16.mxu0 %vm1384_vm2, %v4855_v48  ;;  %v4852_v21 = vmul.f32 %v10337_v52, %v10321_v6  ;;  %v10168_v48 = vld [vmem:[%s14536_s19 + $0x20] ss:$16 sps:$4 sm:$0xff]  }
 0x8ba   : > { %9777 = vmatpush3.bf16.msra.mxu0 %v10155_v0  ;;  %5415 = vmatpush1.bf16.msra.mxu1 %v10168_v48  ;;  %v10204_v48 = vld [vmem:[%s14536_s19 + $0xe0] ss:$16 sps:$4 sm:$0xff]  }
 0x8bb   : > { %v4856_v38 = vpack.c.bf16 %v4852_v21, %v4851_v46  ;;  %9778 = vmatprep.subr.bf16.mxu0 %v10156_v50 }
 0x8bd   : > { %9771 = vmatmul.mubr.msk.bf16.gmra.mrb[140].mxu0 %vm1384_vm2, %v4856_v38 }
 0x8be   : > { %9779 = vmatpush3.bf16.msra.mxu0 %v10156_v50  ;;  %v10171_v50 = vld [vmem:[%s14536_s19 + $0x28] ss:$16 sps:$4 sm:$0xff]  }
 0x8bf   : > { %9780 = vmatprep.subr.bf16.mxu0 %v10157_v47 }
 0x8c2   : > { %9781 = vmatpush3.bf16.msra.mxu0 %v10157_v47 }
 0x8c3   : > { %9782 = vmatprep.subr.bf16.mxu0 %v10158_v53 }
 0x8c6   : > { %9783 = vmatpush3.bf16.msra.mxu0 %v10158_v53 }
 0x8c7   : > { %9784 = vmatprep.subr.bf16.mxu0 %v10159_v22 }
 0x8ca   : > { %9785 = vmatpush3.bf16.msra.mxu0 %v10159_v22 }
 0x8cb   : > { %9786 = vmatprep.subr.bf16.mxu0 %v10160_v24 }
 0x8ce   : > { %9787 = vmatpush3.bf16.msra.mxu0 %v10160_v24 }
 0x8cf   : > { %9788 = vmatprep.subr.bf16.mxu0 %v10161_v16 }
 0x8d2   : > { %9789 = vmatpush3.bf16.msra.mxu0 %v10161_v16 }
 0x8d3   : > { %5485 = vmatprep.subr.bf16.mxu0 %v10167_v3  ;;  %v10203_v3 = vld [vmem:[%s14536_s19 + $0xcc] ss:$16 sps:$4 sm:$0xff]  }
 0x988   : > { %v9768_v60 = vpop.f32.mrb[136].mxu0 }
 0x989   : > { %v4903_v44 = vpop.f32.mrb[137].mxu0 }
 0x98a   : > { %v9769_v8 = vpop.f32.mrb[138].mxu0 }
 0x98b   : > { %v4935_v18 = vpack.c.bf16 %v9769_v8, %v9768_v60  ;;  %v4906_v61 = vpop.f32.mrb[139].mxu0 }
 0x98c   : > { %v4934_v37 = vpack.c.bf16 %v4906_v61, %v4903_v44 }
 0x98e   : > { %9790 = vmatprep.mubr.bf16.mxu0 %v4934_v37 }
 0x98f   : > { %9791 = vmatmul.mubr.bf16.vlgmr.msra.gmra.mrb[144].mxu0 %v4935_v18 }
 0x990   : > { %v9772_v62 = vpop.f32.mrb[140].mxu0  ;;  %5486 = vmatpush1.bf16.msra.mxu0 %v10165_v58  ;;  %v10200_v58 = vld [vmem:[%s14536_s19 + $0xc4] ss:$16 sps:$4 sm:$0xff]  }
 0x991   : > { %v4919_v34 = vpop.f32.mrb[141].mxu0  ;;  %5487 = vmatprep.subr.bf16.mxu0 %v10173_v40  ;;  %v10201_v40 = vld [vmem:[%s14536_s19 + $0xc8] ss:$16 sps:$4 sm:$0xff]  }
 0x992   : > { %v9773_v6 = vpop.f32.mrb[142].mxu0 }
 0x993   : > { %v4937_v7 = vpack.c.bf16 %v9773_v6, %v9772_v62  ;;  %v4922_v43 = vpop.f32.mrb[143].mxu0 }
 0x994   : > { %v4936_v26 = vpack.c.bf16 %v4922_v43, %v4919_v34  ;;  %5488 = vmatpush1.bf16.msra.mxu0 %v10171_v50  ;;  %v10206_v50 = vld [vmem:[%s14536_s19 + $0xe4] ss:$16 sps:$4 sm:$0xff]  }
 0x996   : > { %9794 = vmatprep.mubr.bf16.mxu0 %v4936_v26 }
 0x997   : > { %9795 = vmatmul.mubr.bf16.gmra.mrb[148].mxu0 %v4937_v7 }
 0x998   : > { %5517 = vmatprep.mubr.bf16.mxu0 %v14553_v4 }
 0xa62   : > { %v9792_v12 = vpop.f32.mrb[144].mxu0 }
 0xa63   : > { %v5043_v55 = vpop.f32.mrb[145].mxu0  ;;  %v5052_v49 = vadd.f32 %v9792_v12, %v8959_v56 }
 0xa64   : > { %v5044_v29 = vadd.f32 %v8959_v56, %v5043_v55  ;;  %v9793_v2 = vpop.f32.mrb[146].mxu0 }
 0xa65   : > { %v5046_v36 = vpop.f32.mrb[147].mxu0  ;;  %v5055_v54 = vadd.f32 %v9793_v2, %v8959_v56  ;;  %v12071_v32 = vadd.f32 %v5076_v33, %v5052_v49 }
 0xa66   : > { %v12062_v13 = vadd.f32 %v5074_v25, %v5044_v29  ;;  %v5047_v9 = vadd.f32 %v8959_v56, %v5046_v36 }
 0xa67   : > { %14614 = vst [vmem:[#allocation11_spill] sm:$0xff] %v12071_v32  ;;  %v12076_v20 = vadd.f32 %v5077_v39, %v5055_v54  ;;  %v10176_v54 = vld [vmem:[%s14536_s19 + $0x44] ss:$16 sps:$4 sm:$0xff]   ;;  %v10179_v39 = vld [vmem:[%s14536_s19 + $0x4c] ss:$16 sps:$4 sm:$0xff]  }
 0xa68   : > { %14612 = vst [vmem:[#allocation9_spill] sm:$0xff] %v12062_v13  ;;  %v12068_v10 = vadd.f32 %v5075_v57, %v5047_v9  ;;  %5090 = vadd.xlane.f32.xlu0 %v12062_v13  ;;  %5416 = vmatprep.subr.bf16.mxu1 %v10176_v54 }
 0xa69   : > { %14615 = vst [vmem:[#allocation12_spill] sm:$0xff] %v12076_v20  ;;  %5489 = vmatprep.subr.bf16.mxu0 %v10179_v39 }
 0xa6a   : > { %14613 = vst [vmem:[#allocation10_spill] sm:$0xff] %v12068_v10  ;;  %5092 = vadd.xlane.f32.xlu1 %v12068_v10  ;;  %v9796_v28 = vpop.f32.mrb[148].mxu0 }
 0xa6b   : > { %v5059_v27 = vpop.f32.mrb[149].mxu0  ;;  %v5068_v19 = vadd.f32 %v9796_v28, %v8959_v56  ;;  %v10174_v28 = vld [vmem:[%s14536_s19 + $0x40] ss:$16 sps:$4 sm:$0xff]  }
 0xa6c   : > { %v5060_v59 = vadd.f32 %v8959_v56, %v5059_v27  ;;  %5094 = vadd.xlane.f32.xlu0 %v12071_v32  ;;  %v9797_v15 = vpop.f32.mrb[150].mxu0  ;;  %v10177_v27 = vld [vmem:[%s14536_s19 + $0x48] ss:$16 sps:$4 sm:$0xff]   ;;  %5417 = vmatpush1.bf16.msra.mxu1 %v10174_v28 }
 0xa6d   : > { %v5062_v30 = vpop.f32.mrb[151].mxu0  ;;  %v5071_v11 = vadd.f32 %v9797_v15, %v8959_v56  ;;  %v12091_v14 = vadd.f32 %v5080_v45, %v5068_v19  ;;  %5490 = vmatpush1.bf16.msra.mxu0 %v10177_v27  ;;  %v10180_v15 = vld [vmem:[%s14536_s19 + $0x60] ss:$16 sps:$4 sm:$0xff]   ;;  %v10188_v19 = vld [vmem:[%s14536_s19 + $0x84] ss:$16 sps:$4 sm:$0xff]  }
 0xa6e   : > { %v12081_v0 = vadd.f32 %v5078_v51, %v5060_v59  ;;  %v5063_v41 = vadd.f32 %v8959_v56, %v5062_v30  ;;  %5096 = vadd.xlane.f32.xlu1 %v12076_v20  ;;  %v10182_v59 = vld [vmem:[%s14536_s19 + $0x64] ss:$16 sps:$4 sm:$0xff]   ;;  %v10185_v51 = vld [vmem:[%s14536_s19 + $0x6c] ss:$16 sps:$4 sm:$0xff]   ;;  %v10183_v30 = vld [vmem:[%s14536_s19 + $0x68] ss:$16 sps:$4 sm:$0xff]  }
 0xa6f   : > { %14618 = vst [vmem:[#allocation15_spill] sm:$0xff] %v12091_v14  ;;  %v12096_v23 = vadd.f32 %v5081_v31, %v5071_v11  ;;  %5418 = vmatprep.subr.bf16.mxu1 %v10182_v59  ;;  %5491 = vmatprep.subr.bf16.mxu0 %v10185_v51  ;;  %v10189_v45 = vld [vmem:[%s14536_s19 + $0x88] ss:$16 sps:$4 sm:$0xff]   ;;  %v10194_v11 = vld [vmem:[%s14536_s19 + $0xa4] ss:$16 sps:$4 sm:$0xff]  }
 0xa70   : > { %14616 = vst [vmem:[#allocation13_spill] sm:$0xff] %v12081_v0  ;;  %v12088_v1 = vadd.f32 %v5079_v17, %v5063_v41  ;;  %5098 = vadd.xlane.f32.xlu0 %v12081_v0  ;;  %5419 = vmatpush1.bf16.msra.mxu1 %v10180_v15  ;;  %v10191_v41 = vld [vmem:[%s14536_s19 + $0x8c] ss:$16 sps:$4 sm:$0xff]   ;;  %v10186_v17 = vld [vmem:[%s14536_s19 + $0x80] ss:$16 sps:$4 sm:$0xff]  }
 0xa71   : > { %14619 = vst [vmem:[#allocation16_spill] sm:$0xff] %v12096_v23  ;;  %5492 = vmatpush1.bf16.msra.mxu0 %v10183_v30  ;;  %5420 = vmatprep.subr.bf16.mxu1 %v10188_v19  ;;  %v10197_v31 = vld [vmem:[%s14536_s19 + $0xac] ss:$16 sps:$4 sm:$0xff]   ;;  %v10434_v27 = vld [vmem:[%s14530_s13] ss:$0 sm:$0xff] }
 0xa72   : > { %14617 = vst [vmem:[#allocation14_spill] sm:$0xff] %v12088_v1  ;;  %5100 = vadd.xlane.f32.xlu1 %v12088_v1  ;;  %5493 = vmatprep.subr.bf16.mxu0 %v10191_v41 }
 0xa74   : > { %5102 = vadd.xlane.f32.xlu0 %v12091_v14  ;;  %5421 = vmatpush1.bf16.msra.mxu1 %v10186_v17 }
 0xa75   : > { %5494 = vmatpush1.bf16.msra.mxu0 %v10189_v45  ;;  %5422 = vmatprep.subr.bf16.mxu1 %v10194_v11  ;;  %v10435_v45 = vld [vmem:[%s14531_s14] ss:$0 sm:$0xff] }
 0xa76   : > { %5104 = vadd.xlane.f32.xlu1 %v12096_v23  ;;  %5495 = vmatprep.subr.bf16.mxu0 %v10197_v31 }
 0xa78   : > { %5423 = vmatpush1.bf16.msra.mxu1 %v10192_v35 }
 0xa79   : > { %5496 = vmatpush1.bf16.msra.mxu0 %v10195_v42  ;;  %5424 = vmatprep.subr.bf16.mxu1 %v10200_v58 }
 0xa7a   : > { %5497 = vmatprep.subr.bf16.mxu0 %v10203_v3 }
 0xa7c   : > { %5425 = vmatpush1.bf16.msra.mxu1 %v10198_v63 }
 0xa7d   : > { %5498 = vmatpush1.bf16.msra.mxu0 %v10201_v40  ;;  %5426 = vmatprep.subr.bf16.mxu1 %v10206_v50 }
 0xa80   : > { %5427 = vmatpush1.bf16.msra.mxu1 %v10204_v48 }
 0xaf5   : > { %v5091_v52 = vpop.xlane.xlu0 %5090 }
 0xaf6   : > { %v5106_v46 = vmul.f32 0.0078125, %v5091_v52  ;;  %v10207_v52 = vld [vmem:[%s14536_s19 + $0xe8] ss:$16 sps:$4 sm:$0xff]  }
 0xaf7   : > { %v5093_v21 = vpop.xlane.xlu1 %5092 }
 0xaf8   : > { %v12125_v38 = vsub.f32 %v12062_v13, %v5106_v46  ;;  %v5107_v47 = vmul.f32 0.0078125, %v5093_v21  ;;  %v10209_v46 = vld [vmem:[%s14536_s19 + $0xec] ss:$16 sps:$4 sm:$0xff]  }
 0xaf9   : > { %v5095_v53 = vpop.xlane.xlu0 %5094  ;;  %5499 = vmatprep.subr.bf16.mxu0 %v10209_v46 }
 0xafa   : > { %v12128_v22 = vsub.f32 %v12068_v10, %v5107_v47  ;;  %v5108_v24 = vmul.f32 0.0078125, %v5095_v53  ;;  %v5122_v16 = vmul.f32 %v12125_v38, %v12125_v38  ;;  %5500 = vmatpush1.bf16.msra.mxu0 %v10207_v52 }
 0xafb   : > { %v5097_v60 = vpop.xlane.xlu1 %5096 }
 0xafc   : > { %v12133_v44 = vsub.f32 %v12071_v32, %v5108_v24  ;;  %v5109_v8 = vmul.f32 0.0078125, %v5097_v60  ;;  %5130 = vadd.xlane.f32.xlu0 %v5122_v16  ;;  %v5123_v18 = vmul.f32 %v12128_v22, %v12128_v22 }
 0xafd   : > { %v5099_v61 = vpop.xlane.xlu0 %5098 }
 0xafe   : > { %v12138_v37 = vsub.f32 %v12076_v20, %v5109_v8  ;;  %v5110_v62 = vmul.f32 0.0078125, %v5099_v61  ;;  %5132 = vadd.xlane.f32.xlu1 %v5123_v18  ;;  %v5124_v34 = vmul.f32 %v12133_v44, %v12133_v44 }
 0xaff   : > { %v5101_v6 = vpop.xlane.xlu1 %5100 }
 0xb00   : > { %v12143_v7 = vsub.f32 %v12081_v0, %v5110_v62  ;;  %v5111_v43 = vmul.f32 0.0078125, %v5101_v6  ;;  %5134 = vadd.xlane.f32.xlu0 %v5124_v34  ;;  %v5125_v26 = vmul.f32 %v12138_v37, %v12138_v37 }
 0xb01   : > { %v5103_v56 = vpop.xlane.xlu0 %5102 }
 0xb02   : > { %v12148_v12 = vsub.f32 %v12088_v1, %v5111_v43  ;;  %v5112_v55 = vmul.f32 0.0078125, %v5103_v56  ;;  %5136 = vadd.xlane.f32.xlu1 %v5125_v26  ;;  %v5126_v29 = vmul.f32 %v12143_v7, %v12143_v7 }
 0xb03   : > { %v5105_v25 = vpop.xlane.xlu1 %5104 }
 0xb04   : > { %v12153_v2 = vsub.f32 %v12091_v14, %v5112_v55  ;;  %v5113_v36 = vmul.f32 0.0078125, %v5105_v25  ;;  %5138 = vadd.xlane.f32.xlu0 %v5126_v29  ;;  %v5127_v49 = vmul.f32 %v12148_v12, %v12148_v12 }
 0xb06   : > { %v12158_v9 = vsub.f32 %v12096_v23, %v5113_v36  ;;  %5140 = vadd.xlane.f32.xlu1 %v5127_v49  ;;  %v5128_v57 = vmul.f32 %v12153_v2, %v12153_v2 }
 0xb08   : > { %5142 = vadd.xlane.f32.xlu0 %v5128_v57  ;;  %v5129_v33 = vmul.f32 %v12158_v9, %v12158_v9 }
 0xb0a   : > { %5144 = vadd.xlane.f32.xlu1 %v5129_v33 }
 0xb89   : > { %v5131_v21 = vpop.xlane.xlu0 %5130 }
 0xb8a   : > { %v5146_v47 = vmul.f32 0.0078125, %v5131_v21 }
 0xb8b   : > { %v5133_v53 = vpop.xlane.xlu1 %5132 }
 0xb8c   : > { %v5154_v24 = vadd.f32 1e-05, %v5146_v47  ;;  %v5147_v16 = vmul.f32 0.0078125, %v5133_v53 }
 0xb8d   : > { %v5135_v60 = vpop.xlane.xlu0 %5134 }
 0xb8e   : > { %10338 = vrsqrt.f32 %v5154_v24  ;;  %v5155_v8 = vadd.f32 1e-05, %v5147_v16  ;;  %v5148_v18 = vmul.f32 0.0078125, %v5135_v60 }
 0xb8f   : > { %v5137_v61 = vpop.xlane.xlu1 %5136 }
 0xb90   : > { %10340 = vrsqrt.f32 %v5155_v8  ;;  %v5156_v62 = vadd.f32 1e-05, %v5148_v18  ;;  %v5149_v34 = vmul.f32 0.0078125, %v5137_v61 }
 0xb91   : > { %v5139_v6 = vpop.xlane.xlu0 %5138 }
 0xb92   : > { %10342 = vrsqrt.f32 %v5156_v62  ;;  %v5157_v43 = vadd.f32 1e-05, %v5149_v34  ;;  %v5150_v26 = vmul.f32 0.0078125, %v5139_v6  ;;  %v12265_v34 = vsub.s32 1, %v10735_v5 }
 0xb93   : > { %v5141_v56 = vpop.xlane.xlu1 %5140  ;;  %v12268_v6 = vsub.s32 3, %v10735_v5 }
 0xb94   : > { %10344 = vrsqrt.f32 %v5157_v43  ;;  %v5151_v55 = vmul.f32 0.0078125, %v5141_v56  ;;  %v5158_v29 = vadd.f32 1e-05, %v5150_v26  ;;  %v5230_v43 = vld [vmem:[%s14537_s20] sm:$0xf] }
 0xb95   : > { %v5143_v36 = vpop.xlane.xlu0 %5142 }
 0xb96   : > { %v5159_v25 = vadd.f32 1e-05, %v5151_v55  ;;  %v5152_v28 = vmul.f32 0.0078125, %v5143_v36  ;;  %v12283_v36 = vrot.slane %v5230_v43, %v12268_v6 }
 0xb97   : > { %v5145_v49 = vpop.xlane.xlu1 %5144 }
 0xb98   : > { %v10339_v57 = vpop.eup %10338  ;;  %10346 = vrsqrt.f32 %v5159_v25  ;;  %v5153_v33 = vmul.f32 0.0078125, %v5145_v49  ;;  %v5160_v17 = vadd.f32 1e-05, %v5152_v28  ;;  %v12280_v25 = vrot.slane %v5230_v43, %v12265_v34 }
 0xb99   : > { %v5170_v54 = vmul.f32 %v10339_v57, %v12125_v38  ;;  %10348 = vrsqrt.f32 %v5158_v29 }
 0xb9a   : > { %v10341_v39 = vpop.eup %10340  ;;  %v5161_v30 = vadd.f32 1e-05, %v5153_v33 }
 0xb9b   : > { %v5178_v59 = vmul.f32 %v10434_v27, %v5170_v54  ;;  %v5171_v51 = vmul.f32 %v10341_v39, %v12128_v22 }
 0xb9c   : > { %v10343_v15 = vpop.eup %10342  ;;  %10350 = vrsqrt.f32 %v5161_v30 }
 0xb9d   : > { %v5179_v19 = vmul.f32 %v10434_v27, %v5171_v51  ;;  %v5186_v38 = vadd.f32 %v10435_v45, %v5178_v59  ;;  %v5172_v31 = vmul.f32 %v10343_v15, %v12133_v44  ;;  %10352 = vrsqrt.f32 %v5160_v17 }
 0xb9e   : > { %v10345_v41 = vpop.eup %10344 }
 0xb9f   : > { %v5187_v11 = vadd.f32 %v10435_v45, %v5179_v19  ;;  %v5173_v35 = vmul.f32 %v10345_v41, %v12138_v37  ;;  %v5180_v22 = vmul.f32 %v10434_v27, %v5172_v31 }
 0xba1   : > { %v5194_v42 = vpack.c.bf16 %v5187_v11, %v5186_v38  ;;  %v5181_v58 = vmul.f32 %v10434_v27, %v5173_v35  ;;  %v5188_v50 = vadd.f32 %v10435_v45, %v5180_v22 }
 0xba2   : > { %v10347_v3 = vpop.eup %10346 }
 0xba3   : > { %5445 = vmatmul.mubr.bf16.vlgmr.msra.gmra.mrb[56].mxu1 %v5194_v42  ;;  %5518 = vmatmul.mubr.bf16.vlgmr.msra.gmra.mrb[152].mxu0 %v5194_v42  ;;  %v10349_v63 = vpop.eup %10348  ;;  %v5189_v40 = vadd.f32 %v10435_v45, %v5181_v58  ;;  %v5175_v48 = vmul.f32 %v10347_v3, %v12148_v12 }
 0xba4   : > { %5454 = vmatprep.mubr.bf16.mxu1 %v14553_v4  ;;  %5527 = vmatprep.mubr.bf16.mxu0 %v14553_v4  ;;  %v5174_v44 = vmul.f32 %v10349_v63, %v12143_v7 }
 0xba5   : > { %v5195_v37 = vpack.c.bf16 %v5189_v40, %v5188_v50  ;;  %v5183_v52 = vmul.f32 %v10434_v27, %v5175_v48 }
 0xba6   : > { %v10351_v46 = vpop.eup %10350  ;;  %v5182_v21 = vmul.f32 %v10434_v27, %v5174_v44 }
 0xba7   : > { %v10353_v47 = vpop.eup %10352  ;;  %v5191_v53 = vadd.f32 %v10435_v45, %v5183_v52  ;;  %v5177_v24 = vmul.f32 %v10351_v46, %v12158_v9  ;;  %v12262_v9 = vsub.s32 2, %v10735_v5 }
 0xba8   : > { %v5190_v16 = vadd.f32 %v10435_v45, %v5182_v21  ;;  %v5176_v12 = vmul.f32 %v10353_v47, %v12153_v2  ;;  %v12259_v2 = vsub.s32 0, %v10735_v5 }
 0xba9   : > { %v5185_v8 = vmul.f32 %v10434_v27, %v5177_v24  ;;  %v12277_v56 = vrot.slane %v5230_v43, %v12262_v9 }
 0xbaa   : > { %v5196_v60 = vpack.c.bf16 %v5191_v53, %v5190_v16  ;;  %v5184_v7 = vmul.f32 %v10434_v27, %v5176_v12  ;;  %v12274_v26 = vrot.slane %v5230_v43, %v12259_v2 }
 0xbab   : > { %5455 = vmatmul.mubr.bf16.gmra.mrb[60].mxu1 %v5195_v37  ;;  %5528 = vmatmul.mubr.bf16.gmra.mrb[156].mxu0 %v5195_v37  ;;  %v5193_v18 = vadd.f32 %v10435_v45, %v5185_v8 }
 0xbac   : > { %5464 = vmatprep.mubr.bf16.mxu1 %v14553_v4  ;;  %5537 = vmatprep.mubr.bf16.mxu0 %v14553_v4  ;;  %v5192_v61 = vadd.f32 %v10435_v45, %v5184_v7 }
 0xbae   : > { %v5197_v62 = vpack.c.bf16 %v5193_v18, %v5192_v61 }
 0xbb3   : > { %5465 = vmatmul.mubr.bf16.gmra.mrb[64].mxu1 %v5196_v60  ;;  %5538 = vmatmul.mubr.bf16.gmra.mrb[160].mxu0 %v5196_v60 }
 0xbb4   : > { %5474 = vmatprep.mubr.bf16.mxu1 %v14553_v4  ;;  %5547 = vmatprep.mubr.bf16.mxu0 %v14553_v4 }
 0xbbb   : > { %5475 = vmatmul.mubr.bf16.gmra.mrb[68].mxu1 %v5197_v62  ;;  %5548 = vmatmul.mubr.bf16.gmra.mrb[164].mxu0 %v5197_v62 }
 0xbbc   : > { %5615 = vmatprep.mubr.bf16.mxu1 %v14553_v4  ;;  %5688 = vmatprep.mubr.bf16.mxu0 %v14553_v4 }
 0xc76   : > { %v5446_v55 = vpop.f32.mrb[56].mxu1  ;;  %v5519_v29 = vpop.f32.mrb[152].mxu0 }
 0xc77   : > { %v5448_v5 = vpop.f32.mrb[57].mxu1  ;;  %v5521_v49 = vpop.f32.mrb[153].mxu0  ;;  %v5447_v54 = vadd.f32 %v5446_v55, %v12274_v26  ;;  %v5520_v39 = vadd.f32 %v5519_v29, %v12277_v56 }
 0xc78   : > { %v5450_v57 = vpop.f32.mrb[58].mxu1  ;;  %v5523_v33 = vpop.f32.mrb[154].mxu0  ;;  %v5449_v15 = vadd.f32 %v5448_v5, %v12280_v25  ;;  %v5522_v30 = vadd.f32 %v5521_v49, %v12283_v36 }
 0xc79   : > { %v5451_v28 = vadd.f32 %v5450_v57, %v12274_v26  ;;  %v5524_v27 = vadd.f32 %v5523_v33, %v12277_v56  ;;  %v5452_v59 = vpop.f32.mrb[59].mxu1  ;;  %v5525_v51 = vpop.f32.mrb[155].mxu0 }
 0xc7a   : > { %v5453_v19 = vadd.f32 %v5452_v59, %v12280_v25  ;;  %v5526_v41 = vadd.f32 %v5525_v51, %v12283_v36 }
 0xc7b   : > { %v12293_v17 = vpack.c.bf16 %v5451_v28, %v5447_v54  ;;  %v12295_v45 = vpack.c.bf16 %v5524_v27, %v5520_v39 }
 0xc7c   : > { %v12297_v38 = vpack.c.bf16 %v5453_v19, %v5449_v15  ;;  %v12299_v11 = vpack.c.bf16 %v5526_v41, %v5522_v30 }
 0xc7e   : > { %v5456_v31 = vpop.f32.mrb[60].mxu1  ;;  %v5529_v35 = vpop.f32.mrb[156].mxu0  ;;  %5583 = vmatprep.subr.bf16.mxu1 %v12297_v38  ;;  %5656 = vmatprep.subr.bf16.mxu0 %v12299_v11 }
 0xc7f   : > { %v5458_v42 = vpop.f32.mrb[61].mxu1  ;;  %v5531_v58 = vpop.f32.mrb[157].mxu0  ;;  %5584 = vmatpush1.bf16.msra.mxu1 %v12293_v17  ;;  %5657 = vmatpush1.bf16.msra.mxu0 %v12295_v45  ;;  %v5457_v63 = vadd.f32 %v5456_v31, %v12274_v26  ;;  %v5530_v40 = vadd.f32 %v5529_v35, %v12277_v56 }
 0xc80   : > { %v5460_v3 = vpop.f32.mrb[62].mxu1  ;;  %v5533_v22 = vpop.f32.mrb[158].mxu0  ;;  %v5459_v52 = vadd.f32 %v5458_v42, %v12280_v25  ;;  %v5532_v46 = vadd.f32 %v5531_v58, %v12283_v36 }
 0xc81   : > { %v5461_v48 = vadd.f32 %v5460_v3, %v12274_v26  ;;  %v5534_v50 = vadd.f32 %v5533_v22, %v12277_v56  ;;  %v5462_v44 = vpop.f32.mrb[63].mxu1  ;;  %v5535_v37 = vpop.f32.mrb[159].mxu0 }
 0xc82   : > { %v5463_v21 = vadd.f32 %v5462_v44, %v12280_v25  ;;  %v5536_v47 = vadd.f32 %v5535_v37, %v12283_v36 }
 0xc83   : > { %v12313_v53 = vpack.c.bf16 %v5461_v48, %v5457_v63  ;;  %v12315_v24 = vpack.c.bf16 %v5534_v50, %v5530_v40 }
 0xc84   : > { %v12317_v16 = vpack.c.bf16 %v5463_v21, %v5459_v52  ;;  %v12319_v12 = vpack.c.bf16 %v5536_v47, %v5532_v46 }
 0xc86   : > { %v5466_v60 = vpop.f32.mrb[64].mxu1  ;;  %v5539_v8 = vpop.f32.mrb[160].mxu0  ;;  %5585 = vmatprep.subr.bf16.mxu1 %v12317_v16  ;;  %5658 = vmatprep.subr.bf16.mxu0 %v12319_v12 }
 0xc87   : > { %v5468_v7 = vpop.f32.mrb[65].mxu1  ;;  %v5541_v18 = vpop.f32.mrb[161].mxu0  ;;  %5586 = vmatpush1.bf16.msra.mxu1 %v12313_v53  ;;  %5659 = vmatpush1.bf16.msra.mxu0 %v12315_v24  ;;  %v5467_v43 = vadd.f32 %v5466_v60, %v12274_v26  ;;  %v5540_v55 = vadd.f32 %v5539_v8, %v12277_v56  ;;  %v10440_v8 = vld [vmem:[%s14601_s10 + $0x20] sm:$0xff]  }
 0xc88   : > { %v5470_v61 = vpop.f32.mrb[66].mxu1  ;;  %v5543_v62 = vpop.f32.mrb[162].mxu0  ;;  %v5469_v33 = vadd.f32 %v5468_v7, %v12280_v25  ;;  %v5542_v54 = vadd.f32 %v5541_v18, %v12283_v36  ;;  %v10441_v7 = vld [vmem:[%s14601_s10 + $0x28] sm:$0xff]   ;;  %v10442_v18 = vld [vmem:[%s14601_s10 + $0x30] sm:$0xff]  }
 0xc89   : > { %v5471_v29 = vadd.f32 %v5470_v61, %v12274_v26  ;;  %v5544_v5 = vadd.f32 %v5543_v62, %v12277_v56  ;;  %v5472_v49 = vpop.f32.mrb[67].mxu1  ;;  %v5545_v57 = vpop.f32.mrb[163].mxu0  ;;  %v10443_v61 = vld [vmem:[%s14601_s10 + $0x38] sm:$0xff]   ;;  %v10444_v62 = vld [vmem:[%s14601_s10 + $0x40] sm:$0xff]  }
 0xc8a   : > { %v5473_v39 = vadd.f32 %v5472_v49, %v12280_v25  ;;  %v5546_v28 = vadd.f32 %v5545_v57, %v12283_v36  ;;  %v10449_v49 = vld [vmem:[%s14601_s10 + $0x68] sm:$0xff]   ;;  %v10450_v57 = vld [vmem:[%s14601_s10 + $0x70] sm:$0xff]  }
 0xc8b   : > { %v12333_v27 = vpack.c.bf16 %v5471_v29, %v5467_v43  ;;  %v12335_v59 = vpack.c.bf16 %v5544_v5, %v5540_v55  ;;  %v10445_v43 = vld [vmem:[%s14601_s10 + $0x48] sm:$0xff]   ;;  %v10446_v55 = vld [vmem:[%s14601_s10 + $0x50] sm:$0xff]   ;;  %v10447_v29 = vld [vmem:[%s14601_s10 + $0x58] sm:$0xff]  }
 0xc8c   : > { %v12337_v51 = vpack.c.bf16 %v5473_v39, %v5469_v33  ;;  %v12339_v15 = vpack.c.bf16 %v5546_v28, %v5542_v54  ;;  %v10448_v5 = vld [vmem:[%s14601_s10 + $0x60] sm:$0xff]   ;;  %v10451_v33 = vld [vmem:[%s14601_s10 + $0x78] sm:$0xff]   ;;  %v10453_v39 = vld [vmem:[%s14601_s10 + $0x88] sm:$0xff]  }
 0xc8d   : > { %v10452_v54 = vld [vmem:[%s14601_s10 + $0x80] sm:$0xff]   ;;  %v10454_v28 = vld [vmem:[%s14601_s10 + $0x90] sm:$0xff]  }
 0xc8e   : > { %v5476_v30 = vpop.f32.mrb[68].mxu1  ;;  %v5549_v19 = vpop.f32.mrb[164].mxu0  ;;  %5587 = vmatprep.subr.bf16.mxu1 %v12337_v51  ;;  %5660 = vmatprep.subr.bf16.mxu0 %v12339_v15 }
 0xc8f   : > { %v5478_v41 = vpop.f32.mrb[69].mxu1  ;;  %v5551_v31 = vpop.f32.mrb[165].mxu0  ;;  %5588 = vmatpush1.bf16.msra.mxu1 %v12333_v27  ;;  %5661 = vmatpush1.bf16.msra.mxu0 %v12335_v59  ;;  %v5477_v58 = vadd.f32 %v5476_v30, %v12274_v26  ;;  %v5550_v3 = vadd.f32 %v5549_v19, %v12277_v56  ;;  %v10455_v30 = vld [vmem:[%s14601_s10 + $0x98] sm:$0xff]   ;;  %v10456_v19 = vld [vmem:[%s14601_s10 + $0xa0] sm:$0xff]  }
 0xc90   : > { %v5480_v35 = vpop.f32.mrb[70].mxu1  ;;  %v5553_v42 = vpop.f32.mrb[166].mxu0  ;;  %v5479_v50 = vadd.f32 %v5478_v41, %v12280_v25  ;;  %v5552_v44 = vadd.f32 %v5551_v31, %v12283_v36  ;;  %v10457_v41 = vld [vmem:[%s14601_s10 + $0xa8] sm:$0xff]   ;;  %v10458_v31 = vld [vmem:[%s14601_s10 + $0xb0] sm:$0xff]  }
 0xc91   : > { %v5481_v22 = vadd.f32 %v5480_v35, %v12274_v26  ;;  %v5554_v63 = vadd.f32 %v5553_v42, %v12277_v56  ;;  %v5482_v40 = vpop.f32.mrb[71].mxu1  ;;  %v5555_v48 = vpop.f32.mrb[167].mxu0  ;;  %v10436_v26 = vld [vmem:[%s14601_s10] sm:$0xff]   ;;  %v10437_v56 = vld [vmem:[%s14601_s10 + $0x8] sm:$0xff]   ;;  %v10459_v35 = vld [vmem:[%s14601_s10 + $0xb8] sm:$0xff]  }
 0xc92   : > { %v5483_v37 = vadd.f32 %v5482_v40, %v12280_v25  ;;  %v5556_v52 = vadd.f32 %v5555_v48, %v12283_v36  ;;  %v10438_v25 = vld [vmem:[%s14601_s10 + $0x10] sm:$0xff]   ;;  %v10439_v36 = vld [vmem:[%s14601_s10 + $0x18] sm:$0xff]   ;;  %v10460_v42 = vld [vmem:[%s14601_s10 + $0xc0] sm:$0xff]  }
 0xc93   : > { %v12353_v46 = vpack.c.bf16 %v5481_v22, %v5477_v58  ;;  %v12355_v21 = vpack.c.bf16 %v5554_v63, %v5550_v3  ;;  %v10461_v58 = vld [vmem:[%s14601_s10 + $0xc8] sm:$0xff]   ;;  %v10462_v3 = vld [vmem:[%s14601_s10 + $0xd0] sm:$0xff]  }
 0xc94   : > { %v12357_v47 = vpack.c.bf16 %v5483_v37, %v5479_v50  ;;  %v12359_v60 = vpack.c.bf16 %v5556_v52, %v5552_v44  ;;  %v10463_v37 = vld [vmem:[%s14601_s10 + $0xd8] sm:$0xff]  }
 0xc96   : > { %5589 = vmatprep.subr.bf16.mxu1 %v12357_v47  ;;  %5662 = vmatprep.subr.bf16.mxu0 %v12359_v60 }
 0xc97   : > { %5590 = vmatpush1.bf16.msra.mxu1 %v12353_v46  ;;  %5663 = vmatpush1.bf16.msra.mxu0 %v12355_v21 }
 0xc98   : > { %5814 = vmatprep.subr.bf16.mxu1 %v12297_v38  ;;  %5887 = vmatprep.subr.bf16.mxu0 %v12299_v11 }
 0xc9a   : > { %9000 = vmatmul.mubr.msk.bf16.vlgmr.msra.gmra.mrb[72].mxu1 %vm1384_vm2, %v10436_v26  ;;  %9004 = vmatmul.mubr.msk.bf16.vlgmr.msra.gmra.mrb[168].mxu0 %vm1384_vm2, %v10436_v26 }
 0xc9b   : > { %5815 = vmatpush1.bf16.msra.mxu1 %v12293_v17  ;;  %5888 = vmatpush1.bf16.msra.mxu0 %v12295_v45 }
 0xc9c   : > { %5816 = vmatprep.subr.bf16.mxu1 %v12317_v16  ;;  %5889 = vmatprep.subr.bf16.mxu0 %v12319_v12 }
 0xc9d   : > { %5625 = vmatprep.mubr.bf16.mxu1 %v14553_v4  ;;  %5698 = vmatprep.mubr.bf16.mxu0 %v14553_v4 }
 0xc9f   : > { %5817 = vmatpush1.bf16.msra.mxu1 %v12313_v53  ;;  %5890 = vmatpush1.bf16.msra.mxu0 %v12315_v24 }
 0xca0   : > { %5818 = vmatprep.subr.bf16.mxu1 %v12337_v51  ;;  %5891 = vmatprep.subr.bf16.mxu0 %v12339_v15 }
 0xca2   : > { %9001 = vmatmul.mubr.msk.bf16.gmra.mrb[76].mxu1 %vm1384_vm2, %v10437_v56  ;;  %9005 = vmatmul.mubr.msk.bf16.gmra.mrb[172].mxu0 %vm1384_vm2, %v10437_v56 }
 0xca3   : > { %5819 = vmatpush1.bf16.msra.mxu1 %v12333_v27  ;;  %5892 = vmatpush1.bf16.msra.mxu0 %v12335_v59 }
 0xca4   : > { %5820 = vmatprep.subr.bf16.mxu1 %v12357_v47  ;;  %5893 = vmatprep.subr.bf16.mxu0 %v12359_v60 }
 0xca5   : > { %5635 = vmatprep.mubr.bf16.mxu1 %v14553_v4  ;;  %5708 = vmatprep.mubr.bf16.mxu0 %v14553_v4 }
 0xca7   : > { %5821 = vmatpush1.bf16.msra.mxu1 %v12353_v46  ;;  %5894 = vmatpush1.bf16.msra.mxu0 %v12355_v21 }
 0xca8   : > { %6045 = vmatprep.subr.bf16.mxu1 %v12297_v38  ;;  %6118 = vmatprep.subr.bf16.mxu0 %v12299_v11 }
 0xcaa   : > { %9002 = vmatmul.mubr.msk.bf16.gmra.mrb[80].mxu1 %vm1384_vm2, %v10438_v25  ;;  %9006 = vmatmul.mubr.msk.bf16.gmra.mrb[176].mxu0 %vm1384_vm2, %v10438_v25 }
 0xcab   : > { %5645 = vmatprep.mubr.bf16.mxu1 %v14553_v4  ;;  %5718 = vmatprep.mubr.bf16.mxu0 %v14553_v4 }
 0xcb2   : > { %9003 = vmatmul.mubr.msk.bf16.gmra.mrb[84].mxu1 %vm1384_vm2, %v10439_v36  ;;  %9007 = vmatmul.mubr.msk.bf16.gmra.mrb[180].mxu0 %vm1384_vm2, %v10439_v36 }
 0xcb3   : > { %5846 = vmatprep.mubr.bf16.mxu1 %v14553_v4  ;;  %5919 = vmatprep.mubr.bf16.mxu0 %v14553_v4 }
 0xcba   : > { %9008 = vmatmul.mubr.msk.bf16.vlgmr.msra.gmra.mrb[88].mxu1 %vm1384_vm2, %v10440_v8  ;;  %9012 = vmatmul.mubr.msk.bf16.vlgmr.msra.gmra.mrb[184].mxu0 %vm1384_vm2, %v10440_v8 }
 0xcbb   : > { %6046 = vmatpush1.bf16.msra.mxu1 %v12293_v17  ;;  %6119 = vmatpush1.bf16.msra.mxu0 %v12295_v45 }
 0xcbc   : > { %6047 = vmatprep.subr.bf16.mxu1 %v12317_v16  ;;  %6120 = vmatprep.subr.bf16.mxu0 %v12319_v12 }
 0xcbd   : > { %5856 = vmatprep.mubr.bf16.mxu1 %v14553_v4  ;;  %5929 = vmatprep.mubr.bf16.mxu0 %v14553_v4 }
 0xcbf   : > { %6048 = vmatpush1.bf16.msra.mxu1 %v12313_v53  ;;  %6121 = vmatpush1.bf16.msra.mxu0 %v12315_v24 }
 0xcc0   : > { %6049 = vmatprep.subr.bf16.mxu1 %v12337_v51  ;;  %6122 = vmatprep.subr.bf16.mxu0 %v12339_v15 }
 0xcc2   : > { %9009 = vmatmul.mubr.msk.bf16.gmra.mrb[92].mxu1 %vm1384_vm2, %v10441_v7  ;;  %9013 = vmatmul.mubr.msk.bf16.gmra.mrb[188].mxu0 %vm1384_vm2, %v10441_v7 }
 0xcc3   : > { %6050 = vmatpush1.bf16.msra.mxu1 %v12333_v27  ;;  %6123 = vmatpush1.bf16.msra.mxu0 %v12335_v59 }
 0xcc4   : > { %6051 = vmatprep.subr.bf16.mxu1 %v12357_v47  ;;  %6124 = vmatprep.subr.bf16.mxu0 %v12359_v60 }
 0xcc5   : > { %5866 = vmatprep.mubr.bf16.mxu1 %v14553_v4  ;;  %5939 = vmatprep.mubr.bf16.mxu0 %v14553_v4 }
 0xcc7   : > { %6052 = vmatpush1.bf16.msra.mxu1 %v12353_v46  ;;  %6125 = vmatpush1.bf16.msra.mxu0 %v12355_v21 }
 0xcc8   : > { %6276 = vmatprep.subr.bf16.mxu1 %v12297_v38  ;;  %6349 = vmatprep.subr.bf16.mxu0 %v12299_v11 }
 0xcca   : > { %9010 = vmatmul.mubr.msk.bf16.gmra.mrb[96].mxu1 %vm1384_vm2, %v10442_v18  ;;  %9014 = vmatmul.mubr.msk.bf16.gmra.mrb[192].mxu0 %vm1384_vm2, %v10442_v18 }
 0xccb   : > { %5876 = vmatprep.mubr.bf16.mxu1 %v14553_v4  ;;  %5949 = vmatprep.mubr.bf16.mxu0 %v14553_v4 }
 0xcd2   : > { %9011 = vmatmul.mubr.msk.bf16.gmra.mrb[100].mxu1 %vm1384_vm2, %v10443_v61  ;;  %9015 = vmatmul.mubr.msk.bf16.gmra.mrb[196].mxu0 %vm1384_vm2, %v10443_v61  ;;  %v10464_v61 = vld [vmem:[%s14601_s10 + $0xe0] sm:$0xff]  }
 0xcd3   : > { %6077 = vmatprep.mubr.bf16.mxu1 %v14553_v4  ;;  %6150 = vmatprep.mubr.bf16.mxu0 %v14553_v4 }
 0xcda   : > { %9016 = vmatmul.mubr.msk.bf16.vlgmr.msra.gmra.mrb[104].mxu1 %vm1384_vm2, %v10444_v62  ;;  %9020 = vmatmul.mubr.msk.bf16.vlgmr.msra.gmra.mrb[200].mxu0 %vm1384_vm2, %v10444_v62 }
 0xcdb   : > { %6277 = vmatpush1.bf16.msra.mxu1 %v12293_v17  ;;  %6350 = vmatpush1.bf16.msra.mxu0 %v12295_v45 }
 0xcdc   : > { %6278 = vmatprep.subr.bf16.mxu1 %v12317_v16  ;;  %6351 = vmatprep.subr.bf16.mxu0 %v12319_v12 }
 0xcdd   : > { %6087 = vmatprep.mubr.bf16.mxu1 %v14553_v4  ;;  %6160 = vmatprep.mubr.bf16.mxu0 %v14553_v4 }
 0xcdf   : > { %6279 = vmatpush1.bf16.msra.mxu1 %v12313_v53  ;;  %6352 = vmatpush1.bf16.msra.mxu0 %v12315_v24 }
 0xce0   : > { %6280 = vmatprep.subr.bf16.mxu1 %v12337_v51  ;;  %6353 = vmatprep.subr.bf16.mxu0 %v12339_v15 }
 0xce2   : > { %9017 = vmatmul.mubr.msk.bf16.gmra.mrb[108].mxu1 %vm1384_vm2, %v10445_v43  ;;  %9021 = vmatmul.mubr.msk.bf16.gmra.mrb[204].mxu0 %vm1384_vm2, %v10445_v43 }
 0xce3   : > { %6281 = vmatpush1.bf16.msra.mxu1 %v12333_v27  ;;  %6354 = vmatpush1.bf16.msra.mxu0 %v12335_v59 }
 0xce4   : > { %6282 = vmatprep.subr.bf16.mxu1 %v12357_v47  ;;  %6355 = vmatprep.subr.bf16.mxu0 %v12359_v60 }
 0xce5   : > { %6097 = vmatprep.mubr.bf16.mxu1 %v14553_v4  ;;  %6170 = vmatprep.mubr.bf16.mxu0 %v14553_v4 }
 0xce7   : > { %6283 = vmatpush1.bf16.msra.mxu1 %v12353_v46  ;;  %6356 = vmatpush1.bf16.msra.mxu0 %v12355_v21 }
 0xce8   : > { %6507 = vmatprep.subr.bf16.mxu1 %v12297_v38  ;;  %6580 = vmatprep.subr.bf16.mxu0 %v12299_v11 }
 0xcea   : > { %9018 = vmatmul.mubr.msk.bf16.gmra.mrb[112].mxu1 %vm1384_vm2, %v10446_v55  ;;  %9022 = vmatmul.mubr.msk.bf16.gmra.mrb[208].mxu0 %vm1384_vm2, %v10446_v55 }
 0xceb   : > { %6107 = vmatprep.mubr.bf16.mxu1 %v14553_v4  ;;  %6180 = vmatprep.mubr.bf16.mxu0 %v14553_v4 }
 0xcf2   : > { %9019 = vmatmul.mubr.msk.bf16.gmra.mrb[116].mxu1 %vm1384_vm2, %v10447_v29  ;;  %9023 = vmatmul.mubr.msk.bf16.gmra.mrb[212].mxu0 %vm1384_vm2, %v10447_v29 }
 0xcf3   : > { %6308 = vmatprep.mubr.bf16.mxu1 %v14553_v4  ;;  %6381 = vmatprep.mubr.bf16.mxu0 %v14553_v4 }
 0xcfa   : > { %9024 = vmatmul.mubr.msk.bf16.vlgmr.msra.gmra.mrb[120].mxu1 %vm1384_vm2, %v10448_v5  ;;  %9028 = vmatmul.mubr.msk.bf16.vlgmr.msra.gmra.mrb[216].mxu0 %vm1384_vm2, %v10448_v5  ;;  %v10465_v5 = vld [vmem:[%s14601_s10 + $0xe8] sm:$0xff]  }
 0xcfb   : > { %6508 = vmatpush1.bf16.msra.mxu1 %v12293_v17  ;;  %6581 = vmatpush1.bf16.msra.mxu0 %v12295_v45 }
 0xcfc   : > { %6509 = vmatprep.subr.bf16.mxu1 %v12317_v16  ;;  %6582 = vmatprep.subr.bf16.mxu0 %v12319_v12 }
 0xcfd   : > { %6318 = vmatprep.mubr.bf16.mxu1 %v14553_v4  ;;  %6391 = vmatprep.mubr.bf16.mxu0 %v14553_v4 }
 0xcff   : > { %6510 = vmatpush1.bf16.msra.mxu1 %v12313_v53  ;;  %6583 = vmatpush1.bf16.msra.mxu0 %v12315_v24 }
 0xd00   : > { %6511 = vmatprep.subr.bf16.mxu1 %v12337_v51  ;;  %6584 = vmatprep.subr.bf16.mxu0 %v12339_v15 }
 0xd02   : > { %9025 = vmatmul.mubr.msk.bf16.gmra.mrb[124].mxu1 %vm1384_vm2, %v10449_v49  ;;  %9029 = vmatmul.mubr.msk.bf16.gmra.mrb[220].mxu0 %vm1384_vm2, %v10449_v49 }
 0xd03   : > { %6512 = vmatpush1.bf16.msra.mxu1 %v12333_v27  ;;  %6585 = vmatpush1.bf16.msra.mxu0 %v12335_v59 }
 0xd04   : > { %6513 = vmatprep.subr.bf16.mxu1 %v12357_v47  ;;  %6586 = vmatprep.subr.bf16.mxu0 %v12359_v60 }
 0xd05   : > { %6328 = vmatprep.mubr.bf16.mxu1 %v14553_v4  ;;  %6401 = vmatprep.mubr.bf16.mxu0 %v14553_v4 }
 0xd07   : > { %6514 = vmatpush1.bf16.msra.mxu1 %v12353_v46  ;;  %6587 = vmatpush1.bf16.msra.mxu0 %v12355_v21 }
 0xd08   : > { %6738 = vmatprep.subr.bf16.mxu1 %v12297_v38  ;;  %6811 = vmatprep.subr.bf16.mxu0 %v12299_v11 }
 0xd0a   : > { %9026 = vmatmul.mubr.msk.bf16.gmra.mrb[128].mxu1 %vm1384_vm2, %v10450_v57  ;;  %9030 = vmatmul.mubr.msk.bf16.gmra.mrb[224].mxu0 %vm1384_vm2, %v10450_v57 }
 0xd0b   : > { %6338 = vmatprep.mubr.bf16.mxu1 %v14553_v4  ;;  %6411 = vmatprep.mubr.bf16.mxu0 %v14553_v4 }
 0xd12   : > { %9027 = vmatmul.mubr.msk.bf16.gmra.mrb[132].mxu1 %vm1384_vm2, %v10451_v33  ;;  %9031 = vmatmul.mubr.msk.bf16.gmra.mrb[228].mxu0 %vm1384_vm2, %v10451_v33 }
 0xd13   : > { %6539 = vmatprep.mubr.bf16.mxu1 %v14553_v4  ;;  %6612 = vmatprep.mubr.bf16.mxu0 %v14553_v4 }
 0xd1a   : > { %9032 = vmatmul.mubr.msk.bf16.vlgmr.msra.gmra.mrb[136].mxu1 %vm1384_vm2, %v10452_v54  ;;  %9036 = vmatmul.mubr.msk.bf16.vlgmr.msra.gmra.mrb[232].mxu0 %vm1384_vm2, %v10452_v54 }
 0xd1b   : > { %6739 = vmatpush1.bf16.msra.mxu1 %v12293_v17  ;;  %6812 = vmatpush1.bf16.msra.mxu0 %v12295_v45 }
 0xd1c   : > { %6740 = vmatprep.subr.bf16.mxu1 %v12317_v16  ;;  %6813 = vmatprep.subr.bf16.mxu0 %v12319_v12 }
 0xd1d   : > { %6549 = vmatprep.mubr.bf16.mxu1 %v14553_v4  ;;  %6622 = vmatprep.mubr.bf16.mxu0 %v14553_v4 }
 0xd1f   : > { %6741 = vmatpush1.bf16.msra.mxu1 %v12313_v53  ;;  %6814 = vmatpush1.bf16.msra.mxu0 %v12315_v24 }
 0xd20   : > { %6742 = vmatprep.subr.bf16.mxu1 %v12337_v51  ;;  %6815 = vmatprep.subr.bf16.mxu0 %v12339_v15 }
 0xd22   : > { %9033 = vmatmul.mubr.msk.bf16.gmra.mrb[140].mxu1 %vm1384_vm2, %v10453_v39  ;;  %9037 = vmatmul.mubr.msk.bf16.gmra.mrb[236].mxu0 %vm1384_vm2, %v10453_v39  ;;  %v10466_v39 = vld [vmem:[%s14601_s10 + $0xf0] sm:$0xff]  }
 0xd23   : > { %6743 = vmatpush1.bf16.msra.mxu1 %v12333_v27  ;;  %6816 = vmatpush1.bf16.msra.mxu0 %v12335_v59 }
 0xd24   : > { %6744 = vmatprep.subr.bf16.mxu1 %v12357_v47  ;;  %6817 = vmatprep.subr.bf16.mxu0 %v12359_v60 }
 0xd25   : > { %6559 = vmatprep.mubr.bf16.mxu1 %v14553_v4  ;;  %6632 = vmatprep.mubr.bf16.mxu0 %v14553_v4 }
 0xd27   : > { %6745 = vmatpush1.bf16.msra.mxu1 %v12353_v46  ;;  %6818 = vmatpush1.bf16.msra.mxu0 %v12355_v21 }
 0xd28   : > { %6969 = vmatprep.subr.bf16.mxu1 %v12297_v38  ;;  %7042 = vmatprep.subr.bf16.mxu0 %v12299_v11 }
 0xd2a   : > { %9034 = vmatmul.mubr.msk.bf16.gmra.mrb[144].mxu1 %vm1384_vm2, %v10454_v28  ;;  %9038 = vmatmul.mubr.msk.bf16.gmra.mrb[240].mxu0 %vm1384_vm2, %v10454_v28 }
 0xd2b   : > { %6569 = vmatprep.mubr.bf16.mxu1 %v14553_v4  ;;  %6642 = vmatprep.mubr.bf16.mxu0 %v14553_v4 }
 0xd32   : > { %9035 = vmatmul.mubr.msk.bf16.gmra.mrb[148].mxu1 %vm1384_vm2, %v10455_v30  ;;  %9039 = vmatmul.mubr.msk.bf16.gmra.mrb[244].mxu0 %vm1384_vm2, %v10455_v30 }
 0xd33   : > { %6770 = vmatprep.mubr.bf16.mxu1 %v14553_v4  ;;  %6843 = vmatprep.mubr.bf16.mxu0 %v14553_v4 }
 0xd3a   : > { %9040 = vmatmul.mubr.msk.bf16.vlgmr.msra.gmra.mrb[152].mxu1 %vm1384_vm2, %v10456_v19  ;;  %9044 = vmatmul.mubr.msk.bf16.vlgmr.msra.gmra.mrb[248].mxu0 %vm1384_vm2, %v10456_v19 }
 0xd3b   : > { %6970 = vmatpush1.bf16.msra.mxu1 %v12293_v17  ;;  %7043 = vmatpush1.bf16.msra.mxu0 %v12295_v45 }
 0xd3c   : > { %6971 = vmatprep.subr.bf16.mxu1 %v12317_v16  ;;  %7044 = vmatprep.subr.bf16.mxu0 %v12319_v12 }
 0xd3d   : > { %6780 = vmatprep.mubr.bf16.mxu1 %v14553_v4  ;;  %6853 = vmatprep.mubr.bf16.mxu0 %v14553_v4 }
 0xd3f   : > { %6972 = vmatpush1.bf16.msra.mxu1 %v12313_v53  ;;  %7045 = vmatpush1.bf16.msra.mxu0 %v12315_v24 }
 0xd40   : > { %6973 = vmatprep.subr.bf16.mxu1 %v12337_v51  ;;  %7046 = vmatprep.subr.bf16.mxu0 %v12339_v15 }
 0xd42   : > { %9041 = vmatmul.mubr.msk.bf16.gmra.mrb[156].mxu1 %vm1384_vm2, %v10457_v41  ;;  %9045 = vmatmul.mubr.msk.bf16.gmra.mrb[252].mxu0 %vm1384_vm2, %v10457_v41 }
 0xd43   : > { %6974 = vmatpush1.bf16.msra.mxu1 %v12333_v27  ;;  %7047 = vmatpush1.bf16.msra.mxu0 %v12335_v59 }
 0xd44   : > { %6975 = vmatprep.subr.bf16.mxu1 %v12357_v47  ;;  %7048 = vmatprep.subr.bf16.mxu0 %v12359_v60 }
 0xd45   : > { %6790 = vmatprep.mubr.bf16.mxu1 %v14553_v4  ;;  %6863 = vmatprep.mubr.bf16.mxu0 %v14553_v4 }
 0xd47   : > { %6976 = vmatpush1.bf16.msra.mxu1 %v12353_v46  ;;  %7049 = vmatpush1.bf16.msra.mxu0 %v12355_v21 }
 0xd48   : > { %7200 = vmatprep.subr.bf16.mxu1 %v12297_v38  ;;  %7273 = vmatprep.subr.bf16.mxu0 %v12299_v11 }
 0xd4a   : > { %9042 = vmatmul.mubr.msk.bf16.gmra.mrb[160].mxu1 %vm1384_vm2, %v10458_v31  ;;  %9046 = vmatmul.mubr.msk.bf16.gmra.mrb[0].mxu0 %vm1384_vm2, %v10458_v31 }
 0xd4b   : > { %6800 = vmatprep.mubr.bf16.mxu1 %v14553_v4  ;;  %6873 = vmatprep.mubr.bf16.mxu0 %v14553_v4 }
 0xd52   : > { %9043 = vmatmul.mubr.msk.bf16.gmra.mrb[164].mxu1 %vm1384_vm2, %v10459_v35  ;;  %9047 = vmatmul.mubr.msk.bf16.gmra.mrb[4].mxu0 %vm1384_vm2, %v10459_v35 }
 0xd53   : > { %7001 = vmatprep.mubr.bf16.mxu1 %v14553_v4  ;;  %7074 = vmatprep.mubr.bf16.mxu0 %v14553_v4 }
 0xd5a   : > { %9048 = vmatmul.mubr.msk.bf16.vlgmr.msra.gmra.mrb[168].mxu1 %vm1384_vm2, %v10460_v42  ;;  %9052 = vmatmul.mubr.msk.bf16.vlgmr.msra.gmra.mrb[8].mxu0 %vm1384_vm2, %v10460_v42 }
 0xd5b   : > { %7201 = vmatpush1.bf16.msra.mxu1 %v12293_v17  ;;  %7274 = vmatpush1.bf16.msra.mxu0 %v12295_v45 }
 0xd5c   : > { %7202 = vmatprep.subr.bf16.mxu1 %v12317_v16  ;;  %7275 = vmatprep.subr.bf16.mxu0 %v12319_v12 }
 0xd5d   : > { %7011 = vmatprep.mubr.bf16.mxu1 %v14553_v4  ;;  %7084 = vmatprep.mubr.bf16.mxu0 %v14553_v4 }
 0xd5f   : > { %7203 = vmatpush1.bf16.msra.mxu1 %v12313_v53  ;;  %7276 = vmatpush1.bf16.msra.mxu0 %v12315_v24 }
 0xd60   : > { %7204 = vmatprep.subr.bf16.mxu1 %v12337_v51  ;;  %7277 = vmatprep.subr.bf16.mxu0 %v12339_v15 }
 0xd62   : > { %9049 = vmatmul.mubr.msk.bf16.gmra.mrb[172].mxu1 %vm1384_vm2, %v10461_v58  ;;  %9053 = vmatmul.mubr.msk.bf16.gmra.mrb[12].mxu0 %vm1384_vm2, %v10461_v58 }
 0xd63   : > { %7205 = vmatpush1.bf16.msra.mxu1 %v12333_v27  ;;  %7278 = vmatpush1.bf16.msra.mxu0 %v12335_v59 }
 0xd64   : > { %7206 = vmatprep.subr.bf16.mxu1 %v12357_v47  ;;  %7279 = vmatprep.subr.bf16.mxu0 %v12359_v60 }
 0xd65   : > { %7021 = vmatprep.mubr.bf16.mxu1 %v14553_v4  ;;  %7094 = vmatprep.mubr.bf16.mxu0 %v14553_v4 }
 0xd67   : > { %7207 = vmatpush1.bf16.msra.mxu1 %v12353_v46  ;;  %7280 = vmatpush1.bf16.msra.mxu0 %v12355_v21 }
 0xd68   : > { %7431 = vmatprep.subr.bf16.mxu1 %v12297_v38  ;;  %7504 = vmatprep.subr.bf16.mxu0 %v12299_v11 }
 0xd6a   : > { %9050 = vmatmul.mubr.msk.bf16.gmra.mrb[176].mxu1 %vm1384_vm2, %v10462_v3  ;;  %9054 = vmatmul.mubr.msk.bf16.gmra.mrb[16].mxu0 %vm1384_vm2, %v10462_v3 }
 0xd6b   : > { %7031 = vmatprep.mubr.bf16.mxu1 %v14553_v4  ;;  %7104 = vmatprep.mubr.bf16.mxu0 %v14553_v4 }
 0xd6d   : > { %v12668_v22 = vpop.f32.mrb[72].mxu1  ;;  %v12670_v63 = vpop.f32.mrb[168].mxu0 }
 0xd6e   : > { %v12672_v40 = vpop.f32.mrb[73].mxu1  ;;  %v12674_v38 = vpop.f32.mrb[169].mxu0 }
 0xd6f   : > { %v12676_v11 = vpop.f32.mrb[74].mxu1  ;;  %v12678_v48 = vpop.f32.mrb[170].mxu0 }
 0xd70   : > { %v12680_v50 = vpop.f32.mrb[75].mxu1  ;;  %v12682_v44 = vpop.f32.mrb[171].mxu0 }
 0xd72   : > { %9051 = vmatmul.mubr.msk.bf16.gmra.mrb[180].mxu1 %vm1384_vm2, %v10463_v37  ;;  %9055 = vmatmul.mubr.msk.bf16.gmra.mrb[20].mxu0 %vm1384_vm2, %v10463_v37 }
 0xd73   : > { %7232 = vmatprep.mubr.bf16.mxu1 %v14553_v4  ;;  %7305 = vmatprep.mubr.bf16.mxu0 %v14553_v4 }
 0xd75   : > { %v12691_v52 = vpop.f32.mrb[76].mxu1  ;;  %v12693_v26 = vpop.f32.mrb[172].mxu0 }
 0xd76   : > { %v12695_v56 = vpop.f32.mrb[77].mxu1  ;;  %v12697_v25 = vpop.f32.mrb[173].mxu0 }
 0xd77   : > { %v12699_v36 = vpop.f32.mrb[78].mxu1  ;;  %v12701_v8 = vpop.f32.mrb[174].mxu0 }
 0xd78   : > { %v12703_v7 = vpop.f32.mrb[79].mxu1  ;;  %v12705_v18 = vpop.f32.mrb[175].mxu0 }
 0xd7a   : > { %9056 = vmatmul.mubr.msk.bf16.vlgmr.msra.gmra.mrb[184].mxu1 %vm1384_vm2, %v10464_v61  ;;  %9060 = vmatmul.mubr.msk.bf16.vlgmr.msra.gmra.mrb[24].mxu0 %vm1384_vm2, %v10464_v61 }
 0xd7b   : > { %7432 = vmatpush1.bf16.msra.mxu1 %v12293_v17  ;;  %7505 = vmatpush1.bf16.msra.mxu0 %v12295_v45 }
 0xd7c   : > { %7433 = vmatprep.subr.bf16.mxu1 %v12317_v16  ;;  %7506 = vmatprep.subr.bf16.mxu0 %v12319_v12 }
 0xd7d   : > { %7242 = vmatprep.mubr.bf16.mxu1 %v14553_v4  ;;  %7315 = vmatprep.mubr.bf16.mxu0 %v14553_v4  ;;  %v12718_v62 = vpop.f32.mrb[80].mxu1  ;;  %v12720_v43 = vpop.f32.mrb[176].mxu0 }
 0xd7e   : > { %v12722_v55 = vpop.f32.mrb[81].mxu1  ;;  %v12724_v29 = vpop.f32.mrb[177].mxu0 }
 0xd7f   : > { %7434 = vmatpush1.bf16.msra.mxu1 %v12313_v53  ;;  %7507 = vmatpush1.bf16.msra.mxu0 %v12315_v24  ;;  %v12728_v17 = vpop.f32.mrb[82].mxu1  ;;  %v12730_v45 = vpop.f32.mrb[178].mxu0 }
 0xd80   : > { %7435 = vmatprep.subr.bf16.mxu1 %v12337_v51  ;;  %7508 = vmatprep.subr.bf16.mxu0 %v12339_v15  ;;  %v12734_v16 = vpop.f32.mrb[83].mxu1  ;;  %v12736_v12 = vpop.f32.mrb[179].mxu0  ;;  %v5574_v51 = vld [vmem:[%s14538_s21] sm:$0xf] }
 0xd81   : > { %v12774_v33 = vrot.slane %v5574_v51, %v12259_v2  ;;  %v12777_v54 = vrot.slane %v5574_v51, %v12265_v34 }
 0xd82   : > { %9057 = vmatmul.mubr.msk.bf16.gmra.mrb[188].mxu1 %vm1384_vm2, %v10465_v5  ;;  %9061 = vmatmul.mubr.msk.bf16.gmra.mrb[28].mxu0 %vm1384_vm2, %v10465_v5 }
 0xd83   : > { %7436 = vmatpush1.bf16.msra.mxu1 %v12333_v27  ;;  %7509 = vmatpush1.bf16.msra.mxu0 %v12335_v59  ;;  %v5750_v31 = vmul.f32 %v12774_v33, %v12668_v22  ;;  %v5751_v35 = vmul.f32 %v12777_v54, %v12672_v40  ;;  %v5754_v61 = vmul.f32 %v12774_v33, %v12676_v11 }
 0xd84   : > { %7437 = vmatprep.subr.bf16.mxu1 %v12357_v47  ;;  %7510 = vmatprep.subr.bf16.mxu0 %v12359_v60  ;;  %v5575_v60 = vld [vmem:[%s14538_s21 + $0x4] sm:$0xf] }
 0xd85   : > { %v12747_v53 = vpop.f32.mrb[84].mxu1  ;;  %v12749_v24 = vpop.f32.mrb[180].mxu0  ;;  %7252 = vmatprep.mubr.bf16.mxu1 %v14553_v4  ;;  %7325 = vmatprep.mubr.bf16.mxu0 %v14553_v4  ;;  %v12791_v28 = vrot.slane %v5575_v60, %v12259_v2  ;;  %v12794_v30 = vrot.slane %v5575_v60, %v12262_v9  ;;  %v12797_v19 = vrot.slane %v5575_v60, %v12265_v34 }
 0xd86   : > { %v12756_v15 = vpop.f32.mrb[85].mxu1  ;;  %v12758_v27 = vpop.f32.mrb[181].mxu0  ;;  %v12800_v41 = vrot.slane %v5575_v60, %v12268_v6 }
 0xd87   : > { %7438 = vmatpush1.bf16.msra.mxu1 %v12353_v46  ;;  %7511 = vmatpush1.bf16.msra.mxu0 %v12355_v21  ;;  %v12762_v59 = vpop.f32.mrb[86].mxu1  ;;  %v12764_v47 = vpop.f32.mrb[182].mxu0  ;;  %v12780_v46 = vrot.slane %v5574_v51, %v12262_v9  ;;  %v12783_v21 = vrot.slane %v5574_v51, %v12268_v6 }
 0xd88   : > { %v12769_v49 = vpop.f32.mrb[87].mxu1  ;;  %v12771_v57 = vpop.f32.mrb[183].mxu0 }
 0xd89   : > { %v5752_v42 = vmul.f32 %v12780_v46, %v12670_v63  ;;  %v5753_v58 = vmul.f32 %v12783_v21, %v12674_v38  ;;  %v5756_v5 = vmul.f32 %v12780_v46, %v12678_v48  ;;  %v5755_v63 = vmul.f32 %v12777_v54, %v12680_v50 }
 0xd8a   : > { %9058 = vmatmul.mubr.msk.bf16.gmra.mrb[192].mxu1 %vm1384_vm2, %v10466_v39  ;;  %9062 = vmatmul.mubr.msk.bf16.gmra.mrb[32].mxu0 %vm1384_vm2, %v10466_v39  ;;  %v5757_v38 = vmul.f32 %v12783_v21, %v12682_v44 }
 0xd8b   : > { %7262 = vmatprep.mubr.bf16.mxu1 %v14553_v4  ;;  %7335 = vmatprep.mubr.bf16.mxu0 %v14553_v4 }
 0xd8d   : > { %v5848_v3 = vpop.f32.mrb[88].mxu1  ;;  %v5921_v37 = vpop.f32.mrb[184].mxu0 }
 0xd8e   : > { %v5981_v51 = vmul.f32 %v12791_v28, %v5848_v3  ;;  %v5983_v22 = vmul.f32 %v12794_v30, %v5921_v37  ;;  %v5850_v60 = vpop.f32.mrb[89].mxu1  ;;  %v5923_v40 = vpop.f32.mrb[185].mxu0 }
 0xd8f   : > { %v5982_v39 = vmul.f32 %v12797_v19, %v5850_v60  ;;  %v5984_v4 = vmul.f32 %v12800_v41, %v5923_v40  ;;  %v5852_v11 = vpop.f32.mrb[90].mxu1  ;;  %v5925_v23 = vpop.f32.mrb[186].mxu0 }
 0xd90   : > { %v12824_v14 = vadd.f32 %v5981_v51, %v5750_v31  ;;  %v12826_v48 = vadd.f32 %v5983_v22, %v5752_v42  ;;  %v5985_v3 = vmul.f32 %v12791_v28, %v5852_v11  ;;  %v5987_v37 = vmul.f32 %v12794_v30, %v5925_v23  ;;  %v5854_v1 = vpop.f32.mrb[91].mxu1  ;;  %v5927_v0 = vpop.f32.mrb[187].mxu0  ;;  %v10467_v42 = vld [vmem:[%s14601_s10 + $0xf8] sm:$0xff]  }
 0xd91   : > { %v12830_v50 = vadd.f32 %v5982_v39, %v5751_v35  ;;  %v12832_v20 = vadd.f32 %v5984_v4, %v5753_v58  ;;  %v5986_v44 = vmul.f32 %v12797_v19, %v5854_v1  ;;  %v5988_v60 = vmul.f32 %v12800_v41, %v5927_v0 }
 0xd92   : > { %v12836_v40 = vadd.f32 %v5985_v3, %v5754_v61  ;;  %v12838_v31 = vadd.f32 %v5987_v37, %v5756_v5  ;;  %9059 = vmatmul.mubr.msk.bf16.gmra.mrb[196].mxu1 %vm1384_vm2, %v10467_v42  ;;  %9063 = vmatmul.mubr.msk.bf16.gmra.mrb[36].mxu0 %vm1384_vm2, %v10467_v42  ;;  %v14620_v35 = vmov 0   ;;  %v5758_v0 = vmul.f32 %v12774_v33, %v12691_v52 }
 0xd93   : > { %v12845_v23 = vadd.f32 %v5986_v44, %v5755_v63  ;;  %v12847_v4 = vadd.f32 %v5988_v60, %v5757_v38  ;;  %7463 = vmatprep.mubr.bf16.mxu1 %v14620_v35  ;;  %7536 = vmatprep.mubr.bf16.mxu0 %v14620_v35  ;;  %v5759_v1 = vmul.f32 %v12777_v54, %v12695_v56 }
 0xd94   : > { %v5760_v58 = vmul.f32 %v12780_v46, %v12693_v26  ;;  %v5761_v61 = vmul.f32 %v12783_v21, %v12697_v25  ;;  %v5762_v22 = vmul.f32 %v12774_v33, %v12699_v36  ;;  %v5764_v63 = vmul.f32 %v12780_v46, %v12701_v8 }
 0xd95   : > { %v5858_v5 = vpop.f32.mrb[92].mxu1  ;;  %v5931_v51 = vpop.f32.mrb[188].mxu0  ;;  %v5763_v26 = vmul.f32 %v12777_v54, %v12703_v7  ;;  %v5765_v25 = vmul.f32 %v12783_v21, %v12705_v18 }
 0xd96   : > { %v5989_v38 = vmul.f32 %v12791_v28, %v5858_v5  ;;  %v5991_v52 = vmul.f32 %v12794_v30, %v5931_v51  ;;  %v5860_v39 = vpop.f32.mrb[93].mxu1  ;;  %v5933_v56 = vpop.f32.mrb[189].mxu0 }
 0xd97   : > { %v5990_v11 = vmul.f32 %v12797_v19, %v5860_v39  ;;  %v5992_v3 = vmul.f32 %v12800_v41, %v5933_v56  ;;  %v5862_v36 = vpop.f32.mrb[94].mxu1  ;;  %v5935_v37 = vpop.f32.mrb[190].mxu0 }
 0xd98   : > { %v12871_v44 = vadd.f32 %v5989_v38, %v5758_v0  ;;  %v12873_v8 = vadd.f32 %v5991_v52, %v5760_v58  ;;  %v5993_v60 = vmul.f32 %v12791_v28, %v5862_v36  ;;  %v5995_v42 = vmul.f32 %v12794_v30, %v5935_v37  ;;  %v5864_v5 = vpop.f32.mrb[95].mxu1  ;;  %v5937_v51 = vpop.f32.mrb[191].mxu0  ;;  %v10468_v58 = vld [vmem:[%s14601_s10 + $0x100] sm:$0xff]  }
 0xd99   : > { %v12877_v7 = vadd.f32 %v5990_v11, %v5759_v1  ;;  %v12879_v32 = vadd.f32 %v5992_v3, %v5761_v61  ;;  %v5994_v18 = vmul.f32 %v12797_v19, %v5864_v5  ;;  %v5996_v39 = vmul.f32 %v12800_v41, %v5937_v51 }
 0xd9a   : > { %v12883_v56 = vadd.f32 %v5993_v60, %v5762_v22  ;;  %v12885_v0 = vadd.f32 %v5995_v42, %v5764_v63  ;;  %9064 = vmatmul.mubr.msk.bf16.vlgmr.msra.gmra.mrb[200].mxu1 %vm1384_vm2, %v10468_v58  ;;  %9068 = vmatmul.mubr.msk.bf16.vlgmr.msra.gmra.mrb[40].mxu0 %vm1384_vm2, %v10468_v58  ;;  %v5766_v22 = vmul.f32 %v12774_v33, %v12718_v62 }
 0xd9b   : > { %v12892_v1 = vadd.f32 %v5994_v18, %v5763_v26  ;;  %v12894_v61 = vadd.f32 %v5996_v39, %v5765_v25  ;;  %7473 = vmatprep.mubr.bf16.mxu1 %v14620_v35  ;;  %7546 = vmatprep.mubr.bf16.mxu0 %v14620_v35  ;;  %v5768_v63 = vmul.f32 %v12780_v46, %v12720_v43 }
 0xd9c   : > { %v5767_v38 = vmul.f32 %v12777_v54, %v12722_v55  ;;  %v5769_v52 = vmul.f32 %v12783_v21, %v12724_v29  ;;  %v5770_v25 = vmul.f32 %v12774_v33, %v12728_v17  ;;  %v5772_v3 = vmul.f32 %v12780_v46, %v12730_v45 }
 0xd9d   : > { %v5868_v26 = vpop.f32.mrb[96].mxu1  ;;  %v5941_v11 = vpop.f32.mrb[192].mxu0  ;;  %v5771_v55 = vmul.f32 %v12777_v54, %v12734_v16  ;;  %v5773_v29 = vmul.f32 %v12783_v21, %v12736_v12 }
 0xd9e   : > { %v5997_v36 = vmul.f32 %v12791_v28, %v5868_v26  ;;  %v5999_v62 = vmul.f32 %v12794_v30, %v5941_v11  ;;  %v5870_v37 = vpop.f32.mrb[97].mxu1  ;;  %v5943_v43 = vpop.f32.mrb[193].mxu0 }
 0xd9f   : > { %v5998_v60 = vmul.f32 %v12797_v19, %v5870_v37  ;;  %v6000_v42 = vmul.f32 %v12800_v41, %v5943_v43  ;;  %v5872_v17 = vpop.f32.mrb[98].mxu1  ;;  %v5945_v5 = vpop.f32.mrb[194].mxu0  ;;  %v5774_v43 = vmul.f32 %v12774_v33, %v12747_v53 }
 0xda0   : > { %v12918_v51 = vadd.f32 %v5997_v36, %v5766_v22  ;;  %v12920_v45 = vadd.f32 %v5999_v62, %v5768_v63  ;;  %v6001_v18 = vmul.f32 %v12791_v28, %v5872_v17  ;;  %v6003_v39 = vmul.f32 %v12794_v30, %v5945_v5  ;;  %v5874_v58 = vpop.f32.mrb[99].mxu1  ;;  %v5947_v26 = vpop.f32.mrb[195].mxu0  ;;  %v5576_v22 = vld [vmem:[%s14538_s21 + $0x8] sm:$0xf] }
 0xda1   : > { %v12924_v16 = vadd.f32 %v5998_v60, %v5767_v38  ;;  %v12926_v11 = vadd.f32 %v6000_v42, %v5769_v52  ;;  %v6002_v12 = vmul.f32 %v12797_v19, %v5874_v58  ;;  %v6004_v37 = vmul.f32 %v12800_v41, %v5947_v26  ;;  %v10469_v62 = vld [vmem:[%s14601_s10 + $0x108] sm:$0xff]  }
 0xda2   : > { %v12933_v63 = vadd.f32 %v6001_v18, %v5770_v25  ;;  %v12935_v36 = vadd.f32 %v6003_v39, %v5772_v3  ;;  %9065 = vmatmul.mubr.msk.bf16.gmra.mrb[204].mxu1 %vm1384_vm2, %v10469_v62  ;;  %9069 = vmatmul.mubr.msk.bf16.gmra.mrb[44].mxu0 %vm1384_vm2, %v10469_v62  ;;  %v12949_v25 = vrot.slane %v5576_v22, %v12259_v2 }
 0xda3   : > { %v12942_v38 = vadd.f32 %v6002_v12, %v5771_v55  ;;  %v12944_v52 = vadd.f32 %v6004_v37, %v5773_v29  ;;  %7483 = vmatprep.mubr.bf16.mxu1 %v14620_v35  ;;  %7556 = vmatprep.mubr.bf16.mxu0 %v14620_v35  ;;  %v12952_v3 = vrot.slane %v5576_v22, %v12262_v9 }
 0xda4   : > { %v5776_v60 = vmul.f32 %v12780_v46, %v12749_v24  ;;  %v5775_v55 = vmul.f32 %v12777_v54, %v12756_v15  ;;  %v5777_v29 = vmul.f32 %v12783_v21, %v12758_v27  ;;  %v5778_v5 = vmul.f32 %v12774_v33, %v12762_v59 }
 0xda5   : > { %v5878_v42 = vpop.f32.mrb[100].mxu1  ;;  %v5951_v17 = vpop.f32.mrb[196].mxu0  ;;  %v5780_v18 = vmul.f32 %v12780_v46, %v12764_v47  ;;  %v5779_v15 = vmul.f32 %v12777_v54, %v12769_v49  ;;  %v5781_v27 = vmul.f32 %v12783_v21, %v12771_v57 }
 0xda6   : > { %v6005_v39 = vmul.f32 %v12791_v28, %v5878_v42  ;;  %v6007_v53 = vmul.f32 %v12794_v30, %v5951_v17  ;;  %v5880_v58 = vpop.f32.mrb[101].mxu1  ;;  %v5953_v24 = vpop.f32.mrb[197].mxu0 }
 0xda7   : > { %v6006_v26 = vmul.f32 %v12797_v19, %v5880_v58  ;;  %v6008_v12 = vmul.f32 %v12800_v41, %v5953_v24  ;;  %v5882_v59 = vpop.f32.mrb[102].mxu1  ;;  %v5955_v33 = vpop.f32.mrb[198].mxu0 }
 0xda8   : > { %v12974_v37 = vadd.f32 %v6005_v39, %v5774_v43  ;;  %v12976_v47 = vadd.f32 %v6007_v53, %v5776_v60  ;;  %v6009_v46 = vmul.f32 %v12791_v28, %v5882_v59  ;;  %v6011_v62 = vmul.f32 %v12794_v30, %v5955_v33  ;;  %v5884_v42 = vpop.f32.mrb[103].mxu1  ;;  %v5957_v17 = vpop.f32.mrb[199].mxu0  ;;  %v10470_v28 = vld [vmem:[%s14601_s10 + $0x110] sm:$0xff]  }
 0xda9   : > { %v12980_v49 = vadd.f32 %v6006_v26, %v5775_v55  ;;  %v12982_v54 = vadd.f32 %v6008_v12, %v5777_v29  ;;  %v6010_v57 = vmul.f32 %v12797_v19, %v5884_v42  ;;  %v6012_v21 = vmul.f32 %v12800_v41, %v5957_v17 }
 0xdaa   : > { %v12986_v58 = vadd.f32 %v6009_v46, %v5778_v5  ;;  %v12988_v43 = vadd.f32 %v6011_v62, %v5780_v18  ;;  %9066 = vmatmul.mubr.msk.bf16.gmra.mrb[208].mxu1 %vm1384_vm2, %v10470_v28  ;;  %9070 = vmatmul.mubr.msk.bf16.gmra.mrb[48].mxu0 %vm1384_vm2, %v10470_v28  ;;  %v12996_v30 = vrot.slane %v5576_v22, %v12265_v34 }
 0xdab   : > { %v12998_v60 = vadd.f32 %v6010_v57, %v5779_v15  ;;  %v13000_v19 = vadd.f32 %v6012_v21, %v5781_v27  ;;  %v13003_v41 = vrot.slane %v5576_v22, %v12268_v6  ;;  %7493 = vmatprep.mubr.bf16.mxu1 %v14620_v35  ;;  %7566 = vmatprep.mubr.bf16.mxu0 %v14620_v35  ;;  %v10471_v21 = vld [vmem:[%s14601_s10 + $0x118] sm:$0xff]  }
 0xdad   : > { %v6079_v55 = vpop.f32.mrb[104].mxu1  ;;  %v6152_v29 = vpop.f32.mrb[200].mxu0 }
 0xdae   : > { %v6212_v5 = vmul.f32 %v12949_v25, %v6079_v55  ;;  %v6214_v18 = vmul.f32 %v12952_v3, %v6152_v29  ;;  %v6081_v39 = vpop.f32.mrb[105].mxu1  ;;  %v6154_v53 = vpop.f32.mrb[201].mxu0 }
 0xdaf   : > { %v6213_v24 = vmul.f32 %v12996_v30, %v6081_v39  ;;  %v6215_v15 = vmul.f32 %v13003_v41, %v6154_v53  ;;  %v6083_v27 = vpop.f32.mrb[106].mxu1  ;;  %v6156_v26 = vpop.f32.mrb[202].mxu0 }
 0xdb0   : > { %v13012_v22 = vadd.f32 %v6212_v5, %v12824_v14  ;;  %v13015_v12 = vadd.f32 %v6214_v18, %v12826_v48  ;;  %v6216_v35 = vmul.f32 %v12949_v25, %v6083_v27  ;;  %v6218_v59 = vmul.f32 %v12952_v3, %v6156_v26  ;;  %v6085_v33 = vpop.f32.mrb[107].mxu1  ;;  %v6158_v46 = vpop.f32.mrb[203].mxu0 }
 0xdb1   : > { %v13020_v62 = vadd.f32 %v6213_v24, %v12830_v50  ;;  %v13023_v42 = vadd.f32 %v6215_v15, %v12832_v20  ;;  %v6217_v17 = vmul.f32 %v12996_v30, %v6085_v33  ;;  %v6219_v14 = vmul.f32 %v13003_v41, %v6158_v46 }
 0xdb2   : > { %v13028_v57 = vadd.f32 %v6216_v35, %v12836_v40  ;;  %v13031_v48 = vadd.f32 %v6218_v59, %v12838_v31  ;;  %9067 = vmatmul.mubr.msk.bf16.gmra.mrb[212].mxu1 %vm1384_vm2, %v10471_v21  ;;  %9071 = vmatmul.mubr.msk.bf16.gmra.mrb[52].mxu0 %vm1384_vm2, %v10471_v21 }
 0xdb3   : > { %v13039_v20 = vadd.f32 %v6217_v17, %v12845_v23  ;;  %v13042_v50 = vadd.f32 %v6219_v14, %v12847_v4 }
 0xdb5   : > { %v6089_v28 = vpop.f32.mrb[108].mxu1  ;;  %v6162_v40 = vpop.f32.mrb[204].mxu0 }
 0xdb6   : > { %v6220_v55 = vmul.f32 %v12949_v25, %v6089_v28  ;;  %v6222_v31 = vmul.f32 %v12952_v3, %v6162_v40  ;;  %v6091_v29 = vpop.f32.mrb[109].mxu1  ;;  %v6164_v5 = vpop.f32.mrb[205].mxu0 }
 0xdb7   : > { %v6221_v18 = vmul.f32 %v12996_v30, %v6091_v29  ;;  %v6223_v39 = vmul.f32 %v13003_v41, %v6164_v5  ;;  %v6093_v53 = vpop.f32.mrb[110].mxu1  ;;  %v6166_v24 = vpop.f32.mrb[206].mxu0 }
 0xdb8   : > { %v13049_v23 = vadd.f32 %v6220_v55, %v12871_v44  ;;  %v13052_v4 = vadd.f32 %v6222_v31, %v12873_v8  ;;  %v6224_v15 = vmul.f32 %v12949_v25, %v6093_v53  ;;  %v6226_v27 = vmul.f32 %v12952_v3, %v6166_v24  ;;  %v6095_v26 = vpop.f32.mrb[111].mxu1  ;;  %v6168_v35 = vpop.f32.mrb[207].mxu0 }
 0xdb9   : > { %v13057_v59 = vadd.f32 %v6221_v18, %v12877_v7  ;;  %v13060_v33 = vadd.f32 %v6223_v39, %v12879_v32  ;;  %v6225_v46 = vmul.f32 %v12996_v30, %v6095_v26  ;;  %v6227_v44 = vmul.f32 %v13003_v41, %v6168_v35 }
 0xdba   : > { %v13065_v17 = vadd.f32 %v6224_v15, %v12883_v56  ;;  %v13068_v8 = vadd.f32 %v6226_v27, %v12885_v0 }
 0xdbb   : > { %v13071_v14 = vadd.f32 %v6225_v46, %v12892_v1  ;;  %v13074_v21 = vadd.f32 %v6227_v44, %v12894_v61 }
 0xdbd   : > { %v6099_v7 = vpop.f32.mrb[112].mxu1  ;;  %v6172_v28 = vpop.f32.mrb[208].mxu0 }
 0xdbe   : > { %v6228_v32 = vmul.f32 %v12949_v25, %v6099_v7  ;;  %v6230_v40 = vmul.f32 %v12952_v3, %v6172_v28  ;;  %v6101_v55 = vpop.f32.mrb[113].mxu1  ;;  %v6174_v31 = vpop.f32.mrb[209].mxu0 }
 0xdbf   : > { %v6229_v56 = vmul.f32 %v12996_v30, %v6101_v55  ;;  %v6231_v29 = vmul.f32 %v13003_v41, %v6174_v31  ;;  %v6103_v0 = vpop.f32.mrb[114].mxu1  ;;  %v6176_v5 = vpop.f32.mrb[210].mxu0 }
 0xdc0   : > { %v13081_v1 = vadd.f32 %v6228_v32, %v12918_v51  ;;  %v13084_v61 = vadd.f32 %v6230_v40, %v12920_v45  ;;  %v6232_v18 = vmul.f32 %v12949_v25, %v6103_v0  ;;  %v6234_v39 = vmul.f32 %v12952_v3, %v6176_v5  ;;  %v6105_v53 = vpop.f32.mrb[115].mxu1  ;;  %v6178_v24 = vpop.f32.mrb[211].mxu0 }
 0xdc1   : > { %v13089_v15 = vadd.f32 %v6229_v56, %v12924_v16  ;;  %v13092_v27 = vadd.f32 %v6231_v29, %v12926_v11  ;;  %v6233_v26 = vmul.f32 %v12996_v30, %v6105_v53  ;;  %v6235_v51 = vmul.f32 %v13003_v41, %v6178_v24 }
 0xdc2   : > { %v13097_v35 = vadd.f32 %v6232_v18, %v12933_v63  ;;  %v13100_v45 = vadd.f32 %v6234_v39, %v12935_v36 }
 0xdc3   : > { %v13103_v46 = vadd.f32 %v6233_v26, %v12942_v38  ;;  %v13106_v44 = vadd.f32 %v6235_v51, %v12944_v52  ;;  %v5577_v38 = vld [vmem:[%s14538_s21 + $0xc] sm:$0xf] }
 0xdc5   : > { %v6109_v16 = vpop.f32.mrb[116].mxu1  ;;  %v6182_v7 = vpop.f32.mrb[212].mxu0 }
 0xdc6   : > { %v6236_v11 = vmul.f32 %v12949_v25, %v6109_v16  ;;  %v6238_v28 = vmul.f32 %v12952_v3, %v6182_v7  ;;  %v6111_v32 = vpop.f32.mrb[117].mxu1  ;;  %v6184_v40 = vpop.f32.mrb[213].mxu0 }
 0xdc7   : > { %v6237_v63 = vmul.f32 %v12996_v30, %v6111_v32  ;;  %v6239_v55 = vmul.f32 %v13003_v41, %v6184_v40  ;;  %v6113_v36 = vpop.f32.mrb[118].mxu1  ;;  %v6186_v31 = vpop.f32.mrb[214].mxu0 }
 0xdc8   : > { %v13116_v52 = vadd.f32 %v6236_v11, %v12974_v37  ;;  %v13119_v56 = vadd.f32 %v6238_v28, %v12976_v47  ;;  %v6240_v29 = vmul.f32 %v12949_v25, %v6113_v36  ;;  %v6242_v0 = vmul.f32 %v12952_v3, %v6186_v31  ;;  %v6115_v5 = vpop.f32.mrb[119].mxu1  ;;  %v6188_v18 = vpop.f32.mrb[215].mxu0 }
 0xdc9   : > { %v13124_v39 = vadd.f32 %v6237_v63, %v12980_v49  ;;  %v13127_v53 = vadd.f32 %v6239_v55, %v12982_v54  ;;  %v6241_v24 = vmul.f32 %v12996_v30, %v6115_v5  ;;  %v6243_v37 = vmul.f32 %v13003_v41, %v6188_v18 }
 0xdca   : > { %v13132_v26 = vadd.f32 %v6240_v29, %v12986_v58  ;;  %v13135_v47 = vadd.f32 %v6242_v0, %v12988_v43  ;;  %v13138_v25 = vrot.slane %v5577_v38, %v12259_v2  ;;  %v13141_v3 = vrot.slane %v5577_v38, %v12262_v9 }
 0xdcb   : > { %v13144_v49 = vadd.f32 %v6241_v24, %v12998_v60  ;;  %v13147_v54 = vadd.f32 %v6243_v37, %v13000_v19  ;;  %v13150_v30 = vrot.slane %v5577_v38, %v12265_v34  ;;  %v13153_v58 = vrot.slane %v5577_v38, %v12268_v6 }
 0xdcd   : > { %v6310_v43 = vpop.f32.mrb[120].mxu1  ;;  %v6383_v41 = vpop.f32.mrb[216].mxu0 }
 0xdce   : > { %v6443_v51 = vmul.f32 %v13138_v25, %v6310_v43  ;;  %v6445_v16 = vmul.f32 %v13141_v3, %v6383_v41  ;;  %v6312_v7 = vpop.f32.mrb[121].mxu1  ;;  %v6385_v11 = vpop.f32.mrb[217].mxu0 }
 0xdcf   : > { %v6444_v60 = vmul.f32 %v13150_v30, %v6312_v7  ;;  %v6446_v28 = vmul.f32 %v13153_v58, %v6385_v11  ;;  %v6314_v19 = vpop.f32.mrb[122].mxu1  ;;  %v6387_v32 = vpop.f32.mrb[218].mxu0 }
 0xdd0   : > { %v13160_v40 = vadd.f32 %v6443_v51, %v13012_v22  ;;  %v13163_v63 = vadd.f32 %v6445_v16, %v13015_v12  ;;  %v6447_v55 = vmul.f32 %v13138_v25, %v6314_v19  ;;  %v6449_v36 = vmul.f32 %v13141_v3, %v6387_v32  ;;  %v6316_v31 = vpop.f32.mrb[123].mxu1  ;;  %v6389_v38 = vpop.f32.mrb[219].mxu0 }
 0xdd1   : > { %v13168_v29 = vadd.f32 %v6444_v60, %v13020_v62  ;;  %v13171_v0 = vadd.f32 %v6446_v28, %v13023_v42  ;;  %v6448_v5 = vmul.f32 %v13150_v30, %v6316_v31  ;;  %v6450_v22 = vmul.f32 %v13153_v58, %v6389_v38 }
 0xdd2   : > { %v13176_v18 = vadd.f32 %v6447_v55, %v13028_v57  ;;  %v13179_v12 = vadd.f32 %v6449_v36, %v13031_v48 }
 0xdd3   : > { %v13182_v24 = vadd.f32 %v6448_v5, %v13039_v20  ;;  %v13185_v37 = vadd.f32 %v6450_v22, %v13042_v50 }
 0xdd5   : > { %v6320_v62 = vpop.f32.mrb[124].mxu1  ;;  %v6393_v43 = vpop.f32.mrb[220].mxu0 }
 0xdd6   : > { %v6451_v42 = vmul.f32 %v13138_v25, %v6320_v62  ;;  %v6453_v41 = vmul.f32 %v13141_v3, %v6393_v43  ;;  %v6322_v51 = vpop.f32.mrb[125].mxu1  ;;  %v6395_v16 = vpop.f32.mrb[221].mxu0 }
 0xdd7   : > { %v6452_v57 = vmul.f32 %v13150_v30, %v6322_v51  ;;  %v6454_v7 = vmul.f32 %v13153_v58, %v6395_v16  ;;  %v6324_v48 = vpop.f32.mrb[126].mxu1  ;;  %v6397_v11 = vpop.f32.mrb[222].mxu0 }
 0xdd8   : > { %v13192_v20 = vadd.f32 %v6451_v42, %v13049_v23  ;;  %v13195_v50 = vadd.f32 %v6453_v41, %v13052_v4  ;;  %v6455_v60 = vmul.f32 %v13138_v25, %v6324_v48  ;;  %v6457_v28 = vmul.f32 %v13141_v3, %v6397_v11  ;;  %v6326_v19 = vpop.f32.mrb[127].mxu1  ;;  %v6399_v32 = vpop.f32.mrb[223].mxu0 }
 0xdd9   : > { %v13200_v55 = vadd.f32 %v6452_v57, %v13057_v59  ;;  %v13203_v36 = vadd.f32 %v6454_v7, %v13060_v33  ;;  %v6456_v31 = vmul.f32 %v13150_v30, %v6326_v19  ;;  %v6458_v23 = vmul.f32 %v13153_v58, %v6399_v32 }
 0xdda   : > { %v13208_v38 = vadd.f32 %v6455_v60, %v13065_v17  ;;  %v13211_v4 = vadd.f32 %v6457_v28, %v13068_v8 }
 0xddb   : > { %v13214_v5 = vadd.f32 %v6456_v31, %v13071_v14  ;;  %v13217_v22 = vadd.f32 %v6458_v23, %v13074_v21 }
 0xddd   : > { %v6330_v59 = vpop.f32.mrb[128].mxu1  ;;  %v6403_v62 = vpop.f32.mrb[224].mxu0 }
 0xdde   : > { %v6459_v33 = vmul.f32 %v13138_v25, %v6330_v59  ;;  %v6461_v43 = vmul.f32 %v13141_v3, %v6403_v62  ;;  %v6332_v42 = vpop.f32.mrb[129].mxu1  ;;  %v6405_v41 = vpop.f32.mrb[225].mxu0 }
 0xddf   : > { %v6460_v17 = vmul.f32 %v13150_v30, %v6332_v42  ;;  %v6462_v51 = vmul.f32 %v13153_v58, %v6405_v41  ;;  %v6334_v8 = vpop.f32.mrb[130].mxu1  ;;  %v6407_v16 = vpop.f32.mrb[226].mxu0 }
 0xde0   : > { %v13224_v14 = vadd.f32 %v6459_v33, %v13081_v1  ;;  %v13227_v21 = vadd.f32 %v6461_v43, %v13084_v61  ;;  %v6463_v57 = vmul.f32 %v13138_v25, %v6334_v8  ;;  %v6465_v7 = vmul.f32 %v13141_v3, %v6407_v16  ;;  %v6336_v48 = vpop.f32.mrb[131].mxu1  ;;  %v6409_v11 = vpop.f32.mrb[227].mxu0 }
 0xde1   : > { %v13232_v60 = vadd.f32 %v6460_v17, %v13089_v15  ;;  %v13235_v28 = vadd.f32 %v6462_v51, %v13092_v27  ;;  %v6464_v19 = vmul.f32 %v13150_v30, %v6336_v48  ;;  %v6466_v1 = vmul.f32 %v13153_v58, %v6409_v11 }
 0xde2   : > { %v13240_v32 = vadd.f32 %v6463_v57, %v13097_v35  ;;  %v13243_v61 = vadd.f32 %v6465_v7, %v13100_v45 }
 0xde3   : > { %v13246_v31 = vadd.f32 %v6464_v19, %v13103_v46  ;;  %v13249_v23 = vadd.f32 %v6466_v1, %v13106_v44  ;;  %v5578_v46 = vld [vmem:[%s14538_s21 + $0x10] sm:$0xf] }
 0xde5   : > { %v6340_v15 = vpop.f32.mrb[132].mxu1  ;;  %v6413_v59 = vpop.f32.mrb[228].mxu0 }
 0xde6   : > { %v6467_v27 = vmul.f32 %v13138_v25, %v6340_v15  ;;  %v6469_v62 = vmul.f32 %v13141_v3, %v6413_v59  ;;  %v6342_v33 = vpop.f32.mrb[133].mxu1  ;;  %v6415_v43 = vpop.f32.mrb[229].mxu0 }
 0xde7   : > { %v6468_v35 = vmul.f32 %v13150_v30, %v6342_v33  ;;  %v6470_v42 = vmul.f32 %v13153_v58, %v6415_v43  ;;  %v6344_v45 = vpop.f32.mrb[134].mxu1  ;;  %v6417_v41 = vpop.f32.mrb[230].mxu0 }
 0xde8   : > { %v13259_v44 = vadd.f32 %v6467_v27, %v13116_v52  ;;  %v13262_v17 = vadd.f32 %v6469_v62, %v13119_v56  ;;  %v6471_v51 = vmul.f32 %v13138_v25, %v6344_v45  ;;  %v6473_v8 = vmul.f32 %v13141_v3, %v6417_v41  ;;  %v6346_v16 = vpop.f32.mrb[135].mxu1  ;;  %v6419_v57 = vpop.f32.mrb[231].mxu0 }
 0xde9   : > { %v13267_v7 = vadd.f32 %v6468_v35, %v13124_v39  ;;  %v13270_v48 = vadd.f32 %v6470_v42, %v13127_v53  ;;  %v6472_v11 = vmul.f32 %v13150_v30, %v6346_v16  ;;  %v6474_v52 = vmul.f32 %v13153_v58, %v6419_v57 }
 0xdea   : > { %v13275_v19 = vadd.f32 %v6471_v51, %v13132_v26  ;;  %v13278_v56 = vadd.f32 %v6473_v8, %v13135_v47  ;;  %v13281_v25 = vrot.slane %v5578_v46, %v12259_v2  ;;  %v13284_v3 = vrot.slane %v5578_v46, %v12262_v9 }
 0xdeb   : > { %v13287_v39 = vadd.f32 %v6472_v11, %v13144_v49  ;;  %v13290_v53 = vadd.f32 %v6474_v52, %v13147_v54  ;;  %v13293_v30 = vrot.slane %v5578_v46, %v12265_v34  ;;  %v13296_v26 = vrot.slane %v5578_v46, %v12268_v6  ;;  %v10210_v11 = vld [vmem:[%s14540_s23 + $0x40] sm:$0xff]  }
 0xdec   : > { %9316 = vmatprep.subr.bf16.mxu1 %v10210_v11 }
 0xded   : > { %v6541_v47 = vpop.f32.mrb[136].mxu1  ;;  %v6614_v58 = vpop.f32.mrb[232].mxu0 }
 0xdee   : > { %v6674_v1 = vmul.f32 %v13281_v25, %v6541_v47  ;;  %v6676_v15 = vmul.f32 %v13284_v3, %v6614_v58  ;;  %v6543_v59 = vpop.f32.mrb[137].mxu1  ;;  %v6616_v27 = vpop.f32.mrb[233].mxu0 }
 0xdef   : > { %v6675_v49 = vmul.f32 %v13293_v30, %v6543_v59  ;;  %v6677_v62 = vmul.f32 %v13296_v26, %v6616_v27  ;;  %v6545_v54 = vpop.f32.mrb[138].mxu1  ;;  %v6618_v33 = vpop.f32.mrb[234].mxu0 }
 0xdf0   : > { %v13303_v43 = vadd.f32 %v6674_v1, %v13160_v40  ;;  %v13306_v35 = vadd.f32 %v6676_v15, %v13163_v63  ;;  %v6678_v42 = vmul.f32 %v13281_v25, %v6545_v54  ;;  %v6680_v45 = vmul.f32 %v13284_v3, %v6618_v33  ;;  %v6547_v41 = vpop.f32.mrb[139].mxu1  ;;  %v6620_v46 = vpop.f32.mrb[235].mxu0 }
 0xdf1   : > { %v13311_v51 = vadd.f32 %v6675_v49, %v13168_v29  ;;  %v13314_v8 = vadd.f32 %v6677_v62, %v13171_v0  ;;  %v6679_v16 = vmul.f32 %v13293_v30, %v6547_v41  ;;  %v6681_v40 = vmul.f32 %v13296_v26, %v6620_v46  ;;  %v10211_v29 = vld [vmem:[%s14540_s23 + $0xc0] sm:$0xff]  }
 0xdf2   : > { %v13319_v57 = vadd.f32 %v6678_v42, %v13176_v18  ;;  %v13322_v63 = vadd.f32 %v6680_v45, %v13179_v12  ;;  %v10212_v18 = vld [vmem:[%s14540_s23] sm:$0xff]   ;;  %9356 = vmatprep.subr.bf16.mxu0 %v10211_v29 }
 0xdf3   : > { %v13331_v0 = vadd.f32 %v6679_v16, %v13182_v24  ;;  %v13334_v52 = vadd.f32 %v6681_v40, %v13185_v37  ;;  %v10213_v12 = vld [vmem:[%s14540_s23 + $0x80] sm:$0xff]   ;;  %9317 = vmatpush3.bf16.msra.mxu1 %v10212_v18 }
 0xdf4   : > { %9357 = vmatpush3.bf16.msra.mxu0 %v10213_v12 }
 0xdf5   : > { %v6551_v47 = vpop.f32.mrb[140].mxu1  ;;  %v6624_v58 = vpop.f32.mrb[236].mxu0 }
 0xdf6   : > { %v6682_v24 = vmul.f32 %v13281_v25, %v6551_v47  ;;  %v6684_v1 = vmul.f32 %v13284_v3, %v6624_v58  ;;  %v6553_v37 = vpop.f32.mrb[141].mxu1  ;;  %v6626_v15 = vpop.f32.mrb[237].mxu0 }
 0xdf7   : > { %v6683_v59 = vmul.f32 %v13293_v30, %v6553_v37  ;;  %v6685_v27 = vmul.f32 %v13296_v26, %v6626_v15  ;;  %v6555_v49 = vpop.f32.mrb[142].mxu1  ;;  %v6628_v62 = vpop.f32.mrb[238].mxu0 }
 0xdf8   : > { %v13347_v54 = vadd.f32 %v6682_v24, %v13192_v20  ;;  %v13350_v33 = vadd.f32 %v6684_v1, %v13195_v50  ;;  %v6686_v42 = vmul.f32 %v13281_v25, %v6555_v49  ;;  %v6688_v45 = vmul.f32 %v13284_v3, %v6628_v62  ;;  %v6557_v41 = vpop.f32.mrb[143].mxu1  ;;  %v6630_v46 = vpop.f32.mrb[239].mxu0 }
 0xdf9   : > { %v13355_v16 = vadd.f32 %v6683_v59, %v13200_v55  ;;  %v13358_v40 = vadd.f32 %v6685_v27, %v13203_v36  ;;  %v6687_v11 = vmul.f32 %v13293_v30, %v6557_v41  ;;  %v6689_v20 = vmul.f32 %v13296_v26, %v6630_v46  ;;  %v10216_v59 = vld [vmem:[%s14540_s23 + $0x8] sm:$0xff]  }
 0xdfa   : > { %v13363_v29 = vadd.f32 %v6686_v42, %v13208_v38  ;;  %v13366_v50 = vadd.f32 %v6688_v45, %v13211_v4  ;;  %v10214_v38 = vld [vmem:[%s14540_s23 + $0x48] sm:$0xff]  }
 0xdfb   : > { %v13369_v18 = vadd.f32 %v6687_v11, %v13214_v5  ;;  %v13372_v12 = vadd.f32 %v6689_v20, %v13217_v22  ;;  %v10215_v4 = vld [vmem:[%s14540_s23 + $0xc8] sm:$0xff]   ;;  %9318 = vmatprep.subr.bf16.mxu1 %v10214_v38 }
 0xdfc   : > { %v10217_v27 = vld [vmem:[%s14540_s23 + $0x88] sm:$0xff]   ;;  %9358 = vmatprep.subr.bf16.mxu0 %v10215_v4  ;;  %9319 = vmatpush3.bf16.msra.mxu1 %v10216_v59 }
 0xdfd   : > { %v6561_v55 = vpop.f32.mrb[144].mxu1  ;;  %v6634_v47 = vpop.f32.mrb[240].mxu0  ;;  %9359 = vmatpush3.bf16.msra.mxu0 %v10217_v27 }
 0xdfe   : > { %v6690_v36 = vmul.f32 %v13281_v25, %v6561_v55  ;;  %v6692_v58 = vmul.f32 %v13284_v3, %v6634_v47  ;;  %v6563_v24 = vpop.f32.mrb[145].mxu1  ;;  %v6636_v1 = vpop.f32.mrb[241].mxu0 }
 0xdff   : > { %v6691_v5 = vmul.f32 %v13293_v30, %v6563_v24  ;;  %v6693_v22 = vmul.f32 %v13296_v26, %v6636_v1  ;;  %v6565_v37 = vpop.f32.mrb[146].mxu1  ;;  %v6638_v15 = vpop.f32.mrb[242].mxu0  ;;  %v5579_v24 = vld [vmem:[%s14538_s21 + $0x14] sm:$0xf] }
 0xe00   : > { %v13391_v49 = vadd.f32 %v6690_v36, %v13224_v14  ;;  %v13394_v62 = vadd.f32 %v6692_v58, %v13227_v21  ;;  %v6694_v42 = vmul.f32 %v13281_v25, %v6565_v37  ;;  %v6696_v45 = vmul.f32 %v13284_v3, %v6638_v15  ;;  %v6567_v41 = vpop.f32.mrb[147].mxu1  ;;  %v6640_v46 = vpop.f32.mrb[243].mxu0 }
 0xe01   : > { %v13399_v11 = vadd.f32 %v6691_v5, %v13232_v60  ;;  %v13402_v20 = vadd.f32 %v6693_v22, %v13235_v28  ;;  %v6695_v55 = vmul.f32 %v13293_v30, %v6567_v41  ;;  %v6697_v14 = vmul.f32 %v13296_v26, %v6640_v46  ;;  %v10218_v60 = vld [vmem:[%s14540_s23 + $0x50] sm:$0xff]  }
 0xe02   : > { %v13407_v21 = vadd.f32 %v6694_v42, %v13240_v32  ;;  %v13410_v47 = vadd.f32 %v6696_v45, %v13243_v61  ;;  %v10219_v28 = vld [vmem:[%s14540_s23 + $0xd0] sm:$0xff]   ;;  %9320 = vmatprep.subr.bf16.mxu1 %v10218_v60  ;;  %v13438_v27 = vrot.slane %v5579_v24, %v12259_v2  ;;  %v10222_v60 = vld [vmem:[%s14540_s23 + $0x58] sm:$0xff]  }
 0xe03   : > { %v13419_v36 = vadd.f32 %v6695_v55, %v13246_v31  ;;  %v13422_v58 = vadd.f32 %v6697_v14, %v13249_v23  ;;  %v10220_v32 = vld [vmem:[%s14540_s23 + $0x10] sm:$0xff]   ;;  %9360 = vmatprep.subr.bf16.mxu0 %v10219_v28  ;;  %v10223_v28 = vld [vmem:[%s14540_s23 + $0xd8] sm:$0xff]  }
 0xe04   : > { %v10221_v61 = vld [vmem:[%s14540_s23 + $0x90] sm:$0xff]   ;;  %9321 = vmatpush3.bf16.msra.mxu1 %v10220_v32 }
 0xe05   : > { %v6571_v1 = vpop.f32.mrb[148].mxu1  ;;  %v6644_v31 = vpop.f32.mrb[244].mxu0  ;;  %9361 = vmatpush3.bf16.msra.mxu0 %v10221_v61  ;;  %9322 = vmatprep.subr.bf16.mxu1 %v10222_v60 }
 0xe06   : > { %v6698_v38 = vmul.f32 %v13281_v25, %v6571_v1  ;;  %v6700_v23 = vmul.f32 %v13284_v3, %v6644_v31  ;;  %v6573_v4 = vpop.f32.mrb[149].mxu1  ;;  %v6646_v5 = vpop.f32.mrb[245].mxu0  ;;  %v13469_v1 = vrot.slane %v5579_v24, %v12262_v9  ;;  %9362 = vmatprep.subr.bf16.mxu0 %v10223_v28 }
 0xe07   : > { %v6699_v22 = vmul.f32 %v13293_v30, %v6573_v4  ;;  %v6701_v37 = vmul.f32 %v13296_v26, %v6646_v5  ;;  %v6575_v15 = vpop.f32.mrb[150].mxu1  ;;  %v6648_v59 = vpop.f32.mrb[246].mxu0  ;;  %v10227_v5 = vld [vmem:[%s14540_s23 + $0xe0] sm:$0xff]  }
 0xe08   : > { %v13441_v42 = vadd.f32 %v6698_v38, %v13259_v44  ;;  %v13444_v45 = vadd.f32 %v6700_v23, %v13262_v17  ;;  %v6702_v41 = vmul.f32 %v13281_v25, %v6575_v15  ;;  %v6704_v46 = vmul.f32 %v13284_v3, %v6648_v59  ;;  %v6577_v55 = vpop.f32.mrb[151].mxu1  ;;  %v6650_v14 = vpop.f32.mrb[247].mxu0 }
 0xe09   : > { %v13455_v44 = vadd.f32 %v6699_v22, %v13267_v7  ;;  %v13458_v17 = vadd.f32 %v6701_v37, %v13270_v48  ;;  %v6703_v25 = vmul.f32 %v13293_v30, %v6577_v55  ;;  %v6705_v3 = vmul.f32 %v13296_v26, %v6650_v14  ;;  %v10225_v26 = vld [vmem:[%s14540_s23 + $0x98] sm:$0xff]  }
 0xe0a   : > { %v13463_v32 = vadd.f32 %v6702_v41, %v13275_v19  ;;  %v13466_v61 = vadd.f32 %v6704_v46, %v13278_v56  ;;  %v13478_v30 = vrot.slane %v5579_v24, %v12265_v34  ;;  %v13481_v19 = vrot.slane %v5579_v24, %v12268_v6  ;;  %v10224_v56 = vld [vmem:[%s14540_s23 + $0x18] sm:$0xff]   ;;  %9363 = vmatpush3.bf16.msra.mxu0 %v10225_v26  ;;  %v10226_v24 = vld [vmem:[%s14540_s23 + $0x60] sm:$0xff]  }
 0xe0b   : > { %v13472_v7 = vadd.f32 %v6703_v25, %v13287_v39  ;;  %v13475_v48 = vadd.f32 %v6705_v3, %v13290_v53  ;;  %9323 = vmatpush3.bf16.msra.mxu1 %v10224_v56  ;;  %v10228_v41 = vld [vmem:[%s14540_s23 + $0x20] sm:$0xff]   ;;  %9364 = vmatprep.subr.bf16.mxu0 %v10227_v5 }
 0xe0c   : > { %v10229_v46 = vld [vmem:[%s14540_s23 + $0xa0] sm:$0xff]   ;;  %9324 = vmatprep.subr.bf16.mxu1 %v10226_v24 }
 0xe0d   : > { %v6772_v31 = vpop.f32.mrb[152].mxu1  ;;  %v6845_v39 = vpop.f32.mrb[248].mxu0 }
 0xe0e   : > { %v6905_v53 = vmul.f32 %v13438_v27, %v6772_v31  ;;  %v6907_v38 = vmul.f32 %v13469_v1, %v6845_v39  ;;  %v6774_v23 = vpop.f32.mrb[153].mxu1  ;;  %v6847_v4 = vpop.f32.mrb[249].mxu0  ;;  %9365 = vmatpush3.bf16.msra.mxu0 %v10229_v46 }
 0xe0f   : > { %v6906_v22 = vmul.f32 %v13478_v30, %v6774_v23  ;;  %v6908_v37 = vmul.f32 %v13481_v19, %v6847_v4  ;;  %v6776_v15 = vpop.f32.mrb[154].mxu1  ;;  %v6849_v59 = vpop.f32.mrb[250].mxu0  ;;  %9325 = vmatpush3.bf16.msra.mxu1 %v10228_v41 }
 0xe10   : > { %v13506_v55 = vadd.f32 %v6905_v53, %v13303_v43  ;;  %v13509_v14 = vadd.f32 %v6907_v38, %v13306_v35  ;;  %v6909_v60 = vmul.f32 %v13438_v27, %v6776_v15  ;;  %v6911_v28 = vmul.f32 %v13469_v1, %v6849_v59  ;;  %v6778_v25 = vpop.f32.mrb[155].mxu1  ;;  %v6851_v3 = vpop.f32.mrb[251].mxu0 }
 0xe11   : > { %v13514_v56 = vadd.f32 %v6906_v22, %v13311_v51  ;;  %v13517_v26 = vadd.f32 %v6908_v37, %v13314_v8  ;;  %v6910_v31 = vmul.f32 %v13478_v30, %v6778_v25  ;;  %v6912_v43 = vmul.f32 %v13481_v19, %v6851_v3  ;;  %v10230_v8 = vld [vmem:[%s14540_s23 + $0x68] sm:$0xff]  }
 0xe12   : > { %v13522_v35 = vadd.f32 %v6909_v60, %v13319_v57  ;;  %v13525_v39 = vadd.f32 %v6911_v28, %v13322_v63  ;;  %v10231_v57 = vld [vmem:[%s14540_s23 + $0xe8] sm:$0xff]   ;;  %9326 = vmatprep.subr.bf16.mxu1 %v10230_v8 }
 0xe13   : > { %v13528_v53 = vadd.f32 %v6910_v31, %v13331_v0  ;;  %v13531_v51 = vadd.f32 %v6912_v43, %v13334_v52  ;;  %9366 = vmatprep.subr.bf16.mxu0 %v10231_v57  ;;  %v10232_v25 = vld [vmem:[%s14540_s23 + $0x28] sm:$0xff]  }
 0xe14   : > { %v10233_v3 = vld [vmem:[%s14540_s23 + $0xa8] sm:$0xff]   ;;  %9327 = vmatpush3.bf16.msra.mxu1 %v10232_v25 }
 0xe15   : > { %v6782_v38 = vpop.f32.mrb[156].mxu1  ;;  %v6855_v23 = vpop.f32.mrb[252].mxu0  ;;  %9367 = vmatpush3.bf16.msra.mxu0 %v10233_v3 }
 0xe16   : > { %v6913_v63 = vmul.f32 %v13438_v27, %v6782_v38  ;;  %v6915_v0 = vmul.f32 %v13469_v1, %v6855_v23  ;;  %v6784_v4 = vpop.f32.mrb[157].mxu1  ;;  %v6857_v24 = vpop.f32.mrb[253].mxu0 }
 0xe17   : > { %v6914_v52 = vmul.f32 %v13478_v30, %v6784_v4  ;;  %v6916_v5 = vmul.f32 %v13481_v19, %v6857_v24  ;;  %v6786_v22 = vpop.f32.mrb[158].mxu1  ;;  %v6859_v37 = vpop.f32.mrb[254].mxu0 }
 0xe18   : > { %v13544_v15 = vadd.f32 %v6913_v63, %v13347_v54  ;;  %v13547_v59 = vadd.f32 %v6915_v0, %v13350_v33  ;;  %v6917_v41 = vmul.f32 %v13438_v27, %v6786_v22  ;;  %v6919_v46 = vmul.f32 %v13469_v1, %v6859_v37  ;;  %v6788_v60 = vpop.f32.mrb[159].mxu1  ;;  %v6861_v28 = vpop.f32.mrb[255].mxu0 }
 0xe19   : > { %v13558_v54 = vadd.f32 %v6914_v52, %v13355_v16  ;;  %v13561_v33 = vadd.f32 %v6916_v5, %v13358_v40  ;;  %v6918_v31 = vmul.f32 %v13478_v30, %v6788_v60  ;;  %v6920_v43 = vmul.f32 %v13481_v19, %v6861_v28  ;;  %v10234_v40 = vld [vmem:[%s14540_s23 + $0x70] sm:$0xff]  }
 0xe1a   : > { %v13566_v8 = vadd.f32 %v6917_v41, %v13363_v29  ;;  %v13569_v57 = vadd.f32 %v6919_v46, %v13366_v50  ;;  %v10235_v29 = vld [vmem:[%s14540_s23 + $0xf0] sm:$0xff]   ;;  %9328 = vmatprep.subr.bf16.mxu1 %v10234_v40  ;;  %v10238_v41 = vld [vmem:[%s14540_s23 + $0x78] sm:$0xff]  }
 0xe1b   : > { %v13572_v38 = vadd.f32 %v6918_v31, %v13369_v18  ;;  %v13575_v16 = vadd.f32 %v6920_v43, %v13372_v12  ;;  %v10236_v50 = vld [vmem:[%s14540_s23 + $0x30] sm:$0xff]   ;;  %9368 = vmatprep.subr.bf16.mxu0 %v10235_v29  ;;  %v10239_v46 = vld [vmem:[%s14540_s23 + $0xf8] sm:$0xff]  }
 0xe1c   : > { %v10237_v18 = vld [vmem:[%s14540_s23 + $0xb0] sm:$0xff]   ;;  %9329 = vmatpush3.bf16.msra.mxu1 %v10236_v50  ;;  %v10240_v40 = vld [vmem:[%s14540_s23 + $0x38] sm:$0xff]  }
 0xe1d   : > { %v6792_v23 = vpop.f32.mrb[160].mxu1  ;;  %v6865_v63 = vpop.f32.mrb[0].mxu0  ;;  %9369 = vmatpush3.bf16.msra.mxu0 %v10237_v18  ;;  %v10241_v29 = vld [vmem:[%s14540_s23 + $0xb8] sm:$0xff]   ;;  %9330 = vmatprep.subr.bf16.mxu1 %v10238_v41 }
 0xe1e   : > { %v6921_v12 = vmul.f32 %v13438_v27, %v6792_v23  ;;  %v6923_v0 = vmul.f32 %v13469_v1, %v6865_v63  ;;  %v6794_v4 = vpop.f32.mrb[161].mxu1  ;;  %v6867_v24 = vpop.f32.mrb[1].mxu0  ;;  %9370 = vmatprep.subr.bf16.mxu0 %v10239_v46 }
 0xe1f   : > { %v6922_v52 = vmul.f32 %v13478_v30, %v6794_v4  ;;  %v6924_v5 = vmul.f32 %v13481_v19, %v6867_v24  ;;  %v6796_v22 = vpop.f32.mrb[162].mxu1  ;;  %v6869_v37 = vpop.f32.mrb[2].mxu0 }
 0xe20   : > { %v13600_v60 = vadd.f32 %v6921_v12, %v13391_v49  ;;  %v13603_v28 = vadd.f32 %v6923_v0, %v13394_v62  ;;  %v6925_v25 = vmul.f32 %v13438_v27, %v6796_v22  ;;  %v6927_v3 = vmul.f32 %v13469_v1, %v6869_v37  ;;  %v6798_v31 = vpop.f32.mrb[163].mxu1  ;;  %v6871_v43 = vpop.f32.mrb[3].mxu0  ;;  %9331 = vmatpush3.bf16.msra.mxu1 %v10240_v40 }
 0xe21   : > { %v13614_v49 = vadd.f32 %v6922_v52, %v13399_v11  ;;  %v13617_v62 = vadd.f32 %v6924_v5, %v13402_v20  ;;  %v6926_v50 = vmul.f32 %v13478_v30, %v6798_v31  ;;  %v6928_v18 = vmul.f32 %v13481_v19, %v6871_v43  ;;  %9371 = vmatpush3.bf16.msra.mxu0 %v10241_v29 }
 0xe22   : > { %v13622_v23 = vadd.f32 %v6925_v25, %v13407_v21  ;;  %v13625_v63 = vadd.f32 %v6927_v3, %v13410_v47 }
 0xe23   : > { %v13628_v12 = vadd.f32 %v6926_v50, %v13419_v36  ;;  %v13631_v11 = vadd.f32 %v6928_v18, %v13422_v58  ;;  %v5580_v36 = vld [vmem:[%s14538_s21 + $0x18] sm:$0xf] }
 0xe25   : > { %v6802_v20 = vpop.f32.mrb[164].mxu1  ;;  %v6875_v0 = vpop.f32.mrb[4].mxu0 }
 0xe26   : > { %v6929_v4 = vmul.f32 %v13438_v27, %v6802_v20  ;;  %v6931_v24 = vmul.f32 %v13469_v1, %v6875_v0  ;;  %v6804_v21 = vpop.f32.mrb[165].mxu1  ;;  %v6877_v52 = vpop.f32.mrb[5].mxu0 }
 0xe27   : > { %v6930_v47 = vmul.f32 %v13478_v30, %v6804_v21  ;;  %v6932_v5 = vmul.f32 %v13481_v19, %v6877_v52  ;;  %v6806_v22 = vpop.f32.mrb[166].mxu1  ;;  %v6879_v37 = vpop.f32.mrb[6].mxu0 }
 0xe28   : > { %v13641_v58 = vadd.f32 %v6929_v4, %v13441_v42  ;;  %v13644_v41 = vadd.f32 %v6931_v24, %v13444_v45  ;;  %v6933_v46 = vmul.f32 %v13438_v27, %v6806_v22  ;;  %v6935_v25 = vmul.f32 %v13469_v1, %v6879_v37  ;;  %v6808_v3 = vpop.f32.mrb[167].mxu1  ;;  %v6881_v31 = vpop.f32.mrb[7].mxu0 }
 0xe29   : > { %v13649_v43 = vadd.f32 %v6930_v47, %v13455_v44  ;;  %v13652_v40 = vadd.f32 %v6932_v5, %v13458_v17  ;;  %v6934_v29 = vmul.f32 %v13478_v30, %v6808_v3  ;;  %v6936_v42 = vmul.f32 %v13481_v19, %v6881_v31 }
 0xe2a   : > { %v13657_v50 = vadd.f32 %v6933_v46, %v13463_v32  ;;  %v13660_v45 = vadd.f32 %v6935_v25, %v13466_v61  ;;  %v13663_v27 = vrot.slane %v5580_v36, %v12259_v2  ;;  %v13666_v1 = vrot.slane %v5580_v36, %v12262_v9 }
 0xe2b   : > { %v13669_v44 = vadd.f32 %v6934_v29, %v13472_v7  ;;  %v13672_v17 = vadd.f32 %v6936_v42, %v13475_v48  ;;  %v13675_v30 = vrot.slane %v5580_v36, %v12265_v34  ;;  %v13678_v32 = vrot.slane %v5580_v36, %v12268_v6 }
 0xe2d   : > { %v7003_v61 = vpop.f32.mrb[168].mxu1  ;;  %v7076_v19 = vpop.f32.mrb[8].mxu0 }
 0xe2e   : > { %v7136_v18 = vmul.f32 %v13663_v27, %v7003_v61  ;;  %v7138_v20 = vmul.f32 %v13666_v1, %v7076_v19  ;;  %v7005_v0 = vpop.f32.mrb[169].mxu1  ;;  %v7078_v4 = vpop.f32.mrb[9].mxu0 }
 0xe2f   : > { %v7137_v7 = vmul.f32 %v13675_v30, %v7005_v0  ;;  %v7139_v24 = vmul.f32 %v13678_v32, %v7078_v4  ;;  %v7007_v48 = vpop.f32.mrb[170].mxu1  ;;  %v7080_v21 = vpop.f32.mrb[10].mxu0 }
 0xe30   : > { %v13685_v52 = vadd.f32 %v7136_v18, %v13506_v55  ;;  %v13688_v47 = vadd.f32 %v7138_v20, %v13509_v14  ;;  %v7140_v5 = vmul.f32 %v13663_v27, %v7007_v48  ;;  %v7142_v22 = vmul.f32 %v13666_v1, %v7080_v21  ;;  %v7009_v37 = vpop.f32.mrb[171].mxu1  ;;  %v7082_v36 = vpop.f32.mrb[11].mxu0 }
 0xe31   : > { %v13693_v46 = vadd.f32 %v7137_v7, %v13514_v56  ;;  %v13696_v25 = vadd.f32 %v7139_v24, %v13517_v26  ;;  %v7141_v3 = vmul.f32 %v13675_v30, %v7009_v37  ;;  %v7143_v55 = vmul.f32 %v13678_v32, %v7082_v36 }
 0xe32   : > { %v13701_v31 = vadd.f32 %v7140_v5, %v13522_v35  ;;  %v13704_v14 = vadd.f32 %v7142_v22, %v13525_v39 }
 0xe33   : > { %v13707_v29 = vadd.f32 %v7141_v3, %v13528_v53  ;;  %v13710_v42 = vadd.f32 %v7143_v55, %v13531_v51 }
 0xe35   : > { %v7013_v56 = vpop.f32.mrb[172].mxu1  ;;  %v7086_v61 = vpop.f32.mrb[12].mxu0 }
 0xe36   : > { %v7144_v26 = vmul.f32 %v13663_v27, %v7013_v56  ;;  %v7146_v19 = vmul.f32 %v13666_v1, %v7086_v61  ;;  %v7015_v18 = vpop.f32.mrb[173].mxu1  ;;  %v7088_v20 = vpop.f32.mrb[13].mxu0 }
 0xe37   : > { %v7145_v35 = vmul.f32 %v13675_v30, %v7015_v18  ;;  %v7147_v0 = vmul.f32 %v13678_v32, %v7088_v20  ;;  %v7017_v39 = vpop.f32.mrb[174].mxu1  ;;  %v7090_v4 = vpop.f32.mrb[14].mxu0 }
 0xe38   : > { %v13717_v53 = vadd.f32 %v7144_v26, %v13544_v15  ;;  %v13720_v51 = vadd.f32 %v7146_v19, %v13547_v59  ;;  %v7148_v7 = vmul.f32 %v13663_v27, %v7017_v39  ;;  %v7150_v24 = vmul.f32 %v13666_v1, %v7090_v4  ;;  %v7019_v48 = vpop.f32.mrb[175].mxu1  ;;  %v7092_v21 = vpop.f32.mrb[15].mxu0 }
 0xe39   : > { %v13725_v5 = vadd.f32 %v7145_v35, %v13558_v54  ;;  %v13728_v22 = vadd.f32 %v7147_v0, %v13561_v33  ;;  %v7149_v37 = vmul.f32 %v13675_v30, %v7019_v48  ;;  %v7151_v15 = vmul.f32 %v13678_v32, %v7092_v21 }
 0xe3a   : > { %v13733_v36 = vadd.f32 %v7148_v7, %v13566_v8  ;;  %v13736_v59 = vadd.f32 %v7150_v24, %v13569_v57 }
 0xe3b   : > { %v13739_v3 = vadd.f32 %v7149_v37, %v13572_v38  ;;  %v13742_v55 = vadd.f32 %v7151_v15, %v13575_v16 }
 0xe3d   : > { %v7023_v54 = vpop.f32.mrb[176].mxu1  ;;  %v7096_v56 = vpop.f32.mrb[16].mxu0 }
 0xe3e   : > { %v7152_v33 = vmul.f32 %v13663_v27, %v7023_v54  ;;  %v7154_v61 = vmul.f32 %v13666_v1, %v7096_v56  ;;  %v7025_v26 = vpop.f32.mrb[177].mxu1  ;;  %v7098_v19 = vpop.f32.mrb[17].mxu0 }
 0xe3f   : > { %v7153_v8 = vmul.f32 %v13675_v30, %v7025_v26  ;;  %v7155_v18 = vmul.f32 %v13678_v32, %v7098_v19  ;;  %v7027_v57 = vpop.f32.mrb[178].mxu1  ;;  %v7100_v20 = vpop.f32.mrb[18].mxu0 }
 0xe40   : > { %v13749_v38 = vadd.f32 %v7152_v33, %v13600_v60  ;;  %v13752_v16 = vadd.f32 %v7154_v61, %v13603_v28  ;;  %v7156_v35 = vmul.f32 %v13663_v27, %v7027_v57  ;;  %v7158_v0 = vmul.f32 %v13666_v1, %v7100_v20  ;;  %v7029_v39 = vpop.f32.mrb[179].mxu1  ;;  %v7102_v4 = vpop.f32.mrb[19].mxu0 }
 0xe41   : > { %v13757_v7 = vadd.f32 %v7153_v8, %v13614_v49  ;;  %v13760_v24 = vadd.f32 %v7155_v18, %v13617_v62  ;;  %v7157_v48 = vmul.f32 %v13675_v30, %v7029_v39  ;;  %v7159_v60 = vmul.f32 %v13678_v32, %v7102_v4 }
 0xe42   : > { %v13765_v21 = vadd.f32 %v7156_v35, %v13622_v23  ;;  %v13768_v28 = vadd.f32 %v7158_v0, %v13625_v63 }
 0xe43   : > { %v13771_v37 = vadd.f32 %v7157_v48, %v13628_v12  ;;  %v13774_v15 = vadd.f32 %v7159_v60, %v13631_v11  ;;  %v5581_v12 = vld [vmem:[%s14538_s21 + $0x1c] sm:$0xf] }
 0xe45   : > { %v7033_v49 = vpop.f32.mrb[180].mxu1  ;;  %v7106_v54 = vpop.f32.mrb[20].mxu0 }
 0xe46   : > { %v7160_v62 = vmul.f32 %v13663_v27, %v7033_v49  ;;  %v7162_v56 = vmul.f32 %v13666_v1, %v7106_v54  ;;  %v7035_v33 = vpop.f32.mrb[181].mxu1  ;;  %v7108_v61 = vpop.f32.mrb[21].mxu0 }
 0xe47   : > { %v7161_v23 = vmul.f32 %v13675_v30, %v7035_v33  ;;  %v7163_v26 = vmul.f32 %v13678_v32, %v7108_v61  ;;  %v7037_v63 = vpop.f32.mrb[182].mxu1  ;;  %v7110_v19 = vpop.f32.mrb[22].mxu0 }
 0xe48   : > { %v13784_v11 = vadd.f32 %v7160_v62, %v13641_v58  ;;  %v13787_v8 = vadd.f32 %v7162_v56, %v13644_v41  ;;  %v7164_v18 = vmul.f32 %v13663_v27, %v7037_v63  ;;  %v7166_v57 = vmul.f32 %v13666_v1, %v7110_v19  ;;  %v7039_v20 = vpop.f32.mrb[183].mxu1  ;;  %v7112_v35 = vpop.f32.mrb[23].mxu0 }
 0xe49   : > { %v13792_v0 = vadd.f32 %v7161_v23, %v13649_v43  ;;  %v13795_v39 = vadd.f32 %v7163_v26, %v13652_v40  ;;  %v7165_v4 = vmul.f32 %v13675_v30, %v7039_v20  ;;  %v7167_v58 = vmul.f32 %v13678_v32, %v7112_v35 }
 0xe4a   : > { %v13800_v48 = vadd.f32 %v7164_v18, %v13657_v50  ;;  %v13803_v41 = vadd.f32 %v7166_v57, %v13660_v45  ;;  %v13806_v27 = vrot.slane %v5581_v12, %v12259_v2  ;;  %v13809_v1 = vrot.slane %v5581_v12, %v12262_v9 }
 0xe4b   : > { %v13812_v43 = vadd.f32 %v7165_v4, %v13669_v44  ;;  %v13815_v40 = vadd.f32 %v7167_v58, %v13672_v17  ;;  %v13818_v30 = vrot.slane %v5581_v12, %v12265_v34  ;;  %v13821_v50 = vrot.slane %v5581_v12, %v12268_v6 }
 0xe4d   : > { %v7234_v45 = vpop.f32.mrb[184].mxu1  ;;  %v7307_v32 = vpop.f32.mrb[24].mxu0 }
 0xe4e   : > { %v7367_v60 = vmul.f32 %v13806_v27, %v7234_v45  ;;  %v7369_v49 = vmul.f32 %v13809_v1, %v7307_v32  ;;  %v7236_v54 = vpop.f32.mrb[185].mxu1  ;;  %v7309_v62 = vpop.f32.mrb[25].mxu0 }
 0xe4f   : > { %v7368_v44 = vmul.f32 %v13818_v30, %v7236_v54  ;;  %v7370_v56 = vmul.f32 %v13821_v50, %v7309_v62  ;;  %v7238_v17 = vpop.f32.mrb[186].mxu1  ;;  %v7311_v33 = vpop.f32.mrb[26].mxu0 }
 0xe50   : > { %v13828_v61 = vadd.f32 %v7367_v60, %v13685_v52  ;;  %v13831_v23 = vadd.f32 %v7369_v49, %v13688_v47  ;;  %v7371_v26 = vmul.f32 %v13806_v27, %v7238_v17  ;;  %v7373_v63 = vmul.f32 %v13809_v1, %v7311_v33  ;;  %v7240_v19 = vpop.f32.mrb[187].mxu1  ;;  %v7313_v12 = vpop.f32.mrb[27].mxu0 }
 0xe51   : > { %v13836_v18 = vadd.f32 %v7368_v44, %v13693_v46  ;;  %v13839_v57 = vadd.f32 %v7370_v56, %v13696_v25  ;;  %v7372_v20 = vmul.f32 %v13818_v30, %v7240_v19  ;;  %v7374_v52 = vmul.f32 %v13821_v50, %v7313_v12 }
 0xe52   : > { %v13844_v35 = vadd.f32 %v7371_v26, %v13701_v31  ;;  %v13847_v47 = vadd.f32 %v7373_v63, %v13704_v14 }
 0xe53   : > { %v13850_v4 = vadd.f32 %v7372_v20, %v13707_v29  ;;  %v13853_v58 = vadd.f32 %v7374_v52, %v13710_v42 }
 0xe55   : > { %v7244_v46 = vpop.f32.mrb[188].mxu1  ;;  %v7317_v45 = vpop.f32.mrb[28].mxu0 }
 0xe56   : > { %v7375_v25 = vmul.f32 %v13806_v27, %v7244_v46  ;;  %v7377_v32 = vmul.f32 %v13809_v1, %v7317_v45  ;;  %v7246_v60 = vpop.f32.mrb[189].mxu1  ;;  %v7319_v49 = vpop.f32.mrb[29].mxu0 }
 0xe57   : > { %v7376_v31 = vmul.f32 %v13818_v30, %v7246_v60  ;;  %v7378_v54 = vmul.f32 %v13821_v50, %v7319_v49  ;;  %v7248_v14 = vpop.f32.mrb[190].mxu1  ;;  %v7321_v62 = vpop.f32.mrb[30].mxu0 }
 0xe58   : > { %v13860_v29 = vadd.f32 %v7375_v25, %v13717_v53  ;;  %v13863_v42 = vadd.f32 %v7377_v32, %v13720_v51  ;;  %v7379_v44 = vmul.f32 %v13806_v27, %v7248_v14  ;;  %v7381_v56 = vmul.f32 %v13809_v1, %v7321_v62  ;;  %v7250_v17 = vpop.f32.mrb[191].mxu1  ;;  %v7323_v33 = vpop.f32.mrb[31].mxu0 }
 0xe59   : > { %v13868_v26 = vadd.f32 %v7376_v31, %v13725_v5  ;;  %v13871_v63 = vadd.f32 %v7378_v54, %v13728_v22  ;;  %v7380_v19 = vmul.f32 %v13818_v30, %v7250_v17  ;;  %v7382_v53 = vmul.f32 %v13821_v50, %v7323_v33 }
 0xe5a   : > { %v13876_v12 = vadd.f32 %v7379_v44, %v13733_v36  ;;  %v13879_v51 = vadd.f32 %v7381_v56, %v13736_v59 }
 0xe5b   : > { %v13882_v20 = vadd.f32 %v7380_v19, %v13739_v3  ;;  %v13885_v52 = vadd.f32 %v7382_v53, %v13742_v55 }
 0xe5d   : > { %v7254_v5 = vpop.f32.mrb[192].mxu1  ;;  %v7327_v46 = vpop.f32.mrb[32].mxu0 }
 0xe5e   : > { %v7383_v22 = vmul.f32 %v13806_v27, %v7254_v5  ;;  %v7385_v45 = vmul.f32 %v13809_v1, %v7327_v46  ;;  %v7256_v25 = vpop.f32.mrb[193].mxu1  ;;  %v7329_v32 = vpop.f32.mrb[33].mxu0 }
 0xe5f   : > { %v7384_v36 = vmul.f32 %v13818_v30, %v7256_v25  ;;  %v7386_v60 = vmul.f32 %v13821_v50, %v7329_v32  ;;  %v7258_v59 = vpop.f32.mrb[194].mxu1  ;;  %v7331_v49 = vpop.f32.mrb[34].mxu0 }
 0xe60   : > { %v13892_v3 = vadd.f32 %v7383_v22, %v13749_v38  ;;  %v13895_v55 = vadd.f32 %v7385_v45, %v13752_v16  ;;  %v7387_v31 = vmul.f32 %v13806_v27, %v7258_v59  ;;  %v7389_v54 = vmul.f32 %v13809_v1, %v7331_v49  ;;  %v7260_v14 = vpop.f32.mrb[195].mxu1  ;;  %v7333_v62 = vpop.f32.mrb[35].mxu0 }
 0xe61   : > { %v13900_v44 = vadd.f32 %v7384_v36, %v13757_v7  ;;  %v13903_v56 = vadd.f32 %v7386_v60, %v13760_v24  ;;  %v7388_v17 = vmul.f32 %v13818_v30, %v7260_v14  ;;  %v7390_v38 = vmul.f32 %v13821_v50, %v7333_v62 }
 0xe62   : > { %v13908_v33 = vadd.f32 %v7387_v31, %v13765_v21  ;;  %v13911_v16 = vadd.f32 %v7389_v54, %v13768_v28 }
 0xe63   : > { %v13914_v19 = vadd.f32 %v7388_v17, %v13771_v37  ;;  %v13917_v53 = vadd.f32 %v7390_v38, %v13774_v15  ;;  %v5582_v37 = vld [vmem:[%s14538_s21 + $0x20] sm:$0xf] }
 0xe65   : > { %v7264_v7 = vpop.f32.mrb[196].mxu1  ;;  %v7337_v5 = vpop.f32.mrb[36].mxu0 }
 0xe66   : > { %v7391_v24 = vmul.f32 %v13806_v27, %v7264_v7  ;;  %v7393_v46 = vmul.f32 %v13809_v1, %v7337_v5  ;;  %v7266_v22 = vpop.f32.mrb[197].mxu1  ;;  %v7339_v45 = vpop.f32.mrb[37].mxu0 }
 0xe67   : > { %v7392_v21 = vmul.f32 %v13818_v30, %v7266_v22  ;;  %v7394_v25 = vmul.f32 %v13821_v50, %v7339_v45  ;;  %v7268_v28 = vpop.f32.mrb[198].mxu1  ;;  %v7341_v32 = vpop.f32.mrb[38].mxu0 }
 0xe68   : > { %v13927_v15 = vadd.f32 %v7391_v24, %v13784_v11  ;;  %v13930_v36 = vadd.f32 %v7393_v46, %v13787_v8  ;;  %v7395_v60 = vmul.f32 %v13806_v27, %v7268_v28  ;;  %v7397_v59 = vmul.f32 %v13809_v1, %v7341_v32  ;;  %v7270_v49 = vpop.f32.mrb[199].mxu1  ;;  %v7343_v31 = vpop.f32.mrb[39].mxu0 }
 0xe69   : > { %v13935_v54 = vadd.f32 %v7392_v21, %v13792_v0  ;;  %v13938_v14 = vadd.f32 %v7394_v25, %v13795_v39  ;;  %v7396_v62 = vmul.f32 %v13818_v30, %v7270_v49  ;;  %v7398_v11 = vmul.f32 %v13821_v50, %v7343_v31 }
 0xe6a   : > { %v13943_v17 = vadd.f32 %v7395_v60, %v13800_v48  ;;  %v13946_v8 = vadd.f32 %v7397_v59, %v13803_v41  ;;  %v13949_v27 = vrot.slane %v5582_v37, %v12259_v2  ;;  %v13952_v1 = vrot.slane %v5582_v37, %v12262_v9  ;;  %v7662_v48 = vld [vmem:[%s14539_s22] sm:$0xf] }
 0xe6b   : > { %v13955_v0 = vadd.f32 %v7396_v62, %v13812_v43  ;;  %v13958_v39 = vadd.f32 %v7398_v11, %v13815_v40  ;;  %v13964_v30 = vrot.slane %v5582_v37, %v12265_v34  ;;  %v13967_v41 = vrot.slane %v5582_v37, %v12268_v6 }
 0xe6c   : > { %v13971_v43 = vrot.slane %v7662_v48, %v12259_v2  ;;  %v13975_v5 = vrot.slane %v7662_v48, %v12262_v9 }
 0xe6d   : > { %v7465_v50 = vpop.f32.mrb[200].mxu1  ;;  %v7538_v38 = vpop.f32.mrb[40].mxu0 }
 0xe6e   : > { %v7598_v7 = vmul.f32 %v13949_v27, %v7465_v50  ;;  %v7600_v40 = vmul.f32 %v13952_v1, %v7538_v38  ;;  %v7467_v24 = vpop.f32.mrb[201].mxu1  ;;  %v7540_v46 = vpop.f32.mrb[41].mxu0  ;;  %v13994_v38 = vrot.slane %v7662_v48, %v12265_v34 }
 0xe6f   : > { %v7599_v22 = vmul.f32 %v13964_v30, %v7467_v24  ;;  %v7601_v45 = vmul.f32 %v13967_v41, %v7540_v46  ;;  %v7469_v21 = vpop.f32.mrb[202].mxu1  ;;  %v7542_v25 = vpop.f32.mrb[42].mxu0  ;;  %v14000_v24 = vrot.slane %v7662_v48, %v12268_v6 }
 0xe70   : > { %v7630_v28 = vadd.f32 %v7598_v7, %v13828_v61  ;;  %v7632_v32 = vadd.f32 %v7600_v40, %v13831_v23  ;;  %v7602_v2 = vmul.f32 %v13949_v27, %v7469_v21  ;;  %v7604_v37 = vmul.f32 %v13952_v1, %v7542_v25  ;;  %v7471_v60 = vpop.f32.mrb[203].mxu1  ;;  %v7544_v59 = vpop.f32.mrb[43].mxu0 }
 0xe71   : > { %v7631_v9 = vadd.f32 %v7599_v22, %v13836_v18  ;;  %v7633_v49 = vadd.f32 %v7601_v45, %v13839_v57  ;;  %v7603_v31 = vmul.f32 %v13964_v30, %v7471_v60  ;;  %v7605_v62 = vmul.f32 %v13967_v41, %v7544_v59 }
 0xe72   : > { %v13988_v11 = vadd.f32 %v13971_v43, %v7630_v28  ;;  %v7686_v61 = vadd.f32 %v13975_v5, %v7632_v32  ;;  %v7634_v23 = vadd.f32 %v7602_v2, %v13844_v35  ;;  %v7636_v50 = vadd.f32 %v7604_v37, %v13847_v47 }
 0xe73   : > { %v7635_v18 = vadd.f32 %v7603_v31, %v13850_v4  ;;  %v7637_v57 = vadd.f32 %v7605_v62, %v13853_v58  ;;  %v14009_v25 = vadd.f32 %v13994_v38, %v7631_v9  ;;  %v14014_v37 = vadd.f32 %v14000_v24, %v7633_v49 }
 0xe74   : > { %14621 = vst [vmem:[#allocation17_spill] sm:$0xff] %v13988_v11  ;;  %v7748_v7 = vmul.f32 0.044715, %v13988_v11  ;;  %v7750_v40 = vmul.f32 0.044715, %v7686_v61  ;;  %v14003_v46 = vadd.f32 %v13971_v43, %v7634_v23  ;;  %v7690_v35 = vadd.f32 %v13975_v5, %v7636_v50 }
 0xe75   : > { %v7475_v22 = vpop.f32.mrb[204].mxu1  ;;  %v7548_v47 = vpop.f32.mrb[44].mxu0  ;;  %14623 = vst [vmem:[#allocation19_spill] sm:$0xff] %v14014_v37 }
 0xe76   : > { %14622 = vst [vmem:[#allocation18_spill] sm:$0xff] %v14003_v46  ;;  %v7780_v34 = vmul.f32 %v7748_v7, %v13988_v11  ;;  %v7782_v45 = vmul.f32 %v7750_v40, %v7686_v61  ;;  %v7752_v4 = vmul.f32 0.044715, %v14003_v46  ;;  %v7477_v21 = vpop.f32.mrb[205].mxu1  ;;  %v7550_v58 = vpop.f32.mrb[45].mxu0  ;;  %v7606_v6 = vmul.f32 %v13949_v27, %v7475_v22 }
 0xe77   : > { %v7754_v28 = vmul.f32 0.044715, %v7690_v35  ;;  %v7479_v48 = vpop.f32.mrb[206].mxu1  ;;  %v7552_v59 = vpop.f32.mrb[46].mxu0  ;;  %v7608_v9 = vmul.f32 %v13952_v1, %v7548_v47  ;;  %v7607_v50 = vmul.f32 %v13964_v30, %v7477_v21  ;;  %v7609_v49 = vmul.f32 %v13967_v41, %v7550_v58 }
 0xe78   : > { %v7812_v32 = vmul.f32 %v7780_v34, %v13988_v11  ;;  %v7814_v2 = vmul.f32 %v7782_v45, %v7686_v61  ;;  %v7784_v60 = vmul.f32 %v7752_v4, %v14003_v46  ;;  %v7481_v31 = vpop.f32.mrb[207].mxu1  ;;  %v7638_v23 = vadd.f32 %v7606_v6, %v13860_v29  ;;  %v7554_v7 = vpop.f32.mrb[47].mxu0 }
 0xe79   : > { %v7786_v62 = vmul.f32 %v7754_v28, %v7690_v35  ;;  %v14022_v34 = vadd.f32 %v13994_v38, %v7635_v18  ;;  %v14025_v45 = vmul.f32 0.5, %v7686_v61  ;;  %v7640_v28 = vadd.f32 %v7608_v9, %v13863_v42 }
 0xe7a   : > { %v7846_v40 = vadd.f32 %v7814_v2, %v7686_v61  ;;  %v7816_v22 = vmul.f32 %v7784_v60, %v14003_v46  ;;  %v7639_v29 = vadd.f32 %v7607_v50, %v13868_v26  ;;  %v7844_v47 = vadd.f32 %v7812_v32, %v13988_v11 }
 0xe7b   : > { %v7818_v4 = vmul.f32 %v7786_v62, %v7690_v35  ;;  %v7641_v2 = vadd.f32 %v7609_v49, %v13871_v63  ;;  %v14033_v60 = vmul.f32 0.044715, %v14009_v25  ;;  %v14036_v18 = vmul.f32 0.044715, %v14014_v37 }
 0xe7c   : > { %v7878_v6 = vmul.f32 0.7978846, %v7846_v40  ;;  %v7848_v21 = vadd.f32 %v7816_v22, %v14003_v46  ;;  %v7694_v58 = vadd.f32 %v13975_v5, %v7640_v28  ;;  %v14039_v9 = vmul.f32 0.5, %v7690_v35 }
 0xe7d   : > { %14624 = vst [vmem:[#allocation20_spill] sm:$0xff] %v14036_v18  ;;  %v7850_v61 = vadd.f32 %v7818_v4, %v7690_v35  ;;  %v7485_v62 = vpop.f32.mrb[208].mxu1  ;;  %v7558_v42 = vpop.f32.mrb[48].mxu0  ;;  %v14042_v26 = vmul.f32 0.044715, %v14022_v34  ;;  %v14045_v32 = vadd.f32 %v14000_v24, %v7637_v57  ;;  %v7610_v63 = vmul.f32 %v13949_v27, %v7479_v48 }
 0xe7e   : > { %v7487_v50 = vpop.f32.mrb[209].mxu1  ;;  %v7560_v40 = vpop.f32.mrb[49].mxu0  ;;  %10354 = vtanh.f32 %v7878_v6  ;;  %v14049_v49 = vadd.f32 %v13971_v43, %v7638_v23  ;;  %v7758_v4 = vmul.f32 0.044715, %v7694_v58  ;;  %v7876_v10 = vmul.f32 0.7978846, %v7844_v47 }
 0xe7f   : > { %v7882_v22 = vmul.f32 0.7978846, %v7850_v61  ;;  %v7489_v28 = vpop.f32.mrb[210].mxu1  ;;  %v7880_v35 = vmul.f32 0.7978846, %v7848_v21  ;;  %v14052_v13 = vadd.f32 %v13994_v38, %v7639_v29  ;;  %v7642_v46 = vadd.f32 %v7610_v63, %v13876_v12  ;;  %v7562_v57 = vpop.f32.mrb[50].mxu0 }
 0xe80   : > { %14625 = vst [vmem:[#allocation21_spill] sm:$0xff] %v14049_v49  ;;  %v7491_v11 = vpop.f32.mrb[211].mxu1  ;;  %v7790_v48 = vmul.f32 %v7758_v4, %v7694_v58  ;;  %v7612_v18 = vmul.f32 %v13952_v1, %v7552_v59  ;;  %v7611_v6 = vmul.f32 %v13964_v30, %v7481_v31  ;;  %v7564_v61 = vpop.f32.mrb[51].mxu0  ;;  %v14058_v23 = vadd.f32 %v14000_v24, %v7641_v2 }
 0xe81   : > { %14626 = vst [vmem:[#allocation22_spill] sm:$0xff] %v14052_v13  ;;  %10356 = vtanh.f32 %v7882_v22  ;;  %v7613_v47 = vmul.f32 %v13967_v41, %v7554_v7  ;;  %v7614_v21 = vmul.f32 %v13949_v27, %v7485_v62  ;;  %v7616_v29 = vmul.f32 %v13952_v1, %v7558_v42 }
 0xe82   : > { %14627 = vst [vmem:[#allocation23_spill] sm:$0xff] %v14058_v23  ;;  %v7822_v37 = vmul.f32 %v7790_v48, %v7694_v58  ;;  %v7644_v12 = vadd.f32 %v7612_v18, %v13879_v51  ;;  %v7643_v63 = vadd.f32 %v7611_v6, %v13882_v20  ;;  %v7615_v22 = vmul.f32 %v13964_v30, %v7487_v50 }
 0xe83   : > { %v14067_v59 = vadd.f32 %v13971_v43, %v7642_v46  ;;  %v7645_v31 = vadd.f32 %v7613_v47, %v13885_v52  ;;  %v7646_v2 = vadd.f32 %v7614_v21, %v13892_v3  ;;  %v7648_v7 = vadd.f32 %v7616_v29, %v13895_v55 }
 0xe84   : > { %v14073_v62 = vmul.f32 0.044715, %v14045_v32  ;;  %v7854_v42 = vadd.f32 %v7822_v37, %v7694_v58  ;;  %v7698_v4 = vadd.f32 %v13975_v5, %v7644_v12  ;;  %v7647_v51 = vadd.f32 %v7615_v22, %v13900_v44 }
 0xe85   : > { %14628 = vst [vmem:[#allocation24_spill] sm:$0xff] %v14067_v59  ;;  %v7495_v20 = vpop.f32.mrb[212].mxu1  ;;  %v7568_v18 = vpop.f32.mrb[52].mxu0  ;;  %10358 = vtanh.f32 %v7876_v10  ;;  %v14078_v46 = vmul.f32 0.044715, %v14049_v49  ;;  %v7702_v52 = vadd.f32 %v13975_v5, %v7648_v7  ;;  %v7617_v3 = vmul.f32 %v13967_v41, %v7560_v40 }
 0xe86   : > { %v7497_v50 = vpop.f32.mrb[213].mxu1  ;;  %v7570_v55 = vpop.f32.mrb[53].mxu0  ;;  %10360 = vtanh.f32 %v7880_v35  ;;  %v14082_v48 = vmul.f32 0.5, %v7694_v58  ;;  %v7886_v37 = vmul.f32 0.7978846, %v7854_v42  ;;  %v14097_v58 = vadd.f32 %v13994_v38, %v7643_v63 }
 0xe87   : > { %14629 = vst [vmem:[#allocation25_spill] sm:$0xff] %v14078_v46  ;;  %v7762_v6 = vmul.f32 0.044715, %v7698_v4  ;;  %v14084_v47 = vpop.f32.mrb[214].mxu1  ;;  %v14087_v44 = vmul.f32 0.044715, %v14052_v13  ;;  %v7649_v40 = vadd.f32 %v7617_v3, %v13903_v56  ;;  %v14100_v35 = vadd.f32 %v14000_v24, %v7645_v31 }
 0xe88   : > { %v14090_v10 = vmul.f32 0.044715, %v14058_v23  ;;  %v14093_v21 = vmul.f32 0.044715, %v14067_v59  ;;  %v10355_v29 = vpop.eup %10354  ;;  %v7766_v22 = vmul.f32 0.044715, %v7702_v52  ;;  %10362 = vtanh.f32 %v7886_v37 }
 0xe89   : > { %14630 = vst [vmem:[#allocation26_spill] sm:$0xff] %v14087_v44  ;;  %v7794_v12 = vmul.f32 %v7762_v6, %v7698_v4  ;;  %v7572_v7 = vpop.f32.mrb[54].mxu0  ;;  %v7501_v42 = vpop.f32.mrb[215].mxu1  ;;  %v7942_v46 = vadd.f32 1.0, %v10355_v29  ;;  %v14103_v49 = vadd.f32 %v13971_v43, %v7646_v2  ;;  %v7620_v63 = vmul.f32 %v13952_v1, %v7562_v57 }
 0xe8a   : > { %14631 = vst [vmem:[#allocation27_spill] sm:$0xff] %v14090_v10  ;;  %14632 = vst [vmem:[#allocation28_spill] sm:$0xff] %v14093_v21  ;;  %v7618_v21 = vmul.f32 %v13949_v27, %v7489_v28  ;;  %v14106_v59 = vpop.f32.mrb[55].mxu0  ;;  %v7798_v6 = vmul.f32 %v7766_v22, %v7702_v52  ;;  %v7619_v31 = vmul.f32 %v13964_v30, %v7491_v11  ;;  %v14110_v23 = vmul.f32 0.5, %v7698_v4 }
 0xe8b   : > { %v10357_v56 = vpop.eup %10356  ;;  %v7826_v3 = vmul.f32 %v7794_v12, %v7698_v4  ;;  %v14113_v29 = vadd.f32 %v13994_v38, %v7647_v51  ;;  %v7652_v28 = vadd.f32 %v7620_v63, %v13911_v16  ;;  %v14119_v12 = vmul.f32 %v7942_v46, %v14025_v45 }
 0xe8c   : > { %v7946_v10 = vadd.f32 1.0, %v10357_v56  ;;  %v7650_v2 = vadd.f32 %v7618_v21, %v13908_v33  ;;  %v7830_v44 = vmul.f32 %v7798_v6, %v7702_v52  ;;  %v7651_v13 = vadd.f32 %v7619_v31, %v13914_v19 }
 0xe8d   : > { %v7858_v37 = vadd.f32 %v7826_v3, %v7698_v4  ;;  %v7621_v11 = vmul.f32 %v13967_v41, %v7564_v61  ;;  %v7622_v22 = vmul.f32 %v13949_v27, %v7495_v20  ;;  %v14127_v56 = vmul.f32 0.044715, %v14097_v58 }
 0xe8e   : > { %v14122_v57 = vmul.f32 %v7946_v10, %v14039_v9  ;;  %v7862_v33 = vadd.f32 %v7830_v44, %v7702_v52  ;;  %v7706_v4 = vadd.f32 %v13975_v5, %v7652_v28  ;;  %v14135_v45 = vadd.f32 %v14000_v24, %v7649_v40 }
 0xe8f   : > { %v7890_v51 = vmul.f32 0.7978846, %v7858_v37  ;;  %v14130_v16 = vpop.eup %10358  ;;  %v7653_v9 = vadd.f32 %v7621_v11, %v13917_v53  ;;  %v7654_v61 = vadd.f32 %v7622_v22, %v13927_v15  ;;  %v14142_v46 = vmul.f32 0.044715, %v14100_v35 }
 0xe90   : > { %v14139_v20 = vpop.eup %10360  ;;  %v7894_v44 = vmul.f32 0.7978846, %v7862_v33  ;;  %v7770_v10 = vmul.f32 0.044715, %v7706_v4  ;;  %v14145_v21 = vmul.f32 0.044715, %v14103_v49  ;;  %v7624_v53 = vmul.f32 %v13952_v1, %v7568_v18 }
 0xe91   : > { %10364 = vtanh.f32 %v7890_v51  ;;  %v14147_v3 = vmul.f32 0.5, %v7702_v52  ;;  %v14150_v40 = vmul.f32 0.044715, %v14113_v29  ;;  %v7623_v6 = vmul.f32 %v13964_v30, %v7497_v50 }
 0xe92   : > { %10366 = vtanh.f32 %v7894_v44  ;;  %v7802_v15 = vmul.f32 %v7770_v10, %v7706_v4  ;;  %v7625_v63 = vmul.f32 %v13967_v41, %v7570_v55  ;;  %v10363_v31 = vpop.eup %10362  ;;  %v14156_v37 = vmul.f32 0.044715, %v14135_v45 }
 0xe93   : > { %v14159_v28 = vadd.f32 %v13971_v43, %v7650_v2  ;;  %v14162_v52 = vadd.f32 %v13994_v38, %v7651_v13  ;;  %v7656_v11 = vadd.f32 %v7624_v53, %v13930_v36  ;;  %v7655_v18 = vadd.f32 %v7623_v6, %v13935_v54 }
 0xe94   : > { %v7834_v22 = vmul.f32 %v7802_v15, %v7706_v4  ;;  %v7657_v51 = vadd.f32 %v7625_v63, %v13938_v14  ;;  %v7626_v50 = vmul.f32 %v13949_v27, %v14084_v47  ;;  %v14170_v55 = vadd.f32 %v14000_v24, %v7653_v9 }
 0xe95   : > { %v7710_v33 = vadd.f32 %v13975_v5, %v7656_v11  ;;  %v7628_v2 = vmul.f32 %v13952_v1, %v7572_v7  ;;  %v7627_v13 = vmul.f32 %v13964_v30, %v7501_v42  ;;  %v7950_v44 = vadd.f32 1.0, %v10363_v31 }
 0xe96   : > { %v7866_v10 = vadd.f32 %v7834_v22, %v7706_v4  ;;  %v14176_v36 = vadd.f32 %v13971_v43, %v7654_v61  ;;  %v7658_v54 = vadd.f32 %v7626_v50, %v13943_v17  ;;  %v14180_v14 = vmul.f32 0.044715, %v14159_v28 }
 0xe97   : > { %v7774_v27 = vmul.f32 0.044715, %v7710_v33  ;;  %v7660_v47 = vadd.f32 %v7628_v2, %v13946_v8  ;;  %v7659_v9 = vadd.f32 %v7627_v13, %v13955_v0  ;;  %v14184_v53 = vmul.f32 0.5, %v7706_v4 }
 0xe98   : > { %v7898_v1 = vmul.f32 0.7978846, %v7866_v10  ;;  %v14187_v30 = vmul.f32 0.044715, %v14162_v52  ;;  %v14190_v7 = vadd.f32 %v13994_v38, %v7655_v18  ;;  %v14193_v17 = vadd.f32 %v14000_v24, %v7657_v51 }
 0xe99   : > { %v7806_v42 = vmul.f32 %v7774_v27, %v7710_v33  ;;  %v7714_v61 = vadd.f32 %v13975_v5, %v7660_v47  ;;  %v7629_v8 = vmul.f32 %v13967_v41, %v14106_v59  ;;  %v14199_v0 = vmul.f32 %v7950_v44, %v14082_v48 }
 0xe9a   : > { %10368 = vtanh.f32 %v7898_v1  ;;  %v14202_v4 = vmul.f32 0.044715, %v14170_v55  ;;  %v14205_v6 = vmul.f32 0.044715, %v14176_v36  ;;  %v14207_v31 = vmul.f32 0.5, %v7710_v33 }
 0xe9b   : > { %v10365_v15 = vpop.eup %10364  ;;  %v7838_v11 = vmul.f32 %v7806_v42, %v7710_v33  ;;  %v7778_v22 = vmul.f32 0.044715, %v7714_v61  ;;  %v14210_v18 = vmul.f32 0.044715, %v14190_v7  ;;  %v7661_v41 = vadd.f32 %v7629_v8, %v13958_v39  ;;  %v14633_v8 = vld [vmem:[#allocation19_spill] sm:$0xff] }
 0xe9c   : > { %v7954_v63 = vadd.f32 1.0, %v10365_v15  ;;  %v10367_v5 = vpop.eup %10366  ;;  %v7781_v59 = vmul.f32 %v14033_v60, %v14009_v25  ;;  %v7785_v48 = vmul.f32 %v14042_v26, %v14022_v34  ;;  %v14221_v2 = vmul.f32 0.044715, %v14193_v17  ;;  %v14634_v15 = vld [vmem:[#allocation20_spill] sm:$0xff] }
 0xe9d   : > { %v7870_v50 = vadd.f32 %v7838_v11, %v7710_v33  ;;  %v7810_v13 = vmul.f32 %v7778_v22, %v7714_v61  ;;  %v7958_v44 = vadd.f32 1.0, %v10367_v5  ;;  %v14224_v10 = vadd.f32 %v13971_v43, %v7658_v54 }
 0xe9e   : > { %v14218_v51 = vmul.f32 %v7954_v63, %v14110_v23  ;;  %v7813_v39 = vmul.f32 %v7781_v59, %v14009_v25  ;;  %v7817_v27 = vmul.f32 %v7785_v48, %v14022_v34  ;;  %v14231_v23 = vadd.f32 %v13994_v38, %v7659_v9 }
 0xe9f   : > { %v7902_v26 = vmul.f32 0.7978846, %v7870_v50  ;;  %v7842_v47 = vmul.f32 %v7810_v13, %v7714_v61  ;;  %v14234_v33 = vmul.f32 0.5, %v14009_v25  ;;  %v14237_v1 = vmul.f32 0.5, %v14022_v34  ;;  %v14635_v13 = vld [vmem:[#allocation17_spill] sm:$0xff] }
 0xea0   : > { %v7845_v43 = vadd.f32 %v7813_v39, %v14009_v25  ;;  %v7849_v54 = vadd.f32 %v7817_v27, %v14022_v34  ;;  %v7783_v63 = vmul.f32 %v14634_v15, %v14633_v8  ;;  %v7787_v11 = vmul.f32 %v14073_v62, %v14045_v32  ;;  %v14636_v62 = vld [vmem:[#allocation18_spill] sm:$0xff] }
 0xea1   : > { %10370 = vtanh.f32 %v7902_v26  ;;  %v7874_v42 = vadd.f32 %v7842_v47, %v7714_v61  ;;  %v14246_v38 = vmul.f32 %v7958_v44, %v14147_v3  ;;  %v14249_v9 = vadd.f32 %v14000_v24, %v7661_v41 }
 0xea2   : > { %v7877_v22 = vmul.f32 0.7978846, %v7845_v43  ;;  %v7881_v5 = vmul.f32 0.7978846, %v7849_v54  ;;  %v7815_v25 = vmul.f32 %v7783_v63, %v14633_v8  ;;  %v7819_v34 = vmul.f32 %v7787_v11, %v14045_v32  ;;  %v14638_v43 = vld [vmem:[#allocation26_spill] sm:$0xff] }
 0xea3   : > { %v7906_v59 = vmul.f32 0.7978846, %v7874_v42  ;;  %v7940_v48 = vadd.f32 1.0, %v14130_v16  ;;  %v7716_v39 = vmul.f32 0.5, %v14635_v13  ;;  %v7720_v27 = vmul.f32 0.5, %v14636_v62  ;;  %v14637_v16 = vld [vmem:[#allocation22_spill] sm:$0xff] }
 0xea4   : > { %v10369_v50 = vpop.eup %10368  ;;  %10372 = vtanh.f32 %v7877_v22  ;;  %v7944_v3 = vadd.f32 1.0, %v14139_v20  ;;  %v7847_v24 = vadd.f32 %v7815_v25, %v14633_v8  ;;  %v7851_v41 = vadd.f32 %v7819_v34, %v14045_v32  ;;  %v14639_v34 = vld [vmem:[#allocation23_spill] sm:$0xff] }
 0xea5   : > { %v7962_v44 = vadd.f32 1.0, %v10369_v50  ;;  %10374 = vtanh.f32 %v7906_v59  ;;  %v14259_v26 = vmul.f32 %v7940_v48, %v7716_v39  ;;  %v7789_v54 = vmul.f32 %v14638_v43, %v14637_v16  ;;  %v14640_v48 = vld [vmem:[#allocation27_spill] sm:$0xff] }
 0xea6   : > { %10376 = vtanh.f32 %v7881_v5  ;;  %v14261_v47 = vmul.f32 %v7944_v3, %v7720_v27  ;;  %v7879_v15 = vmul.f32 0.7978846, %v7847_v24  ;;  %v7883_v63 = vmul.f32 0.7978846, %v7851_v41  ;;  %v14642_v24 = vld [vmem:[#allocation25_spill] sm:$0xff] }
 0xea7   : > { %v14266_v42 = vmul.f32 %v7962_v44, %v14184_v53  ;;  %v7793_v20 = vmul.f32 %v14127_v56, %v14097_v58  ;;  %v7746_v11 = vmul.f32 0.5, %v7714_v61  ;;  %v14271_v22 = vmul.f32 0.044715, %v14231_v23  ;;  %v14641_v44 = vld [vmem:[#allocation21_spill] sm:$0xff] }
 0xea8   : > { %v8004_v5 = vpack.c.bf16 %v14261_v47, %v14259_v26  ;;  %v7821_v59 = vmul.f32 %v7789_v54, %v14637_v16  ;;  %10378 = vtanh.f32 %v7879_v15  ;;  %v7791_v50 = vmul.f32 %v14640_v48, %v14639_v34  ;;  %v14643_v15 = vld [vmem:[#allocation24_spill] sm:$0xff] }
 0xea9   : > { %v7825_v53 = vmul.f32 %v7793_v20, %v14097_v58  ;;  %v7719_v56 = vmul.f32 0.5, %v14633_v8  ;;  %10380 = vtanh.f32 %v7883_v63  ;;  %v7795_v13 = vmul.f32 %v14142_v46, %v14100_v35  ;;  %v14644_v63 = vld [vmem:[#allocation28_spill] sm:$0xff] }
 0xeaa   : > { %v7853_v61 = vadd.f32 %v7821_v59, %v14637_v16  ;;  %v14286_v62 = vmul.f32 0.044715, %v14249_v9  ;;  %v7823_v3 = vmul.f32 %v7791_v50, %v14639_v34  ;;  %v7788_v41 = vmul.f32 %v14642_v24, %v14641_v44 }
 0xeab   : > { %v10371_v39 = vpop.eup %10370  ;;  %v7857_v27 = vadd.f32 %v7825_v53, %v14097_v58  ;;  %v7723_v43 = vmul.f32 0.5, %v14045_v32  ;;  %v7827_v54 = vmul.f32 %v7795_v13, %v14100_v35  ;;  %v7792_v20 = vmul.f32 %v14644_v63, %v14643_v15 }
 0xeac   : > { %v7885_v8 = vmul.f32 0.7978846, %v7853_v61  ;;  %v7966_v46 = vadd.f32 1.0, %v10371_v39  ;;  %v7855_v48 = vadd.f32 %v7823_v3, %v14639_v34  ;;  %v7820_v25 = vmul.f32 %v7788_v41, %v14641_v44 }
 0xead   : > { %v7889_v59 = vmul.f32 0.7978846, %v7857_v27  ;;  %v7725_v50 = vmul.f32 0.5, %v14637_v16  ;;  %v7859_v24 = vadd.f32 %v7827_v54, %v14100_v35  ;;  %v7824_v32 = vmul.f32 %v7792_v20, %v14643_v15 }
 0xeae   : > { %v10373_v53 = vpop.eup %10372  ;;  %10382 = vtanh.f32 %v7885_v8  ;;  %v7887_v13 = vmul.f32 0.7978846, %v7855_v48  ;;  %v7852_v63 = vadd.f32 %v7820_v25, %v14641_v44  ;;  %v7729_v3 = vmul.f32 0.5, %v14097_v58 }
 0xeaf   : > { %v10375_v61 = vpop.eup %10374  ;;  %v7941_v60 = vadd.f32 1.0, %v10373_v53  ;;  %10384 = vtanh.f32 %v7889_v59  ;;  %v7891_v19 = vmul.f32 0.7978846, %v7859_v24  ;;  %v7856_v41 = vadd.f32 %v7824_v32, %v14643_v15 }
 0xeb0   : > { %v10377_v39 = vpop.eup %10376  ;;  %v7970_v27 = vadd.f32 1.0, %v10375_v61  ;;  %v14305_v16 = vmul.f32 %v7966_v46, %v14207_v31  ;;  %10386 = vtanh.f32 %v7887_v13  ;;  %v7884_v54 = vmul.f32 0.7978846, %v7852_v63 }
 0xeb1   : > { %v7945_v8 = vadd.f32 1.0, %v10377_v39  ;;  %10388 = vtanh.f32 %v7891_v19  ;;  %v7888_v59 = vmul.f32 0.7978846, %v7856_v41  ;;  %v7797_v25 = vmul.f32 %v14150_v40, %v14113_v29 }
 0xeb2   : > { %v14307_v20 = vmul.f32 %v7970_v27, %v7746_v11  ;;  %v10379_v48 = vpop.eup %10378  ;;  %v7973_v53 = vmul.f32 %v7941_v60, %v14234_v33  ;;  %10390 = vtanh.f32 %v7884_v54  ;;  %v7801_v31 = vmul.f32 %v14187_v30, %v14162_v52 }
 0xeb3   : > { %v7977_v58 = vmul.f32 %v7945_v8, %v14237_v1  ;;  %v10381_v46 = vpop.eup %10380  ;;  %v7943_v11 = vadd.f32 1.0, %v10379_v48  ;;  %10392 = vtanh.f32 %v7888_v59  ;;  %v7829_v19 = vmul.f32 %v7797_v25, %v14113_v29 }
 0xeb4   : > { %v8018_v24 = vpack.c.bf16 %v14307_v20, %v14305_v16  ;;  %v7947_v61 = vadd.f32 1.0, %v10381_v46  ;;  %v7727_v40 = vmul.f32 0.5, %v14639_v34  ;;  %v7833_v60 = vmul.f32 %v7801_v31, %v14162_v52 }
 0xeb5   : > { %v8005_v32 = vpack.c.bf16 %v7977_v58, %v7973_v53  ;;  %v7731_v33 = vmul.f32 0.5, %v14100_v35  ;;  %v7861_v1 = vadd.f32 %v7829_v19, %v14113_v29  ;;  %v7799_v30 = vmul.f32 %v14156_v37, %v14135_v45 }
 0xeb6   : > { %v7803_v13 = vmul.f32 %v14202_v4, %v14170_v55  ;;  %v7975_v63 = vmul.f32 %v7943_v11, %v7719_v56  ;;  %v7979_v39 = vmul.f32 %v7947_v61, %v7723_v43  ;;  %v7724_v27 = vmul.f32 0.5, %v14641_v44 }
 0xeb7   : > { %8315 = vmatprep.mubr.bf16.mxu1 %v8005_v32  ;;  %v7865_v41 = vadd.f32 %v7833_v60, %v14162_v52  ;;  %v7893_v35 = vmul.f32 0.7978846, %v7861_v1  ;;  %v7831_v8 = vmul.f32 %v7799_v30, %v14135_v45  ;;  %v7796_v4 = vmul.f32 %v14145_v21, %v14103_v49 }
 0xeb8   : > { %v10383_v34 = vpop.eup %10382  ;;  %8316 = vmatmul.mubr.bf16.vlgmr.msra.gmra.mrb[216].mxu1 %v8004_v5  ;;  %v7835_v37 = vmul.f32 %v7803_v13, %v14170_v55  ;;  %v8007_v56 = vpack.c.bf16 %v7979_v39, %v7975_v63  ;;  %v7800_v44 = vmul.f32 %v14180_v14, %v14159_v28  ;;  %v14645_v31 = vpack.c.bf16 %v14122_v57, %v14119_v12 }
 0xeb9   : > { %v10385_v54 = vpop.eup %10384  ;;  %v7949_v43 = vadd.f32 1.0, %v10383_v34  ;;  %v7897_v59 = vmul.f32 0.7978846, %v7865_v41  ;;  %10394 = vtanh.f32 %v7893_v35  ;;  %v7863_v26 = vadd.f32 %v7831_v8, %v14135_v45 }
 0xeba   : > { %v7953_v25 = vadd.f32 1.0, %v10385_v54  ;;  %v7867_v47 = vadd.f32 %v7835_v37, %v14170_v55  ;;  %v10387_v5 = vpop.eup %10386  ;;  %8380 = vmatprep.mubr.bf16.mxu0 %v8007_v56  ;;  %v7828_v53 = vmul.f32 %v7796_v4, %v14103_v49  ;;  %v7832_v21 = vmul.f32 %v7800_v44, %v14159_v28 }
 0xebb   : > { %v7981_v48 = vmul.f32 %v7949_v43, %v7725_v50  ;;  %10396 = vtanh.f32 %v7897_v59  ;;  %v10389_v58 = vpop.eup %10388  ;;  %8381 = vmatmul.mubr.bf16.vlgmr.msra.gmra.mrb[56].mxu0 %v14645_v31  ;;  %v7951_v46 = vadd.f32 1.0, %v10387_v5  ;;  %v7895_v11 = vmul.f32 0.7978846, %v7863_v26 }
 0xebc   : > { %v7985_v14 = vmul.f32 %v7953_v25, %v7729_v3  ;;  %v7899_v19 = vmul.f32 0.7978846, %v7867_v47  ;;  %v10391_v32 = vpop.eup %10390  ;;  %v7955_v61 = vadd.f32 1.0, %v10389_v58  ;;  %v7728_v60 = vmul.f32 0.5, %v14643_v15 }
 0xebd   : > { %v7860_v50 = vadd.f32 %v7828_v53, %v14103_v49  ;;  %v7864_v1 = vadd.f32 %v7832_v21, %v14159_v28  ;;  %v10393_v30 = vpop.eup %10392  ;;  %v7983_v63 = vmul.f32 %v7951_v46, %v7727_v40  ;;  %v7948_v39 = vadd.f32 1.0, %v10391_v32 }
 0xebe   : > { %v8009_v13 = vpack.c.bf16 %v7985_v14, %v7981_v48  ;;  %10398 = vtanh.f32 %v7895_v11  ;;  %v7987_v41 = vmul.f32 %v7955_v61, %v7731_v33  ;;  %v7952_v12 = vadd.f32 1.0, %v10393_v30 }
 0xebf   : > { %10400 = vtanh.f32 %v7899_v19  ;;  %v7892_v57 = vmul.f32 0.7978846, %v7860_v50  ;;  %v7776_v3 = vmul.f32 0.044715, %v14224_v10  ;;  %v7980_v34 = vmul.f32 %v7948_v39, %v7724_v27 }
 0xec0   : > { %8323 = vmatprep.mubr.bf16.mxu1 %v8009_v13  ;;  %v7896_v35 = vmul.f32 0.7978846, %v7864_v1  ;;  %v7805_v15 = vmul.f32 %v14210_v18, %v14190_v7  ;;  %v8011_v8 = vpack.c.bf16 %v7987_v41, %v7983_v63  ;;  %v7984_v37 = vmul.f32 %v7952_v12, %v7728_v60 }
 0xec1   : > { %10402 = vtanh.f32 %v7892_v57  ;;  %v7809_v40 = vmul.f32 %v14271_v22, %v14231_v23  ;;  %v7733_v4 = vmul.f32 0.5, %v14113_v29  ;;  %v7737_v33 = vmul.f32 0.5, %v14162_v52 }
 0xec2   : > { %10404 = vtanh.f32 %v7896_v35  ;;  %v7837_v54 = vmul.f32 %v7805_v15, %v14190_v7  ;;  %8388 = vmatprep.mubr.bf16.mxu0 %v8011_v8  ;;  %v8008_v56 = vpack.c.bf16 %v7984_v37, %v7980_v34  ;;  %v7807_v18 = vmul.f32 %v14221_v2, %v14193_v17 }
 0xec3   : > { %v7841_v27 = vmul.f32 %v7809_v40, %v14231_v23  ;;  %v7811_v43 = vmul.f32 %v14286_v62, %v14249_v9  ;;  %v10395_v59 = vpop.eup %10394  ;;  %v14646_v22 = vpack.c.bf16 %v14218_v51, %v14199_v0  ;;  %v7735_v29 = vmul.f32 0.5, %v14135_v45 }
 0xec4   : > { %v7739_v52 = vmul.f32 0.5, %v14170_v55  ;;  %v7869_v44 = vadd.f32 %v7837_v54, %v14190_v7  ;;  %v7804_v25 = vmul.f32 %v14205_v6, %v14176_v36  ;;  %8324 = vmatmul.mubr.bf16.gmra.mrb[220].mxu1 %v8008_v56  ;;  %v7957_v2 = vadd.f32 1.0, %v10395_v59 }
 0xec5   : > { %8389 = vmatmul.mubr.bf16.gmra.mrb[60].mxu0 %v14646_v22  ;;  %v10397_v26 = vpop.eup %10396  ;;  %v7873_v47 = vadd.f32 %v7841_v27, %v14231_v23  ;;  %v7839_v62 = vmul.f32 %v7807_v18, %v14193_v17  ;;  %v7843_v5 = vmul.f32 %v7811_v43, %v14249_v9  ;;  %v7808_v45 = vmul.f32 %v7776_v3, %v14224_v10 }
 0xec6   : > { %v7961_v0 = vadd.f32 1.0, %v10397_v26  ;;  %v7901_v51 = vmul.f32 0.7978846, %v7869_v44  ;;  %v7836_v55 = vmul.f32 %v7804_v25, %v14176_v36  ;;  %v7989_v48 = vmul.f32 %v7957_v2, %v7733_v4 }
 0xec7   : > { %v7905_v53 = vmul.f32 0.7978846, %v7873_v47  ;;  %v7871_v21 = vadd.f32 %v7839_v62, %v14193_v17  ;;  %v7875_v6 = vadd.f32 %v7843_v5, %v14249_v9  ;;  %v7840_v14 = vmul.f32 %v7808_v45, %v14224_v10 }
 0xec8   : > { %v10399_v58 = vpop.eup %10398  ;;  %v7993_v31 = vmul.f32 %v7961_v0, %v7737_v33  ;;  %10406 = vtanh.f32 %v7901_v51  ;;  %v7868_v46 = vadd.f32 %v7836_v55, %v14176_v36  ;;  %v7732_v3 = vmul.f32 0.5, %v14103_v49 }
 0xec9   : > { %v10401_v11 = vpop.eup %10400  ;;  %v7959_v19 = vadd.f32 1.0, %v10399_v58  ;;  %10408 = vtanh.f32 %v7905_v53  ;;  %v7903_v32 = vmul.f32 0.7978846, %v7871_v21  ;;  %v7907_v61 = vmul.f32 0.7978846, %v7875_v6 }
 0xeca   : > { %v8013_v60 = vpack.c.bf16 %v7993_v31, %v7989_v48  ;;  %v7963_v50 = vadd.f32 1.0, %v10401_v11  ;;  %v7872_v1 = vadd.f32 %v7840_v14, %v14224_v10  ;;  %v7900_v30 = vmul.f32 0.7978846, %v7868_v46 }
 0xecb   : > { %v10403_v13 = vpop.eup %10402  ;;  %v7991_v63 = vmul.f32 %v7959_v19, %v7735_v29  ;;  %10410 = vtanh.f32 %v7903_v32  ;;  %v7736_v34 = vmul.f32 0.5, %v14159_v28  ;;  %v14647_v4 = vpack.c.bf16 %v14266_v42, %v14246_v38  ;;  %v14648_v32 = vld [vmem:[#allocation9_spill] sm:$0xff] }
 0xecc   : > { %v10405_v39 = vpop.eup %10404  ;;  %8331 = vmatprep.mubr.bf16.mxu1 %v8013_v60  ;;  %v7995_v41 = vmul.f32 %v7963_v50, %v7739_v52  ;;  %v7956_v12 = vadd.f32 1.0, %v10403_v13  ;;  %10412 = vtanh.f32 %v7907_v61  ;;  %v7904_v57 = vmul.f32 0.7978846, %v7872_v1  ;;  %v14649_v50 = vld [vmem:[#allocation10_spill] sm:$0xff] }
 0xecd   : > { %v7960_v35 = vadd.f32 1.0, %v10405_v39  ;;  %10414 = vtanh.f32 %v7900_v30  ;;  %v7741_v49 = vmul.f32 0.5, %v14190_v7  ;;  %v7745_v28 = vmul.f32 0.5, %v14231_v23 }
 0xece   : > { %v8015_v15 = vpack.c.bf16 %v7995_v41, %v7991_v63  ;;  %10416 = vtanh.f32 %v7904_v57  ;;  %v7988_v8 = vmul.f32 %v7956_v12, %v7732_v3  ;;  %v7743_v44 = vmul.f32 0.5, %v14193_v17 }
 0xecf   : > { %v7992_v37 = vmul.f32 %v7960_v35, %v7736_v34  ;;  %v7747_v38 = vmul.f32 0.5, %v14249_v9  ;;  %v7740_v2 = vmul.f32 0.5, %v14176_v36  ;;  %v7744_v23 = vmul.f32 0.5, %v14224_v10  ;;  %v14395_v36 = vld [vmem:[%s14541_s24] ss:$0 sm:$0xff] }
 0xed0   : > { %8396 = vmatprep.mubr.bf16.mxu0 %v8015_v15 }
 0xed1   : > { %v8012_v40 = vpack.c.bf16 %v7992_v37, %v7988_v8  ;;  %8397 = vmatmul.mubr.bf16.gmra.mrb[64].mxu0 %v14647_v4 }
 0xed2   : > { %v10407_v33 = vpop.eup %10406 }
 0xed3   : > { %v10409_v54 = vpop.eup %10408  ;;  %8332 = vmatmul.mubr.bf16.gmra.mrb[224].mxu1 %v8012_v40  ;;  %v7965_v56 = vadd.f32 1.0, %v10407_v33  ;;  %v14650_v33 = vld [vmem:[#allocation11_spill] sm:$0xff] }
 0xed4   : > { %v7969_v27 = vadd.f32 1.0, %v10409_v54 }
 0xed5   : > { %v10411_v18 = vpop.eup %10410  ;;  %v7997_v59 = vmul.f32 %v7965_v56, %v7741_v49  ;;  %v14651_v56 = vld [vmem:[#allocation12_spill] sm:$0xff] }
 0xed6   : > { %v10413_v43 = vpop.eup %10412  ;;  %v8001_v22 = vmul.f32 %v7969_v27, %v7745_v28  ;;  %v7967_v29 = vadd.f32 1.0, %v10411_v18 }
 0xed7   : > { %v10415_v52 = vpop.eup %10414  ;;  %v7971_v42 = vadd.f32 1.0, %v10413_v43 }
 0xed8   : > { %v10417_v25 = vpop.eup %10416  ;;  %v8017_v26 = vpack.c.bf16 %v8001_v22, %v7997_v59  ;;  %v7964_v47 = vadd.f32 1.0, %v10415_v52  ;;  %v7999_v7 = vmul.f32 %v7967_v29, %v7743_v44 }
 0xed9   : > { %v8003_v62 = vmul.f32 %v7971_v42, %v7747_v38  ;;  %v7968_v5 = vadd.f32 1.0, %v10417_v25 }
 0xeda   : > { %8339 = vmatprep.mubr.bf16.mxu1 %v8017_v26  ;;  %v7996_v51 = vmul.f32 %v7964_v47, %v7740_v2 }
 0xedb   : > { %v8019_v0 = vpack.c.bf16 %v8003_v62, %v7999_v7  ;;  %v8000_v45 = vmul.f32 %v7968_v5, %v7744_v23  ;;  %v14652_v62 = vld [vmem:[#allocation13_spill] sm:$0xff]  ;;  %v14653_v5 = vld [vmem:[#allocation14_spill] sm:$0xff] }
 0xedd   : > { %8404 = vmatprep.mubr.bf16.mxu0 %v8019_v0  ;;  %v8016_v55 = vpack.c.bf16 %v8000_v45, %v7996_v51 }
 0xede   : > { %8405 = vmatmul.mubr.bf16.gmra.mrb[68].mxu0 %v8018_v24 }
 0xedf   : > { %8340 = vmatmul.mubr.bf16.gmra.mrb[228].mxu1 %v8016_v55 }
 0xf8b   : > { %v9332_v17 = vpop.f32.mrb[216].mxu1 }
 0xf8c   : > { %v9333_v9 = vpop.f32.mrb[217].mxu1 }
 0xf8d   : > { %v9334_v10 = vadd.f32 %v9333_v9, %v9332_v17  ;;  %v9335_v48 = vpop.f32.mrb[218].mxu1 }
 0xf8e   : > { %v9336_v53 = vpop.f32.mrb[219].mxu1  ;;  %v9372_v21 = vpop.f32.mrb[56].mxu0 }
 0xf8f   : > { %v8318_v6 = vadd.f32 %v9334_v10, %v14395_v36  ;;  %v9337_v58 = vadd.f32 %v9336_v53, %v9335_v48  ;;  %v9373_v31 = vpop.f32.mrb[57].mxu0 }
 0xf90   : > { %v9374_v14 = vadd.f32 %v9373_v31, %v9372_v21  ;;  %v9375_v46 = vpop.f32.mrb[58].mxu0 }
 0xf91   : > { %v8321_v16 = vadd.f32 %v9337_v58, %v14395_v36  ;;  %v9376_v20 = vpop.f32.mrb[59].mxu0 }
 0xf92   : > { %v8383_v24 = vadd.f32 %v9374_v14, %v8318_v6  ;;  %v9377_v11 = vadd.f32 %v9376_v20, %v9375_v46 }
 0xf94   : > { %v8386_v19 = vadd.f32 %v9377_v11, %v8321_v16  ;;  %v14400_v61 = vadd.f32 %v8383_v24, %v14648_v32  ;;  %v14654_v24 = vld [vmem:[#allocation15_spill] sm:$0xff] }
 0xf96   : > { %8423 = vadd.xlane.f32.xlu0 %v14400_v61  ;;  %v14404_v1 = vadd.f32 %v8386_v19, %v14649_v50  ;;  %v14655_v19 = vld [vmem:[#allocation16_spill] sm:$0xff] }
 0xf97   : > { %v9338_v30 = vpop.f32.mrb[220].mxu1 }
 0xf98   : > { %v9378_v60 = vpop.f32.mrb[60].mxu0  ;;  %v9339_v63 = vpop.f32.mrb[221].mxu1  ;;  %8425 = vadd.xlane.f32.xlu1 %v14404_v1 }
 0xf99   : > { %v9379_v13 = vpop.f32.mrb[61].mxu0  ;;  %v9340_v12 = vadd.f32 %v9339_v63, %v9338_v30  ;;  %v9341_v57 = vpop.f32.mrb[222].mxu1 }
 0xf9a   : > { %v9380_v39 = vadd.f32 %v9379_v13, %v9378_v60  ;;  %v9381_v41 = vpop.f32.mrb[62].mxu0  ;;  %v9342_v34 = vpop.f32.mrb[223].mxu1 }
 0xf9b   : > { %v9382_v3 = vpop.f32.mrb[63].mxu0  ;;  %v8326_v15 = vadd.f32 %v9340_v12, %v14395_v36  ;;  %v9343_v8 = vadd.f32 %v9342_v34, %v9341_v57 }
 0xf9c   : > { %v9383_v35 = vadd.f32 %v9382_v3, %v9381_v41 }
 0xf9d   : > { %v8391_v37 = vadd.f32 %v9380_v39, %v8326_v15  ;;  %v8329_v40 = vadd.f32 %v9343_v8, %v14395_v36 }
 0xf9f   : > { %v8394_v4 = vadd.f32 %v9383_v35, %v8329_v40  ;;  %v8415_v54 = vadd.f32 %v8391_v37, %v14650_v33 }
 0xfa1   : > { %8427 = vadd.xlane.f32.xlu0 %v8415_v54  ;;  %v8416_v49 = vadd.f32 %v8394_v4, %v14651_v56 }
 0xfa3   : > { %8429 = vadd.xlane.f32.xlu1 %v8416_v49 }
 0xfa4   : > { %v9384_v28 = vpop.f32.mrb[64].mxu0 }
 0xfa5   : > { %v9385_v27 = vpop.f32.mrb[65].mxu0 }
 0xfa6   : > { %v9344_v18 = vpop.f32.mrb[224].mxu1  ;;  %v9386_v43 = vadd.f32 %v9385_v27, %v9384_v28  ;;  %v9387_v59 = vpop.f32.mrb[66].mxu0 }
 0xfa7   : > { %v9345_v22 = vpop.f32.mrb[225].mxu1  ;;  %v9388_v29 = vpop.f32.mrb[67].mxu0 }
 0xfa8   : > { %v9346_v52 = vadd.f32 %v9345_v22, %v9344_v18  ;;  %v9347_v44 = vpop.f32.mrb[226].mxu1  ;;  %v9389_v38 = vadd.f32 %v9388_v29, %v9387_v59 }
 0xfa9   : > { %v9348_v42 = vpop.f32.mrb[227].mxu1 }
 0xfaa   : > { %v8334_v25 = vadd.f32 %v9346_v52, %v14395_v36  ;;  %v9349_v26 = vadd.f32 %v9348_v42, %v9347_v44 }
 0xfac   : > { %v8399_v2 = vadd.f32 %v9386_v43, %v8334_v25  ;;  %v8337_v47 = vadd.f32 %v9349_v26, %v14395_v36 }
 0xfae   : > { %v8402_v7 = vadd.f32 %v9389_v38, %v8337_v47  ;;  %v8417_v23 = vadd.f32 %v8399_v2, %v14652_v62 }
 0xfb0   : > { %8431 = vadd.xlane.f32.xlu0 %v8417_v23  ;;  %v8418_v0 = vadd.f32 %v8402_v7, %v14653_v5 }
 0xfb1   : > { %v9390_v51 = vpop.f32.mrb[68].mxu0 }
 0xfb2   : > { %v9350_v45 = vpop.f32.mrb[228].mxu1  ;;  %v9391_v55 = vpop.f32.mrb[69].mxu0  ;;  %8433 = vadd.xlane.f32.xlu1 %v8418_v0 }
 0xfb3   : > { %v9351_v17 = vpop.f32.mrb[229].mxu1  ;;  %v9392_v9 = vadd.f32 %v9391_v55, %v9390_v51  ;;  %v9393_v10 = vpop.f32.mrb[70].mxu0  ;;  %v9105_v51 = vld [vmem:[%s14542_s25] ss:$0 sm:$0xff] }
 0xfb4   : > { %v9352_v48 = vadd.f32 %v9351_v17, %v9350_v45  ;;  %v9353_v53 = vpop.f32.mrb[230].mxu1  ;;  %v9394_v21 = vpop.f32.mrb[71].mxu0 }
 0xfb5   : > { %v9354_v6 = vpop.f32.mrb[231].mxu1  ;;  %v9395_v58 = vadd.f32 %v9394_v21, %v9393_v10 }
 0xfb6   : > { %v8342_v31 = vadd.f32 %v9352_v48, %v14395_v36  ;;  %v9355_v14 = vadd.f32 %v9354_v6, %v9353_v53 }
 0xfb8   : > { %v8407_v46 = vadd.f32 %v9392_v9, %v8342_v31  ;;  %v8345_v16 = vadd.f32 %v9355_v14, %v14395_v36  ;;  %v9106_v9 = vld [vmem:[%s14543_s26] ss:$0 sm:$0xff] }
 0xfba   : > { %v8410_v20 = vadd.f32 %v9395_v58, %v8345_v16  ;;  %v8419_v11 = vadd.f32 %v8407_v46, %v14654_v24 }
 0xfbc   : > { %8435 = vadd.xlane.f32.xlu0 %v8419_v11  ;;  %v8420_v32 = vadd.f32 %v8410_v20, %v14655_v19 }
 0xfbe   : > { %8437 = vadd.xlane.f32.xlu1 %v8420_v32 }
0x1023   : > { %v8424_v60 = vpop.xlane.xlu0 %8423 }
0x1024   : > { %v8439_v50 = vmul.f32 0.0078125, %v8424_v60 }
0x1025   : > { %v8426_v30 = vpop.xlane.xlu1 %8425 }
0x1026   : > { %v8447_v13 = vsub.f32 %v14400_v61, %v8439_v50  ;;  %v8440_v63 = vmul.f32 0.0078125, %v8426_v30 }
0x1028   : > { %v8448_v39 = vsub.f32 %v14404_v1, %v8440_v63  ;;  %v8455_v41 = vmul.f32 %v8447_v13, %v8447_v13 }
0x102a   : > { %8463 = vadd.xlane.f32.xlu0 %v8455_v41  ;;  %v8456_v12 = vmul.f32 %v8448_v39, %v8448_v39 }
0x102c   : > { %8465 = vadd.xlane.f32.xlu1 %v8456_v12 }
0x102e   : > { %v8428_v36 = vpop.xlane.xlu0 %8427 }
0x102f   : > { %v8441_v57 = vmul.f32 0.0078125, %v8428_v36 }
0x1030   : > { %v8430_v3 = vpop.xlane.xlu1 %8429 }
0x1031   : > { %v8449_v34 = vsub.f32 %v8415_v54, %v8441_v57  ;;  %v8442_v35 = vmul.f32 0.0078125, %v8430_v3 }
0x1033   : > { %v14421_v15 = vsub.f32 %v8416_v49, %v8442_v35  ;;  %v8457_v8 = vmul.f32 %v8449_v34, %v8449_v34 }
0x1035   : > { %8467 = vadd.xlane.f32.xlu0 %v8457_v8  ;;  %v8458_v37 = vmul.f32 %v14421_v15, %v14421_v15 }
0x1037   : > { %8469 = vadd.xlane.f32.xlu1 %v8458_v37 }
0x103d   : > { %v8432_v61 = vpop.xlane.xlu0 %8431 }
0x103e   : > { %v8443_v40 = vmul.f32 0.0078125, %v8432_v61 }
0x103f   : > { %v8434_v1 = vpop.xlane.xlu1 %8433 }
0x1040   : > { %v14425_v4 = vsub.f32 %v8417_v23, %v8443_v40  ;;  %v8444_v33 = vmul.f32 0.0078125, %v8434_v1 }
0x1042   : > { %v14427_v56 = vsub.f32 %v8418_v0, %v8444_v33  ;;  %v8459_v54 = vmul.f32 %v14425_v4, %v14425_v4 }
0x1044   : > { %8471 = vadd.xlane.f32.xlu0 %v8459_v54  ;;  %v8460_v49 = vmul.f32 %v14427_v56, %v14427_v56 }
0x1046   : > { %8473 = vadd.xlane.f32.xlu1 %v8460_v49 }
0x1049   : > { %v8436_v28 = vpop.xlane.xlu0 %8435 }
0x104a   : > { %v8445_v27 = vmul.f32 0.0078125, %v8436_v28 }
0x104b   : > { %v8438_v18 = vpop.xlane.xlu1 %8437 }
0x104c   : > { %v14433_v43 = vsub.f32 %v8419_v11, %v8445_v27  ;;  %v8446_v59 = vmul.f32 0.0078125, %v8438_v18 }
0x104e   : > { %v14435_v22 = vsub.f32 %v8420_v32, %v8446_v59  ;;  %v8461_v29 = vmul.f32 %v14433_v43, %v14433_v43 }
0x1050   : > { %8475 = vadd.xlane.f32.xlu0 %v8461_v29  ;;  %v8462_v52 = vmul.f32 %v14435_v22, %v14435_v22 }
0x1052   : > { %8477 = vadd.xlane.f32.xlu1 %v8462_v52 }
0x10b7   : > { %v8464_v44 = vpop.xlane.xlu0 %8463 }
0x10b8   : > { %v8479_v38 = vmul.f32 0.0078125, %v8464_v44 }
0x10b9   : > { %v8466_v42 = vpop.xlane.xlu1 %8465 }
0x10ba   : > { %v8487_v25 = vadd.f32 1e-05, %v8479_v38  ;;  %v8480_v26 = vmul.f32 0.0078125, %v8466_v42 }
0x10bc   : > { %10418 = vrsqrt.f32 %v8487_v25  ;;  %v8488_v2 = vadd.f32 1e-05, %v8480_v26 }
0x10be   : > { %10420 = vrsqrt.f32 %v8488_v2 }
0x10c2   : > { %v8468_v47 = vpop.xlane.xlu0 %8467 }
0x10c3   : > { %v8481_v7 = vmul.f32 0.0078125, %v8468_v47 }
0x10c4   : > { %v8470_v62 = vpop.xlane.xlu1 %8469 }
0x10c5   : > { %v8489_v23 = vadd.f32 1e-05, %v8481_v7  ;;  %v8482_v5 = vmul.f32 0.0078125, %v8470_v62 }
0x10c6   : > { %v10419_v0 = vpop.eup %10418 }
0x10c7   : > { %v8503_v45 = vmul.f32 %v10419_v0, %v8447_v13  ;;  %10422 = vrsqrt.f32 %v8489_v23  ;;  %v8490_v55 = vadd.f32 1e-05, %v8482_v5 }
0x10c8   : > { %v10421_v17 = vpop.eup %10420 }
0x10c9   : > { %v8517_v10 = vmul.f32 %v9105_v51, %v8503_v45  ;;  %v8504_v48 = vmul.f32 %v10421_v17, %v8448_v39  ;;  %10424 = vrsqrt.f32 %v8490_v55 }
0x10cb   : > { %v8531_v53 = vadd.f32 %v9106_v9, %v8517_v10  ;;  %v8518_v21 = vmul.f32 %v9105_v51, %v8504_v48 }
0x10cd   : > { %8539 = vst [vmem:[%s14450_s0] sm:$0xff] %v8531_v53  ;;  %v8532_v6 = vadd.f32 %v9106_v9, %v8518_v21 }
0x10cf   : > { %8540 = vst [vmem:[%s14450_s0 + $0x8] sm:$0xff] %v8532_v6 }
0x10d1   : > { %v8472_v58 = vpop.xlane.xlu0 %8471  ;;  %v10423_v31 = vpop.eup %10422 }
0x10d2   : > { %v8483_v14 = vmul.f32 0.0078125, %v8472_v58  ;;  %v8505_v46 = vmul.f32 %v10423_v31, %v8449_v34 }
0x10d3   : > { %v8474_v16 = vpop.xlane.xlu1 %8473  ;;  %v10425_v20 = vpop.eup %10424 }
0x10d4   : > { %v8491_v24 = vadd.f32 1e-05, %v8483_v14  ;;  %v8484_v11 = vmul.f32 0.0078125, %v8474_v16  ;;  %v8519_v19 = vmul.f32 %v9105_v51, %v8505_v46  ;;  %v8506_v32 = vmul.f32 %v10425_v20, %v14421_v15 }
0x10d6   : > { %10426 = vrsqrt.f32 %v8491_v24  ;;  %v8492_v60 = vadd.f32 1e-05, %v8484_v11  ;;  %v8533_v50 = vadd.f32 %v9106_v9, %v8519_v19  ;;  %v8520_v30 = vmul.f32 %v9105_v51, %v8506_v32 }
0x10d8   : > { %10428 = vrsqrt.f32 %v8492_v60  ;;  %8541 = vst [vmem:[%s14450_s0 + $0x10] sm:$0xff] %v8533_v50  ;;  %v8534_v13 = vadd.f32 %v9106_v9, %v8520_v30 }
0x10da   : > { %8542 = vst [vmem:[%s14450_s0 + $0x18] sm:$0xff] %v8534_v13 }
0x10dd   : > { %v8476_v63 = vpop.xlane.xlu0 %8475 }
0x10de   : > { %v8485_v39 = vmul.f32 0.0078125, %v8476_v63 }
0x10df   : > { %v8478_v41 = vpop.xlane.xlu1 %8477 }
0x10e0   : > { %v10427_v12 = vpop.eup %10426  ;;  %v8493_v36 = vadd.f32 1e-05, %v8485_v39  ;;  %v8486_v57 = vmul.f32 0.0078125, %v8478_v41 }
0x10e1   : > { %v8507_v3 = vmul.f32 %v10427_v12, %v14425_v4 }
0x10e2   : > { %v10429_v34 = vpop.eup %10428  ;;  %10430 = vrsqrt.f32 %v8493_v36  ;;  %v8494_v35 = vadd.f32 1e-05, %v8486_v57 }
0x10e3   : > { %v8521_v15 = vmul.f32 %v9105_v51, %v8507_v3  ;;  %v8508_v8 = vmul.f32 %v10429_v34, %v14427_v56 }
0x10e4   : > { %10432 = vrsqrt.f32 %v8494_v35 }
0x10e5   : > { %v8535_v37 = vadd.f32 %v9106_v9, %v8521_v15  ;;  %v8522_v61 = vmul.f32 %v9105_v51, %v8508_v8 }
0x10e7   : > { %8543 = vst [vmem:[%s14450_s0 + $0x20] sm:$0xff] %v8535_v37  ;;  %v8536_v40 = vadd.f32 %v9106_v9, %v8522_v61 }
0x10e9   : > { %8544 = vst [vmem:[%s14450_s0 + $0x28] sm:$0xff] %v8536_v40 }
0x10ec   : > { %v10431_v1 = vpop.eup %10430 }
0x10ed   : > { %v8509_v4 = vmul.f32 %v10431_v1, %v14433_v43 }
0x10ee   : > { %v10433_v33 = vpop.eup %10432 }
0x10ef   : > { %v8523_v54 = vmul.f32 %v9105_v51, %v8509_v4  ;;  %v8510_v49 = vmul.f32 %v10433_v33, %v14435_v22 }
0x10f1   : > { %v8537_v56 = vadd.f32 %v9106_v9, %v8523_v54  ;;  %v8524_v28 = vmul.f32 %v9105_v51, %v8510_v49 }
0x10f3   : > { %8545 = vst [vmem:[%s14450_s0 + $0x30] sm:$0xff] %v8537_v56  ;;  %v8538_v27 = vadd.f32 %v9106_v9, %v8524_v28 }
0x10f5   : > { %8546 = vst [vmem:[%s14450_s0 + $0x38] sm:$0xff] %v8538_v27 }
0x10f6   : > { %10485 = shalt.err (!%p10482_p3)
}
0x10f7   : > { %s10486_s6 = scalar_lea.hbm %s14468_s28, 1024  ;;  %s10490_s15 = scalar_lea.hbm %s14544_s27, 2048 }
0x10f8   : > { %p10487_p4 = scmp.ne.s32.totalorder %s14468_s28, %s10486_s6  ;;  %p10491_p9 = scmp.lt.u32.totalorder %s14468_s28, %s14544_s27 }
0x10f9   : > { %p10492_p10 = scmp.lt.u32.totalorder %s10490_s15, %s10486_s6  ;;  %p10494_p12 = scmp.lt.u32.totalorder %s10486_s6, %s14468_s28 }
0x10fa   : > { %p10488_p7 = pnand %p10487_p4, %p10719_p5 }
0x10fb   : > { %p10493_p11 = por %p10492_p10, %p10491_p9 }
0x10fc   : > { %p10489_p8 = pneg %p10488_p7 }
0x10fd   : > { %p10495_p13 = por %p10494_p12, %p10493_p11 }
0x10ff   : > { %p10496_p0 = pnand %p10495_p13, %p10489_p8 }
0x1101   : > { %10499 = shalt.err (!%p10496_p0)
}
0x1102   : > { %s10539_s9 = smov 128   ;;  %s10540_s5 = smov 8  }
0x1103   : > { %9929 = dma.vmem_to_hbm [thread:$0]  (%p10719_p5), %s14470_s12, 1024, %s14468_s28, %s14476_s11, %s10539_s9, %s10539_s9, %s10540_s5  }
0x1104 PF: > { %p9935_p1 = scmp.ge.s32.totalorder %s10534_s30, 2  ;;  %s8576_s0 = sand.u32 1, %s10522_s7  }
0x1105   : > { %s8577_s6 = scalar_lea.sflag [#allocation3], %s8576_s0 }
0x1106   : > { %p9932_p2 = pnand %p9935_p1, %p10723_p6 }
0x1108   : > { %10517 = dma.done.wait (!%p9932_p2), %s8577_s6, 1024  }
0x1109   : > { %10519 = vsyncadd (!%p9932_p2), %s8577_s6, 4294966272  ;;  %s14657_s30 = sld [smem:[#allocation6_spill]]  ;;  %s14658_s8 = sld [smem:[#allocation5_spill]] }
0x110a   : > { %s14659_s15 = sld [smem:[#allocation7_spill]]  ;;  %s14660_s7 = smov %s10526_s4 }
0x110f   : > { %p37_p3 = scmp.ge.s32.totalorder %s14657_s30, 4   ;;  %s14661_s4 = smov %s14658_s8 }
0x1110   : > { %s14662_s8 = smov %s14659_s15 }
0x1111   :  { %39 = sbr.rel (!%p37_p3) target bundleno = 19 (0x13), region = 174 }
0x1118   :  { %8582 = vsyncpa [#allocation3], 1 }
0x1119   :  { %8584 = vsyncpa [#allocation3 + $0x1], 1 }

</bundles_post_ra>
